<compile_context>
chip_gen: v7x
topology: tpu7x:2x2x1
jax: 0.10.0
libtpu: 0.0.40
codegen_flags: <defaults>
</compile_context>

<pallas_src>
import functools

import jax
import jax.numpy as jnp
from jax.experimental import pallas as pl
from jax.experimental.pallas import tpu as pltpu

_LN_EPS = 1e-5

_COMPILER_PARAMS = pltpu.CompilerParams(
    dimension_semantics=("parallel",),
    vmem_limit_bytes=64 * 1024 * 1024,
)


def _round_up(x, m):
    return pl.cdiv(x, m) * m


def _row_tile(M, tm=256):
    # Largest tile <= tm (multiple of 8) that still gives >= 2 grid steps.
    return min(tm, max(8, _round_up(pl.cdiv(M, 2), 8)))


# ---------------------------------------------------------------------------
# In-kernel helpers (f32 VPU math)
# ---------------------------------------------------------------------------
def _ln_rows(x, g, b):
    """Two-pass LayerNorm over the last axis. x:(T,C) f32, g/b:(1,C)."""
    mean = jnp.mean(x, axis=-1, keepdims=True)
    xc = x - mean
    var = jnp.mean(xc * xc, axis=-1, keepdims=True)
    return xc * jax.lax.rsqrt(var + _LN_EPS) * g + b


def _erf_approx(x):
    # Abramowitz & Stegun 7.1.26, |error| < 1.5e-7; exp + approx reciprocal
    # both go to the EUP slot.
    p = 0.3275911
    a1, a2, a3, a4, a5 = (0.254829592, -0.284496736, 1.421413741,
                          -1.453152027, 1.061405429)
    sgn = jnp.where(x >= 0.0, 1.0, -1.0)
    ax = jnp.abs(x)
    t = pl.reciprocal(1.0 + p * ax, approx=True)
    poly = ((((a5 * t + a4) * t + a3) * t + a2) * t + a1) * t
    return sgn * (1.0 - poly * jnp.exp(-ax * ax))


def _gelu(y):
    return 0.5 * y * (1.0 + _erf_approx(y * 0.7071067811865476))


def _softmax_rows(s):
    s = s - jnp.max(s, axis=-1, keepdims=True)
    p = jnp.exp(s)
    return p * pl.reciprocal(jnp.sum(p, axis=-1, keepdims=True), approx=True)


def _attend_and_project(q, kv, wp, pb, num_heads, scale):
    """q:(T1,AH) f32, kv:(T2,2AH) f32, wp:(AH,C) bf16 -> (T1,C) f32 (+ bias).

    Per-head output is folded directly into the projection accumulator
    (concat(o_h) @ Wp == sum_h o_h @ Wp[h]) so no lane-concat is needed.
    """
    T1, AH = q.shape
    Dh = AH // num_heads
    C = wp.shape[1]
    acc = jnp.zeros((T1, C), jnp.float32)
    for h in range(num_heads):
        lo, hi = h * Dh, (h + 1) * Dh
        qh = (q[:, lo:hi] * scale).astype(jnp.bfloat16)
        kh = kv[:, lo:hi].astype(jnp.bfloat16)
        vh = kv[:, AH + lo:AH + hi].astype(jnp.bfloat16)
        s = jax.lax.dot_general(qh, kh, (((1,), (1,)), ((), ())),
                                preferred_element_type=jnp.float32)  # (T1,T2)
        p = _softmax_rows(s)
        oh = jnp.dot(p.astype(jnp.bfloat16), vh,
                     preferred_element_type=jnp.float32)             # (T1,Dh)
        acc = acc + jnp.dot(oh.astype(jnp.bfloat16), wp[lo:hi, :],
                            preferred_element_type=jnp.float32)
    return acc + pb


# ---------------------------------------------------------------------------
# Fused attention-branch kernels (gridded over batch)
# ---------------------------------------------------------------------------
def _cross_attn_kernel(x_ref, ctx_ref, gq_ref, bq_ref, gk_ref, bk_ref,
                       wq_ref, wkv_ref, wp_ref, pb_ref, o_ref,
                       *, num_heads, scale):
    """out = x + proj(MHA(LN_q(x), LN_kv(ctx)))   — one batch element."""
    x = x_ref[0].astype(jnp.float32)                     # (T1, C)
    ctx = ctx_ref[0].astype(jnp.float32)                 # (T2, Cc)
    xn = _ln_rows(x, gq_ref[...], bq_ref[...]).astype(jnp.bfloat16)
    cn = _ln_rows(ctx, gk_ref[...], bk_ref[...]).astype(jnp.bfloat16)
    q = jnp.dot(xn, wq_ref[...], preferred_element_type=jnp.float32)    # (T1, AH)
    kv = jnp.dot(cn, wkv_ref[...], preferred_element_type=jnp.float32)  # (T2, 2AH)
    y = _attend_and_project(q, kv, wp_ref[...], pb_ref[...], num_heads, scale)
    o_ref[0] = (x + y).astype(o_ref.dtype)


def _self_attn_kernel(x_ref, g_ref, b_ref, wqkv_ref, wp_ref, pb_ref, o_ref,
                      *, num_heads, scale):
    """out = x + proj(MHA(LN(x)))  with fused (C, 3*AH) qkv weight."""
    x = x_ref[0].astype(jnp.float32)                     # (T, C)
    xn = _ln_rows(x, g_ref[...], b_ref[...]).astype(jnp.bfloat16)
    qkv = jnp.dot(xn, wqkv_ref[...], preferred_element_type=jnp.float32)  # (T,3AH)
    AH = wp_ref.shape[0]
    q = qkv[:, :AH]
    kv = qkv[:, AH:]
    y = _attend_and_project(q, kv, wp_ref[...], pb_ref[...], num_heads, scale)
    o_ref[0] = (x + y).astype(o_ref.dtype)


def cross_attention_branch(x, ctx, p, num_heads):
    B, T1, C = x.shape
    _, T2, Cc = ctx.shape
    wq, wkv = p['cross_attn']['q_w'], p['cross_attn']['kv_w']
    wp, pb = p['cross_attn']['proj_w'], p['cross_attn']['proj_b']
    gq, bq = p['cross_norm1']
    gk, bk = p['cross_norm2']
    AH = wq.shape[1]
    Dh = AH // num_heads
    kernel = functools.partial(_cross_attn_kernel, num_heads=num_heads,
                               scale=Dh ** -0.5)
    flops = 2 * B * (T1 * C * AH + T2 * Cc * 2 * AH
                     + num_heads * 2 * T1 * T2 * Dh + T1 * AH * C)
    bytes_acc = 4 * (2 * B * T1 * C + B * T2 * Cc + 2 * C + 2 * Cc + C) \
        + 2 * (C * AH + Cc * 2 * AH + AH * C)
    return pl.pallas_call(
        kernel,
        out_shape=jax.ShapeDtypeStruct((B, T1, C), x.dtype),
        grid_spec=pltpu.PrefetchScalarGridSpec(
            num_scalar_prefetch=0,
            grid=(B,),
            in_specs=[
                pl.BlockSpec((1, T1, C), lambda i: (i, 0, 0)),
                pl.BlockSpec((1, T2, Cc), lambda i: (i, 0, 0)),
                pl.BlockSpec((1, C), lambda i: (0, 0)),
                pl.BlockSpec((1, C), lambda i: (0, 0)),
                pl.BlockSpec((1, Cc), lambda i: (0, 0)),
                pl.BlockSpec((1, Cc), lambda i: (0, 0)),
                pl.BlockSpec((C, AH), lambda i: (0, 0)),       # resident weights
                pl.BlockSpec((Cc, 2 * AH), lambda i: (0, 0)),
                pl.BlockSpec((AH, C), lambda i: (0, 0)),
                pl.BlockSpec((1, C), lambda i: (0, 0)),
            ],
            out_specs=pl.BlockSpec((1, T1, C), lambda i: (i, 0, 0)),
        ),
        compiler_params=_COMPILER_PARAMS,
        cost_estimate=pl.CostEstimate(flops=int(flops),
                                      transcendentals=int(B * num_heads * T1 * T2),
                                      bytes_accessed=int(bytes_acc)),
    )(x, ctx, gq.reshape(1, C), bq.reshape(1, C),
      gk.reshape(1, Cc), bk.reshape(1, Cc), wq, wkv, wp, pb.reshape(1, C))


def self_attention_branch(x, p, num_heads):
    B, T, C = x.shape
    wqkv = p['attn']['qkv_w']
    wp, pb = p['attn']['proj_w'], p['attn']['proj_b']
    g, b = p['norm1']
    AH = wp.shape[0]
    Dh = AH // num_heads
    kernel = functools.partial(_self_attn_kernel, num_heads=num_heads,
                               scale=Dh ** -0.5)
    flops = 2 * B * (T * C * 3 * AH + num_heads * 2 * T * T * Dh + T * AH * C)
    bytes_acc = 4 * (2 * B * T * C + 3 * C) + 2 * (C * 3 * AH + AH * C)
    return pl.pallas_call(
        kernel,
        out_shape=jax.ShapeDtypeStruct((B, T, C), x.dtype),
        grid_spec=pltpu.PrefetchScalarGridSpec(
            num_scalar_prefetch=0,
            grid=(B,),
            in_specs=[
                pl.BlockSpec((1, T, C), lambda i: (i, 0, 0)),
                pl.BlockSpec((1, C), lambda i: (0, 0)),
                pl.BlockSpec((1, C), lambda i: (0, 0)),
                pl.BlockSpec((C, 3 * AH), lambda i: (0, 0)),
                pl.BlockSpec((AH, C), lambda i: (0, 0)),
                pl.BlockSpec((1, C), lambda i: (0, 0)),
            ],
            out_specs=pl.BlockSpec((1, T, C), lambda i: (i, 0, 0)),
        ),
        compiler_params=_COMPILER_PARAMS,
        cost_estimate=pl.CostEstimate(flops=int(flops),
                                      transcendentals=int(B * num_heads * T * T),
                                      bytes_accessed=int(bytes_acc)),
    )(x, g.reshape(1, C), b.reshape(1, C), wqkv, wp, pb.reshape(1, C))


# ---------------------------------------------------------------------------
# Fused MLP branch:  x + fc2(GELU(fc1(LN(x))))   (hidden never leaves VMEM)
# ---------------------------------------------------------------------------
def _mlp_kernel(x_ref, g_ref, b_ref, w1_ref, b1_ref, w2_ref, b2_ref, o_ref):
    x = x_ref[...].astype(jnp.float32)                   # (tm, C)
    xn = _ln_rows(x, g_ref[...], b_ref[...]).astype(jnp.bfloat16)
    h = jnp.dot(xn, w1_ref[...], preferred_element_type=jnp.float32) + b1_ref[...]
    h = _gelu(h).astype(jnp.bfloat16)
    y = jnp.dot(h, w2_ref[...], preferred_element_type=jnp.float32) + b2_ref[...]
    o_ref[...] = (x + y).astype(o_ref.dtype)


def mlp_branch(x, p, *, tm=256):
    B, T, C = x.shape
    g, b = p['norm2']
    w1, b1 = p['mlp']['fc1_w'], p['mlp']['fc1_b']
    w2, b2 = p['mlp']['fc2_w'], p['mlp']['fc2_b']
    H = w1.shape[1]
    x2 = x.reshape(B * T, C)
    M = B * T
    tm_eff = _row_tile(M, tm)
    grid = pl.cdiv(M, tm_eff)
    flops = 4 * M * C * H
    bytes_acc = 4 * (2 * M * C + 2 * C + H + C) + 2 * (C * H + H * C)
    out = pl.pallas_call(
        _mlp_kernel,
        out_shape=jax.ShapeDtypeStruct((M, C), x.dtype),
        grid_spec=pltpu.PrefetchScalarGridSpec(
            num_scalar_prefetch=0,
            grid=(grid,),
            in_specs=[
                pl.BlockSpec((tm_eff, C), lambda i: (i, 0)),
                pl.BlockSpec((1, C), lambda i: (0, 0)),
                pl.BlockSpec((1, C), lambda i: (0, 0)),
                pl.BlockSpec((C, H), lambda i: (0, 0)),
                pl.BlockSpec((1, H), lambda i: (0, 0)),
                pl.BlockSpec((H, C), lambda i: (0, 0)),
                pl.BlockSpec((1, C), lambda i: (0, 0)),
            ],
            out_specs=pl.BlockSpec((tm_eff, C), lambda i: (i, 0)),
        ),
        compiler_params=_COMPILER_PARAMS,
        cost_estimate=pl.CostEstimate(flops=int(flops),
                                      transcendentals=int(M * H),
                                      bytes_accessed=int(bytes_acc)),
    )(x2, g.reshape(1, C), b.reshape(1, C), w1, b1.reshape(1, H),
      w2, b2.reshape(1, C))
    return out.reshape(B, T, C)


# ---------------------------------------------------------------------------
# Standalone LayerNorm kernel (final per-stream norm)
# ---------------------------------------------------------------------------
def _layernorm_kernel(x_ref, g_ref, b_ref, o_ref):
    x = x_ref[...].astype(jnp.float32)
    o_ref[...] = _ln_rows(x, g_ref[...], b_ref[...]).astype(o_ref.dtype)


def layernorm(x2, gamma, beta, *, tm=256):
    M, C = x2.shape
    tm_eff = _row_tile(M, tm)
    grid = pl.cdiv(M, tm_eff)
    return pl.pallas_call(
        _layernorm_kernel,
        out_shape=jax.ShapeDtypeStruct((M, C), x2.dtype),
        grid_spec=pltpu.PrefetchScalarGridSpec(
            num_scalar_prefetch=0,
            grid=(grid,),
            in_specs=[pl.BlockSpec((tm_eff, C), lambda i: (i, 0)),
                      pl.BlockSpec((1, C), lambda i: (0, 0)),
                      pl.BlockSpec((1, C), lambda i: (0, 0))],
            out_specs=pl.BlockSpec((tm_eff, C), lambda i: (i, 0)),
        ),
        compiler_params=_COMPILER_PARAMS,
        cost_estimate=pl.CostEstimate(flops=int(10 * M * C), transcendentals=int(M),
                                      bytes_accessed=int(4 * (2 * M * C + 2 * C))),
    )(x2, gamma.reshape(1, C), beta.reshape(1, C))


# ---------------------------------------------------------------------------
# Module forward
# ---------------------------------------------------------------------------
def cs_block_forward(x, ctx, p, num_heads):
    x = cross_attention_branch(x, ctx, p, num_heads)
    x = self_attention_branch(x, p, num_heads)
    x = mlp_branch(x, p)
    return x


@functools.partial(jax.jit, static_argnums=(3,))
def encoder_forward(x, x_audio, params, num_heads):
    for pv, pa in zip(params['blocks'], params['blocks_audio']):
        x_new = cs_block_forward(x, x_audio, pv, num_heads)
        xa_new = cs_block_forward(x_audio, x, pa, num_heads)   # uses OLD x
        x, x_audio = x_new, xa_new
    B, T, C = x.shape
    x = layernorm(x.reshape(B * T, C), *params['norm']).reshape(B, T, C)
    Ba, Ta, Ca = x_audio.shape
    x_audio = layernorm(x_audio.reshape(Ba * Ta, Ca),
                        *params['norm_audio']).reshape(Ba, Ta, Ca)
    return x, x_audio


# ---------------------------------------------------------------------------
# Parameter construction (weights stored as bf16 (in, out); biases/LN f32)
# ---------------------------------------------------------------------------
def _ln_init(key, d):
    k1, k2 = jax.random.split(key)
    return (1.0 + 0.2 * jax.random.normal(k1, (d,), jnp.float32),
            0.1 * jax.random.normal(k2, (d,), jnp.float32))


def _xavier(key, fin, fout):
    lim = (6.0 / (fin + fout)) ** 0.5
    return jax.random.uniform(key, (fin, fout), jnp.float32, -lim, lim)


def init_cs_block_params(key, dim, context_dim, num_heads, mlp_ratio):
    ah = (dim // num_heads) * num_heads
    hidden = int(dim * mlp_ratio)
    ks = jax.random.split(key, 16)
    small = lambda k, d: 0.1 * jax.random.normal(k, (d,), jnp.float32)
    bf16 = jnp.bfloat16
    q_w = _xavier(ks[7], dim, ah)
    kv_w = _xavier(ks[8], dim, 2 * ah)
    return {
        'cross_norm1': _ln_init(ks[0], dim),
        'cross_norm2': _ln_init(ks[1], context_dim),
        'cross_attn': {
            'q_w': _xavier(ks[2], dim, ah).astype(bf16),
            'kv_w': _xavier(ks[3], context_dim, 2 * ah).astype(bf16),
            'proj_w': _xavier(ks[4], ah, dim).astype(bf16),
            'proj_b': small(ks[5], dim),
        },
        'norm1': _ln_init(ks[6], dim),
        'attn': {
            # fused q|k|v weight: LN(x) is read & multiplied exactly once
            'qkv_w': jnp.concatenate([q_w, kv_w], axis=1).astype(bf16),
            'proj_w': _xavier(ks[9], ah, dim).astype(bf16),
            'proj_b': small(ks[10], dim),
        },
        'norm2': _ln_init(ks[11], dim),
        'mlp': {
            'fc1_w': _xavier(ks[12], dim, hidden).astype(bf16),
            'fc1_b': small(ks[13], hidden),
            'fc2_w': _xavier(ks[14], hidden, dim).astype(bf16),
            'fc2_b': small(ks[15], dim),
        },
    }


def init_encoder_params(key, dim, dim_audio, depth, num_heads, mlp_ratio):
    keys = jax.random.split(key, 2 * depth + 2)
    blocks = [init_cs_block_params(keys[i], dim, dim_audio, num_heads,
                                   mlp_ratio) for i in range(depth)]
    blocks_a = [init_cs_block_params(keys[depth + i], dim_audio, dim,
                                     num_heads, mlp_ratio)
                for i in range(depth)]
    return {'blocks': blocks, 'blocks_audio': blocks_a,
            'norm': _ln_init(keys[-2], dim),
            'norm_audio': _ln_init(keys[-1], dim_audio)}


# ---------------------------------------------------------------------------
# Pure-JAX reference (mirrors the PyTorch math; f32 HIGHEST precision)
# ---------------------------------------------------------------------------
def _mm(a, b):
    return jnp.matmul(a.astype(jnp.float32), b.astype(jnp.float32),
                      precision=jax.lax.Precision.HIGHEST)


def _ref_ln(x, g, b):
    m = jnp.mean(x, axis=-1, keepdims=True)
    v = jnp.mean((x - m) ** 2, axis=-1, keepdims=True)
    return (x - m) / jnp.sqrt(v + _LN_EPS) * g + b


def _ref_attn(xq, xkv, q_w, kv_w, proj_w, proj_b, H):
    B, T1, _ = xq.shape
    _, T2, _ = xkv.shape
    AH = q_w.shape[1]
    Dh = AH // H
    scale = Dh ** -0.5
    q = _mm(xq, q_w).reshape(B, T1, H, Dh).transpose(0, 2, 1, 3) * scale
    kv = _mm(xkv, kv_w).reshape(B, T2, 2, H, Dh).transpose(2, 0, 3, 1, 4)
    k, v = kv[0], kv[1]
    a = jax.nn.softmax(_mm(q, jnp.swapaxes(k, -1, -2)), axis=-1)
    o = _mm(a, v).transpose(0, 2, 1, 3).reshape(B, T1, AH)
    return _mm(o, proj_w) + proj_b


def _ref_mlp(x, p):
    h = jax.nn.gelu(_mm(x, p['fc1_w']) + p['fc1_b'], approximate=False)
    return _mm(h, p['fc2_w']) + p['fc2_b']


def _ref_block(x, ctx, p, H):
    x = x + _ref_attn(_ref_ln(x, *p['cross_norm1']),
                      _ref_ln(ctx, *p['cross_norm2']),
                      p['cross_attn']['q_w'], p['cross_attn']['kv_w'],
                      p['cross_attn']['proj_w'], p['cross_attn']['proj_b'], H)
    xn = _ref_ln(x, *p['norm1'])
    AH = p['attn']['proj_w'].shape[0]
    qkv = p['attn']['qkv_w']
    x = x + _ref_attn(xn, xn, qkv[:, :AH], qkv[:, AH:],
                      p['attn']['proj_w'], p['attn']['proj_b'], H)
    x = x + _ref_mlp(_ref_ln(x, *p['norm2']), p['mlp'])
    return x


def reference_forward(x, x_audio, params, H):
    for pv, pa in zip(params['blocks'], params['blocks_audio']):
        x, x_audio = _ref_block(x, x_audio, pv, H), _ref_block(x_audio, x, pa, H)
    return (_ref_ln(x, *params['norm']),
            _ref_ln(x_audio, *params['norm_audio']))


# ---------------------------------------------------------------------------
if __name__ == "__main__":
    embed_dim = 128
    embed_dim_audio = 256     # exercise the asymmetric cross-dim path
    depth = 2
    num_heads = 4             # head_dim = 32 (video) / 64 (audio)
    mlp_ratio = 4.0
    B, T_video, T_audio = 2, 16, 8

    key = jax.random.PRNGKey(0)
    k_params, k_x, k_xa = jax.random.split(key, 3)
    params = init_encoder_params(k_params, embed_dim, embed_dim_audio, depth,
                                 num_heads, mlp_ratio)
    x = jax.random.normal(k_x, (B, T_video, embed_dim), jnp.float32)
    x_audio = jax.random.normal(k_xa, (B, T_audio, embed_dim_audio),
                                jnp.float32)

    out_v, out_a = encoder_forward(x, x_audio, params, num_heads)
    out_v = jax.block_until_ready(out_v)
    out_a = jax.block_until_ready(out_a)

    ref_v, ref_a = reference_forward(x, x_audio, params, num_heads)
    assert out_v.shape == (B, T_video, embed_dim), out_v.shape
    assert out_a.shape == (B, T_audio, embed_dim_audio), out_a.shape
    err_v = float(jnp.max(jnp.abs(out_v - ref_v)))
    err_a = float(jnp.max(jnp.abs(out_a - ref_a)))
    # bf16 MXU operands vs. f32 HIGHEST reference: small numeric delta expected
    assert err_v < 7.5e-2 and err_a < 7.5e-2, (err_v, err_a)

    print("KERNEL_OK")
</pallas_src>

<mosaic_0001>
module attributes {stable_mosaic.version = 11 : i64} {
  func.func @_mlp_kernel(%arg0: i32, %arg1: memref<16x128xf32, #tpu.memory_space<vmem>>, %arg2: memref<1x128xf32, #tpu.memory_space<vmem>>, %arg3: memref<1x128xf32, #tpu.memory_space<vmem>>, %arg4: memref<128x512xbf16, #tpu.memory_space<vmem>>, %arg5: memref<1x512xf32, #tpu.memory_space<vmem>>, %arg6: memref<512x128xbf16, #tpu.memory_space<vmem>>, %arg7: memref<1x128xf32, #tpu.memory_space<vmem>>, %arg8: memref<16x128xf32, #tpu.memory_space<vmem>>) attributes {dimension_semantics = [#tpu.dimension_semantics<parallel>], iteration_bounds = array<i64: 2>, scalar_prefetch = 0 : i64, scratch_operands = 0 : i64, tpu.core_type = #tpu.core_type<tc>, window_params = [{transform_indices = @transform_0, window_bounds = array<i64: 16, 128>}, {pipeline_mode = #tpu.pipeline_mode<synchronous>, transform_indices = @transform_1, window_bounds = array<i64: 1, 128>}, {pipeline_mode = #tpu.pipeline_mode<synchronous>, transform_indices = @transform_2, window_bounds = array<i64: 1, 128>}, {pipeline_mode = #tpu.pipeline_mode<synchronous>, transform_indices = @transform_3, window_bounds = array<i64: 128, 512>}, {pipeline_mode = #tpu.pipeline_mode<synchronous>, transform_indices = @transform_4, window_bounds = array<i64: 1, 512>}, {pipeline_mode = #tpu.pipeline_mode<synchronous>, transform_indices = @transform_5, window_bounds = array<i64: 512, 128>}, {pipeline_mode = #tpu.pipeline_mode<synchronous>, transform_indices = @transform_6, window_bounds = array<i64: 1, 128>}, {transform_indices = @transform_7, window_bounds = array<i64: 16, 128>}]} {
    %c0 = arith.constant 0 : index
    %c0_0 = arith.constant 0 : index
    %0 = vector.load %arg1[%c0, %c0_0] : memref<16x128xf32, #tpu.memory_space<vmem>>, vector<16x128xf32>
    %c0_1 = arith.constant 0 : index
    %c0_2 = arith.constant 0 : index
    %1 = vector.load %arg2[%c0_1, %c0_2] : memref<1x128xf32, #tpu.memory_space<vmem>>, vector<1x128xf32>
    %c0_3 = arith.constant 0 : index
    %c0_4 = arith.constant 0 : index
    %2 = vector.load %arg3[%c0_3, %c0_4] : memref<1x128xf32, #tpu.memory_space<vmem>>, vector<1x128xf32>
    %cst = arith.constant dense<0.000000e+00> : vector<16xf32>
    %3 = vector.multi_reduction <add>, %0, %cst [1] : vector<16x128xf32> to vector<16xf32>
    %4 = vector.shape_cast %3 : vector<16xf32> to vector<16x1xf32>
    %cst_5 = arith.constant 1.280000e+02 : f32
    %5 = vector.broadcast %cst_5 : f32 to vector<16x1xf32>
    %6 = arith.divf %4, %5 : vector<16x1xf32>
    %7 = vector.broadcast %6 : vector<16x1xf32> to vector<16x128xf32>
    %8 = arith.subf %0, %7 : vector<16x128xf32>
    %9 = arith.mulf %8, %8 : vector<16x128xf32>
    %cst_6 = arith.constant dense<0.000000e+00> : vector<16xf32>
    %10 = vector.multi_reduction <add>, %9, %cst_6 [1] : vector<16x128xf32> to vector<16xf32>
    %11 = vector.shape_cast %10 : vector<16xf32> to vector<16x1xf32>
    %cst_7 = arith.constant 1.280000e+02 : f32
    %12 = vector.broadcast %cst_7 : f32 to vector<16x1xf32>
    %13 = arith.divf %11, %12 : vector<16x1xf32>
    %cst_8 = arith.constant 9.99999974E-6 : f32
    %14 = vector.broadcast %cst_8 : f32 to vector<16x1xf32>
    %15 = arith.addf %13, %14 : vector<16x1xf32>
    %16 = math.rsqrt %15 : vector<16x1xf32>
    %17 = vector.broadcast %16 : vector<16x1xf32> to vector<16x128xf32>
    %18 = arith.mulf %8, %17 : vector<16x128xf32>
    %19 = vector.broadcast %1 : vector<1x128xf32> to vector<16x128xf32>
    %20 = arith.mulf %18, %19 : vector<16x128xf32>
    %21 = vector.broadcast %2 : vector<1x128xf32> to vector<16x128xf32>
    %22 = arith.addf %20, %21 : vector<16x128xf32>
    %23 = arith.truncf %22 : vector<16x128xf32> to vector<16x128xbf16>
    %c0_9 = arith.constant 0 : index
    %c0_10 = arith.constant 0 : index
    %24 = vector.load %arg4[%c0_9, %c0_10] : memref<128x512xbf16, #tpu.memory_space<vmem>>, vector<128x512xbf16>
    %cst_11 = arith.constant dense<0.000000e+00> : vector<16x512xf32>
    %25 = tpu.matmul %23, %24, %cst_11 {dimension_numbers = #tpu.dot_dimension_numbers<[1], [0], [0], [1], [0, 0, 1, 1], [], []>} : vector<16x128xbf16>, vector<128x512xbf16>, vector<16x512xf32> -> vector<16x512xf32>
    %c0_12 = arith.constant 0 : index
    %c0_13 = arith.constant 0 : index
    %26 = vector.load %arg5[%c0_12, %c0_13] : memref<1x512xf32, #tpu.memory_space<vmem>>, vector<1x512xf32>
    %27 = vector.broadcast %26 : vector<1x512xf32> to vector<16x512xf32>
    %28 = arith.addf %25, %27 : vector<16x512xf32>
    %cst_14 = arith.constant 5.000000e-01 : f32
    %29 = vector.broadcast %cst_14 : f32 to vector<16x512xf32>
    %30 = arith.mulf %29, %28 : vector<16x512xf32>
    %cst_15 = arith.constant 0.707106769 : f32
    %31 = vector.broadcast %cst_15 : f32 to vector<16x512xf32>
    %32 = arith.mulf %28, %31 : vector<16x512xf32>
    %cst_16 = arith.constant 0.000000e+00 : f32
    %33 = vector.broadcast %cst_16 : f32 to vector<16x512xf32>
    %34 = arith.cmpf oge, %32, %33 : vector<16x512xf32>
    %cst_17 = arith.constant 1.000000e+00 : f32
    %cst_18 = arith.constant -1.000000e+00 : f32
    %35 = vector.broadcast %cst_17 : f32 to vector<16x512xf32>
    %36 = vector.broadcast %cst_18 : f32 to vector<16x512xf32>
    %37 = arith.select %34, %35, %36 : vector<16x512xi1>, vector<16x512xf32>
    %38 = math.absf %32 : vector<16x512xf32>
    %cst_19 = arith.constant 0.327591091 : f32
    %39 = vector.broadcast %cst_19 : f32 to vector<16x512xf32>
    %40 = arith.mulf %39, %38 : vector<16x512xf32>
    %cst_20 = arith.constant 1.000000e+00 : f32
    %41 = vector.broadcast %cst_20 : f32 to vector<16x512xf32>
    %42 = arith.addf %41, %40 : vector<16x512xf32>
    %43 = tpu.reciprocal %42 {approx = true} : vector<16x512xf32> -> vector<16x512xf32>
    %cst_21 = arith.constant 1.06140542 : f32
    %44 = vector.broadcast %cst_21 : f32 to vector<16x512xf32>
    %45 = arith.mulf %44, %43 : vector<16x512xf32>
    %cst_22 = arith.constant -1.45315206 : f32
    %46 = vector.broadcast %cst_22 : f32 to vector<16x512xf32>
    %47 = arith.addf %45, %46 : vector<16x512xf32>
    %48 = arith.mulf %47, %43 : vector<16x512xf32>
    %cst_23 = arith.constant 1.42141378 : f32
    %49 = vector.broadcast %cst_23 : f32 to vector<16x512xf32>
    %50 = arith.addf %48, %49 : vector<16x512xf32>
    %51 = arith.mulf %50, %43 : vector<16x512xf32>
    %cst_24 = arith.constant -0.284496725 : f32
    %52 = vector.broadcast %cst_24 : f32 to vector<16x512xf32>
    %53 = arith.addf %51, %52 : vector<16x512xf32>
    %54 = arith.mulf %53, %43 : vector<16x512xf32>
    %cst_25 = arith.constant 0.254829586 : f32
    %55 = vector.broadcast %cst_25 : f32 to vector<16x512xf32>
    %56 = arith.addf %54, %55 : vector<16x512xf32>
    %57 = arith.mulf %56, %43 : vector<16x512xf32>
    %cst_26 = arith.constant 0.000000e+00 : f32
    %58 = vector.broadcast %cst_26 : f32 to vector<16x512xf32>
    %59 = arith.subf %58, %38 : vector<16x512xf32>
    %60 = arith.mulf %59, %38 : vector<16x512xf32>
    %61 = math.exp %60 : vector<16x512xf32>
    %62 = arith.mulf %57, %61 : vector<16x512xf32>
    %cst_27 = arith.constant 1.000000e+00 : f32
    %63 = vector.broadcast %cst_27 : f32 to vector<16x512xf32>
    %64 = arith.subf %63, %62 : vector<16x512xf32>
    %65 = arith.mulf %37, %64 : vector<16x512xf32>
    %cst_28 = arith.constant 1.000000e+00 : f32
    %66 = vector.broadcast %cst_28 : f32 to vector<16x512xf32>
    %67 = arith.addf %66, %65 : vector<16x512xf32>
    %68 = arith.mulf %30, %67 : vector<16x512xf32>
    %69 = arith.truncf %68 : vector<16x512xf32> to vector<16x512xbf16>
    %c0_29 = arith.constant 0 : index
    %c0_30 = arith.constant 0 : index
    %70 = vector.load %arg6[%c0_29, %c0_30] : memref<512x128xbf16, #tpu.memory_space<vmem>>, vector<512x128xbf16>
    %cst_31 = arith.constant dense<0.000000e+00> : vector<16x128xf32>
    %71 = tpu.matmul %69, %70, %cst_31 {dimension_numbers = #tpu.dot_dimension_numbers<[1], [0], [0], [1], [0, 0, 1, 1], [], []>} : vector<16x512xbf16>, vector<512x128xbf16>, vector<16x128xf32> -> vector<16x128xf32>
    %c0_32 = arith.constant 0 : index
    %c0_33 = arith.constant 0 : index
    %72 = vector.load %arg7[%c0_32, %c0_33] : memref<1x128xf32, #tpu.memory_space<vmem>>, vector<1x128xf32>
    %73 = vector.broadcast %72 : vector<1x128xf32> to vector<16x128xf32>
    %74 = arith.addf %71, %73 : vector<16x128xf32>
    %75 = arith.addf %0, %74 : vector<16x128xf32>
    %c0_34 = arith.constant 0 : index
    %c0_35 = arith.constant 0 : index
    %76 = vector.load %arg8[%c0_34, %c0_35] : memref<16x128xf32, #tpu.memory_space<vmem>>, vector<16x128xf32>
    tpu.vector_store %arg8[%c0_34, %c0_35], %75 {strides = array<i32>} : memref<16x128xf32, #tpu.memory_space<vmem>>, vector<16x128xf32>,
    return
  }
  func.func @transform_0(%arg0: i32) -> (i32, i32) {
    %c0_i32 = arith.constant 0 : i32
    %c0_i32_0 = arith.constant 0 : i32
    return %arg0, %c0_i32 : i32, i32
  }
  func.func @transform_1(%arg0: i32) -> (i32, i32) {
    %c0_i32 = arith.constant 0 : i32
    %c0_i32_0 = arith.constant 0 : i32
    %c0_i32_1 = arith.constant 0 : i32
    return %c0_i32, %c0_i32_0 : i32, i32
  }
  func.func @transform_2(%arg0: i32) -> (i32, i32) {
    %c0_i32 = arith.constant 0 : i32
    %c0_i32_0 = arith.constant 0 : i32
    %c0_i32_1 = arith.constant 0 : i32
    return %c0_i32, %c0_i32_0 : i32, i32
  }
  func.func @transform_3(%arg0: i32) -> (i32, i32) {
    %c0_i32 = arith.constant 0 : i32
    %c0_i32_0 = arith.constant 0 : i32
    %c0_i32_1 = arith.constant 0 : i32
    return %c0_i32, %c0_i32_0 : i32, i32
  }
  func.func @transform_4(%arg0: i32) -> (i32, i32) {
    %c0_i32 = arith.constant 0 : i32
    %c0_i32_0 = arith.constant 0 : i32
    %c0_i32_1 = arith.constant 0 : i32
    return %c0_i32, %c0_i32_0 : i32, i32
  }
  func.func @transform_5(%arg0: i32) -> (i32, i32) {
    %c0_i32 = arith.constant 0 : i32
    %c0_i32_0 = arith.constant 0 : i32
    %c0_i32_1 = arith.constant 0 : i32
    return %c0_i32, %c0_i32_0 : i32, i32
  }
  func.func @transform_6(%arg0: i32) -> (i32, i32) {
    %c0_i32 = arith.constant 0 : i32
    %c0_i32_0 = arith.constant 0 : i32
    %c0_i32_1 = arith.constant 0 : i32
    return %c0_i32, %c0_i32_0 : i32, i32
  }
  func.func @transform_7(%arg0: i32) -> (i32, i32) {
    %c0_i32 = arith.constant 0 : i32
    %c0_i32_0 = arith.constant 0 : i32
    return %arg0, %c0_i32 : i32, i32
  }
}

module attributes {stable_mosaic.version = 11 : i64} {
  func.func @_self_attn_kernel(%arg0: i32, %arg1: memref<1x16x128xf32, #tpu.memory_space<vmem>>, %arg2: memref<1x128xf32, #tpu.memory_space<vmem>>, %arg3: memref<1x128xf32, #tpu.memory_space<vmem>>, %arg4: memref<128x384xbf16, #tpu.memory_space<vmem>>, %arg5: memref<128x128xbf16, #tpu.memory_space<vmem>>, %arg6: memref<1x128xf32, #tpu.memory_space<vmem>>, %arg7: memref<1x16x128xf32, #tpu.memory_space<vmem>>) attributes {dimension_semantics = [#tpu.dimension_semantics<parallel>], iteration_bounds = array<i64: 2>, scalar_prefetch = 0 : i64, scratch_operands = 0 : i64, tpu.core_type = #tpu.core_type<tc>, window_params = [{transform_indices = @transform_0, window_bounds = array<i64: 1, 16, 128>}, {pipeline_mode = #tpu.pipeline_mode<synchronous>, transform_indices = @transform_1, window_bounds = array<i64: 1, 128>}, {pipeline_mode = #tpu.pipeline_mode<synchronous>, transform_indices = @transform_2, window_bounds = array<i64: 1, 128>}, {pipeline_mode = #tpu.pipeline_mode<synchronous>, transform_indices = @transform_3, window_bounds = array<i64: 128, 384>}, {pipeline_mode = #tpu.pipeline_mode<synchronous>, transform_indices = @transform_4, window_bounds = array<i64: 128, 128>}, {pipeline_mode = #tpu.pipeline_mode<synchronous>, transform_indices = @transform_5, window_bounds = array<i64: 1, 128>}, {transform_indices = @transform_6, window_bounds = array<i64: 1, 16, 128>}]} {
    %c0 = arith.constant 0 : index
    %c0_0 = arith.constant 0 : index
    %c0_1 = arith.constant 0 : index
    %0 = vector.load %arg1[%c0, %c0_0, %c0_1] : memref<1x16x128xf32, #tpu.memory_space<vmem>>, vector<1x16x128xf32>
    %1 = vector.shape_cast %0 : vector<1x16x128xf32> to vector<16x128xf32>
    %c0_2 = arith.constant 0 : index
    %c0_3 = arith.constant 0 : index
    %2 = vector.load %arg2[%c0_2, %c0_3] : memref<1x128xf32, #tpu.memory_space<vmem>>, vector<1x128xf32>
    %c0_4 = arith.constant 0 : index
    %c0_5 = arith.constant 0 : index
    %3 = vector.load %arg3[%c0_4, %c0_5] : memref<1x128xf32, #tpu.memory_space<vmem>>, vector<1x128xf32>
    %cst = arith.constant dense<0.000000e+00> : vector<16xf32>
    %4 = vector.multi_reduction <add>, %1, %cst [1] : vector<16x128xf32> to vector<16xf32>
    %5 = vector.shape_cast %4 : vector<16xf32> to vector<16x1xf32>
    %cst_6 = arith.constant 1.280000e+02 : f32
    %6 = vector.broadcast %cst_6 : f32 to vector<16x1xf32>
    %7 = arith.divf %5, %6 : vector<16x1xf32>
    %8 = vector.broadcast %7 : vector<16x1xf32> to vector<16x128xf32>
    %9 = arith.subf %1, %8 : vector<16x128xf32>
    %10 = arith.mulf %9, %9 : vector<16x128xf32>
    %cst_7 = arith.constant dense<0.000000e+00> : vector<16xf32>
    %11 = vector.multi_reduction <add>, %10, %cst_7 [1] : vector<16x128xf32> to vector<16xf32>
    %12 = vector.shape_cast %11 : vector<16xf32> to vector<16x1xf32>
    %cst_8 = arith.constant 1.280000e+02 : f32
    %13 = vector.broadcast %cst_8 : f32 to vector<16x1xf32>
    %14 = arith.divf %12, %13 : vector<16x1xf32>
    %cst_9 = arith.constant 9.99999974E-6 : f32
    %15 = vector.broadcast %cst_9 : f32 to vector<16x1xf32>
    %16 = arith.addf %14, %15 : vector<16x1xf32>
    %17 = math.rsqrt %16 : vector<16x1xf32>
    %18 = vector.broadcast %17 : vector<16x1xf32> to vector<16x128xf32>
    %19 = arith.mulf %9, %18 : vector<16x128xf32>
    %20 = vector.broadcast %2 : vector<1x128xf32> to vector<16x128xf32>
    %21 = arith.mulf %19, %20 : vector<16x128xf32>
    %22 = vector.broadcast %3 : vector<1x128xf32> to vector<16x128xf32>
    %23 = arith.addf %21, %22 : vector<16x128xf32>
    %24 = arith.truncf %23 : vector<16x128xf32> to vector<16x128xbf16>
    %c0_10 = arith.constant 0 : index
    %c0_11 = arith.constant 0 : index
    %25 = vector.load %arg4[%c0_10, %c0_11] : memref<128x384xbf16, #tpu.memory_space<vmem>>, vector<128x384xbf16>
    %cst_12 = arith.constant dense<0.000000e+00> : vector<16x384xf32>
    %26 = tpu.matmul %24, %25, %cst_12 {dimension_numbers = #tpu.dot_dimension_numbers<[1], [0], [0], [1], [0, 0, 1, 1], [], []>} : vector<16x128xbf16>, vector<128x384xbf16>, vector<16x384xf32> -> vector<16x384xf32>
    %27 = vector.extract_strided_slice %26 {offsets = [0, 0], sizes = [16, 128], strides = [1, 1]} : vector<16x384xf32> to vector<16x128xf32>
    %28 = vector.extract_strided_slice %26 {offsets = [0, 128], sizes = [16, 256], strides = [1, 1]} : vector<16x384xf32> to vector<16x256xf32>
    %c0_13 = arith.constant 0 : index
    %c0_14 = arith.constant 0 : index
    %29 = vector.load %arg5[%c0_13, %c0_14] : memref<128x128xbf16, #tpu.memory_space<vmem>>, vector<128x128xbf16>
    %c0_15 = arith.constant 0 : index
    %c0_16 = arith.constant 0 : index
    %30 = vector.load %arg6[%c0_15, %c0_16] : memref<1x128xf32, #tpu.memory_space<vmem>>, vector<1x128xf32>
    %cst_17 = arith.constant 0.000000e+00 : f32
    %31 = vector.broadcast %cst_17 : f32 to vector<16x128xf32>
    %32 = vector.extract_strided_slice %27 {offsets = [0, 0], sizes = [16, 32], strides = [1, 1]} : vector<16x128xf32> to vector<16x32xf32>
    %cst_18 = arith.constant 0.176776692 : f32
    %33 = vector.broadcast %cst_18 : f32 to vector<16x32xf32>
    %34 = arith.mulf %32, %33 : vector<16x32xf32>
    %35 = arith.truncf %34 : vector<16x32xf32> to vector<16x32xbf16>
    %36 = vector.extract_strided_slice %28 {offsets = [0, 0], sizes = [16, 32], strides = [1, 1]} : vector<16x256xf32> to vector<16x32xf32>
    %37 = arith.truncf %36 : vector<16x32xf32> to vector<16x32xbf16>
    %38 = vector.extract_strided_slice %28 {offsets = [0, 128], sizes = [16, 32], strides = [1, 1]} : vector<16x256xf32> to vector<16x32xf32>
    %39 = arith.truncf %38 : vector<16x32xf32> to vector<16x32xbf16>
    %cst_19 = arith.constant dense<0.000000e+00> : vector<16x16xf32>
    %40 = tpu.matmul %35, %37, %cst_19 {dimension_numbers = #tpu.dot_dimension_numbers<[1], [1], [0], [0], [0, 0, 1, 0], [], []>} : vector<16x32xbf16>, vector<16x32xbf16>, vector<16x16xf32> -> vector<16x16xf32>
    %cst_20 = arith.constant dense<0xFF800000> : vector<16xf32>
    %41 = vector.multi_reduction <maximumf>, %40, %cst_20 [1] : vector<16x16xf32> to vector<16xf32>
    %42 = vector.shape_cast %41 : vector<16xf32> to vector<16x1xf32>
    %43 = vector.broadcast %42 : vector<16x1xf32> to vector<16x16xf32>
    %44 = arith.subf %40, %43 : vector<16x16xf32>
    %45 = math.exp %44 : vector<16x16xf32>
    %cst_21 = arith.constant dense<0.000000e+00> : vector<16xf32>
    %46 = vector.multi_reduction <add>, %45, %cst_21 [1] : vector<16x16xf32> to vector<16xf32>
    %47 = vector.shape_cast %46 : vector<16xf32> to vector<16x1xf32>
    %48 = tpu.reciprocal %47 {approx = true} : vector<16x1xf32> -> vector<16x1xf32>
    %49 = vector.broadcast %48 : vector<16x1xf32> to vector<16x16xf32>
    %50 = arith.mulf %45, %49 : vector<16x16xf32>
    %51 = arith.truncf %50 : vector<16x16xf32> to vector<16x16xbf16>
    %cst_22 = arith.constant dense<0.000000e+00> : vector<16x32xf32>
    %52 = tpu.matmul %51, %39, %cst_22 {dimension_numbers = #tpu.dot_dimension_numbers<[1], [0], [0], [1], [0, 0, 1, 1], [], []>} : vector<16x16xbf16>, vector<16x32xbf16>, vector<16x32xf32> -> vector<16x32xf32>
    %53 = arith.truncf %52 : vector<16x32xf32> to vector<16x32xbf16>
    %54 = vector.extract_strided_slice %29 {offsets = [0, 0], sizes = [32, 128], strides = [1, 1]} : vector<128x128xbf16> to vector<32x128xbf16>
    %cst_23 = arith.constant dense<0.000000e+00> : vector<16x128xf32>
    %55 = tpu.matmul %53, %54, %cst_23 {dimension_numbers = #tpu.dot_dimension_numbers<[1], [0], [0], [1], [0, 0, 1, 1], [], []>} : vector<16x32xbf16>, vector<32x128xbf16>, vector<16x128xf32> -> vector<16x128xf32>
    %56 = arith.addf %31, %55 : vector<16x128xf32>
    %57 = vector.extract_strided_slice %27 {offsets = [0, 32], sizes = [16, 32], strides = [1, 1]} : vector<16x128xf32> to vector<16x32xf32>
    %cst_24 = arith.constant 0.176776692 : f32
    %58 = vector.broadcast %cst_24 : f32 to vector<16x32xf32>
    %59 = arith.mulf %57, %58 : vector<16x32xf32>
    %60 = arith.truncf %59 : vector<16x32xf32> to vector<16x32xbf16>
    %61 = vector.extract_strided_slice %28 {offsets = [0, 32], sizes = [16, 32], strides = [1, 1]} : vector<16x256xf32> to vector<16x32xf32>
    %62 = arith.truncf %61 : vector<16x32xf32> to vector<16x32xbf16>
    %63 = vector.extract_strided_slice %28 {offsets = [0, 160], sizes = [16, 32], strides = [1, 1]} : vector<16x256xf32> to vector<16x32xf32>
    %64 = arith.truncf %63 : vector<16x32xf32> to vector<16x32xbf16>
    %cst_25 = arith.constant dense<0.000000e+00> : vector<16x16xf32>
    %65 = tpu.matmul %60, %62, %cst_25 {dimension_numbers = #tpu.dot_dimension_numbers<[1], [1], [0], [0], [0, 0, 1, 0], [], []>} : vector<16x32xbf16>, vector<16x32xbf16>, vector<16x16xf32> -> vector<16x16xf32>
    %cst_26 = arith.constant dense<0xFF800000> : vector<16xf32>
    %66 = vector.multi_reduction <maximumf>, %65, %cst_26 [1] : vector<16x16xf32> to vector<16xf32>
    %67 = vector.shape_cast %66 : vector<16xf32> to vector<16x1xf32>
    %68 = vector.broadcast %67 : vector<16x1xf32> to vector<16x16xf32>
    %69 = arith.subf %65, %68 : vector<16x16xf32>
    %70 = math.exp %69 : vector<16x16xf32>
    %cst_27 = arith.constant dense<0.000000e+00> : vector<16xf32>
    %71 = vector.multi_reduction <add>, %70, %cst_27 [1] : vector<16x16xf32> to vector<16xf32>
    %72 = vector.shape_cast %71 : vector<16xf32> to vector<16x1xf32>
    %73 = tpu.reciprocal %72 {approx = true} : vector<16x1xf32> -> vector<16x1xf32>
    %74 = vector.broadcast %73 : vector<16x1xf32> to vector<16x16xf32>
    %75 = arith.mulf %70, %74 : vector<16x16xf32>
    %76 = arith.truncf %75 : vector<16x16xf32> to vector<16x16xbf16>
    %cst_28 = arith.constant dense<0.000000e+00> : vector<16x32xf32>
    %77 = tpu.matmul %76, %64, %cst_28 {dimension_numbers = #tpu.dot_dimension_numbers<[1], [0], [0], [1], [0, 0, 1, 1], [], []>} : vector<16x16xbf16>, vector<16x32xbf16>, vector<16x32xf32> -> vector<16x32xf32>
    %78 = arith.truncf %77 : vector<16x32xf32> to vector<16x32xbf16>
    %79 = vector.extract_strided_slice %29 {offsets = [32, 0], sizes = [32, 128], strides = [1, 1]} : vector<128x128xbf16> to vector<32x128xbf16>
    %cst_29 = arith.constant dense<0.000000e+00> : vector<16x128xf32>
    %80 = tpu.matmul %78, %79, %cst_29 {dimension_numbers = #tpu.dot_dimension_numbers<[1], [0], [0], [1], [0, 0, 1, 1], [], []>} : vector<16x32xbf16>, vector<32x128xbf16>, vector<16x128xf32> -> vector<16x128xf32>
    %81 = arith.addf %56, %80 : vector<16x128xf32>
    %82 = vector.extract_strided_slice %27 {offsets = [0, 64], sizes = [16, 32], strides = [1, 1]} : vector<16x128xf32> to vector<16x32xf32>
    %cst_30 = arith.constant 0.176776692 : f32
    %83 = vector.broadcast %cst_30 : f32 to vector<16x32xf32>
    %84 = arith.mulf %82, %83 : vector<16x32xf32>
    %85 = arith.truncf %84 : vector<16x32xf32> to vector<16x32xbf16>
    %86 = vector.extract_strided_slice %28 {offsets = [0, 64], sizes = [16, 32], strides = [1, 1]} : vector<16x256xf32> to vector<16x32xf32>
    %87 = arith.truncf %86 : vector<16x32xf32> to vector<16x32xbf16>
    %88 = vector.extract_strided_slice %28 {offsets = [0, 192], sizes = [16, 32], strides = [1, 1]} : vector<16x256xf32> to vector<16x32xf32>
    %89 = arith.truncf %88 : vector<16x32xf32> to vector<16x32xbf16>
    %cst_31 = arith.constant dense<0.000000e+00> : vector<16x16xf32>
    %90 = tpu.matmul %85, %87, %cst_31 {dimension_numbers = #tpu.dot_dimension_numbers<[1], [1], [0], [0], [0, 0, 1, 0], [], []>} : vector<16x32xbf16>, vector<16x32xbf16>, vector<16x16xf32> -> vector<16x16xf32>
    %cst_32 = arith.constant dense<0xFF800000> : vector<16xf32>
    %91 = vector.multi_reduction <maximumf>, %90, %cst_32 [1] : vector<16x16xf32> to vector<16xf32>
    %92 = vector.shape_cast %91 : vector<16xf32> to vector<16x1xf32>
    %93 = vector.broadcast %92 : vector<16x1xf32> to vector<16x16xf32>
    %94 = arith.subf %90, %93 : vector<16x16xf32>
    %95 = math.exp %94 : vector<16x16xf32>
    %cst_33 = arith.constant dense<0.000000e+00> : vector<16xf32>
    %96 = vector.multi_reduction <add>, %95, %cst_33 [1] : vector<16x16xf32> to vector<16xf32>
    %97 = vector.shape_cast %96 : vector<16xf32> to vector<16x1xf32>
    %98 = tpu.reciprocal %97 {approx = true} : vector<16x1xf32> -> vector<16x1xf32>
    %99 = vector.broadcast %98 : vector<16x1xf32> to vector<16x16xf32>
    %100 = arith.mulf %95, %99 : vector<16x16xf32>
    %101 = arith.truncf %100 : vector<16x16xf32> to vector<16x16xbf16>
    %cst_34 = arith.constant dense<0.000000e+00> : vector<16x32xf32>
    %102 = tpu.matmul %101, %89, %cst_34 {dimension_numbers = #tpu.dot_dimension_numbers<[1], [0], [0], [1], [0, 0, 1, 1], [], []>} : vector<16x16xbf16>, vector<16x32xbf16>, vector<16x32xf32> -> vector<16x32xf32>
    %103 = arith.truncf %102 : vector<16x32xf32> to vector<16x32xbf16>
    %104 = vector.extract_strided_slice %29 {offsets = [64, 0], sizes = [32, 128], strides = [1, 1]} : vector<128x128xbf16> to vector<32x128xbf16>
    %cst_35 = arith.constant dense<0.000000e+00> : vector<16x128xf32>
    %105 = tpu.matmul %103, %104, %cst_35 {dimension_numbers = #tpu.dot_dimension_numbers<[1], [0], [0], [1], [0, 0, 1, 1], [], []>} : vector<16x32xbf16>, vector<32x128xbf16>, vector<16x128xf32> -> vector<16x128xf32>
    %106 = arith.addf %81, %105 : vector<16x128xf32>
    %107 = vector.extract_strided_slice %27 {offsets = [0, 96], sizes = [16, 32], strides = [1, 1]} : vector<16x128xf32> to vector<16x32xf32>
    %cst_36 = arith.constant 0.176776692 : f32
    %108 = vector.broadcast %cst_36 : f32 to vector<16x32xf32>
    %109 = arith.mulf %107, %108 : vector<16x32xf32>
    %110 = arith.truncf %109 : vector<16x32xf32> to vector<16x32xbf16>
    %111 = vector.extract_strided_slice %28 {offsets = [0, 96], sizes = [16, 32], strides = [1, 1]} : vector<16x256xf32> to vector<16x32xf32>
    %112 = arith.truncf %111 : vector<16x32xf32> to vector<16x32xbf16>
    %113 = vector.extract_strided_slice %28 {offsets = [0, 224], sizes = [16, 32], strides = [1, 1]} : vector<16x256xf32> to vector<16x32xf32>
    %114 = arith.truncf %113 : vector<16x32xf32> to vector<16x32xbf16>
    %cst_37 = arith.constant dense<0.000000e+00> : vector<16x16xf32>
    %115 = tpu.matmul %110, %112, %cst_37 {dimension_numbers = #tpu.dot_dimension_numbers<[1], [1], [0], [0], [0, 0, 1, 0], [], []>} : vector<16x32xbf16>, vector<16x32xbf16>, vector<16x16xf32> -> vector<16x16xf32>
    %cst_38 = arith.constant dense<0xFF800000> : vector<16xf32>
    %116 = vector.multi_reduction <maximumf>, %115, %cst_38 [1] : vector<16x16xf32> to vector<16xf32>
    %117 = vector.shape_cast %116 : vector<16xf32> to vector<16x1xf32>
    %118 = vector.broadcast %117 : vector<16x1xf32> to vector<16x16xf32>
    %119 = arith.subf %115, %118 : vector<16x16xf32>
    %120 = math.exp %119 : vector<16x16xf32>
    %cst_39 = arith.constant dense<0.000000e+00> : vector<16xf32>
    %121 = vector.multi_reduction <add>, %120, %cst_39 [1] : vector<16x16xf32> to vector<16xf32>
    %122 = vector.shape_cast %121 : vector<16xf32> to vector<16x1xf32>
    %123 = tpu.reciprocal %122 {approx = true} : vector<16x1xf32> -> vector<16x1xf32>
    %124 = vector.broadcast %123 : vector<16x1xf32> to vector<16x16xf32>
    %125 = arith.mulf %120, %124 : vector<16x16xf32>
    %126 = arith.truncf %125 : vector<16x16xf32> to vector<16x16xbf16>
    %cst_40 = arith.constant dense<0.000000e+00> : vector<16x32xf32>
    %127 = tpu.matmul %126, %114, %cst_40 {dimension_numbers = #tpu.dot_dimension_numbers<[1], [0], [0], [1], [0, 0, 1, 1], [], []>} : vector<16x16xbf16>, vector<16x32xbf16>, vector<16x32xf32> -> vector<16x32xf32>
    %128 = arith.truncf %127 : vector<16x32xf32> to vector<16x32xbf16>
    %129 = vector.extract_strided_slice %29 {offsets = [96, 0], sizes = [32, 128], strides = [1, 1]} : vector<128x128xbf16> to vector<32x128xbf16>
    %cst_41 = arith.constant dense<0.000000e+00> : vector<16x128xf32>
    %130 = tpu.matmul %128, %129, %cst_41 {dimension_numbers = #tpu.dot_dimension_numbers<[1], [0], [0], [1], [0, 0, 1, 1], [], []>} : vector<16x32xbf16>, vector<32x128xbf16>, vector<16x128xf32> -> vector<16x128xf32>
    %131 = arith.addf %106, %130 : vector<16x128xf32>
    %132 = vector.broadcast %30 : vector<1x128xf32> to vector<16x128xf32>
    %133 = arith.addf %131, %132 : vector<16x128xf32>
    %134 = arith.addf %1, %133 : vector<16x128xf32>
    %c0_42 = arith.constant 0 : index
    %c0_43 = arith.constant 0 : index
    %c0_44 = arith.constant 0 : index
    %135 = vector.load %arg7[%c0_42, %c0_43, %c0_44] : memref<1x16x128xf32, #tpu.memory_space<vmem>>, vector<1x16x128xf32>
    %136 = vector.shape_cast %135 : vector<1x16x128xf32> to vector<16x128xf32>
    %137 = vector.shape_cast %134 : vector<16x128xf32> to vector<1x16x128xf32>
    tpu.vector_store %arg7[%c0_42, %c0_43, %c0_44], %137 {strides = array<i32>} : memref<1x16x128xf32, #tpu.memory_space<vmem>>, vector<1x16x128xf32>,
    return
  }
  func.func @transform_0(%arg0: i32) -> (i32, i32, i32) {
    %c0_i32 = arith.constant 0 : i32
    %c0_i32_0 = arith.constant 0 : i32
    %c0_i32_1 = arith.constant 0 : i32
    return %arg0, %c0_i32, %c0_i32_0 : i32, i32, i32
  }
  func.func @transform_1(%arg0: i32) -> (i32, i32) {
    %c0_i32 = arith.constant 0 : i32
    %c0_i32_0 = arith.constant 0 : i32
    %c0_i32_1 = arith.constant 0 : i32
    return %c0_i32, %c0_i32_0 : i32, i32
  }
  func.func @transform_2(%arg0: i32) -> (i32, i32) {
    %c0_i32 = arith.constant 0 : i32
    %c0_i32_0 = arith.constant 0 : i32
    %c0_i32_1 = arith.constant 0 : i32
    return %c0_i32, %c0_i32_0 : i32, i32
  }
  func.func @transform_3(%arg0: i32) -> (i32, i32) {
    %c0_i32 = arith.constant 0 : i32
    %c0_i32_0 = arith.constant 0 : i32
    %c0_i32_1 = arith.constant 0 : i32
    return %c0_i32, %c0_i32_0 : i32, i32
  }
  func.func @transform_4(%arg0: i32) -> (i32, i32) {
    %c0_i32 = arith.constant 0 : i32
    %c0_i32_0 = arith.constant 0 : i32
    %c0_i32_1 = arith.constant 0 : i32
    return %c0_i32, %c0_i32_0 : i32, i32
  }
  func.func @transform_5(%arg0: i32) -> (i32, i32) {
    %c0_i32 = arith.constant 0 : i32
    %c0_i32_0 = arith.constant 0 : i32
    %c0_i32_1 = arith.constant 0 : i32
    return %c0_i32, %c0_i32_0 : i32, i32
  }
  func.func @transform_6(%arg0: i32) -> (i32, i32, i32) {
    %c0_i32 = arith.constant 0 : i32
    %c0_i32_0 = arith.constant 0 : i32
    %c0_i32_1 = arith.constant 0 : i32
    return %arg0, %c0_i32, %c0_i32_0 : i32, i32, i32
  }
}

module attributes {stable_mosaic.version = 11 : i64} {
  func.func @_cross_attn_kernel(%arg0: i32, %arg1: memref<1x8x256xf32, #tpu.memory_space<vmem>>, %arg2: memref<1x16x128xf32, #tpu.memory_space<vmem>>, %arg3: memref<1x256xf32, #tpu.memory_space<vmem>>, %arg4: memref<1x256xf32, #tpu.memory_space<vmem>>, %arg5: memref<1x128xf32, #tpu.memory_space<vmem>>, %arg6: memref<1x128xf32, #tpu.memory_space<vmem>>, %arg7: memref<256x256xbf16, #tpu.memory_space<vmem>>, %arg8: memref<128x512xbf16, #tpu.memory_space<vmem>>, %arg9: memref<256x256xbf16, #tpu.memory_space<vmem>>, %arg10: memref<1x256xf32, #tpu.memory_space<vmem>>, %arg11: memref<1x8x256xf32, #tpu.memory_space<vmem>>) attributes {dimension_semantics = [#tpu.dimension_semantics<parallel>], iteration_bounds = array<i64: 2>, scalar_prefetch = 0 : i64, scratch_operands = 0 : i64, tpu.core_type = #tpu.core_type<tc>, window_params = [{transform_indices = @transform_0, window_bounds = array<i64: 1, 8, 256>}, {transform_indices = @transform_1, window_bounds = array<i64: 1, 16, 128>}, {pipeline_mode = #tpu.pipeline_mode<synchronous>, transform_indices = @transform_2, window_bounds = array<i64: 1, 256>}, {pipeline_mode = #tpu.pipeline_mode<synchronous>, transform_indices = @transform_3, window_bounds = array<i64: 1, 256>}, {pipeline_mode = #tpu.pipeline_mode<synchronous>, transform_indices = @transform_4, window_bounds = array<i64: 1, 128>}, {pipeline_mode = #tpu.pipeline_mode<synchronous>, transform_indices = @transform_5, window_bounds = array<i64: 1, 128>}, {pipeline_mode = #tpu.pipeline_mode<synchronous>, transform_indices = @transform_6, window_bounds = array<i64: 256, 256>}, {pipeline_mode = #tpu.pipeline_mode<synchronous>, transform_indices = @transform_7, window_bounds = array<i64: 128, 512>}, {pipeline_mode = #tpu.pipeline_mode<synchronous>, transform_indices = @transform_8, window_bounds = array<i64: 256, 256>}, {pipeline_mode = #tpu.pipeline_mode<synchronous>, transform_indices = @transform_9, window_bounds = array<i64: 1, 256>}, {transform_indices = @transform_10, window_bounds = array<i64: 1, 8, 256>}]} {
    %c0 = arith.constant 0 : index
    %c0_0 = arith.constant 0 : index
    %c0_1 = arith.constant 0 : index
    %0 = vector.load %arg1[%c0, %c0_0, %c0_1] : memref<1x8x256xf32, #tpu.memory_space<vmem>>, vector<1x8x256xf32>
    %1 = vector.shape_cast %0 : vector<1x8x256xf32> to vector<8x256xf32>
    %c0_2 = arith.constant 0 : index
    %c0_3 = arith.constant 0 : index
    %c0_4 = arith.constant 0 : index
    %2 = vector.load %arg2[%c0_2, %c0_3, %c0_4] : memref<1x16x128xf32, #tpu.memory_space<vmem>>, vector<1x16x128xf32>
    %3 = vector.shape_cast %2 : vector<1x16x128xf32> to vector<16x128xf32>
    %c0_5 = arith.constant 0 : index
    %c0_6 = arith.constant 0 : index
    %4 = vector.load %arg3[%c0_5, %c0_6] : memref<1x256xf32, #tpu.memory_space<vmem>>, vector<1x256xf32>
    %c0_7 = arith.constant 0 : index
    %c0_8 = arith.constant 0 : index
    %5 = vector.load %arg4[%c0_7, %c0_8] : memref<1x256xf32, #tpu.memory_space<vmem>>, vector<1x256xf32>
    %cst = arith.constant dense<0.000000e+00> : vector<8xf32>
    %6 = vector.multi_reduction <add>, %1, %cst [1] : vector<8x256xf32> to vector<8xf32>
    %7 = vector.shape_cast %6 : vector<8xf32> to vector<8x1xf32>
    %cst_9 = arith.constant 2.560000e+02 : f32
    %8 = vector.broadcast %cst_9 : f32 to vector<8x1xf32>
    %9 = arith.divf %7, %8 : vector<8x1xf32>
    %10 = vector.broadcast %9 : vector<8x1xf32> to vector<8x256xf32>
    %11 = arith.subf %1, %10 : vector<8x256xf32>
    %12 = arith.mulf %11, %11 : vector<8x256xf32>
    %cst_10 = arith.constant dense<0.000000e+00> : vector<8xf32>
    %13 = vector.multi_reduction <add>, %12, %cst_10 [1] : vector<8x256xf32> to vector<8xf32>
    %14 = vector.shape_cast %13 : vector<8xf32> to vector<8x1xf32>
    %cst_11 = arith.constant 2.560000e+02 : f32
    %15 = vector.broadcast %cst_11 : f32 to vector<8x1xf32>
    %16 = arith.divf %14, %15 : vector<8x1xf32>
    %cst_12 = arith.constant 9.99999974E-6 : f32
    %17 = vector.broadcast %cst_12 : f32 to vector<8x1xf32>
    %18 = arith.addf %16, %17 : vector<8x1xf32>
    %19 = math.rsqrt %18 : vector<8x1xf32>
    %20 = vector.broadcast %19 : vector<8x1xf32> to vector<8x256xf32>
    %21 = arith.mulf %11, %20 : vector<8x256xf32>
    %22 = vector.broadcast %4 : vector<1x256xf32> to vector<8x256xf32>
    %23 = arith.mulf %21, %22 : vector<8x256xf32>
    %24 = vector.broadcast %5 : vector<1x256xf32> to vector<8x256xf32>
    %25 = arith.addf %23, %24 : vector<8x256xf32>
    %26 = arith.truncf %25 : vector<8x256xf32> to vector<8x256xbf16>
    %c0_13 = arith.constant 0 : index
    %c0_14 = arith.constant 0 : index
    %27 = vector.load %arg5[%c0_13, %c0_14] : memref<1x128xf32, #tpu.memory_space<vmem>>, vector<1x128xf32>
    %c0_15 = arith.constant 0 : index
    %c0_16 = arith.constant 0 : index
    %28 = vector.load %arg6[%c0_15, %c0_16] : memref<1x128xf32, #tpu.memory_space<vmem>>, vector<1x128xf32>
    %cst_17 = arith.constant dense<0.000000e+00> : vector<16xf32>
    %29 = vector.multi_reduction <add>, %3, %cst_17 [1] : vector<16x128xf32> to vector<16xf32>
    %30 = vector.shape_cast %29 : vector<16xf32> to vector<16x1xf32>
    %cst_18 = arith.constant 1.280000e+02 : f32
    %31 = vector.broadcast %cst_18 : f32 to vector<16x1xf32>
    %32 = arith.divf %30, %31 : vector<16x1xf32>
    %33 = vector.broadcast %32 : vector<16x1xf32> to vector<16x128xf32>
    %34 = arith.subf %3, %33 : vector<16x128xf32>
    %35 = arith.mulf %34, %34 : vector<16x128xf32>
    %cst_19 = arith.constant dense<0.000000e+00> : vector<16xf32>
    %36 = vector.multi_reduction <add>, %35, %cst_19 [1] : vector<16x128xf32> to vector<16xf32>
    %37 = vector.shape_cast %36 : vector<16xf32> to vector<16x1xf32>
    %cst_20 = arith.constant 1.280000e+02 : f32
    %38 = vector.broadcast %cst_20 : f32 to vector<16x1xf32>
    %39 = arith.divf %37, %38 : vector<16x1xf32>
    %cst_21 = arith.constant 9.99999974E-6 : f32
    %40 = vector.broadcast %cst_21 : f32 to vector<16x1xf32>
    %41 = arith.addf %39, %40 : vector<16x1xf32>
    %42 = math.rsqrt %41 : vector<16x1xf32>
    %43 = vector.broadcast %42 : vector<16x1xf32> to vector<16x128xf32>
    %44 = arith.mulf %34, %43 : vector<16x128xf32>
    %45 = vector.broadcast %27 : vector<1x128xf32> to vector<16x128xf32>
    %46 = arith.mulf %44, %45 : vector<16x128xf32>
    %47 = vector.broadcast %28 : vector<1x128xf32> to vector<16x128xf32>
    %48 = arith.addf %46, %47 : vector<16x128xf32>
    %49 = arith.truncf %48 : vector<16x128xf32> to vector<16x128xbf16>
    %c0_22 = arith.constant 0 : index
    %c0_23 = arith.constant 0 : index
    %50 = vector.load %arg7[%c0_22, %c0_23] : memref<256x256xbf16, #tpu.memory_space<vmem>>, vector<256x256xbf16>
    %cst_24 = arith.constant dense<0.000000e+00> : vector<8x256xf32>
    %51 = tpu.matmul %26, %50, %cst_24 {dimension_numbers = #tpu.dot_dimension_numbers<[1], [0], [0], [1], [0, 0, 1, 1], [], []>} : vector<8x256xbf16>, vector<256x256xbf16>, vector<8x256xf32> -> vector<8x256xf32>
    %c0_25 = arith.constant 0 : index
    %c0_26 = arith.constant 0 : index
    %52 = vector.load %arg8[%c0_25, %c0_26] : memref<128x512xbf16, #tpu.memory_space<vmem>>, vector<128x512xbf16>
    %cst_27 = arith.constant dense<0.000000e+00> : vector<16x512xf32>
    %53 = tpu.matmul %49, %52, %cst_27 {dimension_numbers = #tpu.dot_dimension_numbers<[1], [0], [0], [1], [0, 0, 1, 1], [], []>} : vector<16x128xbf16>, vector<128x512xbf16>, vector<16x512xf32> -> vector<16x512xf32>
    %c0_28 = arith.constant 0 : index
    %c0_29 = arith.constant 0 : index
    %54 = vector.load %arg9[%c0_28, %c0_29] : memref<256x256xbf16, #tpu.memory_space<vmem>>, vector<256x256xbf16>
    %c0_30 = arith.constant 0 : index
    %c0_31 = arith.constant 0 : index
    %55 = vector.load %arg10[%c0_30, %c0_31] : memref<1x256xf32, #tpu.memory_space<vmem>>, vector<1x256xf32>
    %cst_32 = arith.constant 0.000000e+00 : f32
    %56 = vector.broadcast %cst_32 : f32 to vector<8x256xf32>
    %57 = vector.extract_strided_slice %51 {offsets = [0, 0], sizes = [8, 64], strides = [1, 1]} : vector<8x256xf32> to vector<8x64xf32>
    %cst_33 = arith.constant 1.250000e-01 : f32
    %58 = vector.broadcast %cst_33 : f32 to vector<8x64xf32>
    %59 = arith.mulf %57, %58 : vector<8x64xf32>
    %60 = arith.truncf %59 : vector<8x64xf32> to vector<8x64xbf16>
    %61 = vector.extract_strided_slice %53 {offsets = [0, 0], sizes = [16, 64], strides = [1, 1]} : vector<16x512xf32> to vector<16x64xf32>
    %62 = arith.truncf %61 : vector<16x64xf32> to vector<16x64xbf16>
    %63 = vector.extract_strided_slice %53 {offsets = [0, 256], sizes = [16, 64], strides = [1, 1]} : vector<16x512xf32> to vector<16x64xf32>
    %64 = arith.truncf %63 : vector<16x64xf32> to vector<16x64xbf16>
    %cst_34 = arith.constant dense<0.000000e+00> : vector<8x16xf32>
    %65 = tpu.matmul %60, %62, %cst_34 {dimension_numbers = #tpu.dot_dimension_numbers<[1], [1], [0], [0], [0, 0, 1, 0], [], []>} : vector<8x64xbf16>, vector<16x64xbf16>, vector<8x16xf32> -> vector<8x16xf32>
    %cst_35 = arith.constant dense<0xFF800000> : vector<8xf32>
    %66 = vector.multi_reduction <maximumf>, %65, %cst_35 [1] : vector<8x16xf32> to vector<8xf32>
    %67 = vector.shape_cast %66 : vector<8xf32> to vector<8x1xf32>
    %68 = vector.broadcast %67 : vector<8x1xf32> to vector<8x16xf32>
    %69 = arith.subf %65, %68 : vector<8x16xf32>
    %70 = math.exp %69 : vector<8x16xf32>
    %cst_36 = arith.constant dense<0.000000e+00> : vector<8xf32>
    %71 = vector.multi_reduction <add>, %70, %cst_36 [1] : vector<8x16xf32> to vector<8xf32>
    %72 = vector.shape_cast %71 : vector<8xf32> to vector<8x1xf32>
    %73 = tpu.reciprocal %72 {approx = true} : vector<8x1xf32> -> vector<8x1xf32>
    %74 = vector.broadcast %73 : vector<8x1xf32> to vector<8x16xf32>
    %75 = arith.mulf %70, %74 : vector<8x16xf32>
    %76 = arith.truncf %75 : vector<8x16xf32> to vector<8x16xbf16>
    %cst_37 = arith.constant dense<0.000000e+00> : vector<8x64xf32>
    %77 = tpu.matmul %76, %64, %cst_37 {dimension_numbers = #tpu.dot_dimension_numbers<[1], [0], [0], [1], [0, 0, 1, 1], [], []>} : vector<8x16xbf16>, vector<16x64xbf16>, vector<8x64xf32> -> vector<8x64xf32>
    %78 = arith.truncf %77 : vector<8x64xf32> to vector<8x64xbf16>
    %79 = vector.extract_strided_slice %54 {offsets = [0, 0], sizes = [64, 256], strides = [1, 1]} : vector<256x256xbf16> to vector<64x256xbf16>
    %cst_38 = arith.constant dense<0.000000e+00> : vector<8x256xf32>
    %80 = tpu.matmul %78, %79, %cst_38 {dimension_numbers = #tpu.dot_dimension_numbers<[1], [0], [0], [1], [0, 0, 1, 1], [], []>} : vector<8x64xbf16>, vector<64x256xbf16>, vector<8x256xf32> -> vector<8x256xf32>
    %81 = arith.addf %56, %80 : vector<8x256xf32>
    %82 = vector.extract_strided_slice %51 {offsets = [0, 64], sizes = [8, 64], strides = [1, 1]} : vector<8x256xf32> to vector<8x64xf32>
    %cst_39 = arith.constant 1.250000e-01 : f32
    %83 = vector.broadcast %cst_39 : f32 to vector<8x64xf32>
    %84 = arith.mulf %82, %83 : vector<8x64xf32>
    %85 = arith.truncf %84 : vector<8x64xf32> to vector<8x64xbf16>
    %86 = vector.extract_strided_slice %53 {offsets = [0, 64], sizes = [16, 64], strides = [1, 1]} : vector<16x512xf32> to vector<16x64xf32>
    %87 = arith.truncf %86 : vector<16x64xf32> to vector<16x64xbf16>
    %88 = vector.extract_strided_slice %53 {offsets = [0, 320], sizes = [16, 64], strides = [1, 1]} : vector<16x512xf32> to vector<16x64xf32>
    %89 = arith.truncf %88 : vector<16x64xf32> to vector<16x64xbf16>
    %cst_40 = arith.constant dense<0.000000e+00> : vector<8x16xf32>
    %90 = tpu.matmul %85, %87, %cst_40 {dimension_numbers = #tpu.dot_dimension_numbers<[1], [1], [0], [0], [0, 0, 1, 0], [], []>} : vector<8x64xbf16>, vector<16x64xbf16>, vector<8x16xf32> -> vector<8x16xf32>
    %cst_41 = arith.constant dense<0xFF800000> : vector<8xf32>
    %91 = vector.multi_reduction <maximumf>, %90, %cst_41 [1] : vector<8x16xf32> to vector<8xf32>
    %92 = vector.shape_cast %91 : vector<8xf32> to vector<8x1xf32>
    %93 = vector.broadcast %92 : vector<8x1xf32> to vector<8x16xf32>
    %94 = arith.subf %90, %93 : vector<8x16xf32>
    %95 = math.exp %94 : vector<8x16xf32>
    %cst_42 = arith.constant dense<0.000000e+00> : vector<8xf32>
    %96 = vector.multi_reduction <add>, %95, %cst_42 [1] : vector<8x16xf32> to vector<8xf32>
    %97 = vector.shape_cast %96 : vector<8xf32> to vector<8x1xf32>
    %98 = tpu.reciprocal %97 {approx = true} : vector<8x1xf32> -> vector<8x1xf32>
    %99 = vector.broadcast %98 : vector<8x1xf32> to vector<8x16xf32>
    %100 = arith.mulf %95, %99 : vector<8x16xf32>
    %101 = arith.truncf %100 : vector<8x16xf32> to vector<8x16xbf16>
    %cst_43 = arith.constant dense<0.000000e+00> : vector<8x64xf32>
    %102 = tpu.matmul %101, %89, %cst_43 {dimension_numbers = #tpu.dot_dimension_numbers<[1], [0], [0], [1], [0, 0, 1, 1], [], []>} : vector<8x16xbf16>, vector<16x64xbf16>, vector<8x64xf32> -> vector<8x64xf32>
    %103 = arith.truncf %102 : vector<8x64xf32> to vector<8x64xbf16>
    %104 = vector.extract_strided_slice %54 {offsets = [64, 0], sizes = [64, 256], strides = [1, 1]} : vector<256x256xbf16> to vector<64x256xbf16>
    %cst_44 = arith.constant dense<0.000000e+00> : vector<8x256xf32>
    %105 = tpu.matmul %103, %104, %cst_44 {dimension_numbers = #tpu.dot_dimension_numbers<[1], [0], [0], [1], [0, 0, 1, 1], [], []>} : vector<8x64xbf16>, vector<64x256xbf16>, vector<8x256xf32> -> vector<8x256xf32>
    %106 = arith.addf %81, %105 : vector<8x256xf32>
    %107 = vector.extract_strided_slice %51 {offsets = [0, 128], sizes = [8, 64], strides = [1, 1]} : vector<8x256xf32> to vector<8x64xf32>
    %cst_45 = arith.constant 1.250000e-01 : f32
    %108 = vector.broadcast %cst_45 : f32 to vector<8x64xf32>
    %109 = arith.mulf %107, %108 : vector<8x64xf32>
    %110 = arith.truncf %109 : vector<8x64xf32> to vector<8x64xbf16>
    %111 = vector.extract_strided_slice %53 {offsets = [0, 128], sizes = [16, 64], strides = [1, 1]} : vector<16x512xf32> to vector<16x64xf32>
    %112 = arith.truncf %111 : vector<16x64xf32> to vector<16x64xbf16>
    %113 = vector.extract_strided_slice %53 {offsets = [0, 384], sizes = [16, 64], strides = [1, 1]} : vector<16x512xf32> to vector<16x64xf32>
    %114 = arith.truncf %113 : vector<16x64xf32> to vector<16x64xbf16>
    %cst_46 = arith.constant dense<0.000000e+00> : vector<8x16xf32>
    %115 = tpu.matmul %110, %112, %cst_46 {dimension_numbers = #tpu.dot_dimension_numbers<[1], [1], [0], [0], [0, 0, 1, 0], [], []>} : vector<8x64xbf16>, vector<16x64xbf16>, vector<8x16xf32> -> vector<8x16xf32>
    %cst_47 = arith.constant dense<0xFF800000> : vector<8xf32>
    %116 = vector.multi_reduction <maximumf>, %115, %cst_47 [1] : vector<8x16xf32> to vector<8xf32>
    %117 = vector.shape_cast %116 : vector<8xf32> to vector<8x1xf32>
    %118 = vector.broadcast %117 : vector<8x1xf32> to vector<8x16xf32>
    %119 = arith.subf %115, %118 : vector<8x16xf32>
    %120 = math.exp %119 : vector<8x16xf32>
    %cst_48 = arith.constant dense<0.000000e+00> : vector<8xf32>
    %121 = vector.multi_reduction <add>, %120, %cst_48 [1] : vector<8x16xf32> to vector<8xf32>
    %122 = vector.shape_cast %121 : vector<8xf32> to vector<8x1xf32>
    %123 = tpu.reciprocal %122 {approx = true} : vector<8x1xf32> -> vector<8x1xf32>
    %124 = vector.broadcast %123 : vector<8x1xf32> to vector<8x16xf32>
    %125 = arith.mulf %120, %124 : vector<8x16xf32>
    %126 = arith.truncf %125 : vector<8x16xf32> to vector<8x16xbf16>
    %cst_49 = arith.constant dense<0.000000e+00> : vector<8x64xf32>
    %127 = tpu.matmul %126, %114, %cst_49 {dimension_numbers = #tpu.dot_dimension_numbers<[1], [0], [0], [1], [0, 0, 1, 1], [], []>} : vector<8x16xbf16>, vector<16x64xbf16>, vector<8x64xf32> -> vector<8x64xf32>
    %128 = arith.truncf %127 : vector<8x64xf32> to vector<8x64xbf16>
    %129 = vector.extract_strided_slice %54 {offsets = [128, 0], sizes = [64, 256], strides = [1, 1]} : vector<256x256xbf16> to vector<64x256xbf16>
    %cst_50 = arith.constant dense<0.000000e+00> : vector<8x256xf32>
    %130 = tpu.matmul %128, %129, %cst_50 {dimension_numbers = #tpu.dot_dimension_numbers<[1], [0], [0], [1], [0, 0, 1, 1], [], []>} : vector<8x64xbf16>, vector<64x256xbf16>, vector<8x256xf32> -> vector<8x256xf32>
    %131 = arith.addf %106, %130 : vector<8x256xf32>
    %132 = vector.extract_strided_slice %51 {offsets = [0, 192], sizes = [8, 64], strides = [1, 1]} : vector<8x256xf32> to vector<8x64xf32>
    %cst_51 = arith.constant 1.250000e-01 : f32
    %133 = vector.broadcast %cst_51 : f32 to vector<8x64xf32>
    %134 = arith.mulf %132, %133 : vector<8x64xf32>
    %135 = arith.truncf %134 : vector<8x64xf32> to vector<8x64xbf16>
    %136 = vector.extract_strided_slice %53 {offsets = [0, 192], sizes = [16, 64], strides = [1, 1]} : vector<16x512xf32> to vector<16x64xf32>
    %137 = arith.truncf %136 : vector<16x64xf32> to vector<16x64xbf16>
    %138 = vector.extract_strided_slice %53 {offsets = [0, 448], sizes = [16, 64], strides = [1, 1]} : vector<16x512xf32> to vector<16x64xf32>
    %139 = arith.truncf %138 : vector<16x64xf32> to vector<16x64xbf16>
    %cst_52 = arith.constant dense<0.000000e+00> : vector<8x16xf32>
    %140 = tpu.matmul %135, %137, %cst_52 {dimension_numbers = #tpu.dot_dimension_numbers<[1], [1], [0], [0], [0, 0, 1, 0], [], []>} : vector<8x64xbf16>, vector<16x64xbf16>, vector<8x16xf32> -> vector<8x16xf32>
    %cst_53 = arith.constant dense<0xFF800000> : vector<8xf32>
    %141 = vector.multi_reduction <maximumf>, %140, %cst_53 [1] : vector<8x16xf32> to vector<8xf32>
    %142 = vector.shape_cast %141 : vector<8xf32> to vector<8x1xf32>
    %143 = vector.broadcast %142 : vector<8x1xf32> to vector<8x16xf32>
    %144 = arith.subf %140, %143 : vector<8x16xf32>
    %145 = math.exp %144 : vector<8x16xf32>
    %cst_54 = arith.constant dense<0.000000e+00> : vector<8xf32>
    %146 = vector.multi_reduction <add>, %145, %cst_54 [1] : vector<8x16xf32> to vector<8xf32>
    %147 = vector.shape_cast %146 : vector<8xf32> to vector<8x1xf32>
    %148 = tpu.reciprocal %147 {approx = true} : vector<8x1xf32> -> vector<8x1xf32>
    %149 = vector.broadcast %148 : vector<8x1xf32> to vector<8x16xf32>
    %150 = arith.mulf %145, %149 : vector<8x16xf32>
    %151 = arith.truncf %150 : vector<8x16xf32> to vector<8x16xbf16>
    %cst_55 = arith.constant dense<0.000000e+00> : vector<8x64xf32>
    %152 = tpu.matmul %151, %139, %cst_55 {dimension_numbers = #tpu.dot_dimension_numbers<[1], [0], [0], [1], [0, 0, 1, 1], [], []>} : vector<8x16xbf16>, vector<16x64xbf16>, vector<8x64xf32> -> vector<8x64xf32>
    %153 = arith.truncf %152 : vector<8x64xf32> to vector<8x64xbf16>
    %154 = vector.extract_strided_slice %54 {offsets = [192, 0], sizes = [64, 256], strides = [1, 1]} : vector<256x256xbf16> to vector<64x256xbf16>
    %cst_56 = arith.constant dense<0.000000e+00> : vector<8x256xf32>
    %155 = tpu.matmul %153, %154, %cst_56 {dimension_numbers = #tpu.dot_dimension_numbers<[1], [0], [0], [1], [0, 0, 1, 1], [], []>} : vector<8x64xbf16>, vector<64x256xbf16>, vector<8x256xf32> -> vector<8x256xf32>
    %156 = arith.addf %131, %155 : vector<8x256xf32>
    %157 = vector.broadcast %55 : vector<1x256xf32> to vector<8x256xf32>
    %158 = arith.addf %156, %157 : vector<8x256xf32>
    %159 = arith.addf %1, %158 : vector<8x256xf32>
    %c0_57 = arith.constant 0 : index
    %c0_58 = arith.constant 0 : index
    %c0_59 = arith.constant 0 : index
    %160 = vector.load %arg11[%c0_57, %c0_58, %c0_59] : memref<1x8x256xf32, #tpu.memory_space<vmem>>, vector<1x8x256xf32>
    %161 = vector.shape_cast %160 : vector<1x8x256xf32> to vector<8x256xf32>
    %162 = vector.shape_cast %159 : vector<8x256xf32> to vector<1x8x256xf32>
    tpu.vector_store %arg11[%c0_57, %c0_58, %c0_59], %162 {strides = array<i32>} : memref<1x8x256xf32, #tpu.memory_space<vmem>>, vector<1x8x256xf32>,
    return
  }
  func.func @transform_0(%arg0: i32) -> (i32, i32, i32) {
    %c0_i32 = arith.constant 0 : i32
    %c0_i32_0 = arith.constant 0 : i32
    %c0_i32_1 = arith.constant 0 : i32
    return %arg0, %c0_i32, %c0_i32_0 : i32, i32, i32
  }
  func.func @transform_1(%arg0: i32) -> (i32, i32, i32) {
    %c0_i32 = arith.constant 0 : i32
    %c0_i32_0 = arith.constant 0 : i32
    %c0_i32_1 = arith.constant 0 : i32
    return %arg0, %c0_i32, %c0_i32_0 : i32, i32, i32
  }
  func.func @transform_2(%arg0: i32) -> (i32, i32) {
    %c0_i32 = arith.constant 0 : i32
    %c0_i32_0 = arith.constant 0 : i32
    %c0_i32_1 = arith.constant 0 : i32
    return %c0_i32, %c0_i32_0 : i32, i32
  }
  func.func @transform_3(%arg0: i32) -> (i32, i32) {
    %c0_i32 = arith.constant 0 : i32
    %c0_i32_0 = arith.constant 0 : i32
    %c0_i32_1 = arith.constant 0 : i32
    return %c0_i32, %c0_i32_0 : i32, i32
  }
  func.func @transform_4(%arg0: i32) -> (i32, i32) {
    %c0_i32 = arith.constant 0 : i32
    %c0_i32_0 = arith.constant 0 : i32
    %c0_i32_1 = arith.constant 0 : i32
    return %c0_i32, %c0_i32_0 : i32, i32
  }
  func.func @transform_5(%arg0: i32) -> (i32, i32) {
    %c0_i32 = arith.constant 0 : i32
    %c0_i32_0 = arith.constant 0 : i32
    %c0_i32_1 = arith.constant 0 : i32
    return %c0_i32, %c0_i32_0 : i32, i32
  }
  func.func @transform_6(%arg0: i32) -> (i32, i32) {
    %c0_i32 = arith.constant 0 : i32
    %c0_i32_0 = arith.constant 0 : i32
    %c0_i32_1 = arith.constant 0 : i32
    return %c0_i32, %c0_i32_0 : i32, i32
  }
  func.func @transform_7(%arg0: i32) -> (i32, i32) {
    %c0_i32 = arith.constant 0 : i32
    %c0_i32_0 = arith.constant 0 : i32
    %c0_i32_1 = arith.constant 0 : i32
    return %c0_i32, %c0_i32_0 : i32, i32
  }
  func.func @transform_8(%arg0: i32) -> (i32, i32) {
    %c0_i32 = arith.constant 0 : i32
    %c0_i32_0 = arith.constant 0 : i32
    %c0_i32_1 = arith.constant 0 : i32
    return %c0_i32, %c0_i32_0 : i32, i32
  }
  func.func @transform_9(%arg0: i32) -> (i32, i32) {
    %c0_i32 = arith.constant 0 : i32
    %c0_i32_0 = arith.constant 0 : i32
    %c0_i32_1 = arith.constant 0 : i32
    return %c0_i32, %c0_i32_0 : i32, i32
  }
  func.func @transform_10(%arg0: i32) -> (i32, i32, i32) {
    %c0_i32 = arith.constant 0 : i32
    %c0_i32_0 = arith.constant 0 : i32
    %c0_i32_1 = arith.constant 0 : i32
    return %arg0, %c0_i32, %c0_i32_0 : i32, i32, i32
  }
}

module attributes {stable_mosaic.version = 11 : i64} {
  func.func @_cross_attn_kernel(%arg0: i32, %arg1: memref<1x16x128xf32, #tpu.memory_space<vmem>>, %arg2: memref<1x8x256xf32, #tpu.memory_space<vmem>>, %arg3: memref<1x128xf32, #tpu.memory_space<vmem>>, %arg4: memref<1x128xf32, #tpu.memory_space<vmem>>, %arg5: memref<1x256xf32, #tpu.memory_space<vmem>>, %arg6: memref<1x256xf32, #tpu.memory_space<vmem>>, %arg7: memref<128x128xbf16, #tpu.memory_space<vmem>>, %arg8: memref<256x256xbf16, #tpu.memory_space<vmem>>, %arg9: memref<128x128xbf16, #tpu.memory_space<vmem>>, %arg10: memref<1x128xf32, #tpu.memory_space<vmem>>, %arg11: memref<1x16x128xf32, #tpu.memory_space<vmem>>) attributes {dimension_semantics = [#tpu.dimension_semantics<parallel>], iteration_bounds = array<i64: 2>, scalar_prefetch = 0 : i64, scratch_operands = 0 : i64, tpu.core_type = #tpu.core_type<tc>, window_params = [{transform_indices = @transform_0, window_bounds = array<i64: 1, 16, 128>}, {transform_indices = @transform_1, window_bounds = array<i64: 1, 8, 256>}, {pipeline_mode = #tpu.pipeline_mode<synchronous>, transform_indices = @transform_2, window_bounds = array<i64: 1, 128>}, {pipeline_mode = #tpu.pipeline_mode<synchronous>, transform_indices = @transform_3, window_bounds = array<i64: 1, 128>}, {pipeline_mode = #tpu.pipeline_mode<synchronous>, transform_indices = @transform_4, window_bounds = array<i64: 1, 256>}, {pipeline_mode = #tpu.pipeline_mode<synchronous>, transform_indices = @transform_5, window_bounds = array<i64: 1, 256>}, {pipeline_mode = #tpu.pipeline_mode<synchronous>, transform_indices = @transform_6, window_bounds = array<i64: 128, 128>}, {pipeline_mode = #tpu.pipeline_mode<synchronous>, transform_indices = @transform_7, window_bounds = array<i64: 256, 256>}, {pipeline_mode = #tpu.pipeline_mode<synchronous>, transform_indices = @transform_8, window_bounds = array<i64: 128, 128>}, {pipeline_mode = #tpu.pipeline_mode<synchronous>, transform_indices = @transform_9, window_bounds = array<i64: 1, 128>}, {transform_indices = @transform_10, window_bounds = array<i64: 1, 16, 128>}]} {
    %c0 = arith.constant 0 : index
    %c0_0 = arith.constant 0 : index
    %c0_1 = arith.constant 0 : index
    %0 = vector.load %arg1[%c0, %c0_0, %c0_1] : memref<1x16x128xf32, #tpu.memory_space<vmem>>, vector<1x16x128xf32>
    %1 = vector.shape_cast %0 : vector<1x16x128xf32> to vector<16x128xf32>
    %c0_2 = arith.constant 0 : index
    %c0_3 = arith.constant 0 : index
    %c0_4 = arith.constant 0 : index
    %2 = vector.load %arg2[%c0_2, %c0_3, %c0_4] : memref<1x8x256xf32, #tpu.memory_space<vmem>>, vector<1x8x256xf32>
    %3 = vector.shape_cast %2 : vector<1x8x256xf32> to vector<8x256xf32>
    %c0_5 = arith.constant 0 : index
    %c0_6 = arith.constant 0 : index
    %4 = vector.load %arg3[%c0_5, %c0_6] : memref<1x128xf32, #tpu.memory_space<vmem>>, vector<1x128xf32>
    %c0_7 = arith.constant 0 : index
    %c0_8 = arith.constant 0 : index
    %5 = vector.load %arg4[%c0_7, %c0_8] : memref<1x128xf32, #tpu.memory_space<vmem>>, vector<1x128xf32>
    %cst = arith.constant dense<0.000000e+00> : vector<16xf32>
    %6 = vector.multi_reduction <add>, %1, %cst [1] : vector<16x128xf32> to vector<16xf32>
    %7 = vector.shape_cast %6 : vector<16xf32> to vector<16x1xf32>
    %cst_9 = arith.constant 1.280000e+02 : f32
    %8 = vector.broadcast %cst_9 : f32 to vector<16x1xf32>
    %9 = arith.divf %7, %8 : vector<16x1xf32>
    %10 = vector.broadcast %9 : vector<16x1xf32> to vector<16x128xf32>
    %11 = arith.subf %1, %10 : vector<16x128xf32>
    %12 = arith.mulf %11, %11 : vector<16x128xf32>
    %cst_10 = arith.constant dense<0.000000e+00> : vector<16xf32>
    %13 = vector.multi_reduction <add>, %12, %cst_10 [1] : vector<16x128xf32> to vector<16xf32>
    %14 = vector.shape_cast %13 : vector<16xf32> to vector<16x1xf32>
    %cst_11 = arith.constant 1.280000e+02 : f32
    %15 = vector.broadcast %cst_11 : f32 to vector<16x1xf32>
    %16 = arith.divf %14, %15 : vector<16x1xf32>
    %cst_12 = arith.constant 9.99999974E-6 : f32
    %17 = vector.broadcast %cst_12 : f32 to vector<16x1xf32>
    %18 = arith.addf %16, %17 : vector<16x1xf32>
    %19 = math.rsqrt %18 : vector<16x1xf32>
    %20 = vector.broadcast %19 : vector<16x1xf32> to vector<16x128xf32>
    %21 = arith.mulf %11, %20 : vector<16x128xf32>
    %22 = vector.broadcast %4 : vector<1x128xf32> to vector<16x128xf32>
    %23 = arith.mulf %21, %22 : vector<16x128xf32>
    %24 = vector.broadcast %5 : vector<1x128xf32> to vector<16x128xf32>
    %25 = arith.addf %23, %24 : vector<16x128xf32>
    %26 = arith.truncf %25 : vector<16x128xf32> to vector<16x128xbf16>
    %c0_13 = arith.constant 0 : index
    %c0_14 = arith.constant 0 : index
    %27 = vector.load %arg5[%c0_13, %c0_14] : memref<1x256xf32, #tpu.memory_space<vmem>>, vector<1x256xf32>
    %c0_15 = arith.constant 0 : index
    %c0_16 = arith.constant 0 : index
    %28 = vector.load %arg6[%c0_15, %c0_16] : memref<1x256xf32, #tpu.memory_space<vmem>>, vector<1x256xf32>
    %cst_17 = arith.constant dense<0.000000e+00> : vector<8xf32>
    %29 = vector.multi_reduction <add>, %3, %cst_17 [1] : vector<8x256xf32> to vector<8xf32>
    %30 = vector.shape_cast %29 : vector<8xf32> to vector<8x1xf32>
    %cst_18 = arith.constant 2.560000e+02 : f32
    %31 = vector.broadcast %cst_18 : f32 to vector<8x1xf32>
    %32 = arith.divf %30, %31 : vector<8x1xf32>
    %33 = vector.broadcast %32 : vector<8x1xf32> to vector<8x256xf32>
    %34 = arith.subf %3, %33 : vector<8x256xf32>
    %35 = arith.mulf %34, %34 : vector<8x256xf32>
    %cst_19 = arith.constant dense<0.000000e+00> : vector<8xf32>
    %36 = vector.multi_reduction <add>, %35, %cst_19 [1] : vector<8x256xf32> to vector<8xf32>
    %37 = vector.shape_cast %36 : vector<8xf32> to vector<8x1xf32>
    %cst_20 = arith.constant 2.560000e+02 : f32
    %38 = vector.broadcast %cst_20 : f32 to vector<8x1xf32>
    %39 = arith.divf %37, %38 : vector<8x1xf32>
    %cst_21 = arith.constant 9.99999974E-6 : f32
    %40 = vector.broadcast %cst_21 : f32 to vector<8x1xf32>
    %41 = arith.addf %39, %40 : vector<8x1xf32>
    %42 = math.rsqrt %41 : vector<8x1xf32>
    %43 = vector.broadcast %42 : vector<8x1xf32> to vector<8x256xf32>
    %44 = arith.mulf %34, %43 : vector<8x256xf32>
    %45 = vector.broadcast %27 : vector<1x256xf32> to vector<8x256xf32>
    %46 = arith.mulf %44, %45 : vector<8x256xf32>
    %47 = vector.broadcast %28 : vector<1x256xf32> to vector<8x256xf32>
    %48 = arith.addf %46, %47 : vector<8x256xf32>
    %49 = arith.truncf %48 : vector<8x256xf32> to vector<8x256xbf16>
    %c0_22 = arith.constant 0 : index
    %c0_23 = arith.constant 0 : index
    %50 = vector.load %arg7[%c0_22, %c0_23] : memref<128x128xbf16, #tpu.memory_space<vmem>>, vector<128x128xbf16>
    %cst_24 = arith.constant dense<0.000000e+00> : vector<16x128xf32>
    %51 = tpu.matmul %26, %50, %cst_24 {dimension_numbers = #tpu.dot_dimension_numbers<[1], [0], [0], [1], [0, 0, 1, 1], [], []>} : vector<16x128xbf16>, vector<128x128xbf16>, vector<16x128xf32> -> vector<16x128xf32>
    %c0_25 = arith.constant 0 : index
    %c0_26 = arith.constant 0 : index
    %52 = vector.load %arg8[%c0_25, %c0_26] : memref<256x256xbf16, #tpu.memory_space<vmem>>, vector<256x256xbf16>
    %cst_27 = arith.constant dense<0.000000e+00> : vector<8x256xf32>
    %53 = tpu.matmul %49, %52, %cst_27 {dimension_numbers = #tpu.dot_dimension_numbers<[1], [0], [0], [1], [0, 0, 1, 1], [], []>} : vector<8x256xbf16>, vector<256x256xbf16>, vector<8x256xf32> -> vector<8x256xf32>
    %c0_28 = arith.constant 0 : index
    %c0_29 = arith.constant 0 : index
    %54 = vector.load %arg9[%c0_28, %c0_29] : memref<128x128xbf16, #tpu.memory_space<vmem>>, vector<128x128xbf16>
    %c0_30 = arith.constant 0 : index
    %c0_31 = arith.constant 0 : index
    %55 = vector.load %arg10[%c0_30, %c0_31] : memref<1x128xf32, #tpu.memory_space<vmem>>, vector<1x128xf32>
    %cst_32 = arith.constant 0.000000e+00 : f32
    %56 = vector.broadcast %cst_32 : f32 to vector<16x128xf32>
    %57 = vector.extract_strided_slice %51 {offsets = [0, 0], sizes = [16, 32], strides = [1, 1]} : vector<16x128xf32> to vector<16x32xf32>
    %cst_33 = arith.constant 0.176776692 : f32
    %58 = vector.broadcast %cst_33 : f32 to vector<16x32xf32>
    %59 = arith.mulf %57, %58 : vector<16x32xf32>
    %60 = arith.truncf %59 : vector<16x32xf32> to vector<16x32xbf16>
    %61 = vector.extract_strided_slice %53 {offsets = [0, 0], sizes = [8, 32], strides = [1, 1]} : vector<8x256xf32> to vector<8x32xf32>
    %62 = arith.truncf %61 : vector<8x32xf32> to vector<8x32xbf16>
    %63 = vector.extract_strided_slice %53 {offsets = [0, 128], sizes = [8, 32], strides = [1, 1]} : vector<8x256xf32> to vector<8x32xf32>
    %64 = arith.truncf %63 : vector<8x32xf32> to vector<8x32xbf16>
    %cst_34 = arith.constant dense<0.000000e+00> : vector<16x8xf32>
    %65 = tpu.matmul %60, %62, %cst_34 {dimension_numbers = #tpu.dot_dimension_numbers<[1], [1], [0], [0], [0, 0, 1, 0], [], []>} : vector<16x32xbf16>, vector<8x32xbf16>, vector<16x8xf32> -> vector<16x8xf32>
    %cst_35 = arith.constant dense<0xFF800000> : vector<16xf32>
    %66 = vector.multi_reduction <maximumf>, %65, %cst_35 [1] : vector<16x8xf32> to vector<16xf32>
    %67 = vector.shape_cast %66 : vector<16xf32> to vector<16x1xf32>
    %68 = vector.broadcast %67 : vector<16x1xf32> to vector<16x8xf32>
    %69 = arith.subf %65, %68 : vector<16x8xf32>
    %70 = math.exp %69 : vector<16x8xf32>
    %cst_36 = arith.constant dense<0.000000e+00> : vector<16xf32>
    %71 = vector.multi_reduction <add>, %70, %cst_36 [1] : vector<16x8xf32> to vector<16xf32>
    %72 = vector.shape_cast %71 : vector<16xf32> to vector<16x1xf32>
    %73 = tpu.reciprocal %72 {approx = true} : vector<16x1xf32> -> vector<16x1xf32>
    %74 = vector.broadcast %73 : vector<16x1xf32> to vector<16x8xf32>
    %75 = arith.mulf %70, %74 : vector<16x8xf32>
    %76 = arith.truncf %75 : vector<16x8xf32> to vector<16x8xbf16>
    %cst_37 = arith.constant dense<0.000000e+00> : vector<16x32xf32>
    %77 = tpu.matmul %76, %64, %cst_37 {dimension_numbers = #tpu.dot_dimension_numbers<[1], [0], [0], [1], [0, 0, 1, 1], [], []>} : vector<16x8xbf16>, vector<8x32xbf16>, vector<16x32xf32> -> vector<16x32xf32>
    %78 = arith.truncf %77 : vector<16x32xf32> to vector<16x32xbf16>
    %79 = vector.extract_strided_slice %54 {offsets = [0, 0], sizes = [32, 128], strides = [1, 1]} : vector<128x128xbf16> to vector<32x128xbf16>
    %cst_38 = arith.constant dense<0.000000e+00> : vector<16x128xf32>
    %80 = tpu.matmul %78, %79, %cst_38 {dimension_numbers = #tpu.dot_dimension_numbers<[1], [0], [0], [1], [0, 0, 1, 1], [], []>} : vector<16x32xbf16>, vector<32x128xbf16>, vector<16x128xf32> -> vector<16x128xf32>
    %81 = arith.addf %56, %80 : vector<16x128xf32>
    %82 = vector.extract_strided_slice %51 {offsets = [0, 32], sizes = [16, 32], strides = [1, 1]} : vector<16x128xf32> to vector<16x32xf32>
    %cst_39 = arith.constant 0.176776692 : f32
    %83 = vector.broadcast %cst_39 : f32 to vector<16x32xf32>
    %84 = arith.mulf %82, %83 : vector<16x32xf32>
    %85 = arith.truncf %84 : vector<16x32xf32> to vector<16x32xbf16>
    %86 = vector.extract_strided_slice %53 {offsets = [0, 32], sizes = [8, 32], strides = [1, 1]} : vector<8x256xf32> to vector<8x32xf32>
    %87 = arith.truncf %86 : vector<8x32xf32> to vector<8x32xbf16>
    %88 = vector.extract_strided_slice %53 {offsets = [0, 160], sizes = [8, 32], strides = [1, 1]} : vector<8x256xf32> to vector<8x32xf32>
    %89 = arith.truncf %88 : vector<8x32xf32> to vector<8x32xbf16>
    %cst_40 = arith.constant dense<0.000000e+00> : vector<16x8xf32>
    %90 = tpu.matmul %85, %87, %cst_40 {dimension_numbers = #tpu.dot_dimension_numbers<[1], [1], [0], [0], [0, 0, 1, 0], [], []>} : vector<16x32xbf16>, vector<8x32xbf16>, vector<16x8xf32> -> vector<16x8xf32>
    %cst_41 = arith.constant dense<0xFF800000> : vector<16xf32>
    %91 = vector.multi_reduction <maximumf>, %90, %cst_41 [1] : vector<16x8xf32> to vector<16xf32>
    %92 = vector.shape_cast %91 : vector<16xf32> to vector<16x1xf32>
    %93 = vector.broadcast %92 : vector<16x1xf32> to vector<16x8xf32>
    %94 = arith.subf %90, %93 : vector<16x8xf32>
    %95 = math.exp %94 : vector<16x8xf32>
    %cst_42 = arith.constant dense<0.000000e+00> : vector<16xf32>
    %96 = vector.multi_reduction <add>, %95, %cst_42 [1] : vector<16x8xf32> to vector<16xf32>
    %97 = vector.shape_cast %96 : vector<16xf32> to vector<16x1xf32>
    %98 = tpu.reciprocal %97 {approx = true} : vector<16x1xf32> -> vector<16x1xf32>
    %99 = vector.broadcast %98 : vector<16x1xf32> to vector<16x8xf32>
    %100 = arith.mulf %95, %99 : vector<16x8xf32>
    %101 = arith.truncf %100 : vector<16x8xf32> to vector<16x8xbf16>
    %cst_43 = arith.constant dense<0.000000e+00> : vector<16x32xf32>
    %102 = tpu.matmul %101, %89, %cst_43 {dimension_numbers = #tpu.dot_dimension_numbers<[1], [0], [0], [1], [0, 0, 1, 1], [], []>} : vector<16x8xbf16>, vector<8x32xbf16>, vector<16x32xf32> -> vector<16x32xf32>
    %103 = arith.truncf %102 : vector<16x32xf32> to vector<16x32xbf16>
    %104 = vector.extract_strided_slice %54 {offsets = [32, 0], sizes = [32, 128], strides = [1, 1]} : vector<128x128xbf16> to vector<32x128xbf16>
    %cst_44 = arith.constant dense<0.000000e+00> : vector<16x128xf32>
    %105 = tpu.matmul %103, %104, %cst_44 {dimension_numbers = #tpu.dot_dimension_numbers<[1], [0], [0], [1], [0, 0, 1, 1], [], []>} : vector<16x32xbf16>, vector<32x128xbf16>, vector<16x128xf32> -> vector<16x128xf32>
    %106 = arith.addf %81, %105 : vector<16x128xf32>
    %107 = vector.extract_strided_slice %51 {offsets = [0, 64], sizes = [16, 32], strides = [1, 1]} : vector<16x128xf32> to vector<16x32xf32>
    %cst_45 = arith.constant 0.176776692 : f32
    %108 = vector.broadcast %cst_45 : f32 to vector<16x32xf32>
    %109 = arith.mulf %107, %108 : vector<16x32xf32>
    %110 = arith.truncf %109 : vector<16x32xf32> to vector<16x32xbf16>
    %111 = vector.extract_strided_slice %53 {offsets = [0, 64], sizes = [8, 32], strides = [1, 1]} : vector<8x256xf32> to vector<8x32xf32>
    %112 = arith.truncf %111 : vector<8x32xf32> to vector<8x32xbf16>
    %113 = vector.extract_strided_slice %53 {offsets = [0, 192], sizes = [8, 32], strides = [1, 1]} : vector<8x256xf32> to vector<8x32xf32>
    %114 = arith.truncf %113 : vector<8x32xf32> to vector<8x32xbf16>
    %cst_46 = arith.constant dense<0.000000e+00> : vector<16x8xf32>
    %115 = tpu.matmul %110, %112, %cst_46 {dimension_numbers = #tpu.dot_dimension_numbers<[1], [1], [0], [0], [0, 0, 1, 0], [], []>} : vector<16x32xbf16>, vector<8x32xbf16>, vector<16x8xf32> -> vector<16x8xf32>
    %cst_47 = arith.constant dense<0xFF800000> : vector<16xf32>
    %116 = vector.multi_reduction <maximumf>, %115, %cst_47 [1] : vector<16x8xf32> to vector<16xf32>
    %117 = vector.shape_cast %116 : vector<16xf32> to vector<16x1xf32>
    %118 = vector.broadcast %117 : vector<16x1xf32> to vector<16x8xf32>
    %119 = arith.subf %115, %118 : vector<16x8xf32>
    %120 = math.exp %119 : vector<16x8xf32>
    %cst_48 = arith.constant dense<0.000000e+00> : vector<16xf32>
    %121 = vector.multi_reduction <add>, %120, %cst_48 [1] : vector<16x8xf32> to vector<16xf32>
    %122 = vector.shape_cast %121 : vector<16xf32> to vector<16x1xf32>
    %123 = tpu.reciprocal %122 {approx = true} : vector<16x1xf32> -> vector<16x1xf32>
    %124 = vector.broadcast %123 : vector<16x1xf32> to vector<16x8xf32>
    %125 = arith.mulf %120, %124 : vector<16x8xf32>
    %126 = arith.truncf %125 : vector<16x8xf32> to vector<16x8xbf16>
    %cst_49 = arith.constant dense<0.000000e+00> : vector<16x32xf32>
    %127 = tpu.matmul %126, %114, %cst_49 {dimension_numbers = #tpu.dot_dimension_numbers<[1], [0], [0], [1], [0, 0, 1, 1], [], []>} : vector<16x8xbf16>, vector<8x32xbf16>, vector<16x32xf32> -> vector<16x32xf32>
    %128 = arith.truncf %127 : vector<16x32xf32> to vector<16x32xbf16>
    %129 = vector.extract_strided_slice %54 {offsets = [64, 0], sizes = [32, 128], strides = [1, 1]} : vector<128x128xbf16> to vector<32x128xbf16>
    %cst_50 = arith.constant dense<0.000000e+00> : vector<16x128xf32>
    %130 = tpu.matmul %128, %129, %cst_50 {dimension_numbers = #tpu.dot_dimension_numbers<[1], [0], [0], [1], [0, 0, 1, 1], [], []>} : vector<16x32xbf16>, vector<32x128xbf16>, vector<16x128xf32> -> vector<16x128xf32>
    %131 = arith.addf %106, %130 : vector<16x128xf32>
    %132 = vector.extract_strided_slice %51 {offsets = [0, 96], sizes = [16, 32], strides = [1, 1]} : vector<16x128xf32> to vector<16x32xf32>
    %cst_51 = arith.constant 0.176776692 : f32
    %133 = vector.broadcast %cst_51 : f32 to vector<16x32xf32>
    %134 = arith.mulf %132, %133 : vector<16x32xf32>
    %135 = arith.truncf %134 : vector<16x32xf32> to vector<16x32xbf16>
    %136 = vector.extract_strided_slice %53 {offsets = [0, 96], sizes = [8, 32], strides = [1, 1]} : vector<8x256xf32> to vector<8x32xf32>
    %137 = arith.truncf %136 : vector<8x32xf32> to vector<8x32xbf16>
    %138 = vector.extract_strided_slice %53 {offsets = [0, 224], sizes = [8, 32], strides = [1, 1]} : vector<8x256xf32> to vector<8x32xf32>
    %139 = arith.truncf %138 : vector<8x32xf32> to vector<8x32xbf16>
    %cst_52 = arith.constant dense<0.000000e+00> : vector<16x8xf32>
    %140 = tpu.matmul %135, %137, %cst_52 {dimension_numbers = #tpu.dot_dimension_numbers<[1], [1], [0], [0], [0, 0, 1, 0], [], []>} : vector<16x32xbf16>, vector<8x32xbf16>, vector<16x8xf32> -> vector<16x8xf32>
    %cst_53 = arith.constant dense<0xFF800000> : vector<16xf32>
    %141 = vector.multi_reduction <maximumf>, %140, %cst_53 [1] : vector<16x8xf32> to vector<16xf32>
    %142 = vector.shape_cast %141 : vector<16xf32> to vector<16x1xf32>
    %143 = vector.broadcast %142 : vector<16x1xf32> to vector<16x8xf32>
    %144 = arith.subf %140, %143 : vector<16x8xf32>
    %145 = math.exp %144 : vector<16x8xf32>
    %cst_54 = arith.constant dense<0.000000e+00> : vector<16xf32>
    %146 = vector.multi_reduction <add>, %145, %cst_54 [1] : vector<16x8xf32> to vector<16xf32>
    %147 = vector.shape_cast %146 : vector<16xf32> to vector<16x1xf32>
    %148 = tpu.reciprocal %147 {approx = true} : vector<16x1xf32> -> vector<16x1xf32>
    %149 = vector.broadcast %148 : vector<16x1xf32> to vector<16x8xf32>
    %150 = arith.mulf %145, %149 : vector<16x8xf32>
    %151 = arith.truncf %150 : vector<16x8xf32> to vector<16x8xbf16>
    %cst_55 = arith.constant dense<0.000000e+00> : vector<16x32xf32>
    %152 = tpu.matmul %151, %139, %cst_55 {dimension_numbers = #tpu.dot_dimension_numbers<[1], [0], [0], [1], [0, 0, 1, 1], [], []>} : vector<16x8xbf16>, vector<8x32xbf16>, vector<16x32xf32> -> vector<16x32xf32>
    %153 = arith.truncf %152 : vector<16x32xf32> to vector<16x32xbf16>
    %154 = vector.extract_strided_slice %54 {offsets = [96, 0], sizes = [32, 128], strides = [1, 1]} : vector<128x128xbf16> to vector<32x128xbf16>
    %cst_56 = arith.constant dense<0.000000e+00> : vector<16x128xf32>
    %155 = tpu.matmul %153, %154, %cst_56 {dimension_numbers = #tpu.dot_dimension_numbers<[1], [0], [0], [1], [0, 0, 1, 1], [], []>} : vector<16x32xbf16>, vector<32x128xbf16>, vector<16x128xf32> -> vector<16x128xf32>
    %156 = arith.addf %131, %155 : vector<16x128xf32>
    %157 = vector.broadcast %55 : vector<1x128xf32> to vector<16x128xf32>
    %158 = arith.addf %156, %157 : vector<16x128xf32>
    %159 = arith.addf %1, %158 : vector<16x128xf32>
    %c0_57 = arith.constant 0 : index
    %c0_58 = arith.constant 0 : index
    %c0_59 = arith.constant 0 : index
    %160 = vector.load %arg11[%c0_57, %c0_58, %c0_59] : memref<1x16x128xf32, #tpu.memory_space<vmem>>, vector<1x16x128xf32>
    %161 = vector.shape_cast %160 : vector<1x16x128xf32> to vector<16x128xf32>
    %162 = vector.shape_cast %159 : vector<16x128xf32> to vector<1x16x128xf32>
    tpu.vector_store %arg11[%c0_57, %c0_58, %c0_59], %162 {strides = array<i32>} : memref<1x16x128xf32, #tpu.memory_space<vmem>>, vector<1x16x128xf32>,
    return
  }
  func.func @transform_0(%arg0: i32) -> (i32, i32, i32) {
    %c0_i32 = arith.constant 0 : i32
    %c0_i32_0 = arith.constant 0 : i32
    %c0_i32_1 = arith.constant 0 : i32
    return %arg0, %c0_i32, %c0_i32_0 : i32, i32, i32
  }
  func.func @transform_1(%arg0: i32) -> (i32, i32, i32) {
    %c0_i32 = arith.constant 0 : i32
    %c0_i32_0 = arith.constant 0 : i32
    %c0_i32_1 = arith.constant 0 : i32
    return %arg0, %c0_i32, %c0_i32_0 : i32, i32, i32
  }
  func.func @transform_2(%arg0: i32) -> (i32, i32) {
    %c0_i32 = arith.constant 0 : i32
    %c0_i32_0 = arith.constant 0 : i32
    %c0_i32_1 = arith.constant 0 : i32
    return %c0_i32, %c0_i32_0 : i32, i32
  }
  func.func @transform_3(%arg0: i32) -> (i32, i32) {
    %c0_i32 = arith.constant 0 : i32
    %c0_i32_0 = arith.constant 0 : i32
    %c0_i32_1 = arith.constant 0 : i32
    return %c0_i32, %c0_i32_0 : i32, i32
  }
  func.func @transform_4(%arg0: i32) -> (i32, i32) {
    %c0_i32 = arith.constant 0 : i32
    %c0_i32_0 = arith.constant 0 : i32
    %c0_i32_1 = arith.constant 0 : i32
    return %c0_i32, %c0_i32_0 : i32, i32
  }
  func.func @transform_5(%arg0: i32) -> (i32, i32) {
    %c0_i32 = arith.constant 0 : i32
    %c0_i32_0 = arith.constant 0 : i32
    %c0_i32_1 = arith.constant 0 : i32
    return %c0_i32, %c0_i32_0 : i32, i32
  }
  func.func @transform_6(%arg0: i32) -> (i32, i32) {
    %c0_i32 = arith.constant 0 : i32
    %c0_i32_0 = arith.constant 0 : i32
    %c0_i32_1 = arith.constant 0 : i32
    return %c0_i32, %c0_i32_0 : i32, i32
  }
  func.func @transform_7(%arg0: i32) -> (i32, i32) {
    %c0_i32 = arith.constant 0 : i32
    %c0_i32_0 = arith.constant 0 : i32
    %c0_i32_1 = arith.constant 0 : i32
    return %c0_i32, %c0_i32_0 : i32, i32
  }
  func.func @transform_8(%arg0: i32) -> (i32, i32) {
    %c0_i32 = arith.constant 0 : i32
    %c0_i32_0 = arith.constant 0 : i32
    %c0_i32_1 = arith.constant 0 : i32
    return %c0_i32, %c0_i32_0 : i32, i32
  }
  func.func @transform_9(%arg0: i32) -> (i32, i32) {
    %c0_i32 = arith.constant 0 : i32
    %c0_i32_0 = arith.constant 0 : i32
    %c0_i32_1 = arith.constant 0 : i32
    return %c0_i32, %c0_i32_0 : i32, i32
  }
  func.func @transform_10(%arg0: i32) -> (i32, i32, i32) {
    %c0_i32 = arith.constant 0 : i32
    %c0_i32_0 = arith.constant 0 : i32
    %c0_i32_1 = arith.constant 0 : i32
    return %arg0, %c0_i32, %c0_i32_0 : i32, i32, i32
  }
}

module attributes {stable_mosaic.version = 11 : i64} {
  func.func @_self_attn_kernel(%arg0: i32, %arg1: memref<1x8x256xf32, #tpu.memory_space<vmem>>, %arg2: memref<1x256xf32, #tpu.memory_space<vmem>>, %arg3: memref<1x256xf32, #tpu.memory_space<vmem>>, %arg4: memref<256x768xbf16, #tpu.memory_space<vmem>>, %arg5: memref<256x256xbf16, #tpu.memory_space<vmem>>, %arg6: memref<1x256xf32, #tpu.memory_space<vmem>>, %arg7: memref<1x8x256xf32, #tpu.memory_space<vmem>>) attributes {dimension_semantics = [#tpu.dimension_semantics<parallel>], iteration_bounds = array<i64: 2>, scalar_prefetch = 0 : i64, scratch_operands = 0 : i64, tpu.core_type = #tpu.core_type<tc>, window_params = [{transform_indices = @transform_0, window_bounds = array<i64: 1, 8, 256>}, {pipeline_mode = #tpu.pipeline_mode<synchronous>, transform_indices = @transform_1, window_bounds = array<i64: 1, 256>}, {pipeline_mode = #tpu.pipeline_mode<synchronous>, transform_indices = @transform_2, window_bounds = array<i64: 1, 256>}, {pipeline_mode = #tpu.pipeline_mode<synchronous>, transform_indices = @transform_3, window_bounds = array<i64: 256, 768>}, {pipeline_mode = #tpu.pipeline_mode<synchronous>, transform_indices = @transform_4, window_bounds = array<i64: 256, 256>}, {pipeline_mode = #tpu.pipeline_mode<synchronous>, transform_indices = @transform_5, window_bounds = array<i64: 1, 256>}, {transform_indices = @transform_6, window_bounds = array<i64: 1, 8, 256>}]} {
    %c0 = arith.constant 0 : index
    %c0_0 = arith.constant 0 : index
    %c0_1 = arith.constant 0 : index
    %0 = vector.load %arg1[%c0, %c0_0, %c0_1] : memref<1x8x256xf32, #tpu.memory_space<vmem>>, vector<1x8x256xf32>
    %1 = vector.shape_cast %0 : vector<1x8x256xf32> to vector<8x256xf32>
    %c0_2 = arith.constant 0 : index
    %c0_3 = arith.constant 0 : index
    %2 = vector.load %arg2[%c0_2, %c0_3] : memref<1x256xf32, #tpu.memory_space<vmem>>, vector<1x256xf32>
    %c0_4 = arith.constant 0 : index
    %c0_5 = arith.constant 0 : index
    %3 = vector.load %arg3[%c0_4, %c0_5] : memref<1x256xf32, #tpu.memory_space<vmem>>, vector<1x256xf32>
    %cst = arith.constant dense<0.000000e+00> : vector<8xf32>
    %4 = vector.multi_reduction <add>, %1, %cst [1] : vector<8x256xf32> to vector<8xf32>
    %5 = vector.shape_cast %4 : vector<8xf32> to vector<8x1xf32>
    %cst_6 = arith.constant 2.560000e+02 : f32
    %6 = vector.broadcast %cst_6 : f32 to vector<8x1xf32>
    %7 = arith.divf %5, %6 : vector<8x1xf32>
    %8 = vector.broadcast %7 : vector<8x1xf32> to vector<8x256xf32>
    %9 = arith.subf %1, %8 : vector<8x256xf32>
    %10 = arith.mulf %9, %9 : vector<8x256xf32>
    %cst_7 = arith.constant dense<0.000000e+00> : vector<8xf32>
    %11 = vector.multi_reduction <add>, %10, %cst_7 [1] : vector<8x256xf32> to vector<8xf32>
    %12 = vector.shape_cast %11 : vector<8xf32> to vector<8x1xf32>
    %cst_8 = arith.constant 2.560000e+02 : f32
    %13 = vector.broadcast %cst_8 : f32 to vector<8x1xf32>
    %14 = arith.divf %12, %13 : vector<8x1xf32>
    %cst_9 = arith.constant 9.99999974E-6 : f32
    %15 = vector.broadcast %cst_9 : f32 to vector<8x1xf32>
    %16 = arith.addf %14, %15 : vector<8x1xf32>
    %17 = math.rsqrt %16 : vector<8x1xf32>
    %18 = vector.broadcast %17 : vector<8x1xf32> to vector<8x256xf32>
    %19 = arith.mulf %9, %18 : vector<8x256xf32>
    %20 = vector.broadcast %2 : vector<1x256xf32> to vector<8x256xf32>
    %21 = arith.mulf %19, %20 : vector<8x256xf32>
    %22 = vector.broadcast %3 : vector<1x256xf32> to vector<8x256xf32>
    %23 = arith.addf %21, %22 : vector<8x256xf32>
    %24 = arith.truncf %23 : vector<8x256xf32> to vector<8x256xbf16>
    %c0_10 = arith.constant 0 : index
    %c0_11 = arith.constant 0 : index
    %25 = vector.load %arg4[%c0_10, %c0_11] : memref<256x768xbf16, #tpu.memory_space<vmem>>, vector<256x768xbf16>
    %cst_12 = arith.constant dense<0.000000e+00> : vector<8x768xf32>
    %26 = tpu.matmul %24, %25, %cst_12 {dimension_numbers = #tpu.dot_dimension_numbers<[1], [0], [0], [1], [0, 0, 1, 1], [], []>} : vector<8x256xbf16>, vector<256x768xbf16>, vector<8x768xf32> -> vector<8x768xf32>
    %27 = vector.extract_strided_slice %26 {offsets = [0, 0], sizes = [8, 256], strides = [1, 1]} : vector<8x768xf32> to vector<8x256xf32>
    %28 = vector.extract_strided_slice %26 {offsets = [0, 256], sizes = [8, 512], strides = [1, 1]} : vector<8x768xf32> to vector<8x512xf32>
    %c0_13 = arith.constant 0 : index
    %c0_14 = arith.constant 0 : index
    %29 = vector.load %arg5[%c0_13, %c0_14] : memref<256x256xbf16, #tpu.memory_space<vmem>>, vector<256x256xbf16>
    %c0_15 = arith.constant 0 : index
    %c0_16 = arith.constant 0 : index
    %30 = vector.load %arg6[%c0_15, %c0_16] : memref<1x256xf32, #tpu.memory_space<vmem>>, vector<1x256xf32>
    %cst_17 = arith.constant 0.000000e+00 : f32
    %31 = vector.broadcast %cst_17 : f32 to vector<8x256xf32>
    %32 = vector.extract_strided_slice %27 {offsets = [0, 0], sizes = [8, 64], strides = [1, 1]} : vector<8x256xf32> to vector<8x64xf32>
    %cst_18 = arith.constant 1.250000e-01 : f32
    %33 = vector.broadcast %cst_18 : f32 to vector<8x64xf32>
    %34 = arith.mulf %32, %33 : vector<8x64xf32>
    %35 = arith.truncf %34 : vector<8x64xf32> to vector<8x64xbf16>
    %36 = vector.extract_strided_slice %28 {offsets = [0, 0], sizes = [8, 64], strides = [1, 1]} : vector<8x512xf32> to vector<8x64xf32>
    %37 = arith.truncf %36 : vector<8x64xf32> to vector<8x64xbf16>
    %38 = vector.extract_strided_slice %28 {offsets = [0, 256], sizes = [8, 64], strides = [1, 1]} : vector<8x512xf32> to vector<8x64xf32>
    %39 = arith.truncf %38 : vector<8x64xf32> to vector<8x64xbf16>
    %cst_19 = arith.constant dense<0.000000e+00> : vector<8x8xf32>
    %40 = tpu.matmul %35, %37, %cst_19 {dimension_numbers = #tpu.dot_dimension_numbers<[1], [1], [0], [0], [0, 0, 1, 0], [], []>} : vector<8x64xbf16>, vector<8x64xbf16>, vector<8x8xf32> -> vector<8x8xf32>
    %cst_20 = arith.constant dense<0xFF800000> : vector<8xf32>
    %41 = vector.multi_reduction <maximumf>, %40, %cst_20 [1] : vector<8x8xf32> to vector<8xf32>
    %42 = vector.shape_cast %41 : vector<8xf32> to vector<8x1xf32>
    %43 = vector.broadcast %42 : vector<8x1xf32> to vector<8x8xf32>
    %44 = arith.subf %40, %43 : vector<8x8xf32>
    %45 = math.exp %44 : vector<8x8xf32>
    %cst_21 = arith.constant dense<0.000000e+00> : vector<8xf32>
    %46 = vector.multi_reduction <add>, %45, %cst_21 [1] : vector<8x8xf32> to vector<8xf32>
    %47 = vector.shape_cast %46 : vector<8xf32> to vector<8x1xf32>
    %48 = tpu.reciprocal %47 {approx = true} : vector<8x1xf32> -> vector<8x1xf32>
    %49 = vector.broadcast %48 : vector<8x1xf32> to vector<8x8xf32>
    %50 = arith.mulf %45, %49 : vector<8x8xf32>
    %51 = arith.truncf %50 : vector<8x8xf32> to vector<8x8xbf16>
    %cst_22 = arith.constant dense<0.000000e+00> : vector<8x64xf32>
    %52 = tpu.matmul %51, %39, %cst_22 {dimension_numbers = #tpu.dot_dimension_numbers<[1], [0], [0], [1], [0, 0, 1, 1], [], []>} : vector<8x8xbf16>, vector<8x64xbf16>, vector<8x64xf32> -> vector<8x64xf32>
    %53 = arith.truncf %52 : vector<8x64xf32> to vector<8x64xbf16>
    %54 = vector.extract_strided_slice %29 {offsets = [0, 0], sizes = [64, 256], strides = [1, 1]} : vector<256x256xbf16> to vector<64x256xbf16>
    %cst_23 = arith.constant dense<0.000000e+00> : vector<8x256xf32>
    %55 = tpu.matmul %53, %54, %cst_23 {dimension_numbers = #tpu.dot_dimension_numbers<[1], [0], [0], [1], [0, 0, 1, 1], [], []>} : vector<8x64xbf16>, vector<64x256xbf16>, vector<8x256xf32> -> vector<8x256xf32>
    %56 = arith.addf %31, %55 : vector<8x256xf32>
    %57 = vector.extract_strided_slice %27 {offsets = [0, 64], sizes = [8, 64], strides = [1, 1]} : vector<8x256xf32> to vector<8x64xf32>
    %cst_24 = arith.constant 1.250000e-01 : f32
    %58 = vector.broadcast %cst_24 : f32 to vector<8x64xf32>
    %59 = arith.mulf %57, %58 : vector<8x64xf32>
    %60 = arith.truncf %59 : vector<8x64xf32> to vector<8x64xbf16>
    %61 = vector.extract_strided_slice %28 {offsets = [0, 64], sizes = [8, 64], strides = [1, 1]} : vector<8x512xf32> to vector<8x64xf32>
    %62 = arith.truncf %61 : vector<8x64xf32> to vector<8x64xbf16>
    %63 = vector.extract_strided_slice %28 {offsets = [0, 320], sizes = [8, 64], strides = [1, 1]} : vector<8x512xf32> to vector<8x64xf32>
    %64 = arith.truncf %63 : vector<8x64xf32> to vector<8x64xbf16>
    %cst_25 = arith.constant dense<0.000000e+00> : vector<8x8xf32>
    %65 = tpu.matmul %60, %62, %cst_25 {dimension_numbers = #tpu.dot_dimension_numbers<[1], [1], [0], [0], [0, 0, 1, 0], [], []>} : vector<8x64xbf16>, vector<8x64xbf16>, vector<8x8xf32> -> vector<8x8xf32>
    %cst_26 = arith.constant dense<0xFF800000> : vector<8xf32>
    %66 = vector.multi_reduction <maximumf>, %65, %cst_26 [1] : vector<8x8xf32> to vector<8xf32>
    %67 = vector.shape_cast %66 : vector<8xf32> to vector<8x1xf32>
    %68 = vector.broadcast %67 : vector<8x1xf32> to vector<8x8xf32>
    %69 = arith.subf %65, %68 : vector<8x8xf32>
    %70 = math.exp %69 : vector<8x8xf32>
    %cst_27 = arith.constant dense<0.000000e+00> : vector<8xf32>
    %71 = vector.multi_reduction <add>, %70, %cst_27 [1] : vector<8x8xf32> to vector<8xf32>
    %72 = vector.shape_cast %71 : vector<8xf32> to vector<8x1xf32>
    %73 = tpu.reciprocal %72 {approx = true} : vector<8x1xf32> -> vector<8x1xf32>
    %74 = vector.broadcast %73 : vector<8x1xf32> to vector<8x8xf32>
    %75 = arith.mulf %70, %74 : vector<8x8xf32>
    %76 = arith.truncf %75 : vector<8x8xf32> to vector<8x8xbf16>
    %cst_28 = arith.constant dense<0.000000e+00> : vector<8x64xf32>
    %77 = tpu.matmul %76, %64, %cst_28 {dimension_numbers = #tpu.dot_dimension_numbers<[1], [0], [0], [1], [0, 0, 1, 1], [], []>} : vector<8x8xbf16>, vector<8x64xbf16>, vector<8x64xf32> -> vector<8x64xf32>
    %78 = arith.truncf %77 : vector<8x64xf32> to vector<8x64xbf16>
    %79 = vector.extract_strided_slice %29 {offsets = [64, 0], sizes = [64, 256], strides = [1, 1]} : vector<256x256xbf16> to vector<64x256xbf16>
    %cst_29 = arith.constant dense<0.000000e+00> : vector<8x256xf32>
    %80 = tpu.matmul %78, %79, %cst_29 {dimension_numbers = #tpu.dot_dimension_numbers<[1], [0], [0], [1], [0, 0, 1, 1], [], []>} : vector<8x64xbf16>, vector<64x256xbf16>, vector<8x256xf32> -> vector<8x256xf32>
    %81 = arith.addf %56, %80 : vector<8x256xf32>
    %82 = vector.extract_strided_slice %27 {offsets = [0, 128], sizes = [8, 64], strides = [1, 1]} : vector<8x256xf32> to vector<8x64xf32>
    %cst_30 = arith.constant 1.250000e-01 : f32
    %83 = vector.broadcast %cst_30 : f32 to vector<8x64xf32>
    %84 = arith.mulf %82, %83 : vector<8x64xf32>
    %85 = arith.truncf %84 : vector<8x64xf32> to vector<8x64xbf16>
    %86 = vector.extract_strided_slice %28 {offsets = [0, 128], sizes = [8, 64], strides = [1, 1]} : vector<8x512xf32> to vector<8x64xf32>
    %87 = arith.truncf %86 : vector<8x64xf32> to vector<8x64xbf16>
    %88 = vector.extract_strided_slice %28 {offsets = [0, 384], sizes = [8, 64], strides = [1, 1]} : vector<8x512xf32> to vector<8x64xf32>
    %89 = arith.truncf %88 : vector<8x64xf32> to vector<8x64xbf16>
    %cst_31 = arith.constant dense<0.000000e+00> : vector<8x8xf32>
    %90 = tpu.matmul %85, %87, %cst_31 {dimension_numbers = #tpu.dot_dimension_numbers<[1], [1], [0], [0], [0, 0, 1, 0], [], []>} : vector<8x64xbf16>, vector<8x64xbf16>, vector<8x8xf32> -> vector<8x8xf32>
    %cst_32 = arith.constant dense<0xFF800000> : vector<8xf32>
    %91 = vector.multi_reduction <maximumf>, %90, %cst_32 [1] : vector<8x8xf32> to vector<8xf32>
    %92 = vector.shape_cast %91 : vector<8xf32> to vector<8x1xf32>
    %93 = vector.broadcast %92 : vector<8x1xf32> to vector<8x8xf32>
    %94 = arith.subf %90, %93 : vector<8x8xf32>
    %95 = math.exp %94 : vector<8x8xf32>
    %cst_33 = arith.constant dense<0.000000e+00> : vector<8xf32>
    %96 = vector.multi_reduction <add>, %95, %cst_33 [1] : vector<8x8xf32> to vector<8xf32>
    %97 = vector.shape_cast %96 : vector<8xf32> to vector<8x1xf32>
    %98 = tpu.reciprocal %97 {approx = true} : vector<8x1xf32> -> vector<8x1xf32>
    %99 = vector.broadcast %98 : vector<8x1xf32> to vector<8x8xf32>
    %100 = arith.mulf %95, %99 : vector<8x8xf32>
    %101 = arith.truncf %100 : vector<8x8xf32> to vector<8x8xbf16>
    %cst_34 = arith.constant dense<0.000000e+00> : vector<8x64xf32>
    %102 = tpu.matmul %101, %89, %cst_34 {dimension_numbers = #tpu.dot_dimension_numbers<[1], [0], [0], [1], [0, 0, 1, 1], [], []>} : vector<8x8xbf16>, vector<8x64xbf16>, vector<8x64xf32> -> vector<8x64xf32>
    %103 = arith.truncf %102 : vector<8x64xf32> to vector<8x64xbf16>
    %104 = vector.extract_strided_slice %29 {offsets = [128, 0], sizes = [64, 256], strides = [1, 1]} : vector<256x256xbf16> to vector<64x256xbf16>
    %cst_35 = arith.constant dense<0.000000e+00> : vector<8x256xf32>
    %105 = tpu.matmul %103, %104, %cst_35 {dimension_numbers = #tpu.dot_dimension_numbers<[1], [0], [0], [1], [0, 0, 1, 1], [], []>} : vector<8x64xbf16>, vector<64x256xbf16>, vector<8x256xf32> -> vector<8x256xf32>
    %106 = arith.addf %81, %105 : vector<8x256xf32>
    %107 = vector.extract_strided_slice %27 {offsets = [0, 192], sizes = [8, 64], strides = [1, 1]} : vector<8x256xf32> to vector<8x64xf32>
    %cst_36 = arith.constant 1.250000e-01 : f32
    %108 = vector.broadcast %cst_36 : f32 to vector<8x64xf32>
    %109 = arith.mulf %107, %108 : vector<8x64xf32>
    %110 = arith.truncf %109 : vector<8x64xf32> to vector<8x64xbf16>
    %111 = vector.extract_strided_slice %28 {offsets = [0, 192], sizes = [8, 64], strides = [1, 1]} : vector<8x512xf32> to vector<8x64xf32>
    %112 = arith.truncf %111 : vector<8x64xf32> to vector<8x64xbf16>
    %113 = vector.extract_strided_slice %28 {offsets = [0, 448], sizes = [8, 64], strides = [1, 1]} : vector<8x512xf32> to vector<8x64xf32>
    %114 = arith.truncf %113 : vector<8x64xf32> to vector<8x64xbf16>
    %cst_37 = arith.constant dense<0.000000e+00> : vector<8x8xf32>
    %115 = tpu.matmul %110, %112, %cst_37 {dimension_numbers = #tpu.dot_dimension_numbers<[1], [1], [0], [0], [0, 0, 1, 0], [], []>} : vector<8x64xbf16>, vector<8x64xbf16>, vector<8x8xf32> -> vector<8x8xf32>
    %cst_38 = arith.constant dense<0xFF800000> : vector<8xf32>
    %116 = vector.multi_reduction <maximumf>, %115, %cst_38 [1] : vector<8x8xf32> to vector<8xf32>
    %117 = vector.shape_cast %116 : vector<8xf32> to vector<8x1xf32>
    %118 = vector.broadcast %117 : vector<8x1xf32> to vector<8x8xf32>
    %119 = arith.subf %115, %118 : vector<8x8xf32>
    %120 = math.exp %119 : vector<8x8xf32>
    %cst_39 = arith.constant dense<0.000000e+00> : vector<8xf32>
    %121 = vector.multi_reduction <add>, %120, %cst_39 [1] : vector<8x8xf32> to vector<8xf32>
    %122 = vector.shape_cast %121 : vector<8xf32> to vector<8x1xf32>
    %123 = tpu.reciprocal %122 {approx = true} : vector<8x1xf32> -> vector<8x1xf32>
    %124 = vector.broadcast %123 : vector<8x1xf32> to vector<8x8xf32>
    %125 = arith.mulf %120, %124 : vector<8x8xf32>
    %126 = arith.truncf %125 : vector<8x8xf32> to vector<8x8xbf16>
    %cst_40 = arith.constant dense<0.000000e+00> : vector<8x64xf32>
    %127 = tpu.matmul %126, %114, %cst_40 {dimension_numbers = #tpu.dot_dimension_numbers<[1], [0], [0], [1], [0, 0, 1, 1], [], []>} : vector<8x8xbf16>, vector<8x64xbf16>, vector<8x64xf32> -> vector<8x64xf32>
    %128 = arith.truncf %127 : vector<8x64xf32> to vector<8x64xbf16>
    %129 = vector.extract_strided_slice %29 {offsets = [192, 0], sizes = [64, 256], strides = [1, 1]} : vector<256x256xbf16> to vector<64x256xbf16>
    %cst_41 = arith.constant dense<0.000000e+00> : vector<8x256xf32>
    %130 = tpu.matmul %128, %129, %cst_41 {dimension_numbers = #tpu.dot_dimension_numbers<[1], [0], [0], [1], [0, 0, 1, 1], [], []>} : vector<8x64xbf16>, vector<64x256xbf16>, vector<8x256xf32> -> vector<8x256xf32>
    %131 = arith.addf %106, %130 : vector<8x256xf32>
    %132 = vector.broadcast %30 : vector<1x256xf32> to vector<8x256xf32>
    %133 = arith.addf %131, %132 : vector<8x256xf32>
    %134 = arith.addf %1, %133 : vector<8x256xf32>
    %c0_42 = arith.constant 0 : index
    %c0_43 = arith.constant 0 : index
    %c0_44 = arith.constant 0 : index
    %135 = vector.load %arg7[%c0_42, %c0_43, %c0_44] : memref<1x8x256xf32, #tpu.memory_space<vmem>>, vector<1x8x256xf32>
    %136 = vector.shape_cast %135 : vector<1x8x256xf32> to vector<8x256xf32>
    %137 = vector.shape_cast %134 : vector<8x256xf32> to vector<1x8x256xf32>
    tpu.vector_store %arg7[%c0_42, %c0_43, %c0_44], %137 {strides = array<i32>} : memref<1x8x256xf32, #tpu.memory_space<vmem>>, vector<1x8x256xf32>,
    return
  }
  func.func @transform_0(%arg0: i32) -> (i32, i32, i32) {
    %c0_i32 = arith.constant 0 : i32
    %c0_i32_0 = arith.constant 0 : i32
    %c0_i32_1 = arith.constant 0 : i32
    return %arg0, %c0_i32, %c0_i32_0 : i32, i32, i32
  }
  func.func @transform_1(%arg0: i32) -> (i32, i32) {
    %c0_i32 = arith.constant 0 : i32
    %c0_i32_0 = arith.constant 0 : i32
    %c0_i32_1 = arith.constant 0 : i32
    return %c0_i32, %c0_i32_0 : i32, i32
  }
  func.func @transform_2(%arg0: i32) -> (i32, i32) {
    %c0_i32 = arith.constant 0 : i32
    %c0_i32_0 = arith.constant 0 : i32
    %c0_i32_1 = arith.constant 0 : i32
    return %c0_i32, %c0_i32_0 : i32, i32
  }
  func.func @transform_3(%arg0: i32) -> (i32, i32) {
    %c0_i32 = arith.constant 0 : i32
    %c0_i32_0 = arith.constant 0 : i32
    %c0_i32_1 = arith.constant 0 : i32
    return %c0_i32, %c0_i32_0 : i32, i32
  }
  func.func @transform_4(%arg0: i32) -> (i32, i32) {
    %c0_i32 = arith.constant 0 : i32
    %c0_i32_0 = arith.constant 0 : i32
    %c0_i32_1 = arith.constant 0 : i32
    return %c0_i32, %c0_i32_0 : i32, i32
  }
  func.func @transform_5(%arg0: i32) -> (i32, i32) {
    %c0_i32 = arith.constant 0 : i32
    %c0_i32_0 = arith.constant 0 : i32
    %c0_i32_1 = arith.constant 0 : i32
    return %c0_i32, %c0_i32_0 : i32, i32
  }
  func.func @transform_6(%arg0: i32) -> (i32, i32, i32) {
    %c0_i32 = arith.constant 0 : i32
    %c0_i32_0 = arith.constant 0 : i32
    %c0_i32_1 = arith.constant 0 : i32
    return %arg0, %c0_i32, %c0_i32_0 : i32, i32, i32
  }
}

module attributes {stable_mosaic.version = 11 : i64} {
  func.func @_mlp_kernel(%arg0: i32, %arg1: memref<8x256xf32, #tpu.memory_space<vmem>>, %arg2: memref<1x256xf32, #tpu.memory_space<vmem>>, %arg3: memref<1x256xf32, #tpu.memory_space<vmem>>, %arg4: memref<256x1024xbf16, #tpu.memory_space<vmem>>, %arg5: memref<1x1024xf32, #tpu.memory_space<vmem>>, %arg6: memref<1024x256xbf16, #tpu.memory_space<vmem>>, %arg7: memref<1x256xf32, #tpu.memory_space<vmem>>, %arg8: memref<8x256xf32, #tpu.memory_space<vmem>>) attributes {dimension_semantics = [#tpu.dimension_semantics<parallel>], iteration_bounds = array<i64: 2>, scalar_prefetch = 0 : i64, scratch_operands = 0 : i64, tpu.core_type = #tpu.core_type<tc>, window_params = [{transform_indices = @transform_0, window_bounds = array<i64: 8, 256>}, {pipeline_mode = #tpu.pipeline_mode<synchronous>, transform_indices = @transform_1, window_bounds = array<i64: 1, 256>}, {pipeline_mode = #tpu.pipeline_mode<synchronous>, transform_indices = @transform_2, window_bounds = array<i64: 1, 256>}, {pipeline_mode = #tpu.pipeline_mode<synchronous>, transform_indices = @transform_3, window_bounds = array<i64: 256, 1024>}, {pipeline_mode = #tpu.pipeline_mode<synchronous>, transform_indices = @transform_4, window_bounds = array<i64: 1, 1024>}, {pipeline_mode = #tpu.pipeline_mode<synchronous>, transform_indices = @transform_5, window_bounds = array<i64: 1024, 256>}, {pipeline_mode = #tpu.pipeline_mode<synchronous>, transform_indices = @transform_6, window_bounds = array<i64: 1, 256>}, {transform_indices = @transform_7, window_bounds = array<i64: 8, 256>}]} {
    %c0 = arith.constant 0 : index
    %c0_0 = arith.constant 0 : index
    %0 = vector.load %arg1[%c0, %c0_0] : memref<8x256xf32, #tpu.memory_space<vmem>>, vector<8x256xf32>
    %c0_1 = arith.constant 0 : index
    %c0_2 = arith.constant 0 : index
    %1 = vector.load %arg2[%c0_1, %c0_2] : memref<1x256xf32, #tpu.memory_space<vmem>>, vector<1x256xf32>
    %c0_3 = arith.constant 0 : index
    %c0_4 = arith.constant 0 : index
    %2 = vector.load %arg3[%c0_3, %c0_4] : memref<1x256xf32, #tpu.memory_space<vmem>>, vector<1x256xf32>
    %cst = arith.constant dense<0.000000e+00> : vector<8xf32>
    %3 = vector.multi_reduction <add>, %0, %cst [1] : vector<8x256xf32> to vector<8xf32>
    %4 = vector.shape_cast %3 : vector<8xf32> to vector<8x1xf32>
    %cst_5 = arith.constant 2.560000e+02 : f32
    %5 = vector.broadcast %cst_5 : f32 to vector<8x1xf32>
    %6 = arith.divf %4, %5 : vector<8x1xf32>
    %7 = vector.broadcast %6 : vector<8x1xf32> to vector<8x256xf32>
    %8 = arith.subf %0, %7 : vector<8x256xf32>
    %9 = arith.mulf %8, %8 : vector<8x256xf32>
    %cst_6 = arith.constant dense<0.000000e+00> : vector<8xf32>
    %10 = vector.multi_reduction <add>, %9, %cst_6 [1] : vector<8x256xf32> to vector<8xf32>
    %11 = vector.shape_cast %10 : vector<8xf32> to vector<8x1xf32>
    %cst_7 = arith.constant 2.560000e+02 : f32
    %12 = vector.broadcast %cst_7 : f32 to vector<8x1xf32>
    %13 = arith.divf %11, %12 : vector<8x1xf32>
    %cst_8 = arith.constant 9.99999974E-6 : f32
    %14 = vector.broadcast %cst_8 : f32 to vector<8x1xf32>
    %15 = arith.addf %13, %14 : vector<8x1xf32>
    %16 = math.rsqrt %15 : vector<8x1xf32>
    %17 = vector.broadcast %16 : vector<8x1xf32> to vector<8x256xf32>
    %18 = arith.mulf %8, %17 : vector<8x256xf32>
    %19 = vector.broadcast %1 : vector<1x256xf32> to vector<8x256xf32>
    %20 = arith.mulf %18, %19 : vector<8x256xf32>
    %21 = vector.broadcast %2 : vector<1x256xf32> to vector<8x256xf32>
    %22 = arith.addf %20, %21 : vector<8x256xf32>
    %23 = arith.truncf %22 : vector<8x256xf32> to vector<8x256xbf16>
    %c0_9 = arith.constant 0 : index
    %c0_10 = arith.constant 0 : index
    %24 = vector.load %arg4[%c0_9, %c0_10] : memref<256x1024xbf16, #tpu.memory_space<vmem>>, vector<256x1024xbf16>
    %cst_11 = arith.constant dense<0.000000e+00> : vector<8x1024xf32>
    %25 = tpu.matmul %23, %24, %cst_11 {dimension_numbers = #tpu.dot_dimension_numbers<[1], [0], [0], [1], [0, 0, 1, 1], [], []>} : vector<8x256xbf16>, vector<256x1024xbf16>, vector<8x1024xf32> -> vector<8x1024xf32>
    %c0_12 = arith.constant 0 : index
    %c0_13 = arith.constant 0 : index
    %26 = vector.load %arg5[%c0_12, %c0_13] : memref<1x1024xf32, #tpu.memory_space<vmem>>, vector<1x1024xf32>
    %27 = vector.broadcast %26 : vector<1x1024xf32> to vector<8x1024xf32>
    %28 = arith.addf %25, %27 : vector<8x1024xf32>
    %cst_14 = arith.constant 5.000000e-01 : f32
    %29 = vector.broadcast %cst_14 : f32 to vector<8x1024xf32>
    %30 = arith.mulf %29, %28 : vector<8x1024xf32>
    %cst_15 = arith.constant 0.707106769 : f32
    %31 = vector.broadcast %cst_15 : f32 to vector<8x1024xf32>
    %32 = arith.mulf %28, %31 : vector<8x1024xf32>
    %cst_16 = arith.constant 0.000000e+00 : f32
    %33 = vector.broadcast %cst_16 : f32 to vector<8x1024xf32>
    %34 = arith.cmpf oge, %32, %33 : vector<8x1024xf32>
    %cst_17 = arith.constant 1.000000e+00 : f32
    %cst_18 = arith.constant -1.000000e+00 : f32
    %35 = vector.broadcast %cst_17 : f32 to vector<8x1024xf32>
    %36 = vector.broadcast %cst_18 : f32 to vector<8x1024xf32>
    %37 = arith.select %34, %35, %36 : vector<8x1024xi1>, vector<8x1024xf32>
    %38 = math.absf %32 : vector<8x1024xf32>
    %cst_19 = arith.constant 0.327591091 : f32
    %39 = vector.broadcast %cst_19 : f32 to vector<8x1024xf32>
    %40 = arith.mulf %39, %38 : vector<8x1024xf32>
    %cst_20 = arith.constant 1.000000e+00 : f32
    %41 = vector.broadcast %cst_20 : f32 to vector<8x1024xf32>
    %42 = arith.addf %41, %40 : vector<8x1024xf32>
    %43 = tpu.reciprocal %42 {approx = true} : vector<8x1024xf32> -> vector<8x1024xf32>
    %cst_21 = arith.constant 1.06140542 : f32
    %44 = vector.broadcast %cst_21 : f32 to vector<8x1024xf32>
    %45 = arith.mulf %44, %43 : vector<8x1024xf32>
    %cst_22 = arith.constant -1.45315206 : f32
    %46 = vector.broadcast %cst_22 : f32 to vector<8x1024xf32>
    %47 = arith.addf %45, %46 : vector<8x1024xf32>
    %48 = arith.mulf %47, %43 : vector<8x1024xf32>
    %cst_23 = arith.constant 1.42141378 : f32
    %49 = vector.broadcast %cst_23 : f32 to vector<8x1024xf32>
    %50 = arith.addf %48, %49 : vector<8x1024xf32>
    %51 = arith.mulf %50, %43 : vector<8x1024xf32>
    %cst_24 = arith.constant -0.284496725 : f32
    %52 = vector.broadcast %cst_24 : f32 to vector<8x1024xf32>
    %53 = arith.addf %51, %52 : vector<8x1024xf32>
    %54 = arith.mulf %53, %43 : vector<8x1024xf32>
    %cst_25 = arith.constant 0.254829586 : f32
    %55 = vector.broadcast %cst_25 : f32 to vector<8x1024xf32>
    %56 = arith.addf %54, %55 : vector<8x1024xf32>
    %57 = arith.mulf %56, %43 : vector<8x1024xf32>
    %cst_26 = arith.constant 0.000000e+00 : f32
    %58 = vector.broadcast %cst_26 : f32 to vector<8x1024xf32>
    %59 = arith.subf %58, %38 : vector<8x1024xf32>
    %60 = arith.mulf %59, %38 : vector<8x1024xf32>
    %61 = math.exp %60 : vector<8x1024xf32>
    %62 = arith.mulf %57, %61 : vector<8x1024xf32>
    %cst_27 = arith.constant 1.000000e+00 : f32
    %63 = vector.broadcast %cst_27 : f32 to vector<8x1024xf32>
    %64 = arith.subf %63, %62 : vector<8x1024xf32>
    %65 = arith.mulf %37, %64 : vector<8x1024xf32>
    %cst_28 = arith.constant 1.000000e+00 : f32
    %66 = vector.broadcast %cst_28 : f32 to vector<8x1024xf32>
    %67 = arith.addf %66, %65 : vector<8x1024xf32>
    %68 = arith.mulf %30, %67 : vector<8x1024xf32>
    %69 = arith.truncf %68 : vector<8x1024xf32> to vector<8x1024xbf16>
    %c0_29 = arith.constant 0 : index
    %c0_30 = arith.constant 0 : index
    %70 = vector.load %arg6[%c0_29, %c0_30] : memref<1024x256xbf16, #tpu.memory_space<vmem>>, vector<1024x256xbf16>
    %cst_31 = arith.constant dense<0.000000e+00> : vector<8x256xf32>
    %71 = tpu.matmul %69, %70, %cst_31 {dimension_numbers = #tpu.dot_dimension_numbers<[1], [0], [0], [1], [0, 0, 1, 1], [], []>} : vector<8x1024xbf16>, vector<1024x256xbf16>, vector<8x256xf32> -> vector<8x256xf32>
    %c0_32 = arith.constant 0 : index
    %c0_33 = arith.constant 0 : index
    %72 = vector.load %arg7[%c0_32, %c0_33] : memref<1x256xf32, #tpu.memory_space<vmem>>, vector<1x256xf32>
    %73 = vector.broadcast %72 : vector<1x256xf32> to vector<8x256xf32>
    %74 = arith.addf %71, %73 : vector<8x256xf32>
    %75 = arith.addf %0, %74 : vector<8x256xf32>
    %c0_34 = arith.constant 0 : index
    %c0_35 = arith.constant 0 : index
    %76 = vector.load %arg8[%c0_34, %c0_35] : memref<8x256xf32, #tpu.memory_space<vmem>>, vector<8x256xf32>
    tpu.vector_store %arg8[%c0_34, %c0_35], %75 {strides = array<i32>} : memref<8x256xf32, #tpu.memory_space<vmem>>, vector<8x256xf32>,
    return
  }
  func.func @transform_0(%arg0: i32) -> (i32, i32) {
    %c0_i32 = arith.constant 0 : i32
    %c0_i32_0 = arith.constant 0 : i32
    return %arg0, %c0_i32 : i32, i32
  }
  func.func @transform_1(%arg0: i32) -> (i32, i32) {
    %c0_i32 = arith.constant 0 : i32
    %c0_i32_0 = arith.constant 0 : i32
    %c0_i32_1 = arith.constant 0 : i32
    return %c0_i32, %c0_i32_0 : i32, i32
  }
  func.func @transform_2(%arg0: i32) -> (i32, i32) {
    %c0_i32 = arith.constant 0 : i32
    %c0_i32_0 = arith.constant 0 : i32
    %c0_i32_1 = arith.constant 0 : i32
    return %c0_i32, %c0_i32_0 : i32, i32
  }
  func.func @transform_3(%arg0: i32) -> (i32, i32) {
    %c0_i32 = arith.constant 0 : i32
    %c0_i32_0 = arith.constant 0 : i32
    %c0_i32_1 = arith.constant 0 : i32
    return %c0_i32, %c0_i32_0 : i32, i32
  }
  func.func @transform_4(%arg0: i32) -> (i32, i32) {
    %c0_i32 = arith.constant 0 : i32
    %c0_i32_0 = arith.constant 0 : i32
    %c0_i32_1 = arith.constant 0 : i32
    return %c0_i32, %c0_i32_0 : i32, i32
  }
  func.func @transform_5(%arg0: i32) -> (i32, i32) {
    %c0_i32 = arith.constant 0 : i32
    %c0_i32_0 = arith.constant 0 : i32
    %c0_i32_1 = arith.constant 0 : i32
    return %c0_i32, %c0_i32_0 : i32, i32
  }
  func.func @transform_6(%arg0: i32) -> (i32, i32) {
    %c0_i32 = arith.constant 0 : i32
    %c0_i32_0 = arith.constant 0 : i32
    %c0_i32_1 = arith.constant 0 : i32
    return %c0_i32, %c0_i32_0 : i32, i32
  }
  func.func @transform_7(%arg0: i32) -> (i32, i32) {
    %c0_i32 = arith.constant 0 : i32
    %c0_i32_0 = arith.constant 0 : i32
    return %arg0, %c0_i32 : i32, i32
  }
}

module attributes {stable_mosaic.version = 11 : i64} {
  func.func @_layernorm_kernel(%arg0: i32, %arg1: memref<16x128xf32, #tpu.memory_space<vmem>>, %arg2: memref<1x128xf32, #tpu.memory_space<vmem>>, %arg3: memref<1x128xf32, #tpu.memory_space<vmem>>, %arg4: memref<16x128xf32, #tpu.memory_space<vmem>>) attributes {dimension_semantics = [#tpu.dimension_semantics<parallel>], iteration_bounds = array<i64: 2>, scalar_prefetch = 0 : i64, scratch_operands = 0 : i64, tpu.core_type = #tpu.core_type<tc>, window_params = [{transform_indices = @transform_0, window_bounds = array<i64: 16, 128>}, {pipeline_mode = #tpu.pipeline_mode<synchronous>, transform_indices = @transform_1, window_bounds = array<i64: 1, 128>}, {pipeline_mode = #tpu.pipeline_mode<synchronous>, transform_indices = @transform_2, window_bounds = array<i64: 1, 128>}, {transform_indices = @transform_3, window_bounds = array<i64: 16, 128>}]} {
    %c0 = arith.constant 0 : index
    %c0_0 = arith.constant 0 : index
    %0 = vector.load %arg1[%c0, %c0_0] : memref<16x128xf32, #tpu.memory_space<vmem>>, vector<16x128xf32>
    %c0_1 = arith.constant 0 : index
    %c0_2 = arith.constant 0 : index
    %1 = vector.load %arg2[%c0_1, %c0_2] : memref<1x128xf32, #tpu.memory_space<vmem>>, vector<1x128xf32>
    %c0_3 = arith.constant 0 : index
    %c0_4 = arith.constant 0 : index
    %2 = vector.load %arg3[%c0_3, %c0_4] : memref<1x128xf32, #tpu.memory_space<vmem>>, vector<1x128xf32>
    %cst = arith.constant dense<0.000000e+00> : vector<16xf32>
    %3 = vector.multi_reduction <add>, %0, %cst [1] : vector<16x128xf32> to vector<16xf32>
    %4 = vector.shape_cast %3 : vector<16xf32> to vector<16x1xf32>
    %cst_5 = arith.constant 1.280000e+02 : f32
    %5 = vector.broadcast %cst_5 : f32 to vector<16x1xf32>
    %6 = arith.divf %4, %5 : vector<16x1xf32>
    %7 = vector.broadcast %6 : vector<16x1xf32> to vector<16x128xf32>
    %8 = arith.subf %0, %7 : vector<16x128xf32>
    %9 = arith.mulf %8, %8 : vector<16x128xf32>
    %cst_6 = arith.constant dense<0.000000e+00> : vector<16xf32>
    %10 = vector.multi_reduction <add>, %9, %cst_6 [1] : vector<16x128xf32> to vector<16xf32>
    %11 = vector.shape_cast %10 : vector<16xf32> to vector<16x1xf32>
    %cst_7 = arith.constant 1.280000e+02 : f32
    %12 = vector.broadcast %cst_7 : f32 to vector<16x1xf32>
    %13 = arith.divf %11, %12 : vector<16x1xf32>
    %cst_8 = arith.constant 9.99999974E-6 : f32
    %14 = vector.broadcast %cst_8 : f32 to vector<16x1xf32>
    %15 = arith.addf %13, %14 : vector<16x1xf32>
    %16 = math.rsqrt %15 : vector<16x1xf32>
    %17 = vector.broadcast %16 : vector<16x1xf32> to vector<16x128xf32>
    %18 = arith.mulf %8, %17 : vector<16x128xf32>
    %19 = vector.broadcast %1 : vector<1x128xf32> to vector<16x128xf32>
    %20 = arith.mulf %18, %19 : vector<16x128xf32>
    %21 = vector.broadcast %2 : vector<1x128xf32> to vector<16x128xf32>
    %22 = arith.addf %20, %21 : vector<16x128xf32>
    %c0_9 = arith.constant 0 : index
    %c0_10 = arith.constant 0 : index
    %23 = vector.load %arg4[%c0_9, %c0_10] : memref<16x128xf32, #tpu.memory_space<vmem>>, vector<16x128xf32>
    tpu.vector_store %arg4[%c0_9, %c0_10], %22 {strides = array<i32>} : memref<16x128xf32, #tpu.memory_space<vmem>>, vector<16x128xf32>,
    return
  }
  func.func @transform_0(%arg0: i32) -> (i32, i32) {
    %c0_i32 = arith.constant 0 : i32
    %c0_i32_0 = arith.constant 0 : i32
    return %arg0, %c0_i32 : i32, i32
  }
  func.func @transform_1(%arg0: i32) -> (i32, i32) {
    %c0_i32 = arith.constant 0 : i32
    %c0_i32_0 = arith.constant 0 : i32
    %c0_i32_1 = arith.constant 0 : i32
    return %c0_i32, %c0_i32_0 : i32, i32
  }
  func.func @transform_2(%arg0: i32) -> (i32, i32) {
    %c0_i32 = arith.constant 0 : i32
    %c0_i32_0 = arith.constant 0 : i32
    %c0_i32_1 = arith.constant 0 : i32
    return %c0_i32, %c0_i32_0 : i32, i32
  }
  func.func @transform_3(%arg0: i32) -> (i32, i32) {
    %c0_i32 = arith.constant 0 : i32
    %c0_i32_0 = arith.constant 0 : i32
    return %arg0, %c0_i32 : i32, i32
  }
}

module attributes {stable_mosaic.version = 11 : i64} {
  func.func @_layernorm_kernel(%arg0: i32, %arg1: memref<8x256xf32, #tpu.memory_space<vmem>>, %arg2: memref<1x256xf32, #tpu.memory_space<vmem>>, %arg3: memref<1x256xf32, #tpu.memory_space<vmem>>, %arg4: memref<8x256xf32, #tpu.memory_space<vmem>>) attributes {dimension_semantics = [#tpu.dimension_semantics<parallel>], iteration_bounds = array<i64: 2>, scalar_prefetch = 0 : i64, scratch_operands = 0 : i64, tpu.core_type = #tpu.core_type<tc>, window_params = [{transform_indices = @transform_0, window_bounds = array<i64: 8, 256>}, {pipeline_mode = #tpu.pipeline_mode<synchronous>, transform_indices = @transform_1, window_bounds = array<i64: 1, 256>}, {pipeline_mode = #tpu.pipeline_mode<synchronous>, transform_indices = @transform_2, window_bounds = array<i64: 1, 256>}, {transform_indices = @transform_3, window_bounds = array<i64: 8, 256>}]} {
    %c0 = arith.constant 0 : index
    %c0_0 = arith.constant 0 : index
    %0 = vector.load %arg1[%c0, %c0_0] : memref<8x256xf32, #tpu.memory_space<vmem>>, vector<8x256xf32>
    %c0_1 = arith.constant 0 : index
    %c0_2 = arith.constant 0 : index
    %1 = vector.load %arg2[%c0_1, %c0_2] : memref<1x256xf32, #tpu.memory_space<vmem>>, vector<1x256xf32>
    %c0_3 = arith.constant 0 : index
    %c0_4 = arith.constant 0 : index
    %2 = vector.load %arg3[%c0_3, %c0_4] : memref<1x256xf32, #tpu.memory_space<vmem>>, vector<1x256xf32>
    %cst = arith.constant dense<0.000000e+00> : vector<8xf32>
    %3 = vector.multi_reduction <add>, %0, %cst [1] : vector<8x256xf32> to vector<8xf32>
    %4 = vector.shape_cast %3 : vector<8xf32> to vector<8x1xf32>
    %cst_5 = arith.constant 2.560000e+02 : f32
    %5 = vector.broadcast %cst_5 : f32 to vector<8x1xf32>
    %6 = arith.divf %4, %5 : vector<8x1xf32>
    %7 = vector.broadcast %6 : vector<8x1xf32> to vector<8x256xf32>
    %8 = arith.subf %0, %7 : vector<8x256xf32>
    %9 = arith.mulf %8, %8 : vector<8x256xf32>
    %cst_6 = arith.constant dense<0.000000e+00> : vector<8xf32>
    %10 = vector.multi_reduction <add>, %9, %cst_6 [1] : vector<8x256xf32> to vector<8xf32>
    %11 = vector.shape_cast %10 : vector<8xf32> to vector<8x1xf32>
    %cst_7 = arith.constant 2.560000e+02 : f32
    %12 = vector.broadcast %cst_7 : f32 to vector<8x1xf32>
    %13 = arith.divf %11, %12 : vector<8x1xf32>
    %cst_8 = arith.constant 9.99999974E-6 : f32
    %14 = vector.broadcast %cst_8 : f32 to vector<8x1xf32>
    %15 = arith.addf %13, %14 : vector<8x1xf32>
    %16 = math.rsqrt %15 : vector<8x1xf32>
    %17 = vector.broadcast %16 : vector<8x1xf32> to vector<8x256xf32>
    %18 = arith.mulf %8, %17 : vector<8x256xf32>
    %19 = vector.broadcast %1 : vector<1x256xf32> to vector<8x256xf32>
    %20 = arith.mulf %18, %19 : vector<8x256xf32>
    %21 = vector.broadcast %2 : vector<1x256xf32> to vector<8x256xf32>
    %22 = arith.addf %20, %21 : vector<8x256xf32>
    %c0_9 = arith.constant 0 : index
    %c0_10 = arith.constant 0 : index
    %23 = vector.load %arg4[%c0_9, %c0_10] : memref<8x256xf32, #tpu.memory_space<vmem>>, vector<8x256xf32>
    tpu.vector_store %arg4[%c0_9, %c0_10], %22 {strides = array<i32>} : memref<8x256xf32, #tpu.memory_space<vmem>>, vector<8x256xf32>,
    return
  }
  func.func @transform_0(%arg0: i32) -> (i32, i32) {
    %c0_i32 = arith.constant 0 : i32
    %c0_i32_0 = arith.constant 0 : i32
    return %arg0, %c0_i32 : i32, i32
  }
  func.func @transform_1(%arg0: i32) -> (i32, i32) {
    %c0_i32 = arith.constant 0 : i32
    %c0_i32_0 = arith.constant 0 : i32
    %c0_i32_1 = arith.constant 0 : i32
    return %c0_i32, %c0_i32_0 : i32, i32
  }
  func.func @transform_2(%arg0: i32) -> (i32, i32) {
    %c0_i32 = arith.constant 0 : i32
    %c0_i32_0 = arith.constant 0 : i32
    %c0_i32_1 = arith.constant 0 : i32
    return %c0_i32, %c0_i32_0 : i32, i32
  }
  func.func @transform_3(%arg0: i32) -> (i32, i32) {
    %c0_i32 = arith.constant 0 : i32
    %c0_i32_0 = arith.constant 0 : i32
    return %arg0, %c0_i32 : i32, i32
  }
}

</mosaic_0001>

<bundles_post_ra>
// kernel: encoder_forward.15
= control target key start
LH: loop header
LB: loop body
LE: loop exit
PB: predicated region body
PF: predicated region fallthrough
CT: control target
= control target key end

     0   :  { %11 = vsyncpa [#allocation3], 0  ;;  %s2654_s0 = inlined_call_operand.hbm [shape: f32[2,16,128], index: 0, kind: input, shape index: {}]   ;;  %s2655_s1 = inlined_call_operand.hbm [shape: f32[1,128], index: 1, kind: input, shape index: {}]   ;;  %s2656_s2 = inlined_call_operand.hbm [shape: f32[1,128], index: 2, kind: input, shape index: {}]   ;;  %s2657_s3 = inlined_call_operand.hbm [shape: bf16[128,384], index: 3, kind: input, shape index: {}]   ;;  %s2658_s4 = inlined_call_operand.hbm [shape: bf16[128,128], index: 4, kind: input, shape index: {}]   ;;  %s2659_s5 = inlined_call_operand.hbm [shape: f32[1,128], index: 5, kind: input, shape index: {}]   ;;  %s2660_s6 = inlined_call_operand.hbm [shape: f32[2,16,128], index: 6, kind: output, shape index: {}]  }
   0x1   :  { %13 = vsyncpa [#allocation3 + $0x1], 0 }
   0x2   :  { %14 = vsyncpa [#allocation6], 0 }
   0x3   :  { %15 = vsyncpa [#allocation9], 0 }
   0x4   :  { %16 = vsyncpa [#allocation12], 0 }
   0x5   :  { %17 = vsyncpa [#allocation4], 0 }
   0x6   :  { %19 = vsyncpa [#allocation4 + $0x1], 0  ;;  %s2212_s21 = smov 0   ;;  %s2214_s22 = smov 0  }
   0x7   :  { %s2216_s23 = smov 0   ;;  %s2218_s24 = smov 0  }
   0x8 LB: > { %s2156_s25 = smov [#allocation5]   ;;  %s2233_s27 = sadd.s32 4294967295, %s2154_s24   ;;  %s2154_s24 = sphi %s2218_s24, %s2685_s24   ;;  %s2150_s23 = sphi %s2216_s23, %s2684_s23   ;;  %s2146_s22 = sphi %s2214_s22, %s2683_s22   ;;  %s2142_s21 = sphi %s2212_s21, %s2682_s21  }
   0x9   : > { %s200_s26 = sshll.u32 %s2156_s25, 4  ;;  %p1510_p0 = scmp.ge.s32.totalorder %s2154_s24, 1  ;;  %s2238_s26 = int_to_ptr.vmem [resolvable:$true] %s200_s26 }
   0xa   : > { %p2661_p1 = scmp.eq.s32.totalorder %s2233_s27, 0  ;;  %p187_p2 = scmp.lt.s32.totalorder %s2154_s24, 3 }
   0xb   : > { %s2157_s29 = smov [#allocation8]   ;;  %s2158_s8 = smov [#allocation7]  }
   0xc   : > { %p2240_p3 = pnand %p1510_p0, %p187_p2  ;;  %s221_s30 = sshll.u32 %s2157_s29, 4  ;;  %s2247_s30 = int_to_ptr.vmem [resolvable:$true] %s221_s30 }
   0xd   : > { %s211_s9 = sshll.u32 %s2158_s8, 4  ;;  %s1906_s12 = scalar_lea.hbm %s2655_s1, 16  ;;  %s2255_s9 = int_to_ptr.vmem [resolvable:$true] %s211_s9 }
   0xe   : > { %s2664_s28 = scalar_select %p2240_p3, 1, 0 }
   0xf   : > { %p1743_p5 = pneg %p2240_p3  ;;  %p1907_p7 = scmp.ne.s32.totalorder %s2655_s1, %s1906_s12 }
  0x10   : > { %p1913_p11 = scmp.lt.u32.totalorder %s1906_s12, %s2655_s1 }
  0x11   : > { %p2251_p6 = pnand %p1743_p5, %p2661_p1 }
  0x13   : > { %p2265_p8 = pneg %p2251_p6 }
  0x15   : > { %p1909_p9 = pnand %p2265_p8, %p1907_p7 }
  0x17   : > { %p1910_p10 = pneg %p1909_p9 }
  0x19   : > { %p1915_p12 = pnand %p1913_p11, %p1910_p10 }
  0x1b   : > { %1918 = shalt.err (!%p1915_p12)
}
  0x1c   : > { %s1919_s18 = scalar_lea.vmem %s2238_s26, 16  ;;  %s1926_s19 = scalar_lea.vmem %s2238_s26, 32 }
  0x1d   : > { %p1920_p13 = scmp.ne.s32.totalorder %s2238_s26, %s1919_s18  ;;  %p1927_p5 = scmp.lt.s32.totalorder %s2238_s26, %s2238_s26 }
  0x1e   : > { %p1928_p7 = scmp.lt.s32.totalorder %s1926_s19, %s1919_s18 }
  0x1f   : > { %p1922_p0 = pnand %p1920_p13, %p2265_p8 }
  0x20   : > { %p1929_p9 = por %p1928_p7, %p1927_p5 }
  0x21   : > { %p1923_p2 = pneg %p1922_p0 }
  0x23   : > { %p1930_p4 = pnand %p1929_p9, %p1923_p2 }
  0x25   : > { %1933 = shalt.err (!%p1930_p4)
}
  0x26   : > { %1746 = dma.hbm_to_vmem [thread:$0]  (!%p2251_p6), %s2655_s1, 16, %s2238_s26, [#allocation6]  }
  0x27   : > { %s1934_s10 = scalar_lea.hbm %s2657_s3, 3072 }
  0x28   : > { %p1935_p10 = scmp.ne.s32.totalorder %s2657_s3, %s1934_s10  ;;  %p1941_p4 = scmp.lt.u32.totalorder %s1934_s10, %s2657_s3 }
  0x2a   : > { %p1937_p11 = pnand %p1935_p10, %p2265_p8 }
  0x2c   : > { %p1938_p12 = pneg %p1937_p11 }
  0x2e   : > { %p1943_p13 = pnand %p1941_p4, %p1938_p12 }
  0x30   : > { %1946 = shalt.err (!%p1943_p13)
}
  0x31   : > { %s1947_s26 = scalar_lea.vmem %s2247_s30, 3072  ;;  %p1955_p7 = scmp.lt.s32.totalorder %s2247_s30, %s2247_s30 }
  0x32   : > { %p1948_p0 = scmp.ne.s32.totalorder %s2247_s30, %s1947_s26  ;;  %p1956_p9 = scmp.lt.s32.totalorder %s1947_s26, %s1947_s26 }
  0x34   : > { %p1950_p2 = pnand %p1948_p0, %p2265_p8  ;;  %p1957_p10 = por %p1956_p9, %p1955_p7 }
  0x36   : > { %p1951_p5 = pneg %p1950_p2 }
  0x38   : > { %p1958_p11 = pnand %p1957_p10, %p1951_p5 }
  0x3a   : > { %1961 = shalt.err (!%p1958_p11)
}
  0x3b   : > { %s2159_s16 = smov 192   ;;  %s2160_s17 = smov 12  }
  0x3c   : > { %1752 = dma.hbm_to_vmem [thread:$0]  (!%p2251_p6), %s2657_s3, 3072, %s2247_s30, [#allocation9], %s2159_s16, %s2159_s16, %s2160_s17  }
  0x3d   : > { %s1962_s29 = scalar_lea.hbm %s2656_s2, 16 }
  0x3e   : > { %p1963_p12 = scmp.ne.s32.totalorder %s2656_s2, %s1962_s29  ;;  %p1969_p0 = scmp.lt.u32.totalorder %s1962_s29, %s2656_s2 }
  0x40   : > { %p1965_p4 = pnand %p1963_p12, %p2265_p8 }
  0x42   : > { %p1966_p13 = pneg %p1965_p4 }
  0x44   : > { %p1971_p2 = pnand %p1969_p0, %p1966_p13 }
  0x46   : > { %1974 = shalt.err (!%p1971_p2)
}
  0x47   : > { %s1975_s30 = scalar_lea.vmem %s2255_s9, 16  ;;  %s1982_s13 = scalar_lea.vmem %s2255_s9, 32 }
  0x48   : > { %p1976_p5 = scmp.ne.s32.totalorder %s2255_s9, %s1975_s30  ;;  %p1983_p10 = scmp.lt.s32.totalorder %s2255_s9, %s2255_s9 }
  0x49   : > { %p1984_p11 = scmp.lt.s32.totalorder %s1982_s13, %s1975_s30 }
  0x4a   : > { %p1978_p7 = pnand %p1976_p5, %p2265_p8 }
  0x4b   : > { %p1985_p12 = por %p1984_p11, %p1983_p10 }
  0x4c   : > { %p1979_p9 = pneg %p1978_p7 }
  0x4e   : > { %p1986_p4 = pnand %p1985_p12, %p1979_p9 }
  0x50   : > { %1989 = shalt.err (!%p1986_p4)
}
  0x51   : > { %1749 = dma.hbm_to_vmem [thread:$0]  (!%p2251_p6), %s2656_s2, 16, %s2255_s9, [#allocation6]  }
  0x52   : > { %s2161_s16 = smov [#allocation10]   ;;  %s1990_s20 = scalar_lea.hbm %s2658_s4, 1024 }
  0x53   : > { %s234_s17 = sshll.u32 %s2161_s16, 4  ;;  %p1991_p13 = scmp.ne.s32.totalorder %s2658_s4, %s1990_s20  ;;  %s235_s17 = int_to_ptr.vmem [resolvable:$true] %s234_s17 }
  0x54   : > { %p1997_p5 = scmp.lt.u32.totalorder %s1990_s20, %s2658_s4 }
  0x55   : > { %p1993_p0 = pnand %p1991_p13, %p2265_p8 }
  0x57   : > { %p1994_p2 = pneg %p1993_p0 }
  0x59   : > { %p1999_p7 = pnand %p1997_p5, %p1994_p2 }
  0x5b   : > { %2002 = shalt.err (!%p1999_p7)
}
  0x5c   : > { %s2003_s9 = scalar_lea.vmem %s235_s17, 1024  ;;  %p2011_p12 = scmp.lt.s32.totalorder %s235_s17, %s235_s17 }
  0x5d   : > { %p2004_p9 = scmp.ne.s32.totalorder %s235_s17, %s2003_s9  ;;  %p2012_p4 = scmp.lt.s32.totalorder %s2003_s9, %s2003_s9 }
  0x5f   : > { %p2006_p10 = pnand %p2004_p9, %p2265_p8  ;;  %p2013_p1 = por %p2012_p4, %p2011_p12 }
  0x61   : > { %p2007_p11 = pneg %p2006_p10 }
  0x63   : > { %p2014_p3 = pnand %p2013_p1, %p2007_p11 }
  0x65   : > { %2017 = shalt.err (!%p2014_p3)
}
  0x66   : > { %s2162_s11 = smov 64   ;;  %s2163_s12 = smov 4  }
  0x67   : > { %1755 = dma.hbm_to_vmem [thread:$0]  (!%p2251_p6), %s2658_s4, 1024, %s235_s17, [#allocation9], %s2162_s11, %s2162_s11, %s2163_s12  }
  0x68   : > { %s2164_s14 = smov [#allocation11]   ;;  %s2018_s19 = scalar_lea.hbm %s2659_s5, 16 }
  0x69   : > { %s248_s26 = sshll.u32 %s2164_s14, 4  ;;  %p2019_p1 = scmp.ne.s32.totalorder %s2659_s5, %s2018_s19  ;;  %s249_s26 = int_to_ptr.vmem [resolvable:$true] %s248_s26 }
  0x6a   : > { %p2025_p0 = scmp.lt.u32.totalorder %s2018_s19, %s2659_s5 }
  0x6b   : > { %p2021_p3 = pnand %p2019_p1, %p2265_p8 }
  0x6d   : > { %p2022_p13 = pneg %p2021_p3 }
  0x6f   : > { %p2027_p2 = pnand %p2025_p0, %p2022_p13 }
  0x71   : > { %2030 = shalt.err (!%p2027_p2)
}
  0x72   : > { %s2031_s17 = scalar_lea.vmem %s249_s26, 16  ;;  %s2038_s10 = scalar_lea.vmem %s249_s26, 32 }
  0x73   : > { %p2032_p5 = scmp.ne.s32.totalorder %s249_s26, %s2031_s17  ;;  %p2039_p10 = scmp.lt.s32.totalorder %s249_s26, %s249_s26 }
  0x74   : > { %p2040_p11 = scmp.lt.s32.totalorder %s2038_s10, %s2031_s17 }
  0x75   : > { %p2034_p7 = pnand %p2032_p5, %p2265_p8 }
  0x76   : > { %p2041_p12 = por %p2040_p11, %p2039_p10 }
  0x77   : > { %p2035_p9 = pneg %p2034_p7 }
  0x79   : > { %p2042_p4 = pnand %p2041_p12, %p2035_p9 }
  0x7b   : > { %2045 = shalt.err (!%p2042_p4)
}
  0x7c   : > { %1758 = dma.hbm_to_vmem [thread:$0]  (!%p2251_p6), %s2659_s5, 16, %s249_s26, [#allocation12]  }
  0x7d   : > { %s1509_s15 = sadd.s32 4294967294, %s2154_s24   ;;  %s2372_s7 = sadd.s32 1, %s2154_s24  }
  0x7e   : > { %s32_s12 = sadd.s32 1, %s2150_s23  ;;  %s29_s30 = ssub.s32 %s2154_s24, %s2372_s7 }
  0x7f   : > { %p39_p8 = scmp.ne.s32.totalorder %s2150_s23, %s2146_s22  ;;  %p30_p1 = scmp.eq.s32.totalorder %s29_s30, 0 }
  0x80   : > { %p40_p3 = scmp.eq.s32.totalorder %s2154_s24, 0  ;;  %p45_p13 = scmp.ne.s32.totalorder %s2146_s22, %s2142_s21 }
  0x81   : > { %p174_p0 = scmp.eq.s32.totalorder %s2233_s27, 1  ;;  %p2667_p5 = scmp.eq.s32.totalorder %s2233_s27, 0 }
  0x82   : > { %s2384_s13 = scalar_select %p30_p1, %s2150_s23, %s32_s12  }
  0x83   : > { %p41_p2 = por %p40_p3, %p39_p8  ;;  %p2388_p7 = por %p2667_p5, %p45_p13 }
  0x84   : > { %p2392_p6 = por %p174_p0, %p39_p8  ;;  %p180_p9 = scmp.eq.s32.totalorder %s1509_s15, 1 }
  0x85   : > { %p1772_p10 = scmp.lt.s32.totalorder %s2154_s24, 2  ;;  %s259_s16 = sand.u32 1, %s2150_s23  }
  0x86   : > { %s2669_s26 = scalar_select %p2392_p6, 1, 0 }
  0x87   : > { %p2398_p11 = por %p180_p9, %p45_p13  ;;  %s1517_s19 = sshll.u32 %s259_s16, 4 }
  0x88   : > { %s1580_s20 = sshll.u32 %s2154_s24, 8  ;;  %s263_s17 = scalar_lea.vmem [#allocation2], %s1517_s19 }
  0x89   : > { %s2670_s18 = scalar_select %p2398_p11, 1, 0 }
  0x8a   : > { %s2406_s8 = scalar_lea.hbm %s2654_s0, %s1580_s20  ;;  %s270_s10 = sshll.u32 %s263_s17, 4  ;;  %s2412_s10 = int_to_ptr.vmem [resolvable:$true] %s270_s10 }
  0x8b   : > { %p2408_p12 = pnand %p1772_p10, %p41_p2  ;;  %s2414_s11 = scalar_lea.sflag [#allocation3], %s259_s16 }
  0x8c   : > { %s2046_s15 = scalar_lea.hbm %s2406_s8, 256  ;;  %s2051_s19 = scalar_lea.hbm %s2654_s0, 512 }
  0x8d   : > { %p2047_p4 = scmp.ne.s32.totalorder %s2406_s8, %s2046_s15  ;;  %p2048_p8 = pneg %p2408_p12 }
  0x8e   : > { %p2052_p13 = scmp.lt.u32.totalorder %s2406_s8, %s2654_s0  ;;  %p2053_p0 = scmp.lt.u32.totalorder %s2051_s19, %s2046_s15 }
  0x8f   : > { %p2049_p1 = pnand %p2048_p8, %p2047_p4  ;;  %p2055_p5 = scmp.lt.u32.totalorder %s2046_s15, %s2406_s8 }
  0x90   : > { %p2054_p2 = por %p2053_p0, %p2052_p13 }
  0x91   : > { %p2050_p3 = pneg %p2049_p1 }
  0x92   : > { %p2056_p9 = por %p2055_p5, %p2054_p2 }
  0x94   : > { %p2057_p10 = pnand %p2056_p9, %p2050_p3 }
  0x96   : > { %2060 = shalt.err (!%p2057_p10)
}
  0x97   : > { %s2061_s16 = scalar_lea.vmem %s2412_s10, 256  ;;  %s2165_s29 = smov [#allocation2]  }
  0x98   : > { %p2062_p4 = scmp.ne.s32.totalorder %s2412_s10, %s2061_s16  ;;  %s2066_s17 = sshll.u32 %s2165_s29, 4  ;;  %s2067_s17 = int_to_ptr.vmem [resolvable:$false] %s2066_s17 }
  0x99   : > { %s2068_s12 = scalar_lea.vmem %s2067_s17, 512  ;;  %p2069_p6 = scmp.lt.s32.totalorder %s2412_s10, %s2067_s17 }
  0x9a   : > { %p2064_p1 = pnand %p2062_p4, %p2048_p8  ;;  %p2070_p13 = scmp.lt.s32.totalorder %s2068_s12, %s2061_s16 }
  0x9c   : > { %p2065_p11 = pneg %p2064_p1  ;;  %p2071_p0 = por %p2070_p13, %p2069_p6 }
  0x9e   : > { %p2072_p2 = pnand %p2071_p0, %p2065_p11 }
  0xa0   : > { %2075 = shalt.err (!%p2072_p2)
}
  0xa1   : > { %s2166_s15 = smov 128   ;;  %s2167_s30 = smov 8  }
  0xa2   : > { %1762 = dma.hbm_to_vmem [thread:$0]  (!%p2408_p12), %s2406_s8, 256, %s2412_s10, %s2414_s11, %s2166_s15, %s2166_s15, %s2167_s30  }
  0xa3   : > { %p2672_p8 = scmp.ne.s32.totalorder %s2664_s28, 0 }
  0xa4   : > { %s2445_s19 = sand.u32 (!%p2672_p8), 1, %s2146_s22  }
  0xa5   : > { %282 = sbr.rel (%p2672_p8) target bundleno = 3116 (0xc2c), region = 44  ;;  %s1521_s20 = sshll.u32 (!%p2672_p8), %s2445_s19, 4 }
  0xa6   : > { %s285_s25 = scalar_lea.sflag (!%p2672_p8), [#allocation3], %s2445_s19  ;;  %s288_s16 = scalar_lea.vmem (!%p2672_p8), [#allocation2], %s1521_s20 }
  0xac   : > { %2121 = dma.done.wait (%p2388_p7), %s285_s25, 256  }
  0xad   : > { %2123 = vsyncadd (%p2388_p7), %s285_s25, 4294967040  ;;  %p2673_p6 = scmp.eq.s32.totalorder %s2233_s27, 0 }
  0xaf   : > { %2125 = dma.done.wait (%p2673_p6), [#allocation6], 32   ;;  %p2674_p11 = pmov %p2673_p6 }
  0xb0   : > { %p2675_p12 = pmov %p2673_p6 }
  0xb1   : > { %2127 = vsyncadd (%p2674_p11), [#allocation6], 4294967264 }
  0xb2   : > { %2129 = dma.done.wait (%p2675_p12), [#allocation9], 4096   ;;  %p2676_p3 = pmov %p2673_p6 }
  0xb4   : > { %2131 = vsyncadd (%p2676_p3), [#allocation9], 4294963200  ;;  %p2677_p5 = pmov %p2676_p3 }
  0xb5   : > { %p2678_p9 = pmov %p2676_p3 }
  0xb6   : > { %2133 = dma.done.wait (%p2677_p5), [#allocation12], 16  }
  0xb7   : > { %2135 = vsyncadd (%p2678_p9), [#allocation12], 4294967280  ;;  %v2467_v0 = vld [vmem:[%s288_s16] sm:$0xff]  ;;  %v2469_v1 = vld [vmem:[%s288_s16 + $0x8] sm:$0xff]  ;;  %v2168_v4 = vmov 0.0   ;;  %v2169_v30 = vmov 0  }
  0xb8   : > { %342 = vadd.xlane.f32.xlu0 %v2467_v0  ;;  %v1830_v2 = vld [vmem:[#allocation8 + $0x4] ss:$12 sps:$4 sm:$0xff]   ;;  %v1832_v3 = vld [vmem:[#allocation8] ss:$12 sps:$4 sm:$0xff]   ;;  %1619 = vmatprep.subr.bf16.mxu1 %v2168_v4  ;;  %v1833_v5 = vld [vmem:[#allocation8 + $0x8] ss:$12 sps:$4 sm:$0xff]  }
  0xb9   : > { %v1834_v6 = vld [vmem:[#allocation8 + $0x1c] ss:$12 sps:$4 sm:$0xff]   ;;  %542 = vmatprep.subr.bf16.mxu0 %v1830_v2  ;;  %1620 = vmatpush3.bf16.msra.mxu1 %v1833_v5  ;;  %v1836_v15 = vld [vmem:[#allocation8 + $0x18] ss:$12 sps:$4 sm:$0xff]   ;;  %v1837_v16 = vld [vmem:[#allocation8 + $0x20] ss:$12 sps:$4 sm:$0xff]  }
  0xba   : > { %543 = vmatpush1.bf16.msra.mxu0 %v1832_v3  ;;  %1621 = vmatprep.subr.bf16.mxu1 %v2168_v4  ;;  %v1838_v17 = vld [vmem:[#allocation8 + $0x34] ss:$12 sps:$4 sm:$0xff]   ;;  %v1840_v18 = vld [vmem:[#allocation8 + $0x30] ss:$12 sps:$4 sm:$0xff]   ;;  %v1841_v19 = vld [vmem:[#allocation8 + $0x38] ss:$12 sps:$4 sm:$0xff]  }
  0xbb   : > { %544 = vmatprep.subr.bf16.mxu0 %v1834_v6  ;;  %v1842_v20 = vld [vmem:[#allocation8 + $0x4c] ss:$12 sps:$4 sm:$0xff]   ;;  %v1844_v21 = vld [vmem:[#allocation8 + $0x48] ss:$12 sps:$4 sm:$0xff]   ;;  %v1845_v22 = vld [vmem:[#allocation8 + $0x50] ss:$12 sps:$4 sm:$0xff]   ;;  %574 = vmatprep.mubr.bf16.mxu0 %v2169_v30 }
  0xbc   : > { %344 = vadd.xlane.f32.xlu0 %v2469_v1  ;;  %v1846_v23 = vld [vmem:[#allocation8 + $0x64] ss:$12 sps:$4 sm:$0xff]   ;;  %v1848_v24 = vld [vmem:[#allocation8 + $0x60] ss:$12 sps:$4 sm:$0xff]   ;;  %v1849_v25 = vld [vmem:[#allocation8 + $0x68] ss:$12 sps:$4 sm:$0xff]  }
  0xbd   : > { %1622 = vmatpush3.bf16.msra.mxu1 %v1837_v16  ;;  %v1850_v26 = vld [vmem:[#allocation8 + $0x7c] ss:$12 sps:$4 sm:$0xff]   ;;  %v1852_v27 = vld [vmem:[#allocation8 + $0x78] ss:$12 sps:$4 sm:$0xff]   ;;  %v1853_v28 = vld [vmem:[#allocation8 + $0x80] ss:$12 sps:$4 sm:$0xff]  }
  0xbe   : > { %545 = vmatpush1.bf16.msra.mxu0 %v1836_v15  ;;  %1623 = vmatprep.subr.bf16.mxu1 %v2168_v4  ;;  %v1854_v29 = vld [vmem:[#allocation8 + $0x94] ss:$12 sps:$4 sm:$0xff]   ;;  %vm2170_vm0 = vmmov 0   ;;  %v1856_v31 = vld [vmem:[#allocation8 + $0x90] ss:$12 sps:$4 sm:$0xff]   ;;  %vm648_vm1 = vcmask 261120  }
  0xbf   : > { %546 = vmatprep.subr.bf16.mxu0 %v1838_v17  ;;  %1635 = vmatprep.mubr.msk.bf16.mxu1 %vm2170_vm0, %v2168_v4  ;;  %v1857_v32 = vld [vmem:[#allocation8 + $0x98] ss:$12 sps:$4 sm:$0xff]   ;;  %v1860_v34 = vld [vmem:[#allocation8 + $0xa8] ss:$12 sps:$4 sm:$0xff]   ;;  %v1861_v35 = vld [vmem:[#allocation8 + $0xb0] ss:$12 sps:$4 sm:$0xff]  }
  0xc0   : > { %v1858_v33 = vld [vmem:[#allocation8 + $0xac] ss:$12 sps:$4 sm:$0xff]   ;;  %v1528_v44 = vld [vmem:[#allocation5] ss:$0 sm:$0xff]  ;;  %v1529_v48 = vld [vmem:[#allocation7] ss:$0 sm:$0xff] }
  0xc1   : > { %1624 = vmatpush3.bf16.msra.mxu1 %v1841_v19  ;;  %s2171_s28 = smov 96   ;;  %vm696_vm2 = vcmask 130048   ;;  %s2172_s14 = smov 64  }
  0xc2   : > { %547 = vmatpush1.bf16.msra.mxu0 %v1840_v18  ;;  %1625 = vmatprep.subr.bf16.mxu1 %v2168_v4  ;;  %s2173_s8 = smov 32   ;;  %s336_s10 = scalar_lea.vmem [#allocation13], %s1521_s20 }
  0xc3   : > { %548 = vmatprep.subr.bf16.mxu0 %v1842_v20  ;;  %s1388_s9 = sshll.u32 %s336_s10, 4  ;;  %s1581_s11 = sshll.u32 %s2233_s27, 8  ;;  %s2604_s9 = int_to_ptr.vmem [resolvable:$true] %s1388_s9 }
  0xc4   : > { %s2609_s12 = scalar_lea.hbm %s2660_s6, %s1581_s11  ;;  %s1375_s15 = scalar_lea.sflag [#allocation4], %s2445_s19 }
  0xc5   : > { %1626 = vmatpush3.bf16.msra.mxu1 %v1845_v22  ;;  %s2076_s30 = scalar_lea.vmem %s2604_s9, 256  ;;  %p2679_p10 = scmp.ne.s32.totalorder %s2669_s26, 0 }
  0xc6   : > { %549 = vmatpush1.bf16.msra.mxu0 %v1844_v21  ;;  %1627 = vmatprep.subr.bf16.mxu1 %v2168_v4  ;;  %p2077_p7 = scmp.ne.s32.totalorder %s2604_s9, %s2076_s30  ;;  %s2174_s27 = smov [#allocation13]  }
  0xc7   : > { %550 = vmatprep.subr.bf16.mxu0 %v1846_v23  ;;  %s2080_s20 = sshll.u32 %s2174_s27, 4  ;;  %s2081_s20 = int_to_ptr.vmem [resolvable:$false] %s2080_s20 }
  0xc8   : > { %p2078_p4 = pnand %p2077_p7, %p2679_p10  ;;  %s2082_s25 = scalar_lea.vmem %s2081_s20, 512 }
  0xc9   : > { %1628 = vmatpush3.bf16.msra.mxu1 %v1849_v25  ;;  %p2083_p13 = scmp.lt.s32.totalorder %s2604_s9, %s2081_s20  ;;  %p2084_p0 = scmp.lt.s32.totalorder %s2082_s25, %s2076_s30 }
  0xca   : > { %551 = vmatpush1.bf16.msra.mxu0 %v1848_v24  ;;  %1629 = vmatprep.subr.bf16.mxu1 %v2168_v4  ;;  %p2079_p1 = pneg %p2078_p4 }
  0xcb   : > { %552 = vmatprep.subr.bf16.mxu0 %v1850_v26  ;;  %p2085_p2 = por %p2084_p0, %p2083_p13 }
  0xcd   : > { %1630 = vmatpush3.bf16.msra.mxu1 %v1853_v28  ;;  %p2086_p8 = pnand %p2085_p2, %p2079_p1 }
  0xce   : > { %553 = vmatpush1.bf16.msra.mxu0 %v1852_v27  ;;  %1631 = vmatprep.subr.bf16.mxu1 %v2168_v4 }
  0xcf   : > { %554 = vmatprep.subr.bf16.mxu0 %v1854_v29 }
  0xd1   : > { %1632 = vmatpush3.bf16.msra.mxu1 %v1857_v32 }
  0xd2   : > { %555 = vmatpush1.bf16.msra.mxu0 %v1856_v31  ;;  %1633 = vmatprep.subr.bf16.mxu1 %v2168_v4 }
  0xd3   : > { %556 = vmatprep.subr.bf16.mxu0 %v1858_v33 }
  0xd5   : > { %1634 = vmatpush3.bf16.msra.mxu1 %v1861_v35 }
  0xd6   : > { %557 = vmatpush1.bf16.msra.mxu0 %v1860_v34  ;;  %1645 = vmatprep.subr.bf16.mxu1 %v2168_v4 }
  0xd7   : > { %1639 = vmatprep.subr.bf16.mxu0 %v2168_v4 }
 0x145   : > { %v343_v7 = vpop.xlane.xlu0 %342 }
 0x146   : > { %v347_v8 = vmul.f32 0.0078125, %v343_v7 }
 0x148   : > { %v2476_v9 = vsub.f32 %v2467_v0, %v347_v8 }
 0x149   : > { %v345_v10 = vpop.xlane.xlu0 %344 }
 0x14a   : > { %v348_v11 = vmul.f32 0.0078125, %v345_v10  ;;  %v351_v12 = vmul.f32 %v2476_v9, %v2476_v9 }
 0x14c   : > { %v2481_v13 = vsub.f32 %v2469_v1, %v348_v11  ;;  %353 = vadd.xlane.f32.xlu1 %v351_v12 }
 0x14e   : > { %v352_v14 = vmul.f32 %v2481_v13, %v2481_v13 }
 0x150   : > { %355 = vadd.xlane.f32.xlu1 %v352_v14 }
 0x1d9   : > { %v354_v36 = vpop.xlane.xlu1 %353 }
 0x1da   : > { %v357_v37 = vmul.f32 0.0078125, %v354_v36 }
 0x1dc   : > { %v359_v38 = vadd.f32 1e-05, %v357_v37 }
 0x1dd   : > { %v356_v39 = vpop.xlane.xlu1 %355 }
 0x1de   : > { %1870 = vrsqrt.f32 %v359_v38  ;;  %v358_v40 = vmul.f32 0.0078125, %v356_v39 }
 0x1e0   : > { %v360_v41 = vadd.f32 1e-05, %v358_v40 }
 0x1e2   : > { %1872 = vrsqrt.f32 %v360_v41 }
 0x1e8   : > { %v1871_v42 = vpop.eup %1870 }
 0x1e9   : > { %v363_v43 = vmul.f32 %v1871_v42, %v2476_v9 }
 0x1eb   : > { %v371_v47 = vmul.f32 %v1528_v44, %v363_v43 }
 0x1ec   : > { %v1873_v45 = vpop.eup %1872 }
 0x1ed   : > { %v364_v46 = vmul.f32 %v1873_v45, %v2481_v13  ;;  %v379_v50 = vadd.f32 %v1529_v48, %v371_v47 }
 0x1ef   : > { %v372_v49 = vmul.f32 %v1528_v44, %v364_v46 }
 0x1f1   : > { %v380_v51 = vadd.f32 %v1529_v48, %v372_v49  ;;  %v1864_v48 = vld [vmem:[#allocation10 + $0x10] sm:$0xff]   ;;  %v1865_v49 = vld [vmem:[#allocation10 + $0x18] sm:$0xff]  }
 0x1f3   : > { %v381_v52 = vpack.c.bf16 %v380_v51, %v379_v50 }
 0x1f5   : > { %575 = vmatmul.mubr.bf16.vlgmr.msra.gmra.mrb[0].mxu0 %v381_v52  ;;  %1636 = vmatmul.mubr.bf16.vlgmr.msra.gmra.mrb[0].mxu1 %v381_v52 }
 0x1f6   : > { %1641 = vmatprep.mubr.msk.bf16.mxu0 %vm2170_vm0, %v2168_v4  ;;  %1647 = vmatprep.mubr.msk.bf16.mxu1 %vm2170_vm0, %v2168_v4 }
 0x2c8   : > { %v576_v53 = vpop.f32.mrb[0].mxu0  ;;  %v619_v54 = vpop.f32.mrb[0].mxu1 }
 0x2c9   : > { %v578_v55 = vpop.f32.mrb[1].mxu0  ;;  %v1637_v56 = vpop.f32.mrb[1].mxu1  ;;  %v643_v59 = vmul.f32 0.17677669, %v576_v53 }
 0x2ca   : > { %v580_v57 = vpop.f32.mrb[2].mxu0  ;;  %v622_v58 = vpop.f32.mrb[2].mxu1 }
 0x2cb   : > { %v644_v60 = vmul.f32 0.17677669, %v580_v57  ;;  %v2501_v61 = vpack.c.bf16 %v622_v58, %v619_v54  ;;  %v582_v62 = vpop.f32.mrb[3].mxu0  ;;  %v1638_v63 = vpop.f32.mrb[3].mxu1  ;;  %v1862_v57 = vld [vmem:[#allocation10] sm:$0xff]  }
 0x2cc   : > { %v2503_v2 = vpack.c.bf16 %v582_v62, %v578_v55 }
 0x2cd   : > { %v2505_v3 = vpack.c.bf16 %v644_v60, %v643_v59  ;;  %1646 = vmatpush3.bf16.msra.mxu1 %v2501_v61  ;;  %v1863_v59 = vld [vmem:[#allocation10 + $0x8] sm:$0xff]  }
 0x2ce   : > { %769 = vrot.lane.b32.xlu0 %v2503_v2, %s2171_s28  ;;  %v653_v5 = vsel %vm648_vm1, %v2503_v2, 0  ;;  %1657 = vmatprep.subr.bf16.mxu1 %v2168_v4 }
 0x2cf   : > { %766 = vrot.lane.b32.xlu1 %v2505_v3, %s2171_s28  ;;  %1640 = vmatpush3.bf16.xpose.msra.mxu0 %v653_v5 }
 0x2d0   : > { %1651 = vmatprep.subr.bf16.mxu0 %v2168_v4 }
 0x2d6   : > { %1642 = vmatmul.mubr.msk.bf16.vlgmr.msra.gmra.mrb[4].mxu0 %vm648_vm1, %v2505_v3 }
 0x2d7   : > { %1653 = vmatprep.mubr.msk.bf16.mxu0 %vm2170_vm0, %v2168_v4 }
 0x340   : > { %v770_v6 = vpop.permute.xlu0 %769 }
 0x341   : > { %v775_v7 = vsel %vm648_vm1, %v770_v6, 0  ;;  %v767_v8 = vpop.permute.xlu1 %766 }
 0x342   : > { %1652 = vmatpush3.bf16.xpose.msra.mxu0 %v775_v7 }
 0x343   : > { %1663 = vmatprep.subr.bf16.mxu0 %v2168_v4 }
 0x349   : > { %1654 = vmatmul.mubr.msk.bf16.vlgmr.msra.gmra.mrb[8].mxu0 %vm648_vm1, %v767_v8 }
 0x34a   : > { %1667 = vmatprep.mubr.msk.bf16.mxu0 %vm2170_vm0, %v2168_v4  ;;  %1664 = vmatpush3.bf16.msra.mxu0 %v1864_v48 }
 0x34b   : > { %1665 = vmatprep.subr.bf16.mxu0 %v2168_v4 }
 0x34e   : > { %1666 = vmatpush3.bf16.msra.mxu0 %v1865_v49 }
 0x34f   : > { %1679 = vmatprep.subr.bf16.mxu0 %v2168_v4 }
 0x3a9   : > { %v689_v9 = vpop.f32.mrb[4].mxu0 }
 0x3aa   : > { %v1643_v10 = vpop.f32.mrb[5].mxu0  ;;  %v697_v11 = vsel %vm696_vm2, %v689_v9, -inf }
 0x3ab   : > { %698 = vmax.xlane.f32.xlu1 %v697_v11  ;;  %v692_v12 = vpop.f32.mrb[6].mxu0 }
 0x3ac   : > { %v1644_v13 = vpop.f32.mrb[7].mxu0  ;;  %v700_v14 = vsel %vm696_vm2, %v692_v12, -inf }
 0x3ad   : > { %701 = vmax.xlane.f32.xlu0 %v700_v14 }
 0x41c   : > { %v811_v15 = vpop.f32.mrb[8].mxu0 }
 0x41d   : > { %v1655_v16 = vpop.f32.mrb[9].mxu0  ;;  %v818_v17 = vsel %vm696_vm2, %v811_v15, -inf }
 0x41e   : > { %819 = vmax.xlane.f32.xlu0 %v818_v17  ;;  %v814_v18 = vpop.f32.mrb[10].mxu0 }
 0x41f   : > { %v1656_v19 = vpop.f32.mrb[11].mxu0  ;;  %v821_v20 = vsel %vm696_vm2, %v814_v18, -inf }
 0x420   : > { %822 = vmax.xlane.f32.xlu1 %v821_v20 }
 0x438   : > { %v699_v21 = vpop.xlane.xlu1 %698 }
 0x439   : > { %v703_v22 = vsub.f32 %v689_v9, %v699_v21 }
 0x43a   : > { %v702_v23 = vpop.xlane.xlu0 %701 }
 0x43b   : > { %v705_v24 = vmul.f32 1.442695, %v703_v22  ;;  %v704_v25 = vsub.f32 %v692_v12, %v702_v23 }
 0x43d   : > { %1874 = vpow2.f32 %v705_v24  ;;  %v707_v26 = vmul.f32 1.442695, %v704_v25 }
 0x43f   : > { %1876 = vpow2.f32 %v707_v26 }
 0x447   : > { %v1875_v27 = vpop.eup %1874 }
 0x448   : > { %v709_v28 = vsel %vm696_vm2, %v1875_v27, 0.0 }
 0x449   : > { %v1877_v29 = vpop.eup %1876  ;;  %710 = vadd.xlane.f32.xlu0 %v709_v28 }
 0x44a   : > { %v712_v30 = vsel %vm696_vm2, %v1877_v29, 0.0 }
 0x44b   : > { %713 = vadd.xlane.f32.xlu1 %v712_v30 }
 0x4ab   : > { %v820_v31 = vpop.xlane.xlu0 %819 }
 0x4ac   : > { %v824_v32 = vsub.f32 %v811_v15, %v820_v31 }
 0x4ad   : > { %v823_v33 = vpop.xlane.xlu1 %822 }
 0x4ae   : > { %v826_v34 = vmul.f32 1.442695, %v824_v32  ;;  %v825_v35 = vsub.f32 %v814_v18, %v823_v33 }
 0x4b0   : > { %1878 = vpow2.f32 %v826_v34  ;;  %v828_v36 = vmul.f32 1.442695, %v825_v35 }
 0x4b2   : > { %1880 = vpow2.f32 %v828_v36 }
 0x4ba   : > { %v1879_v37 = vpop.eup %1878 }
 0x4bb   : > { %v830_v38 = vsel %vm696_vm2, %v1879_v37, 0.0 }
 0x4bc   : > { %v1881_v39 = vpop.eup %1880  ;;  %831 = vadd.xlane.f32.xlu0 %v830_v38 }
 0x4bd   : > { %v833_v40 = vsel %vm696_vm2, %v1881_v39, 0.0 }
 0x4be   : > { %834 = vadd.xlane.f32.xlu1 %v833_v40 }
 0x4cf   : > { %1004 = vrot.lane.b32.xlu1 %v2503_v2, %s2172_s14 }
 0x4d2   : > { %842 = vrot.lane.b32.xlu0 %v2501_v61, %s2171_s28 }
 0x4d3   : > { %1002 = vrot.lane.b32.xlu1 %v2505_v3, %s2172_s14 }
 0x4d6   : > { %v711_v41 = vpop.xlane.xlu0 %710 }
 0x4d7   : > { %1882 = vrcp.f32 %v711_v41 }
 0x4d8   : > { %v714_v42 = vpop.xlane.xlu1 %713 }
 0x4d9   : > { %1884 = vrcp.f32 %v714_v42 }
 0x4e1   : > { %v1883_v43 = vpop.eup %1882 }
 0x4e2   : > { %v717_v45 = vmul.f32 %v1883_v43, %v1875_v27 }
 0x4e3   : > { %v1885_v44 = vpop.eup %1884 }
 0x4e4   : > { %v718_v46 = vmul.f32 %v1885_v44, %v1877_v29 }
 0x4e6   : > { %v719_v47 = vpack.c.bf16 %v718_v46, %v717_v45 }
 0x4e8   : > { %1648 = vmatmul.mubr.msk.bf16.vlgmr.msra.gmra.mrb[4].mxu1 %vm696_vm2, %v719_v47 }
 0x4e9   : > { %1659 = vmatprep.mubr.msk.bf16.mxu1 %vm2170_vm0, %v2168_v4 }
 0x549   : > { %v832_v50 = vpop.xlane.xlu0 %831 }
 0x54a   : > { %1886 = vrcp.f32 %v832_v50 }
 0x54b   : > { %v835_v51 = vpop.xlane.xlu1 %834 }
 0x54c   : > { %1888 = vrcp.f32 %v835_v51  ;;  %v1867_v51 = vld [vmem:[#allocation10 + $0x28] sm:$0xff]  }
 0x54d   : > { %v843_v52 = vpop.permute.xlu0 %842 }
 0x54e   : > { %1658 = vmatpush3.bf16.msra.mxu1 %v843_v52 }
 0x54f   : > { %1671 = vmatprep.subr.bf16.mxu1 %v2168_v4  ;;  %v1005_v9 = vpop.permute.xlu1 %1004 }
 0x550   : > { %v1010_v13 = vsel %vm648_vm1, %v1005_v9, 0 }
 0x553   : > { %v1003_v14 = vpop.permute.xlu1 %1002 }
 0x554   : > { %v1887_v53 = vpop.eup %1886 }
 0x555   : > { %v838_v55 = vmul.f32 %v1887_v53, %v1879_v37 }
 0x556   : > { %v1889_v54 = vpop.eup %1888 }
 0x557   : > { %v839_v56 = vmul.f32 %v1889_v54, %v1881_v39 }
 0x559   : > { %v840_v58 = vpack.c.bf16 %v839_v56, %v838_v55 }
 0x55b   : > { %1660 = vmatmul.mubr.msk.bf16.vlgmr.msra.gmra.mrb[8].mxu1 %vm696_vm2, %v840_v58 }
 0x55c   : > { %1672 = vmatpush3.bf16.msra.mxu1 %v1862_v57  ;;  %1675 = vmatprep.mubr.msk.bf16.mxu1 %vm2170_vm0, %v2168_v4 }
 0x55d   : > { %1673 = vmatprep.subr.bf16.mxu1 %v2168_v4 }
 0x560   : > { %1674 = vmatpush3.bf16.msra.mxu1 %v1863_v59 }
 0x561   : > { %1685 = vmatprep.subr.bf16.mxu1 %v2168_v4 }
 0x5bb   : > { %v757_v60 = vpop.f32.mrb[4].mxu1 }
 0x5bc   : > { %v1649_v62 = vpop.f32.mrb[5].mxu1 }
 0x5bd   : > { %v760_v63 = vpop.f32.mrb[6].mxu1 }
 0x5be   : > { %v764_v5 = vpack.c.bf16 %v760_v63, %v757_v60  ;;  %v1650_v6 = vpop.f32.mrb[7].mxu1 }
 0x5c0   : > { %1676 = vmatmul.mubr.msk.bf16.vlgmr.msra.gmra.mrb[12].mxu1 %vm648_vm1, %v764_v5 }
 0x5c1   : > { %1687 = vmatprep.mubr.msk.bf16.mxu1 %vm2170_vm0, %v2168_v4 }
 0x62e   : > { %v882_v7 = vpop.f32.mrb[8].mxu1 }
 0x62f   : > { %v1661_v8 = vpop.f32.mrb[9].mxu1 }
 0x630   : > { %v885_v10 = vpop.f32.mrb[10].mxu1 }
 0x631   : > { %v889_v11 = vpack.c.bf16 %v885_v10, %v882_v7  ;;  %v1662_v12 = vpop.f32.mrb[11].mxu1 }
 0x633   : > { %1668 = vmatmul.mubr.msk.bf16.vlgmr.msra.gmra.mrb[12].mxu0 %vm648_vm1, %v889_v11 }
 0x634   : > { %1680 = vmatpush3.bf16.xpose.msra.mxu0 %v1010_v13  ;;  %1681 = vmatprep.mubr.msk.bf16.mxu0 %vm2170_vm0, %v2168_v4 }
 0x635   : > { %1691 = vmatprep.subr.bf16.mxu0 %v2168_v4 }
 0x63b   : > { %1682 = vmatmul.mubr.msk.bf16.vlgmr.msra.gmra.mrb[16].mxu0 %vm648_vm1, %v1003_v14 }
 0x63c   : > { %1695 = vmatprep.mubr.msk.bf16.mxu0 %vm2170_vm0, %v2168_v4 }
 0x693   : > { %v995_v15 = vpop.f32.mrb[12].mxu1 }
 0x694   : > { %v1677_v16 = vpop.f32.mrb[13].mxu1 }
 0x695   : > { %v998_v17 = vpop.f32.mrb[14].mxu1 }
 0x696   : > { %v1678_v18 = vpop.f32.mrb[15].mxu1 }
 0x706   : > { %v939_v19 = vpop.f32.mrb[12].mxu0 }
 0x707   : > { %v2561_v20 = vadd.f32 %v995_v15, %v939_v19  ;;  %v1669_v21 = vpop.f32.mrb[13].mxu0  ;;  %v1868_v15 = vld [vmem:[#allocation10 + $0x30] sm:$0xff]  }
 0x708   : > { %v942_v22 = vpop.f32.mrb[14].mxu0 }
 0x709   : > { %v2563_v23 = vadd.f32 %v998_v17, %v942_v22  ;;  %v1670_v24 = vpop.f32.mrb[15].mxu0 }
 0x70e   : > { %v1046_v25 = vpop.f32.mrb[16].mxu0 }
 0x70f   : > { %v1683_v26 = vpop.f32.mrb[17].mxu0  ;;  %v1053_v27 = vsel %vm696_vm2, %v1046_v25, -inf }
 0x710   : > { %1054 = vmax.xlane.f32.xlu1 %v1053_v27  ;;  %v1049_v28 = vpop.f32.mrb[18].mxu0 }
 0x711   : > { %v1684_v29 = vpop.f32.mrb[19].mxu0  ;;  %v1056_v30 = vsel %vm696_vm2, %v1049_v28, -inf }
 0x712   : > { %1057 = vmax.xlane.f32.xlu0 %v1056_v30 }
 0x721   : > { %1076 = vrot.lane.b32.xlu1 %v2501_v61, %s2172_s14 }
 0x725   : > { %1182 = vrot.lane.b32.xlu1 %v2505_v3, %s2173_s8  ;;  %v1866_v3 = vld [vmem:[#allocation10 + $0x20] sm:$0xff]  }
 0x726   : > { %1692 = vmatpush3.bf16.msra.mxu0 %v1866_v3 }
 0x727   : > { %1693 = vmatprep.subr.bf16.mxu0 %v2168_v4 }
 0x72a   : > { %1694 = vmatpush3.bf16.msra.mxu0 %v1867_v51 }
 0x72b   : > { %1705 = vmatprep.subr.bf16.mxu0 %v2168_v4 }
 0x79d   : > { %v1055_v31 = vpop.xlane.xlu1 %1054 }
 0x79e   : > { %v1059_v32 = vsub.f32 %v1046_v25, %v1055_v31 }
 0x79f   : > { %v1058_v33 = vpop.xlane.xlu0 %1057 }
 0x7a0   : > { %v1061_v34 = vmul.f32 1.442695, %v1059_v32  ;;  %v1060_v35 = vsub.f32 %v1049_v28, %v1058_v33 }
 0x7a1   : > { %v1077_v36 = vpop.permute.xlu1 %1076 }
 0x7a2   : > { %1890 = vpow2.f32 %v1061_v34  ;;  %v1063_v37 = vmul.f32 1.442695, %v1060_v35  ;;  %1686 = vmatpush3.bf16.msra.mxu1 %v1077_v36  ;;  %v1574_v34 = vld [vmem:[#allocation11] ss:$0 sm:$0xff] }
 0x7a3   : > { %1699 = vmatprep.subr.bf16.mxu1 %v2168_v4 }
 0x7a4   : > { %1892 = vpow2.f32 %v1063_v37 }
 0x7ac   : > { %v1891_v38 = vpop.eup %1890 }
 0x7ad   : > { %v1065_v39 = vsel %vm696_vm2, %v1891_v38, 0.0 }
 0x7ae   : > { %v1893_v40 = vpop.eup %1892  ;;  %1066 = vadd.xlane.f32.xlu0 %v1065_v39 }
 0x7af   : > { %v1068_v41 = vsel %vm696_vm2, %v1893_v40, 0.0 }
 0x7b2   : > { %1069 = vadd.xlane.f32.xlu0 %v1068_v41 }
 0x7c8   : > { %1184 = vrot.lane.b32.xlu0 %v2503_v2, %s2173_s8  ;;  %v1183_v2 = vpop.permute.xlu1 %1182 }
 0x83b   : > { %v1067_v42 = vpop.xlane.xlu0 %1066 }
 0x83c   : > { %1894 = vrcp.f32 %v1067_v42 }
 0x83f   : > { %v1070_v43 = vpop.xlane.xlu0 %1069 }
 0x840   : > { %1896 = vrcp.f32 %v1070_v43 }
 0x843   : > { %v1185_v48 = vpop.permute.xlu0 %1184 }
 0x844   : > { %v1190_v50 = vsel %vm648_vm1, %v1185_v48, 0 }
 0x846   : > { %v1895_v44 = vpop.eup %1894 }
 0x847   : > { %v1073_v46 = vmul.f32 %v1895_v44, %v1891_v38 }
 0x84a   : > { %v1897_v45 = vpop.eup %1896 }
 0x84b   : > { %v1074_v47 = vmul.f32 %v1897_v45, %v1893_v40 }
 0x84d   : > { %v1075_v49 = vpack.c.bf16 %v1074_v47, %v1073_v46 }
 0x84f   : > { %1688 = vmatmul.mubr.msk.bf16.vlgmr.msra.gmra.mrb[16].mxu1 %vm696_vm2, %v1075_v49 }
 0x850   : > { %1700 = vmatpush3.bf16.xpose.msra.mxu1 %v1190_v50  ;;  %1701 = vmatprep.mubr.msk.bf16.mxu1 %vm2170_vm0, %v2168_v4 }
 0x851   : > { %1711 = vmatprep.subr.bf16.mxu1 %v2168_v4 }
 0x857   : > { %1702 = vmatmul.mubr.msk.bf16.vlgmr.msra.gmra.mrb[20].mxu1 %vm648_vm1, %v1183_v2 }
 0x858   : > { %1715 = vmatprep.mubr.msk.bf16.mxu1 %vm2170_vm0, %v2168_v4  ;;  %1712 = vmatpush3.bf16.msra.mxu1 %v1868_v15 }
 0x859   : > { %1713 = vmatprep.subr.bf16.mxu1 %v2168_v4 }
 0x922   : > { %v1116_v52 = vpop.f32.mrb[16].mxu1 }
 0x923   : > { %v1689_v53 = vpop.f32.mrb[17].mxu1 }
 0x924   : > { %v1119_v54 = vpop.f32.mrb[18].mxu1 }
 0x925   : > { %v1123_v55 = vpack.c.bf16 %v1119_v54, %v1116_v52  ;;  %v1690_v56 = vpop.f32.mrb[19].mxu1 }
 0x927   : > { %1696 = vmatmul.mubr.msk.bf16.vlgmr.msra.gmra.mrb[20].mxu0 %vm648_vm1, %v1123_v55 }
 0x928   : > { %1707 = vmatprep.mubr.msk.bf16.mxu0 %vm2170_vm0, %v2168_v4 }
 0x92a   : > { %v1226_v57 = vpop.f32.mrb[20].mxu1 }
 0x92b   : > { %v1703_v58 = vpop.f32.mrb[21].mxu1  ;;  %v1233_v59 = vsel %vm696_vm2, %v1226_v57, -inf }
 0x92c   : > { %1234 = vmax.xlane.f32.xlu1 %v1233_v59  ;;  %v1229_v60 = vpop.f32.mrb[22].mxu1 }
 0x92d   : > { %v1704_v62 = vpop.f32.mrb[23].mxu1  ;;  %v1236_v63 = vsel %vm696_vm2, %v1229_v60, -inf }
 0x92e   : > { %1237 = vmax.xlane.f32.xlu0 %v1236_v63 }
 0x9b9   : > { %v1235_v5 = vpop.xlane.xlu1 %1234 }
 0x9ba   : > { %v1239_v6 = vsub.f32 %v1226_v57, %v1235_v5 }
 0x9bb   : > { %v1238_v7 = vpop.xlane.xlu0 %1237 }
 0x9bc   : > { %v1241_v8 = vmul.f32 1.442695, %v1239_v6  ;;  %v1240_v9 = vsub.f32 %v1229_v60, %v1238_v7 }
 0x9be   : > { %1898 = vpow2.f32 %v1241_v8  ;;  %v1243_v10 = vmul.f32 1.442695, %v1240_v9 }
 0x9c0   : > { %1900 = vpow2.f32 %v1243_v10 }
 0x9c8   : > { %v1899_v11 = vpop.eup %1898 }
 0x9c9   : > { %v1245_v12 = vsel %vm696_vm2, %v1899_v11, 0.0 }
 0x9ca   : > { %v1901_v13 = vpop.eup %1900  ;;  %1246 = vadd.xlane.f32.xlu0 %v1245_v12 }
 0x9cb   : > { %v1248_v14 = vsel %vm696_vm2, %v1901_v13, 0.0 }
 0x9cc   : > { %1249 = vadd.xlane.f32.xlu1 %v1248_v14 }
 0x9e0   : > { %1256 = vrot.lane.b32.xlu0 %v2501_v61, %s2173_s8 }
 0x9fa   : > { %v1173_v16 = vpop.f32.mrb[20].mxu0 }
 0x9fb   : > { %v1180_v17 = vadd.f32 %v1173_v16, %v2561_v20  ;;  %v1697_v18 = vpop.f32.mrb[21].mxu0  ;;  %v1869_v20 = vld [vmem:[#allocation10 + $0x38] sm:$0xff]  }
 0x9fc   : > { %v1176_v19 = vpop.f32.mrb[22].mxu0  ;;  %1714 = vmatpush3.bf16.msra.mxu1 %v1869_v20 }
 0x9fd   : > { %v1181_v21 = vadd.f32 %v1176_v19, %v2563_v23  ;;  %v1698_v22 = vpop.f32.mrb[23].mxu0 }
 0xa57   : > { %v1247_v24 = vpop.xlane.xlu0 %1246 }
 0xa58   : > { %1902 = vrcp.f32 %v1247_v24 }
 0xa59   : > { %v1250_v25 = vpop.xlane.xlu1 %1249 }
 0xa5a   : > { %1904 = vrcp.f32 %v1250_v25 }
 0xa5b   : > { %v1257_v26 = vpop.permute.xlu0 %1256 }
 0xa5c   : > { %1706 = vmatpush3.bf16.msra.mxu0 %v1257_v26 }
 0xa62   : > { %v1903_v27 = vpop.eup %1902 }
 0xa63   : > { %v1253_v28 = vmul.f32 %v1903_v27, %v1899_v11 }
 0xa64   : > { %v1905_v61 = vpop.eup %1904 }
 0xa65   : > { %v1254_v29 = vmul.f32 %v1905_v61, %v1901_v13 }
 0xa67   : > { %v1255_v4 = vpack.c.bf16 %v1254_v29, %v1253_v28 }
 0xa69   : > { %1708 = vmatmul.mubr.msk.bf16.vlgmr.msra.gmra.mrb[24].mxu0 %vm696_vm2, %v1255_v4 }
 0xb3c   : > { %v1296_v30 = vpop.f32.mrb[24].mxu0 }
 0xb3d   : > { %v1709_v23 = vpop.f32.mrb[25].mxu0 }
 0xb3e   : > { %v1299_v31 = vpop.f32.mrb[26].mxu0 }
 0xb3f   : > { %v1303_v32 = vpack.c.bf16 %v1299_v31, %v1296_v30  ;;  %v1710_v33 = vpop.f32.mrb[27].mxu0 }
 0xb41   : > { %1716 = vmatmul.mubr.msk.bf16.vlgmr.msra.gmra.mrb[24].mxu1 %vm648_vm1, %v1303_v32 }
 0xc14   : > { %v1353_v35 = vpop.f32.mrb[24].mxu1 }
 0xc15   : > { %v1360_v36 = vadd.f32 %v1353_v35, %v1180_v17  ;;  %v1717_v37 = vpop.f32.mrb[25].mxu1 }
 0xc16   : > { %v1356_v38 = vpop.f32.mrb[26].mxu1 }
 0xc17   : > { %v1368_v39 = vadd.f32 %v1574_v34, %v1360_v36  ;;  %v1361_v40 = vadd.f32 %v1356_v38, %v1181_v21  ;;  %v1718_v41 = vpop.f32.mrb[27].mxu1 }
 0xc19   : > { %v1370_v3 = vadd.f32 %v1368_v39, %v2467_v0  ;;  %v1369_v42 = vadd.f32 %v1574_v34, %v1361_v40 }
 0xc1b   : > { %1372 = vst [vmem:[%s336_s10] sm:$0xff] %v1370_v3  ;;  %v1371_v43 = vadd.f32 %v1369_v42, %v2469_v1 }
 0xc1d   : > { %1373 = vst [vmem:[%s336_s10 + $0x8] sm:$0xff] %v1371_v43 }
 0xc1e   : > { %2089 = shalt.err (!%p2086_p8)
}
 0xc1f   : > { %s2090_s16 = scalar_lea.hbm %s2609_s12, 256  ;;  %s2094_s8 = scalar_lea.hbm %s2660_s6, 512 }
 0xc20   : > { %p2091_p6 = scmp.ne.s32.totalorder %s2609_s12, %s2090_s16  ;;  %p2095_p3 = scmp.lt.u32.totalorder %s2609_s12, %s2660_s6 }
 0xc21   : > { %p2096_p5 = scmp.lt.u32.totalorder %s2094_s8, %s2090_s16  ;;  %p2098_p7 = scmp.lt.u32.totalorder %s2090_s16, %s2609_s12 }
 0xc22   : > { %p2092_p11 = pnand %p2091_p6, %p2679_p10 }
 0xc23   : > { %p2097_p9 = por %p2096_p5, %p2095_p3 }
 0xc24   : > { %p2093_p12 = pneg %p2092_p11 }
 0xc25   : > { %p2099_p4 = por %p2098_p7, %p2097_p9 }
 0xc27   : > { %p2100_p1 = pnand %p2099_p4, %p2093_p12 }
 0xc29   : > { %2103 = shalt.err (!%p2100_p1)
}
 0xc2a   : > { %s2175_s29 = smov 128   ;;  %s2176_s17 = smov 8  }
 0xc2b   : > { %1741 = dma.vmem_to_hbm [thread:$0]  (%p2679_p10), %s2604_s9, 256, %s2609_s12, %s1375_s15, %s2175_s29, %s2175_s29, %s2176_s17  }
 0xc2c PF: > { %s1403_s30 = sand.u32 1, %s2142_s21   ;;  %p2680_p13 = scmp.ne.s32.totalorder %s2670_s18, 0 }
 0xc2d   : > { %p2681_p0 = scmp.ge.s32.totalorder %s2154_s24, 2  ;;  %s1404_s27 = scalar_lea.sflag [#allocation4], %s1403_s30 }
 0xc2f   : > { %p1764_p2 = pnand %p2681_p0, %p2680_p13 }
 0xc31   : > { %2137 = dma.done.wait (!%p1764_p2), %s1404_s27, 256  }
 0xc32   : > { %2139 = vsyncadd (!%p1764_p2), %s1404_s27, 4294967040  ;;  %p22_p8 = scmp.ge.s32.totalorder %s2372_s7, 4   ;;  %s2682_s21 = smov %s2146_s22 }
 0xc33   : > { %s2683_s22 = smov %s2150_s23  ;;  %s2684_s23 = smov %s2384_s13 }
 0xc34   : > { %s2685_s24 = smov %s2372_s7  ;;  %24 = sbr.rel (!%p22_p8) target bundleno = 8 (0x8), region = 109 }
 0xc3b   :  { %1409 = vsyncpa [#allocation3], 1 }
 0xc3c   :  { %1411 = vsyncpa [#allocation3 + $0x1], 1 }
 0xc3d   :  { %1412 = vsyncpa [#allocation6], 1 }
 0xc3e   :  { %1413 = vsyncpa [#allocation9], 1 }
 0xc3f   :  { %1414 = vsyncpa [#allocation12], 1 }
 0xc40   :  { %1415 = vsyncpa [#allocation4], 1 }
 0xc41   :  { %1417 = vsyncpa [#allocation4 + $0x1], 1 }

// kernel: encoder_forward.16
= control target key start
LH: loop header
LB: loop body
LE: loop exit
PB: predicated region body
PF: predicated region fallthrough
CT: control target
= control target key end

     0   :  { %s2626_s0 = inlined_call_operand.hbm [shape: f32[32,128], index: 0, kind: input, shape index: {}]   ;;  %s2627_s1 = inlined_call_operand.hbm [shape: f32[1,128], index: 1, kind: input, shape index: {}]   ;;  %s2628_s2 = inlined_call_operand.hbm [shape: f32[1,128], index: 2, kind: input, shape index: {}]   ;;  %s2629_s3 = inlined_call_operand.hbm [shape: bf16[128,512], index: 3, kind: input, shape index: {}]   ;;  %s2630_s4 = inlined_call_operand.hbm [shape: f32[1,512], index: 4, kind: input, shape index: {}]   ;;  %s2631_s5 = inlined_call_operand.hbm [shape: bf16[512,128], index: 5, kind: input, shape index: {}]   ;;  %s2632_s6 = inlined_call_operand.hbm [shape: f32[1,128], index: 6, kind: input, shape index: {}]   ;;  %s2633_s7 = inlined_call_operand.hbm [shape: f32[32,128], index: 7, kind: output, shape index: {}]  }
   0x1   :  { %2637 = sst [smem:[#allocation20_spill]] %s2627_s1 }
   0x2   :  { %12 = vsyncpa [#allocation3], 0 }
   0x3   :  { %14 = vsyncpa [#allocation3 + $0x1], 0 }
   0x4   :  { %15 = vsyncpa [#allocation6], 0 }
   0x5   :  { %16 = vsyncpa [#allocation9], 0 }
   0x6   :  { %17 = vsyncpa [#allocation12], 0 }
   0x7   :  { %18 = vsyncpa [#allocation4], 0 }
   0x8   :  { %20 = vsyncpa [#allocation4 + $0x1], 0  ;;  %s2138_s24 = smov 0   ;;  %s2140_s25 = smov 0  }
   0x9   :  { %s2142_s26 = smov 0   ;;  %s2144_s27 = smov 0  }
   0xa LB: > { %s2080_s28 = smov [#allocation5]   ;;  %s2159_s30 = sadd.s32 4294967295, %s2078_s27   ;;  %s2078_s27 = sphi %s2144_s27, %s2661_s27   ;;  %s2074_s26 = sphi %s2142_s26, %s2660_s26   ;;  %s2070_s25 = sphi %s2140_s25, %s2659_s25   ;;  %s2066_s24 = sphi %s2138_s24, %s2658_s24  }
   0xb   : > { %s222_s29 = sshll.u32 %s2080_s28, 4  ;;  %p1429_p0 = scmp.ge.s32.totalorder %s2078_s27, 1  ;;  %s2164_s29 = int_to_ptr.vmem [resolvable:$true] %s222_s29 }
   0xc   : > { %p2634_p1 = scmp.eq.s32.totalorder %s2159_s30, 0  ;;  %p209_p2 = scmp.lt.s32.totalorder %s2078_s27, 3 }
   0xd   : > { %s2081_s9 = smov [#allocation8]   ;;  %s2082_s12 = smov [#allocation11]  }
   0xe   : > { %p2166_p3 = pnand %p1429_p0, %p209_p2  ;;  %s243_s10 = sshll.u32 %s2081_s9, 4  ;;  %s2173_s10 = int_to_ptr.vmem [resolvable:$true] %s243_s10 }
   0xf   : > { %s267_s13 = sshll.u32 %s2082_s12, 4  ;;  %s2640_s1 = sld [smem:[#allocation20_spill]]  ;;  %s2181_s13 = int_to_ptr.vmem [resolvable:$true] %s267_s13 }
  0x10   : > { %s2638_s8 = scalar_select %p2166_p3, 1, 0 }
  0x11   : > { %p1595_p5 = pneg %p2166_p3 }
  0x13   : > { %p2177_p6 = pnand %p1595_p5, %p2634_p1 }
  0x15   : > { %s1802_s16 = scalar_lea.hbm %s2640_s1, 16  ;;  %p2191_p8 = pneg %p2177_p6 }
  0x16   : > { %p1803_p7 = scmp.ne.s32.totalorder %s2640_s1, %s1802_s16  ;;  %p1809_p11 = scmp.lt.u32.totalorder %s1802_s16, %s2640_s1 }
  0x18   : > { %p1805_p9 = pnand %p2191_p8, %p1803_p7 }
  0x1a   : > { %p1806_p10 = pneg %p1805_p9 }
  0x1c   : > { %p1811_p12 = pnand %p1809_p11, %p1806_p10 }
  0x1e   : > { %1814 = shalt.err (!%p1811_p12)
}
  0x1f   : > { %s1815_s22 = scalar_lea.vmem %s2164_s29, 16  ;;  %s1822_s23 = scalar_lea.vmem %s2164_s29, 32 }
  0x20   : > { %p1816_p13 = scmp.ne.s32.totalorder %s2164_s29, %s1815_s22  ;;  %p1823_p5 = scmp.lt.s32.totalorder %s2164_s29, %s2164_s29 }
  0x21   : > { %p1824_p7 = scmp.lt.s32.totalorder %s1822_s23, %s1815_s22 }
  0x22   : > { %p1818_p0 = pnand %p1816_p13, %p2191_p8 }
  0x23   : > { %p1825_p9 = por %p1824_p7, %p1823_p5 }
  0x24   : > { %p1819_p2 = pneg %p1818_p0 }
  0x26   : > { %p1826_p4 = pnand %p1825_p9, %p1819_p2 }
  0x28   : > { %1829 = shalt.err (!%p1826_p4)
}
  0x29   : > { %1598 = dma.hbm_to_vmem [thread:$0]  (!%p2177_p6), %s2640_s1, 16, %s2164_s29, [#allocation6]  }
  0x2a   : > { %s1830_s15 = scalar_lea.hbm %s2629_s3, 4096 }
  0x2b   : > { %p1831_p10 = scmp.ne.s32.totalorder %s2629_s3, %s1830_s15  ;;  %p1837_p4 = scmp.lt.u32.totalorder %s1830_s15, %s2629_s3 }
  0x2d   : > { %p1833_p11 = pnand %p1831_p10, %p2191_p8 }
  0x2f   : > { %p1834_p12 = pneg %p1833_p11 }
  0x31   : > { %p1839_p13 = pnand %p1837_p4, %p1834_p12 }
  0x33   : > { %1842 = shalt.err (!%p1839_p13)
}
  0x34   : > { %s1843_s29 = scalar_lea.vmem %s2173_s10, 4096  ;;  %p1851_p7 = scmp.lt.s32.totalorder %s2173_s10, %s2173_s10 }
  0x35   : > { %p1844_p0 = scmp.ne.s32.totalorder %s2173_s10, %s1843_s29  ;;  %p1852_p9 = scmp.lt.s32.totalorder %s1843_s29, %s1843_s29 }
  0x37   : > { %p1846_p2 = pnand %p1844_p0, %p2191_p8  ;;  %p1853_p10 = por %p1852_p9, %p1851_p7 }
  0x39   : > { %p1847_p5 = pneg %p1846_p2 }
  0x3b   : > { %p1854_p11 = pnand %p1853_p10, %p1847_p5 }
  0x3d   : > { %1857 = shalt.err (!%p1854_p11)
}
  0x3e   : > { %s2083_s21 = smov 256   ;;  %s2084_s22 = smov 16  }
  0x3f   : > { %1604 = dma.hbm_to_vmem [thread:$0]  (!%p2177_p6), %s2629_s3, 4096, %s2173_s10, [#allocation9], %s2083_s21, %s2083_s21, %s2084_s22  }
  0x40   : > { %s1858_s14 = scalar_lea.hbm %s2631_s5, 4096 }
  0x41   : > { %p1859_p12 = scmp.ne.s32.totalorder %s2631_s5, %s1858_s14  ;;  %p1865_p0 = scmp.lt.u32.totalorder %s1858_s14, %s2631_s5 }
  0x43   : > { %p1861_p4 = pnand %p1859_p12, %p2191_p8 }
  0x45   : > { %p1862_p13 = pneg %p1861_p4 }
  0x47   : > { %p1867_p2 = pnand %p1865_p0, %p1862_p13 }
  0x49   : > { %1870 = shalt.err (!%p1867_p2)
}
  0x4a   : > { %s1871_s10 = scalar_lea.vmem %s2181_s13, 4096  ;;  %p1879_p10 = scmp.lt.s32.totalorder %s2181_s13, %s2181_s13 }
  0x4b   : > { %p1872_p5 = scmp.ne.s32.totalorder %s2181_s13, %s1871_s10  ;;  %p1880_p11 = scmp.lt.s32.totalorder %s1871_s10, %s1871_s10 }
  0x4d   : > { %p1874_p7 = pnand %p1872_p5, %p2191_p8  ;;  %p1881_p12 = por %p1880_p11, %p1879_p10 }
  0x4f   : > { %p1875_p9 = pneg %p1874_p7 }
  0x51   : > { %p1882_p4 = pnand %p1881_p12, %p1875_p9 }
  0x53   : > { %1885 = shalt.err (!%p1882_p4)
}
  0x54   : > { %s2085_s20 = smov 64   ;;  %s2086_s29 = smov 4  }
  0x55   : > { %1610 = dma.hbm_to_vmem [thread:$0]  (!%p2177_p6), %s2631_s5, 4096, %s2181_s13, [#allocation12], %s2085_s20, %s2085_s20, %s2086_s29  }
  0x56   : > { %s2087_s23 = smov [#allocation7]   ;;  %s2088_s9 = smov [#allocation10]  }
  0x57   : > { %s233_s28 = sshll.u32 %s2087_s23, 4  ;;  %s257_s12 = sshll.u32 %s2088_s9, 4  ;;  %s234_s28 = int_to_ptr.vmem [resolvable:$true] %s233_s28  ;;  %s258_s12 = int_to_ptr.vmem [resolvable:$true] %s257_s12 }
  0x58   : > { %s1886_s16 = scalar_lea.hbm %s2628_s2, 16 }
  0x59   : > { %p1887_p13 = scmp.ne.s32.totalorder %s2628_s2, %s1886_s16  ;;  %p1893_p5 = scmp.lt.u32.totalorder %s1886_s16, %s2628_s2 }
  0x5b   : > { %p1889_p0 = pnand %p1887_p13, %p2191_p8 }
  0x5d   : > { %p1890_p2 = pneg %p1889_p0 }
  0x5f   : > { %p1895_p7 = pnand %p1893_p5, %p1890_p2 }
  0x61   : > { %1898 = shalt.err (!%p1895_p7)
}
  0x62   : > { %s1899_s13 = scalar_lea.vmem %s234_s28, 16  ;;  %s1906_s20 = scalar_lea.vmem %s234_s28, 32 }
  0x63   : > { %p1900_p9 = scmp.ne.s32.totalorder %s234_s28, %s1899_s13  ;;  %p1907_p12 = scmp.lt.s32.totalorder %s234_s28, %s234_s28 }
  0x64   : > { %p1908_p4 = scmp.lt.s32.totalorder %s1906_s20, %s1899_s13 }
  0x65   : > { %p1902_p10 = pnand %p1900_p9, %p2191_p8 }
  0x66   : > { %p1909_p1 = por %p1908_p4, %p1907_p12 }
  0x67   : > { %p1903_p11 = pneg %p1902_p10 }
  0x69   : > { %p1910_p3 = pnand %p1909_p1, %p1903_p11 }
  0x6b   : > { %1913 = shalt.err (!%p1910_p3)
}
  0x6c   : > { %1601 = dma.hbm_to_vmem [thread:$0]  (!%p2177_p6), %s2628_s2, 16, %s234_s28, [#allocation6]  }
  0x6d   : > { %s1914_s23 = scalar_lea.hbm %s2630_s4, 64 }
  0x6e   : > { %p1915_p13 = scmp.ne.s32.totalorder %s2630_s4, %s1914_s23  ;;  %p1921_p3 = scmp.lt.u32.totalorder %s1914_s23, %s2630_s4 }
  0x70   : > { %p1917_p0 = pnand %p1915_p13, %p2191_p8 }
  0x72   : > { %p1918_p1 = pneg %p1917_p0 }
  0x74   : > { %p1923_p2 = pnand %p1921_p3, %p1918_p1 }
  0x76   : > { %1926 = shalt.err (!%p1923_p2)
}
  0x77   : > { %s1927_s17 = scalar_lea.vmem %s258_s12, 64  ;;  %p1935_p10 = scmp.lt.s32.totalorder %s258_s12, %s258_s12 }
  0x78   : > { %p1928_p5 = scmp.ne.s32.totalorder %s258_s12, %s1927_s17  ;;  %p1936_p11 = scmp.lt.s32.totalorder %s1927_s17, %s1927_s17 }
  0x7a   : > { %p1930_p7 = pnand %p1928_p5, %p2191_p8  ;;  %p1937_p12 = por %p1936_p11, %p1935_p10 }
  0x7c   : > { %p1931_p9 = pneg %p1930_p7 }
  0x7e   : > { %p1938_p4 = pnand %p1937_p12, %p1931_p9 }
  0x80   : > { %1941 = shalt.err (!%p1938_p4)
}
  0x81   : > { %1607 = dma.hbm_to_vmem [thread:$0]  (!%p2177_p6), %s2630_s4, 64, %s258_s12, [#allocation9]  }
  0x82   : > { %s2089_s10 = smov [#allocation13]   ;;  %s1942_s21 = scalar_lea.hbm %s2632_s6, 16 }
  0x83   : > { %s281_s13 = sshll.u32 %s2089_s10, 4  ;;  %p1943_p13 = scmp.ne.s32.totalorder %s2632_s6, %s1942_s21  ;;  %s282_s13 = int_to_ptr.vmem [resolvable:$true] %s281_s13 }
  0x84   : > { %p1949_p3 = scmp.lt.u32.totalorder %s1942_s21, %s2632_s6 }
  0x85   : > { %p1945_p0 = pnand %p1943_p13, %p2191_p8 }
  0x87   : > { %p1946_p1 = pneg %p1945_p0 }
  0x89   : > { %p1951_p2 = pnand %p1949_p3, %p1946_p1 }
  0x8b   : > { %1954 = shalt.err (!%p1951_p2)
}
  0x8c   : > { %s1955_s12 = scalar_lea.vmem %s282_s13, 16  ;;  %s1962_s14 = scalar_lea.vmem %s282_s13, 32 }
  0x8d   : > { %p1956_p5 = scmp.ne.s32.totalorder %s282_s13, %s1955_s12  ;;  %p1963_p10 = scmp.lt.s32.totalorder %s282_s13, %s282_s13 }
  0x8e   : > { %p1964_p11 = scmp.lt.s32.totalorder %s1962_s14, %s1955_s12 }
  0x8f   : > { %p1958_p7 = pnand %p1956_p5, %p2191_p8 }
  0x90   : > { %p1965_p12 = por %p1964_p11, %p1963_p10 }
  0x91   : > { %p1959_p9 = pneg %p1958_p7 }
  0x93   : > { %p1966_p4 = pnand %p1965_p12, %p1959_p9 }
  0x95   : > { %1969 = shalt.err (!%p1966_p4)
}
  0x96   : > { %1613 = dma.hbm_to_vmem [thread:$0]  (!%p2177_p6), %s2632_s6, 16, %s282_s13, [#allocation12]  }
  0x97   : > { %s1428_s19 = sadd.s32 4294967294, %s2078_s27   ;;  %s2315_s11 = sadd.s32 1, %s2078_s27  }
  0x98   : > { %s30_s17 = ssub.s32 %s2078_s27, %s2315_s11  ;;  %s33_s28 = sadd.s32 1, %s2074_s26 }
  0x99   : > { %p31_p8 = scmp.eq.s32.totalorder %s30_s17, 0  ;;  %p40_p13 = scmp.ne.s32.totalorder %s2074_s26, %s2070_s25 }
  0x9a   : > { %p41_p0 = scmp.eq.s32.totalorder %s2078_s27, 0  ;;  %p46_p1 = scmp.ne.s32.totalorder %s2070_s25, %s2066_s24 }
  0x9b   : > { %s2326_s18 = scalar_select %p31_p8, %s2074_s26, %s33_s28  }
  0x9c   : > { %p2328_p3 = por %p41_p0, %p40_p13  ;;  %p2643_p2 = scmp.eq.s32.totalorder %s2159_s30, 0 }
  0x9d   : > { %p196_p5 = scmp.eq.s32.totalorder %s2159_s30, 1  ;;  %p202_p7 = scmp.eq.s32.totalorder %s1428_s19, 1 }
  0x9e   : > { %p2334_p6 = por %p2643_p2, %p46_p1  ;;  %p1628_p9 = scmp.lt.s32.totalorder %s2078_s27, 2 }
  0x9f   : > { %s292_s20 = sand.u32 1, %s2074_s26   ;;  %p2341_p10 = por %p196_p5, %p40_p13 }
  0xa0   : > { %p2345_p11 = por %p202_p7, %p46_p1  ;;  %s1437_s1 = sshll.u32 %s292_s20, 4 }
  0xa1   : > { %s2645_s29 = scalar_select %p2341_p10, 1, 0 }
  0xa2   : > { %s2646_s21 = scalar_select %p2345_p11, 1, 0 }
  0xa3   : > { %s1521_s22 = sshll.u32 %s2078_s27, 8  ;;  %s296_s14 = scalar_lea.vmem [#allocation2], %s1437_s1 }
  0xa4   : > { %s2353_s12 = scalar_lea.hbm %s2626_s0, %s1521_s22  ;;  %s303_s15 = sshll.u32 %s296_s14, 4  ;;  %s2355_s15 = int_to_ptr.vmem [resolvable:$true] %s303_s15 }
  0xa5   : > { %p2359_p12 = pnand %p1628_p9, %p2328_p3  ;;  %s2363_s19 = scalar_lea.sflag [#allocation3], %s292_s20 }
  0xa6   : > { %s1970_s17 = scalar_lea.hbm %s2353_s12, 256  ;;  %s1975_s10 = scalar_lea.hbm %s2626_s0, 512 }
  0xa7   : > { %p1971_p4 = scmp.ne.s32.totalorder %s2353_s12, %s1970_s17  ;;  %p1972_p8 = pneg %p2359_p12 }
  0xa8   : > { %p1976_p1 = scmp.lt.u32.totalorder %s2353_s12, %s2626_s0  ;;  %p1977_p3 = scmp.lt.u32.totalorder %s1975_s10, %s1970_s17 }
  0xa9   : > { %p1973_p13 = pnand %p1972_p8, %p1971_p4  ;;  %p1979_p5 = scmp.lt.u32.totalorder %s1970_s17, %s2353_s12 }
  0xaa   : > { %p1978_p2 = por %p1977_p3, %p1976_p1 }
  0xab   : > { %p1974_p0 = pneg %p1973_p13 }
  0xac   : > { %p1980_p7 = por %p1979_p5, %p1978_p2 }
  0xae   : > { %p1981_p9 = pnand %p1980_p7, %p1974_p0 }
  0xb0   : > { %1984 = shalt.err (!%p1981_p9)
}
  0xb1   : > { %s1985_s20 = scalar_lea.vmem %s2355_s15, 256  ;;  %s2090_s9 = smov [#allocation2]  }
  0xb2   : > { %p1986_p4 = scmp.ne.s32.totalorder %s2355_s15, %s1985_s20  ;;  %s1990_s14 = sshll.u32 %s2090_s9, 4  ;;  %s1991_s14 = int_to_ptr.vmem [resolvable:$false] %s1990_s14 }
  0xb3   : > { %s1992_s28 = scalar_lea.vmem %s1991_s14, 512  ;;  %p1993_p10 = scmp.lt.s32.totalorder %s2355_s15, %s1991_s14 }
  0xb4   : > { %p1988_p13 = pnand %p1986_p4, %p1972_p8  ;;  %p1994_p1 = scmp.lt.s32.totalorder %s1992_s28, %s1985_s20 }
  0xb6   : > { %p1989_p11 = pneg %p1988_p13  ;;  %p1995_p3 = por %p1994_p1, %p1993_p10 }
  0xb8   : > { %p1996_p2 = pnand %p1995_p3, %p1989_p11 }
  0xba   : > { %1999 = shalt.err (!%p1996_p2)
}
  0xbb   : > { %s2091_s17 = smov 128   ;;  %s2092_s1 = smov 8  }
  0xbc   : > { %1617 = dma.hbm_to_vmem [thread:$0]  (!%p2359_p12), %s2353_s12, 256, %s2355_s15, %s2363_s19, %s2091_s17, %s2091_s17, %s2092_s1  }
  0xbd   : > { %p2648_p8 = scmp.ne.s32.totalorder %s2638_s8, 0 }
  0xbe   : > { %s2394_s10 = sand.u32 (!%p2648_p8), 1, %s2070_s25  }
  0xbf   : > { %315 = sbr.rel (%p2648_p8) target bundleno = 1043 (0x413), region = 48  ;;  %s1441_s22 = sshll.u32 (!%p2648_p8), %s2394_s10, 4 }
  0xc0   : > { %s318_s23 = scalar_lea.sflag (!%p2648_p8), [#allocation3], %s2394_s10  ;;  %s2400_s20 = scalar_lea.vmem (!%p2648_p8), [#allocation2], %s1441_s22 }
  0xc6   : > { %2045 = dma.done.wait (%p2334_p6), %s318_s23, 256  }
  0xc7   : > { %2047 = vsyncadd (%p2334_p6), %s318_s23, 4294967040  ;;  %p2649_p10 = scmp.eq.s32.totalorder %s2159_s30, 0 }
  0xc9   : > { %2049 = dma.done.wait (%p2649_p10), [#allocation6], 32   ;;  %p2650_p11 = pmov %p2649_p10 }
  0xca   : > { %p2651_p12 = pmov %p2649_p10 }
  0xcb   : > { %2051 = vsyncadd (%p2650_p11), [#allocation6], 4294967264 }
  0xcc   : > { %2053 = dma.done.wait (%p2651_p12), [#allocation9], 4160   ;;  %p2652_p0 = pmov %p2649_p10 }
  0xce   : > { %2055 = vsyncadd (%p2652_p0), [#allocation9], 4294963136  ;;  %p2653_p5 = pmov %p2652_p0 }
  0xcf   : > { %p2654_p7 = pmov %p2652_p0 }
  0xd0   : > { %2057 = dma.done.wait (%p2653_p5), [#allocation12], 4112  }
  0xd1   : > { %2059 = vsyncadd (%p2654_p7), [#allocation12], 4294963184  ;;  %v379_v0 = vld [vmem:[%s2400_s20] sm:$0xff]  ;;  %v380_v1 = vld [vmem:[%s2400_s20 + $0x8] sm:$0xff]  ;;  %v2093_v36 = vmov 0   ;;  %s375_s8 = scalar_lea.vmem [#allocation14], %s1441_s22 }
  0xd2   : > { %383 = vadd.xlane.f32.xlu0 %v379_v0  ;;  %v1684_v2 = vld [vmem:[#allocation8 + $0x4] ss:$16 sps:$4 sm:$0xff]   ;;  %v1686_v3 = vld [vmem:[#allocation8 + $0xc] ss:$16 sps:$4 sm:$0xff]   ;;  %v1688_v4 = vld [vmem:[#allocation8] ss:$16 sps:$4 sm:$0xff]   ;;  %669 = vmatprep.mubr.bf16.mxu0 %v2093_v36 }
  0xd3   : > { %v1689_v5 = vld [vmem:[#allocation8 + $0x8] ss:$16 sps:$4 sm:$0xff]   ;;  %v1690_v6 = vld [vmem:[#allocation8 + $0x24] ss:$16 sps:$4 sm:$0xff]   ;;  %v1692_v7 = vld [vmem:[#allocation8 + $0x2c] ss:$16 sps:$4 sm:$0xff]   ;;  %637 = vmatprep.subr.bf16.mxu0 %v1684_v2  ;;  %680 = vmatprep.subr.bf16.mxu1 %v1686_v3 }
  0xd4   : > { %638 = vmatpush1.bf16.msra.mxu0 %v1688_v4  ;;  %681 = vmatpush1.bf16.msra.mxu1 %v1689_v5  ;;  %v1694_v16 = vld [vmem:[#allocation8 + $0x20] ss:$16 sps:$4 sm:$0xff]   ;;  %v1695_v17 = vld [vmem:[#allocation8 + $0x28] ss:$16 sps:$4 sm:$0xff]   ;;  %v1696_v18 = vld [vmem:[#allocation8 + $0x44] ss:$16 sps:$4 sm:$0xff]  }
  0xd5   : > { %639 = vmatprep.subr.bf16.mxu0 %v1690_v6  ;;  %682 = vmatprep.subr.bf16.mxu1 %v1692_v7  ;;  %v1698_v19 = vld [vmem:[#allocation8 + $0x4c] ss:$16 sps:$4 sm:$0xff]   ;;  %v1700_v20 = vld [vmem:[#allocation8 + $0x40] ss:$16 sps:$4 sm:$0xff]   ;;  %v1701_v21 = vld [vmem:[#allocation8 + $0x48] ss:$16 sps:$4 sm:$0xff]  }
  0xd6   : > { %385 = vadd.xlane.f32.xlu0 %v380_v1  ;;  %v1702_v22 = vld [vmem:[#allocation8 + $0x64] ss:$16 sps:$4 sm:$0xff]   ;;  %v1704_v23 = vld [vmem:[#allocation8 + $0x6c] ss:$16 sps:$4 sm:$0xff]   ;;  %v1706_v24 = vld [vmem:[#allocation8 + $0x60] ss:$16 sps:$4 sm:$0xff]   ;;  %712 = vmatprep.mubr.bf16.mxu1 %v2093_v36 }
  0xd7   : > { %v1707_v25 = vld [vmem:[#allocation8 + $0x68] ss:$16 sps:$4 sm:$0xff]   ;;  %v1708_v26 = vld [vmem:[#allocation8 + $0x84] ss:$16 sps:$4 sm:$0xff]   ;;  %v1710_v27 = vld [vmem:[#allocation8 + $0x8c] ss:$16 sps:$4 sm:$0xff]  }
  0xd8   : > { %640 = vmatpush1.bf16.msra.mxu0 %v1694_v16  ;;  %683 = vmatpush1.bf16.msra.mxu1 %v1695_v17  ;;  %v1712_v28 = vld [vmem:[#allocation8 + $0x80] ss:$16 sps:$4 sm:$0xff]   ;;  %v1713_v29 = vld [vmem:[#allocation8 + $0x88] ss:$16 sps:$4 sm:$0xff]   ;;  %v1714_v30 = vld [vmem:[#allocation8 + $0xa4] ss:$16 sps:$4 sm:$0xff]  }
  0xd9   : > { %641 = vmatprep.subr.bf16.mxu0 %v1696_v18  ;;  %684 = vmatprep.subr.bf16.mxu1 %v1698_v19  ;;  %v1716_v31 = vld [vmem:[#allocation8 + $0xac] ss:$16 sps:$4 sm:$0xff]   ;;  %v1718_v32 = vld [vmem:[#allocation8 + $0xa0] ss:$16 sps:$4 sm:$0xff]   ;;  %v1719_v33 = vld [vmem:[#allocation8 + $0xa8] ss:$16 sps:$4 sm:$0xff]  }
  0xda   : > { %v1720_v34 = vld [vmem:[#allocation8 + $0xc4] ss:$16 sps:$4 sm:$0xff]   ;;  %v1722_v35 = vld [vmem:[#allocation8 + $0xcc] ss:$16 sps:$4 sm:$0xff]   ;;  %v1724_v37 = vld [vmem:[#allocation8 + $0xc0] ss:$16 sps:$4 sm:$0xff]  }
  0xdb   : > { %v1725_v38 = vld [vmem:[#allocation8 + $0xc8] ss:$16 sps:$4 sm:$0xff]   ;;  %v1726_v39 = vld [vmem:[#allocation8 + $0xe4] ss:$16 sps:$4 sm:$0xff]   ;;  %v1728_v40 = vld [vmem:[#allocation8 + $0xec] ss:$16 sps:$4 sm:$0xff]  }
  0xdc   : > { %642 = vmatpush1.bf16.msra.mxu0 %v1700_v20  ;;  %685 = vmatpush1.bf16.msra.mxu1 %v1701_v21  ;;  %v1730_v41 = vld [vmem:[#allocation8 + $0xe0] ss:$16 sps:$4 sm:$0xff]   ;;  %v1731_v42 = vld [vmem:[#allocation8 + $0xe8] ss:$16 sps:$4 sm:$0xff]   ;;  %v1449_v51 = vld [vmem:[#allocation5] ss:$0 sm:$0xff] }
  0xdd   : > { %643 = vmatprep.subr.bf16.mxu0 %v1702_v22  ;;  %686 = vmatprep.subr.bf16.mxu1 %v1704_v23  ;;  %v1450_v55 = vld [vmem:[#allocation7] ss:$0 sm:$0xff]  ;;  %v1732_v60 = vld [vmem:[#allocation11 + $0x40] sm:$0xff]   ;;  %v1738_v2 = vld [vmem:[#allocation11 + $0x8] sm:$0xff]   ;;  %s1298_s13 = sshll.u32 %s375_s8, 4  ;;  %s1522_s12 = sshll.u32 %s2159_s30, 8  ;;  %s2576_s13 = int_to_ptr.vmem [resolvable:$true] %s1298_s13 }
  0xde   : > { %v1733_v61 = vld [vmem:[#allocation11 + $0xc0] sm:$0xff]   ;;  %v1739_v3 = vld [vmem:[#allocation11 + $0x88] sm:$0xff]   ;;  %v1740_v4 = vld [vmem:[#allocation11 + $0x50] sm:$0xff]   ;;  %s2581_s19 = scalar_lea.hbm %s2633_s7, %s1522_s12  ;;  %s1285_s9 = scalar_lea.sflag [#allocation4], %s2394_s10 }
  0xdf   : > { %v1734_v62 = vld [vmem:[#allocation11] sm:$0xff]   ;;  %v1741_v5 = vld [vmem:[#allocation11 + $0xd0] sm:$0xff]   ;;  %v1752_v16 = vld [vmem:[#allocation11 + $0x68] sm:$0xff]   ;;  %s2000_s14 = scalar_lea.vmem %s2576_s13, 256  ;;  %p2655_p9 = scmp.ne.s32.totalorder %s2645_s29, 0 }
  0xe0   : > { %644 = vmatpush1.bf16.msra.mxu0 %v1706_v24  ;;  %687 = vmatpush1.bf16.msra.mxu1 %v1707_v25  ;;  %v1735_v63 = vld [vmem:[#allocation11 + $0x80] sm:$0xff]   ;;  %v1742_v6 = vld [vmem:[#allocation11 + $0x10] sm:$0xff]   ;;  %v1753_v17 = vld [vmem:[#allocation11 + $0xe8] sm:$0xff]   ;;  %p2001_p6 = scmp.ne.s32.totalorder %s2576_s13, %s2000_s14  ;;  %s2095_s30 = smov [#allocation14]  }
  0xe1   : > { %645 = vmatprep.subr.bf16.mxu0 %v1708_v26  ;;  %688 = vmatprep.subr.bf16.mxu1 %v1710_v27  ;;  %v1743_v7 = vld [vmem:[#allocation11 + $0x90] sm:$0xff]   ;;  %v1754_v18 = vld [vmem:[#allocation11 + $0x28] sm:$0xff]   ;;  %v1760_v24 = vld [vmem:[#allocation11 + $0x78] sm:$0xff]   ;;  %s2004_s28 = sshll.u32 %s2095_s30, 4  ;;  %s2005_s28 = int_to_ptr.vmem [resolvable:$false] %s2004_s28 }
  0xe2   : > { %v1755_v19 = vld [vmem:[#allocation11 + $0xa8] sm:$0xff]   ;;  %v1756_v20 = vld [vmem:[#allocation11 + $0x70] sm:$0xff]   ;;  %v1761_v25 = vld [vmem:[#allocation11 + $0xf8] sm:$0xff]   ;;  %p2002_p4 = pnand %p2001_p6, %p2655_p9  ;;  %s2006_s17 = scalar_lea.vmem %s2005_s28, 512 }
  0xe3   : > { %v1757_v21 = vld [vmem:[#allocation11 + $0xf0] sm:$0xff]   ;;  %v1762_v26 = vld [vmem:[#allocation11 + $0x38] sm:$0xff]   ;;  %p2007_p1 = scmp.lt.s32.totalorder %s2576_s13, %s2005_s28  ;;  %p2008_p3 = scmp.lt.s32.totalorder %s2006_s17, %s2000_s14 }
  0xe4   : > { %646 = vmatpush1.bf16.msra.mxu0 %v1712_v28  ;;  %689 = vmatpush1.bf16.msra.mxu1 %v1713_v29  ;;  %v1758_v22 = vld [vmem:[#allocation11 + $0x30] sm:$0xff]   ;;  %v1763_v27 = vld [vmem:[#allocation11 + $0xb8] sm:$0xff]   ;;  %v457_v28 = vlaneseq  ;;  %p2003_p13 = pneg %p2002_p4 }
  0xe5   : > { %647 = vmatprep.subr.bf16.mxu0 %v1714_v30  ;;  %690 = vmatprep.subr.bf16.mxu1 %v1716_v31  ;;  %v1759_v23 = vld [vmem:[#allocation11 + $0xb0] sm:$0xff]   ;;  %p2009_p2 = por %p2008_p3, %p2007_p1 }
  0xe6   : > { %v458_v29 = vshrl.u32 %v457_v28, 7 }
  0xe7   : > { %p2010_p8 = pnand %p2009_p2, %p2003_p13 }
  0xe8   : > { %648 = vmatpush1.bf16.msra.mxu0 %v1718_v32  ;;  %691 = vmatpush1.bf16.msra.mxu1 %v1719_v33  ;;  %v459_v30 = vsub.s32 0, %v458_v29  ;;  %v467_v31 = vsub.s32 2, %v458_v29  ;;  %v455_v32 = vld [vmem:[#allocation10] sm:$0xf]  ;;  %v463_v33 = vsub.s32 1, %v458_v29 }
  0xe9   : > { %649 = vmatprep.subr.bf16.mxu0 %v1720_v34  ;;  %692 = vmatprep.subr.bf16.mxu1 %v1722_v35  ;;  %v471_v34 = vsub.s32 3, %v458_v29 }
  0xea   : > { %v460_v35 = vrot.slane %v455_v32, %v459_v30  ;;  %v468_v36 = vrot.slane %v455_v32, %v467_v31 }
  0xec   : > { %650 = vmatpush1.bf16.msra.mxu0 %v1724_v37  ;;  %693 = vmatpush1.bf16.msra.mxu1 %v1725_v38  ;;  %v464_v37 = vrot.slane %v455_v32, %v463_v33  ;;  %v472_v38 = vrot.slane %v455_v32, %v471_v34 }
  0xed   : > { %651 = vmatprep.subr.bf16.mxu0 %v1726_v39  ;;  %694 = vmatprep.subr.bf16.mxu1 %v1728_v40 }
  0xf0   : > { %652 = vmatpush1.bf16.msra.mxu0 %v1730_v41  ;;  %695 = vmatpush1.bf16.msra.mxu1 %v1731_v42 }
  0xf1   : > { %1523 = vmatprep.subr.bf16.mxu0 %v1732_v60  ;;  %1545 = vmatprep.subr.bf16.mxu1 %v1733_v61 }
 0x15f   : > { %v384_v8 = vpop.xlane.xlu0 %383 }
 0x160   : > { %v388_v9 = vmul.f32 0.0078125, %v384_v8  ;;  %v1744_v8 = vld [vmem:[#allocation11 + $0x58] sm:$0xff]  }
 0x162   : > { %v2420_v10 = vsub.f32 %v379_v0, %v388_v9  ;;  %v1736_v0 = vld [vmem:[#allocation11 + $0x48] sm:$0xff]   ;;  %v1745_v9 = vld [vmem:[#allocation11 + $0xd8] sm:$0xff]  }
 0x163   : > { %v386_v11 = vpop.xlane.xlu0 %385 }
 0x164   : > { %v389_v12 = vmul.f32 0.0078125, %v386_v11  ;;  %v392_v13 = vmul.f32 %v2420_v10, %v2420_v10  ;;  %v1747_v11 = vld [vmem:[#allocation11 + $0x98] sm:$0xff]  }
 0x166   : > { %v2424_v14 = vsub.f32 %v380_v1, %v389_v12  ;;  %394 = vadd.xlane.f32.xlu1 %v392_v13  ;;  %v1737_v1 = vld [vmem:[#allocation11 + $0xc8] sm:$0xff]   ;;  %v1748_v12 = vld [vmem:[#allocation11 + $0x60] sm:$0xff]  }
 0x167   : > { %v1749_v13 = vld [vmem:[#allocation11 + $0xe0] sm:$0xff]  }
 0x168   : > { %v393_v15 = vmul.f32 %v2424_v14, %v2424_v14 }
 0x16a   : > { %396 = vadd.xlane.f32.xlu1 %v393_v15  ;;  %v1751_v15 = vld [vmem:[#allocation11 + $0xa0] sm:$0xff]  }
 0x1f3   : > { %v395_v43 = vpop.xlane.xlu1 %394 }
 0x1f4   : > { %v398_v44 = vmul.f32 0.0078125, %v395_v43 }
 0x1f6   : > { %v400_v45 = vadd.f32 1e-05, %v398_v44 }
 0x1f7   : > { %v397_v46 = vpop.xlane.xlu1 %396 }
 0x1f8   : > { %1764 = vrsqrt.f32 %v400_v45  ;;  %v399_v47 = vmul.f32 0.0078125, %v397_v46 }
 0x1fa   : > { %v401_v48 = vadd.f32 1e-05, %v399_v47 }
 0x1fc   : > { %1766 = vrsqrt.f32 %v401_v48 }
 0x202   : > { %v1765_v49 = vpop.eup %1764 }
 0x203   : > { %v404_v50 = vmul.f32 %v1765_v49, %v2420_v10  ;;  %v1746_v10 = vld [vmem:[#allocation11 + $0x18] sm:$0xff]  }
 0x205   : > { %v412_v54 = vmul.f32 %v1449_v51, %v404_v50 }
 0x206   : > { %v1767_v52 = vpop.eup %1766 }
 0x207   : > { %v405_v53 = vmul.f32 %v1767_v52, %v2424_v14  ;;  %v420_v57 = vadd.f32 %v1450_v55, %v412_v54  ;;  %v1750_v14 = vld [vmem:[#allocation11 + $0x20] sm:$0xff]  }
 0x209   : > { %v413_v56 = vmul.f32 %v1449_v51, %v405_v53 }
 0x20b   : > { %v421_v58 = vadd.f32 %v1450_v55, %v413_v56 }
 0x20d   : > { %v422_v59 = vpack.c.bf16 %v421_v58, %v420_v57 }
 0x20f   : > { %670 = vmatmul.mubr.bf16.vlgmr.msra.gmra.mrb[0].mxu0 %v422_v59  ;;  %713 = vmatmul.mubr.bf16.vlgmr.msra.gmra.mrb[0].mxu1 %v422_v59 }
 0x210   : > { %1524 = vmatpush3.bf16.msra.mxu0 %v1734_v62  ;;  %1546 = vmatpush3.bf16.msra.mxu1 %v1735_v63 }
 0x211   : > { %1525 = vmatprep.subr.bf16.mxu0 %v1736_v0  ;;  %1547 = vmatprep.subr.bf16.mxu1 %v1737_v1 }
 0x214   : > { %1526 = vmatpush3.bf16.msra.mxu0 %v1738_v2  ;;  %1548 = vmatpush3.bf16.msra.mxu1 %v1739_v3 }
 0x215   : > { %1527 = vmatprep.subr.bf16.mxu0 %v1740_v4  ;;  %1549 = vmatprep.subr.bf16.mxu1 %v1741_v5 }
 0x218   : > { %1528 = vmatpush3.bf16.msra.mxu0 %v1742_v6  ;;  %1550 = vmatpush3.bf16.msra.mxu1 %v1743_v7 }
 0x219   : > { %1529 = vmatprep.subr.bf16.mxu0 %v1744_v8  ;;  %1551 = vmatprep.subr.bf16.mxu1 %v1745_v9 }
 0x21c   : > { %1530 = vmatpush3.bf16.msra.mxu0 %v1746_v10  ;;  %1552 = vmatpush3.bf16.msra.mxu1 %v1747_v11 }
 0x21d   : > { %1531 = vmatprep.subr.bf16.mxu0 %v1748_v12  ;;  %1553 = vmatprep.subr.bf16.mxu1 %v1749_v13 }
 0x220   : > { %1532 = vmatpush3.bf16.msra.mxu0 %v1750_v14  ;;  %1554 = vmatpush3.bf16.msra.mxu1 %v1751_v15 }
 0x221   : > { %1533 = vmatprep.subr.bf16.mxu0 %v1752_v16  ;;  %1555 = vmatprep.subr.bf16.mxu1 %v1753_v17 }
 0x224   : > { %1534 = vmatpush3.bf16.msra.mxu0 %v1754_v18  ;;  %1556 = vmatpush3.bf16.msra.mxu1 %v1755_v19 }
 0x225   : > { %1535 = vmatprep.subr.bf16.mxu0 %v1756_v20  ;;  %1557 = vmatprep.subr.bf16.mxu1 %v1757_v21 }
 0x228   : > { %1536 = vmatpush3.bf16.msra.mxu0 %v1758_v22  ;;  %1558 = vmatpush3.bf16.msra.mxu1 %v1759_v23 }
 0x229   : > { %1537 = vmatprep.subr.bf16.mxu0 %v1760_v24  ;;  %1559 = vmatprep.subr.bf16.mxu1 %v1761_v25 }
 0x22c   : > { %1538 = vmatpush3.bf16.msra.mxu0 %v1762_v26  ;;  %1560 = vmatpush3.bf16.msra.mxu1 %v1763_v27 }
 0x2e2   : > { %v671_v39 = vpop.f32.mrb[0].mxu0  ;;  %v714_v40 = vpop.f32.mrb[0].mxu1 }
 0x2e3   : > { %v672_v41 = vadd.f32 %v671_v39, %v460_v35  ;;  %v715_v42 = vadd.f32 %v714_v40, %v468_v36  ;;  %v673_v43 = vpop.f32.mrb[1].mxu0  ;;  %v716_v44 = vpop.f32.mrb[1].mxu1 }
 0x2e4   : > { %v2430_v45 = vadd.f32 %v673_v43, %v464_v37  ;;  %v2432_v46 = vadd.f32 %v716_v44, %v472_v38  ;;  %v675_v47 = vpop.f32.mrb[2].mxu0  ;;  %v718_v48 = vpop.f32.mrb[2].mxu1 }
 0x2e5   : > { %v2434_v49 = vmul.f32 0.70710677, %v672_v41  ;;  %v2436_v50 = vmul.f32 0.70710677, %v715_v42  ;;  %v677_v56 = vpop.f32.mrb[3].mxu0  ;;  %v720_v60 = vpop.f32.mrb[3].mxu1  ;;  %v2448_v1 = vadd.f32 %v675_v47, %v460_v35  ;;  %v2453_v4 = vadd.f32 %v718_v48, %v468_v36 }
 0x2e6   : > { %v2439_v51 = vmul.f32 0.70710677, %v2430_v45  ;;  %v2445_v55 = vmul.f32 0.70710677, %v2432_v46  ;;  %v2455_v6 = vadd.f32 %v677_v56, %v464_v37  ;;  %v2465_v16 = vadd.f32 %v720_v60, %v472_v38 }
 0x2e7   : > { %v755_v52 = vand.u32 2147483647, %v2434_v49  ;;  %v757_v53 = vand.u32 2147483647, %v2436_v50  ;;  %v2451_v3 = vmul.f32 0.70710677, %v2448_v1 }
 0x2e8   : > { %v756_v54 = vand.u32 2147483647, %v2439_v51  ;;  %v758_v63 = vand.u32 2147483647, %v2445_v55  ;;  %v2459_v9 = vmul.f32 0.70710677, %v2453_v4 }
 0x2e9   : > { %v763_v57 = vmul.f32 0.3275911, %v755_v52  ;;  %v765_v58 = vmul.f32 0.3275911, %v757_v53  ;;  %v759_v7 = vand.u32 2147483647, %v2451_v3 }
 0x2ea   : > { %v764_v59 = vmul.f32 0.3275911, %v756_v54  ;;  %v766_v2 = vmul.f32 0.3275911, %v758_v63  ;;  %v859_v8 = vsub.f32 0.0, %v755_v52  ;;  %v861_v10 = vsub.f32 0.0, %v757_v53 }
 0x2eb   : > { %v771_v61 = vadd.f32 1.0, %v763_v57  ;;  %v773_v62 = vadd.f32 1.0, %v765_v58  ;;  %v767_v11 = vmul.f32 0.3275911, %v759_v7  ;;  %v860_v12 = vsub.f32 0.0, %v756_v54 }
 0x2ec   : > { %v772_v0 = vadd.f32 1.0, %v764_v59  ;;  %v774_v5 = vadd.f32 1.0, %v766_v2  ;;  %v761_v13 = vand.u32 2147483647, %v2459_v9  ;;  %v2463_v14 = vmul.f32 0.70710677, %v2455_v6 }
 0x2ed   : > { %1768 = vrcp.f32 %v771_v61  ;;  %v775_v15 = vadd.f32 1.0, %v767_v11  ;;  %v867_v17 = vmul.f32 %v859_v8, %v755_v52  ;;  %v869_v21 = vmul.f32 %v861_v10, %v757_v53 }
 0x2ee   : > { %1770 = vrcp.f32 %v773_v62  ;;  %v769_v18 = vmul.f32 0.3275911, %v761_v13  ;;  %v2468_v19 = vand.u32 2147483647, %v2463_v14  ;;  %v862_v22 = vsub.f32 0.0, %v758_v63 }
 0x2ef   : > { %1772 = vrcp.f32 %v772_v0  ;;  %v868_v25 = vmul.f32 %v860_v12, %v756_v54  ;;  %v2476_v28 = vmul.f32 0.5, %v672_v41  ;;  %v2478_v29 = vmul.f32 0.5, %v715_v42 }
 0x2f0   : > { %1774 = vrcp.f32 %v774_v5  ;;  %v777_v26 = vadd.f32 1.0, %v769_v18  ;;  %v768_v27 = vmul.f32 0.3275911, %v2468_v19  ;;  %v2482_v31 = vmul.f32 0.70710677, %v2465_v16 }
 0x2f1   : > { %1776 = vrcp.f32 %v775_v15  ;;  %v875_v33 = vmul.f32 1.442695, %v867_v17  ;;  %v879_v37 = vmul.f32 1.442695, %v869_v21  ;;  %v870_v38 = vmul.f32 %v862_v22, %v758_v63 }
 0x2f2   : > { %1778 = vrcp.f32 %v777_v26  ;;  %v776_v34 = vadd.f32 1.0, %v768_v27  ;;  %v2487_v39 = vand.u32 2147483647, %v2482_v31  ;;  %v877_v42 = vmul.f32 1.442695, %v868_v25 }
 0x2f3   : > { %v863_v43 = vsub.f32 0.0, %v759_v7  ;;  %v865_v48 = vsub.f32 0.0, %v761_v13  ;;  %v881_v58 = vmul.f32 1.442695, %v870_v38  ;;  %vm739_vm0 = vcmp.ge.f32.partialorder %v2434_v49, 0.0 }
 0x2f4   : > { %1780 = vrcp.f32 %v776_v34  ;;  %v770_v52 = vmul.f32 0.3275911, %v2487_v39  ;;  %v864_v17 = vsub.f32 0.0, %v2468_v19  ;;  %vm741_vm1 = vcmp.ge.f32.partialorder %v2436_v50, 0.0 }
 0x2f5   : > { %1782 = vpow2.f32 %v875_v33  ;;  %v871_v2 = vmul.f32 %v863_v43, %v759_v7  ;;  %v873_v5 = vmul.f32 %v865_v48, %v761_v13  ;;  %vm740_vm2 = vcmp.ge.f32.partialorder %v2439_v51, 0.0 }
 0x2f6   : > { %1784 = vpow2.f32 %v879_v37  ;;  %v778_v59 = vadd.f32 1.0, %v770_v52  ;;  %vm743_vm3 = vcmp.ge.f32.partialorder %v2451_v3, 0.0  ;;  %vm745_vm4 = vcmp.ge.f32.partialorder %v2459_v9, 0.0 }
 0x2f7   : > { %v2470_v20 = vpop.eup %1768  ;;  %1786 = vpow2.f32 %v877_v42  ;;  %v883_v25 = vmul.f32 1.442695, %v871_v2  ;;  %v887_v27 = vmul.f32 1.442695, %v873_v5  ;;  %vm742_vm5 = vcmp.ge.f32.partialorder %v2445_v55, 0.0 }
 0x2f8   : > { %v2472_v23 = vpop.eup %1770  ;;  %v787_v24 = vmul.f32 1.0614054, %v2470_v20  ;;  %1788 = vrcp.f32 %v778_v59  ;;  %vm744_vm6 = vcmp.ge.f32.partialorder %v2463_v14, 0.0  ;;  %vm746_vm7 = vcmp.ge.f32.partialorder %v2482_v31, 0.0 }
 0x2f9   : > { %v789_v30 = vmul.f32 1.0614054, %v2472_v23  ;;  %v2484_v35 = vpop.eup %1772  ;;  %1790 = vpow2.f32 %v881_v58  ;;  %v730_v31 = vmul.f32 0.5, %v2465_v16 }
 0x2fa   : > { %v795_v32 = vadd.f32 -1.4531521, %v787_v24  ;;  %v788_v41 = vmul.f32 1.0614054, %v2484_v35  ;;  %v2491_v44 = vpop.eup %1774  ;;  %1792 = vpow2.f32 %v883_v25 }
 0x2fb   : > { %v797_v36 = vadd.f32 -1.4531521, %v789_v30  ;;  %v790_v56 = vmul.f32 1.0614054, %v2491_v44  ;;  %v2498_v63 = vpop.eup %1776  ;;  %1794 = vpow2.f32 %v887_v27 }
 0x2fc   : > { %v803_v40 = vmul.f32 %v2470_v20, %v795_v32  ;;  %v796_v54 = vadd.f32 -1.4531521, %v788_v41  ;;  %v791_v12 = vmul.f32 1.0614054, %v2498_v63  ;;  %v2505_v18 = vpop.eup %1778  ;;  %v866_v41 = vsub.f32 0.0, %v2487_v39 }
 0x2fd   : > { %v805_v47 = vmul.f32 %v2472_v23, %v797_v36  ;;  %v798_v62 = vadd.f32 -1.4531521, %v790_v56  ;;  %v793_v26 = vmul.f32 1.0614054, %v2505_v18 }
 0x2fe   : > { %v811_v53 = vadd.f32 1.4214138, %v803_v40  ;;  %v804_v61 = vmul.f32 %v2484_v35, %v796_v54  ;;  %v799_v22 = vadd.f32 -1.4531521, %v791_v12  ;;  %v2513_v36 = vpop.eup %1780  ;;  %v872_v40 = vmul.f32 %v864_v17, %v2468_v19 }
 0x2ff   : > { %v813_v57 = vadd.f32 1.4214138, %v805_v47  ;;  %v806_v11 = vmul.f32 %v2491_v44, %v798_v62  ;;  %v801_v38 = vadd.f32 -1.4531521, %v793_v26  ;;  %v1783_v42 = vpop.eup %1782  ;;  %v792_v56 = vmul.f32 1.0614054, %v2513_v36 }
 0x300   : > { %v819_v60 = vmul.f32 %v2470_v20, %v811_v53  ;;  %v812_v10 = vadd.f32 1.4214138, %v804_v61  ;;  %v807_v34 = vmul.f32 %v2498_v63, %v799_v22  ;;  %v1785_v53 = vpop.eup %1784  ;;  %v2094_v61 = vmov -1.0  }
 0x301   : > { %v821_v0 = vmul.f32 %v2472_v23, %v813_v57  ;;  %v814_v13 = vadd.f32 1.4214138, %v806_v11  ;;  %v809_v54 = vmul.f32 %v2505_v18, %v801_v38  ;;  %v1787_v57 = vpop.eup %1786  ;;  %v747_v62 = vsel %vm739_vm0, 1.0, %v2094_v61 }
 0x302   : > { %v827_v8 = vadd.f32 -0.28449672, %v819_v60  ;;  %v820_v7 = vmul.f32 %v2484_v35, %v812_v10  ;;  %v815_v52 = vadd.f32 1.4214138, %v807_v34  ;;  %v2525_v60 = vpop.eup %1788  ;;  %v800_v2 = vadd.f32 -1.4531521, %v792_v56 }
 0x303   : > { %v829_v15 = vadd.f32 -0.28449672, %v821_v0  ;;  %v822_v33 = vmul.f32 %v2491_v44, %v814_v13  ;;  %v817_v0 = vadd.f32 1.4214138, %v809_v54  ;;  %v885_v10 = vmul.f32 1.442695, %v872_v40  ;;  %v1791_v11 = vpop.eup %1790 }
 0x304   : > { %v835_v21 = vmul.f32 %v2470_v20, %v827_v8  ;;  %v828_v32 = vadd.f32 -0.28449672, %v820_v7  ;;  %v749_v12 = vsel %vm741_vm1, 1.0, %v2094_v61  ;;  %v808_v17 = vmul.f32 %v2513_v36, %v800_v2  ;;  %v1793_v38 = vpop.eup %1792 }
 0x305   : > { %v837_v24 = vmul.f32 %v2472_v23, %v829_v15  ;;  %v830_v48 = vadd.f32 -0.28449672, %v822_v33  ;;  %v825_v15 = vmul.f32 %v2505_v18, %v817_v0  ;;  %v794_v49 = vmul.f32 1.0614054, %v2525_v60 }
 0x306   : > { %v843_v30 = vadd.f32 0.2548296, %v835_v21  ;;  %v836_v47 = vmul.f32 %v2484_v35, %v828_v32  ;;  %v816_v25 = vadd.f32 1.4214138, %v808_v17  ;;  %1796 = vpow2.f32 %v885_v10 }
 0x307   : > { %v845_v37 = vadd.f32 0.2548296, %v837_v24  ;;  %v838_v59 = vmul.f32 %v2491_v44, %v830_v48  ;;  %v833_v24 = vadd.f32 -0.28449672, %v825_v15  ;;  %v748_v51 = vsel %vm740_vm2, 1.0, %v2094_v61 }
 0x308   : > { %v851_v43 = vmul.f32 %v2470_v20, %v843_v30  ;;  %v844_v58 = vadd.f32 0.2548296, %v836_v47  ;;  %v823_v20 = vmul.f32 %v2498_v63, %v815_v52  ;;  %v824_v32 = vmul.f32 %v2513_v36, %v816_v25  ;;  %v1795_v52 = vpop.eup %1794 }
 0x309   : > { %v853_v19 = vmul.f32 %v2472_v23, %v845_v37  ;;  %v874_v23 = vmul.f32 %v866_v41, %v2487_v39  ;;  %v846_v13 = vadd.f32 0.2548296, %v838_v59  ;;  %v802_v39 = vadd.f32 -1.4531521, %v794_v49 }
 0x30a   : > { %v891_v5 = vmul.f32 %v1783_v42, %v851_v43  ;;  %v831_v8 = vadd.f32 -0.28449672, %v823_v20  ;;  %v852_v7 = vmul.f32 %v2484_v35, %v844_v58  ;;  %v841_v30 = vmul.f32 %v2505_v18, %v833_v24 }
 0x30b   : > { %v893_v21 = vmul.f32 %v1785_v53, %v853_v19  ;;  %v889_v50 = vmul.f32 1.442695, %v874_v23  ;;  %v810_v33 = vmul.f32 %v2525_v60, %v802_v39  ;;  %v854_v40 = vmul.f32 %v2491_v44, %v846_v13 }
 0x30c   : > { %v839_v22 = vmul.f32 %v2498_v63, %v831_v8  ;;  %v899_v26 = vsub.f32 1.0, %v891_v5  ;;  %v892_v35 = vmul.f32 %v1787_v57, %v852_v7  ;;  %v849_v41 = vadd.f32 0.2548296, %v841_v30 }
 0x30d   : > { %v901_v34 = vsub.f32 1.0, %v893_v21  ;;  %v832_v42 = vadd.f32 -0.28449672, %v824_v32  ;;  %v818_v43 = vadd.f32 1.4214138, %v810_v33  ;;  %1798 = vpow2.f32 %v889_v50 }
 0x30e   : > { %v847_v27 = vadd.f32 0.2548296, %v839_v22  ;;  %v907_v47 = vmul.f32 %v899_v26, %v747_v62  ;;  %v751_v53 = vsel %vm743_vm3, 1.0, %v2094_v61  ;;  %v857_v54 = vmul.f32 %v2505_v18, %v849_v41 }
 0x30f   : > { %v840_v3 = vmul.f32 %v2513_v36, %v832_v42  ;;  %v909_v56 = vmul.f32 %v901_v34, %v749_v12  ;;  %v900_v57 = vsub.f32 1.0, %v892_v35  ;;  %v894_v19 = vmul.f32 %v1791_v11, %v854_v40 }
 0x310   : > { %v855_v37 = vmul.f32 %v2498_v63, %v847_v27  ;;  %v826_v63 = vmul.f32 %v2525_v60, %v818_v43  ;;  %v897_v58 = vmul.f32 %v1795_v52, %v857_v54  ;;  %v915_v62 = vadd.f32 1.0, %v907_v47  ;;  %v1797_v23 = vpop.eup %1796 }
 0x311   : > { %v848_v59 = vadd.f32 0.2548296, %v840_v3  ;;  %v727_v0 = vmul.f32 0.5, %v2448_v1  ;;  %v753_v18 = vsel %vm745_vm4, 1.0, %v2094_v61  ;;  %v917_v12 = vadd.f32 1.0, %v909_v56 }
 0x312   : > { %v895_v48 = vmul.f32 %v1793_v38, %v855_v37  ;;  %v834_v20 = vadd.f32 -0.28449672, %v826_v63  ;;  %v905_v5 = vsub.f32 1.0, %v897_v58  ;;  %v908_v9 = vmul.f32 %v900_v57, %v748_v51 }
 0x313   : > { %v856_v8 = vmul.f32 %v2513_v36, %v848_v59  ;;  %v902_v15 = vsub.f32 1.0, %v894_v19  ;;  %v923_v1 = vmul.f32 %v915_v62, %v2476_v28  ;;  %v750_v7 = vsel %vm742_vm5, 1.0, %v2094_v61  ;;  %v1800_v62 = vld [vmem:[%s2400_s20] sm:$0xff] }
 0x314   : > { %v903_v44 = vsub.f32 1.0, %v895_v48  ;;  %v842_v10 = vmul.f32 %v2525_v60, %v834_v20  ;;  %v913_v17 = vmul.f32 %v905_v5, %v753_v18  ;;  %v729_v36 = vmul.f32 0.5, %v2453_v4  ;;  %v1801_v18 = vld [vmem:[%s2400_s20 + $0x8] sm:$0xff] }
 0x315   : > { %v896_v49 = vmul.f32 %v1797_v23, %v856_v8  ;;  %v752_v24 = vsel %vm744_vm6, 1.0, %v2094_v61  ;;  %v925_v26 = vmul.f32 %v917_v12, %v2478_v29  ;;  %v916_v27 = vadd.f32 1.0, %v908_v9 }
 0x316   : > { %v911_v2 = vmul.f32 %v903_v44, %v751_v53  ;;  %v850_v21 = vadd.f32 0.2548296, %v842_v10  ;;  %v921_v22 = vadd.f32 1.0, %v913_v17  ;;  %v910_v28 = vmul.f32 %v902_v15, %v750_v7 }
 0x317   : > { %v904_v25 = vsub.f32 1.0, %v896_v49  ;;  %v1799_v14 = vpop.eup %1798  ;;  %v724_v33 = vmul.f32 0.5, %v2430_v45  ;;  %v728_v34 = vmul.f32 0.5, %v2455_v6  ;;  %v726_v42 = vmul.f32 0.5, %v2432_v46 }
 0x318   : > { %v919_v11 = vadd.f32 1.0, %v911_v2  ;;  %v858_v39 = vmul.f32 %v2525_v60, %v850_v21  ;;  %v929_v30 = vmul.f32 %v921_v22, %v729_v36  ;;  %v754_v60 = vsel %vm746_vm7, 1.0, %v2094_v61  ;;  %v1483_v61 = vld [vmem:[#allocation13] ss:$0 sm:$0xff] }
 0x319   : > { %v912_v55 = vmul.f32 %v904_v25, %v752_v24  ;;  %v924_v38 = vmul.f32 %v916_v27, %v724_v33  ;;  %v918_v40 = vadd.f32 1.0, %v910_v28 }
 0x31a   : > { %v927_v13 = vmul.f32 %v919_v11, %v727_v0  ;;  %v898_v32 = vmul.f32 %v1799_v14, %v858_v39  ;;  %v933_v4 = vpack.c.bf16 %v929_v30, %v925_v26 }
 0x31b   : > { %v920_v35 = vadd.f32 1.0, %v912_v55  ;;  %v926_v51 = vmul.f32 %v918_v40, %v726_v42 }
 0x31c   : > { %v931_v50 = vpack.c.bf16 %v927_v13, %v923_v1  ;;  %v906_v37 = vsub.f32 1.0, %v898_v32 }
 0x31d   : > { %v928_v29 = vmul.f32 %v920_v35, %v728_v34 }
 0x31e   : > { %v914_v41 = vmul.f32 %v906_v37, %v754_v60 }
 0x31f   : > { %v932_v47 = vpack.c.bf16 %v928_v29, %v924_v38 }
 0x320   : > { %v922_v43 = vadd.f32 1.0, %v914_v41 }
 0x321   : > { %1230 = vmatprep.mubr.bf16.mxu0 %v932_v47 }
 0x322   : > { %v930_v48 = vmul.f32 %v922_v43, %v730_v31  ;;  %1231 = vmatmul.mubr.bf16.vlgmr.msra.gmra.mrb[4].mxu0 %v931_v50 }
 0x324   : > { %v934_v45 = vpack.c.bf16 %v930_v48, %v926_v51 }
 0x326   : > { %1271 = vmatprep.mubr.bf16.mxu1 %v934_v45 }
 0x327   : > { %1272 = vmatmul.mubr.bf16.vlgmr.msra.gmra.mrb[4].mxu1 %v933_v4 }
 0x3f5   : > { %v1539_v6 = vpop.f32.mrb[4].mxu0 }
 0x3f6   : > { %v1540_v52 = vpop.f32.mrb[5].mxu0 }
 0x3f7   : > { %v1541_v53 = vadd.f32 %v1540_v52, %v1539_v6  ;;  %v1542_v54 = vpop.f32.mrb[6].mxu0 }
 0x3f8   : > { %v1543_v46 = vpop.f32.mrb[7].mxu0 }
 0x3f9   : > { %v1233_v16 = vadd.f32 %v1541_v53, %v1483_v61  ;;  %v1544_v63 = vadd.f32 %v1543_v46, %v1542_v54 }
 0x3fa   : > { %v1561_v3 = vpop.f32.mrb[4].mxu1 }
 0x3fb   : > { %v1562_v56 = vpop.f32.mrb[5].mxu1  ;;  %v1236_v19 = vadd.f32 %v1544_v63, %v1483_v61 }
 0x3fc   : > { %v1563_v57 = vadd.f32 %v1562_v56, %v1561_v3  ;;  %v1564_v44 = vpop.f32.mrb[6].mxu1 }
 0x3fd   : > { %v1565_v58 = vpop.f32.mrb[7].mxu1 }
 0x3fe   : > { %v1274_v59 = vadd.f32 %v1563_v57, %v1233_v16  ;;  %v1566_v20 = vadd.f32 %v1565_v58, %v1564_v44 }
 0x400   : > { %v1280_v0 = vadd.f32 %v1800_v62, %v1274_v59  ;;  %v1277_v2 = vadd.f32 %v1566_v20, %v1236_v19 }
 0x402   : > { %1282 = vst [vmem:[%s375_s8] sm:$0xff] %v1280_v0  ;;  %v1281_v5 = vadd.f32 %v1801_v18, %v1277_v2 }
 0x404   : > { %1283 = vst [vmem:[%s375_s8 + $0x8] sm:$0xff] %v1281_v5 }
 0x405   : > { %2013 = shalt.err (!%p2010_p8)
}
 0x406   : > { %s2014_s1 = scalar_lea.hbm %s2581_s19, 256  ;;  %s2018_s20 = scalar_lea.hbm %s2633_s7, 512 }
 0x407   : > { %p2015_p10 = scmp.ne.s32.totalorder %s2581_s19, %s2014_s1  ;;  %p2019_p0 = scmp.lt.u32.totalorder %s2581_s19, %s2633_s7 }
 0x408   : > { %p2020_p5 = scmp.lt.u32.totalorder %s2018_s20, %s2014_s1  ;;  %p2022_p6 = scmp.lt.u32.totalorder %s2014_s1, %s2581_s19 }
 0x409   : > { %p2016_p11 = pnand %p2015_p10, %p2655_p9 }
 0x40a   : > { %p2021_p7 = por %p2020_p5, %p2019_p0 }
 0x40b   : > { %p2017_p12 = pneg %p2016_p11 }
 0x40c   : > { %p2023_p4 = por %p2022_p6, %p2021_p7 }
 0x40e   : > { %p2024_p13 = pnand %p2023_p4, %p2017_p12 }
 0x410   : > { %2027 = shalt.err (!%p2024_p13)
}
 0x411   : > { %s2096_s15 = smov 128   ;;  %s2097_s16 = smov 8  }
 0x412   : > { %1593 = dma.vmem_to_hbm [thread:$0]  (%p2655_p9), %s2576_s13, 256, %s2581_s19, %s1285_s9, %s2096_s15, %s2096_s15, %s2097_s16  }
 0x413 PF: > { %s1313_s14 = sand.u32 1, %s2066_s24   ;;  %p2656_p1 = scmp.ne.s32.totalorder %s2646_s21, 0 }
 0x414   : > { %p2657_p3 = scmp.ge.s32.totalorder %s2078_s27, 2  ;;  %s1314_s30 = scalar_lea.sflag [#allocation4], %s1313_s14 }
 0x416   : > { %p1619_p2 = pnand %p2657_p3, %p2656_p1 }
 0x418   : > { %2061 = dma.done.wait (!%p1619_p2), %s1314_s30, 256  }
 0x419   : > { %2063 = vsyncadd (!%p1619_p2), %s1314_s30, 4294967040  ;;  %p23_p8 = scmp.ge.s32.totalorder %s2315_s11, 4   ;;  %s2658_s24 = smov %s2070_s25 }
 0x41a   : > { %s2659_s25 = smov %s2074_s26  ;;  %s2660_s26 = smov %s2326_s18 }
 0x41b   : > { %s2661_s27 = smov %s2315_s11  ;;  %25 = sbr.rel (!%p23_p8) target bundleno = 10 (0xa), region = 117 }
 0x422   :  { %1319 = vsyncpa [#allocation3], 1 }
 0x423   :  { %1321 = vsyncpa [#allocation3 + $0x1], 1 }
 0x424   :  { %1322 = vsyncpa [#allocation6], 1 }
 0x425   :  { %1323 = vsyncpa [#allocation9], 1 }
 0x426   :  { %1324 = vsyncpa [#allocation12], 1 }
 0x427   :  { %1325 = vsyncpa [#allocation4], 1 }
 0x428   :  { %1327 = vsyncpa [#allocation4 + $0x1], 1 }

// kernel: encoder_forward.17
= control target key start
LH: loop header
LB: loop body
LE: loop exit
PB: predicated region body
PF: predicated region fallthrough
CT: control target
= control target key end

     0   :  { %s3660_s0 = inlined_call_operand.hbm [shape: f32[2,8,256], index: 0, kind: input, shape index: {}]   ;;  %s3661_s1 = inlined_call_operand.hbm [shape: f32[2,16,128], index: 1, kind: input, shape index: {}]   ;;  %s3662_s2 = inlined_call_operand.hbm [shape: f32[1,256], index: 2, kind: input, shape index: {}]   ;;  %s3663_s3 = inlined_call_operand.hbm [shape: f32[1,256], index: 3, kind: input, shape index: {}]   ;;  %s3664_s4 = inlined_call_operand.hbm [shape: f32[1,128], index: 4, kind: input, shape index: {}]   ;;  %s3665_s5 = inlined_call_operand.hbm [shape: f32[1,128], index: 5, kind: input, shape index: {}]   ;;  %s3666_s6 = inlined_call_operand.hbm [shape: bf16[256,256], index: 6, kind: input, shape index: {}]   ;;  %s3667_s7 = inlined_call_operand.hbm [shape: bf16[128,512], index: 7, kind: input, shape index: {}]   ;;  %s3668_s8 = inlined_call_operand.hbm [shape: bf16[256,256], index: 8, kind: input, shape index: {}]   ;;  %s3669_s9 = inlined_call_operand.hbm [shape: f32[1,256], index: 9, kind: input, shape index: {}]   ;;  %s3670_s10 = inlined_call_operand.hbm [shape: f32[2,8,256], index: 10, kind: output, shape index: {}]  }
   0x1   :  { %3677 = sst [smem:[#allocation28_spill]] %s3662_s2 }
   0x2   :  { %3678 = sst [smem:[#allocation29_spill]] %s3663_s3 }
   0x3   :  { %3679 = sst [smem:[#allocation30_spill]] %s3664_s4 }
   0x4   :  { %3680 = sst [smem:[#allocation31_spill]] %s3665_s5 }
   0x5   :  { %3681 = sst [smem:[#allocation32_spill]] %s3666_s6 }
   0x6   :  { %3682 = sst [smem:[#allocation33_spill]] %s3667_s7 }
   0x7   :  { %3683 = sst [smem:[#allocation34_spill]] %s3670_s10 }
   0x8   :  { %15 = vsyncpa [#allocation3], 0 }
   0x9   :  { %17 = vsyncpa [#allocation3 + $0x1], 0 }
   0xa   :  { %18 = vsyncpa [#allocation6], 0 }
   0xb   :  { %20 = vsyncpa [#allocation6 + $0x1], 0 }
   0xc   :  { %21 = vsyncpa [#allocation9], 0 }
   0xd   :  { %22 = vsyncpa [#allocation12], 0 }
   0xe   :  { %23 = vsyncpa [#allocation15], 0 }
   0xf   :  { %24 = vsyncpa [#allocation18], 0 }
  0x10   :  { %25 = vsyncpa [#allocation4], 0 }
  0x11   :  { %27 = vsyncpa [#allocation4 + $0x1], 0  ;;  %s3108_s13 = smov 0   ;;  %s3110_s14 = smov 0  }
  0x12   :  { %s3112_s15 = smov 0   ;;  %s3114_s16 = smov 0  }
  0x13 LB: > { %s3034_s17 = smov [#allocation7]   ;;  %s3129_s19 = sadd.s32 4294967295, %s3032_s16   ;;  %s3032_s16 = sphi %s3114_s16, %s3719_s16   ;;  %s3028_s15 = sphi %s3112_s15, %s3718_s15   ;;  %s3024_s14 = sphi %s3110_s14, %s3717_s14   ;;  %s3020_s13 = sphi %s3108_s13, %s3716_s13  }
  0x14   : > { %s297_s18 = sshll.u32 %s3034_s17, 4  ;;  %p2140_p0 = scmp.ge.s32.totalorder %s3032_s16, 1  ;;  %s3134_s18 = int_to_ptr.vmem [resolvable:$true] %s297_s18 }
  0x15   : > { %p3672_p1 = scmp.eq.s32.totalorder %s3129_s19, 0  ;;  %p284_p2 = scmp.lt.s32.totalorder %s3032_s16, 3 }
  0x16   : > { %s3035_s21 = smov [#allocation8]   ;;  %s3036_s23 = smov [#allocation11]  }
  0x17   : > { %p3136_p3 = pnand %p2140_p0, %p284_p2  ;;  %s308_s22 = sshll.u32 %s3035_s21, 4  ;;  %s3143_s22 = int_to_ptr.vmem [resolvable:$true] %s308_s22 }
  0x18   : > { %s330_s24 = sshll.u32 %s3036_s23, 4  ;;  %s3037_s26 = smov [#allocation14]   ;;  %s3151_s24 = int_to_ptr.vmem [resolvable:$true] %s330_s24 }
  0x19   : > { %s3684_s20 = scalar_select %p3136_p3, 1, 0 }
  0x1a   : > { %p2388_p5 = pneg %p3136_p3  ;;  %s3153_s27 = sshll.u32 %s3037_s26, 4  ;;  %s354_s27 = int_to_ptr.vmem [resolvable:$true] %s3153_s27 }
  0x1b   : > { %s3686_s2 = sld [smem:[#allocation28_spill]] }
  0x1c   : > { %p3147_p6 = pnand %p2388_p5, %p3672_p1 }
  0x1e   : > { %p3163_p8 = pneg %p3147_p6 }
  0x21   : > { %s2658_s30 = scalar_lea.hbm %s3686_s2, 32 }
  0x22   : > { %p2659_p7 = scmp.ne.s32.totalorder %s3686_s2, %s2658_s30  ;;  %p2665_p11 = scmp.lt.u32.totalorder %s2658_s30, %s3686_s2 }
  0x24   : > { %p2661_p9 = pnand %p3163_p8, %p2659_p7 }
  0x26   : > { %p2662_p10 = pneg %p2661_p9 }
  0x28   : > { %p2667_p12 = pnand %p2665_p11, %p2662_p10 }
  0x2a   : > { %2670 = shalt.err (!%p2667_p12)
}
  0x2b   : > { %s2671_s26 = scalar_lea.vmem %s3134_s18, 32  ;;  %p2679_p5 = scmp.lt.s32.totalorder %s3134_s18, %s3134_s18 }
  0x2c   : > { %p2672_p13 = scmp.ne.s32.totalorder %s3134_s18, %s2671_s26  ;;  %p2680_p4 = scmp.lt.s32.totalorder %s2671_s26, %s2671_s26 }
  0x2e   : > { %p2674_p0 = pnand %p2672_p13, %p3163_p8  ;;  %p2681_p7 = por %p2680_p4, %p2679_p5 }
  0x30   : > { %p2675_p2 = pneg %p2674_p0 }
  0x32   : > { %p2682_p9 = pnand %p2681_p7, %p2675_p2 }
  0x34   : > { %2685 = shalt.err (!%p2682_p9)
}
  0x35   : > { %2391 = dma.hbm_to_vmem [thread:$0]  (!%p3147_p6), %s3686_s2, 32, %s3134_s18, [#allocation6]  }
  0x36   : > { %s3688_s3 = sld [smem:[#allocation29_spill]] }
  0x3c   : > { %s2686_s12 = scalar_lea.hbm %s3688_s3, 32 }
  0x3d   : > { %p2687_p10 = scmp.ne.s32.totalorder %s3688_s3, %s2686_s12  ;;  %p2693_p12 = scmp.lt.u32.totalorder %s2686_s12, %s3688_s3 }
  0x3f   : > { %p2689_p4 = pnand %p2687_p10, %p3163_p8 }
  0x41   : > { %p2690_p11 = pneg %p2689_p4 }
  0x43   : > { %p2695_p13 = pnand %p2693_p12, %p2690_p11 }
  0x45   : > { %2698 = shalt.err (!%p2695_p13)
}
  0x46   : > { %s2699_s18 = scalar_lea.vmem %s3143_s22, 32  ;;  %p2707_p7 = scmp.lt.s32.totalorder %s3143_s22, %s3143_s22 }
  0x47   : > { %p2700_p0 = scmp.ne.s32.totalorder %s3143_s22, %s2699_s18  ;;  %p2708_p9 = scmp.lt.s32.totalorder %s2699_s18, %s2699_s18 }
  0x49   : > { %p2702_p2 = pnand %p2700_p0, %p3163_p8  ;;  %p2709_p10 = por %p2708_p9, %p2707_p7 }
  0x4b   : > { %p2703_p5 = pneg %p2702_p2 }
  0x4d   : > { %p2710_p4 = pnand %p2709_p10, %p2703_p5 }
  0x4f   : > { %2713 = shalt.err (!%p2710_p4)
}
  0x50   : > { %2394 = dma.hbm_to_vmem [thread:$0]  (!%p3147_p6), %s3688_s3, 32, %s3143_s22, [#allocation9]  }
  0x51   : > { %s3689_s5 = sld [smem:[#allocation31_spill]] }
  0x57   : > { %s2714_s11 = scalar_lea.hbm %s3689_s5, 16 }
  0x58   : > { %p2715_p11 = scmp.ne.s32.totalorder %s3689_s5, %s2714_s11  ;;  %p2721_p0 = scmp.lt.u32.totalorder %s2714_s11, %s3689_s5 }
  0x5a   : > { %p2717_p12 = pnand %p2715_p11, %p3163_p8 }
  0x5c   : > { %p2718_p13 = pneg %p2717_p12 }
  0x5e   : > { %p2723_p2 = pnand %p2721_p0, %p2718_p13 }
  0x60   : > { %2726 = shalt.err (!%p2723_p2)
}
  0x61   : > { %s2727_s22 = scalar_lea.vmem %s3151_s24, 16  ;;  %s2734_s18 = scalar_lea.vmem %s3151_s24, 32 }
  0x62   : > { %p2728_p5 = scmp.ne.s32.totalorder %s3151_s24, %s2727_s22  ;;  %p2735_p10 = scmp.lt.s32.totalorder %s3151_s24, %s3151_s24 }
  0x63   : > { %p2736_p4 = scmp.lt.s32.totalorder %s2734_s18, %s2727_s22 }
  0x64   : > { %p2730_p7 = pnand %p2728_p5, %p3163_p8 }
  0x65   : > { %p2737_p11 = por %p2736_p4, %p2735_p10 }
  0x66   : > { %p2731_p9 = pneg %p2730_p7 }
  0x68   : > { %p2738_p12 = pnand %p2737_p11, %p2731_p9 }
  0x6a   : > { %2741 = shalt.err (!%p2738_p12)
}
  0x6b   : > { %2400 = dma.hbm_to_vmem [thread:$0]  (!%p3147_p6), %s3689_s5, 16, %s3151_s24, [#allocation12]  }
  0x6c   : > { %s3690_s7 = sld [smem:[#allocation33_spill]] }
  0x72   : > { %s2742_s11 = scalar_lea.hbm %s3690_s7, 4096 }
  0x73   : > { %p2743_p13 = scmp.ne.s32.totalorder %s3690_s7, %s2742_s11  ;;  %p2749_p5 = scmp.lt.u32.totalorder %s2742_s11, %s3690_s7 }
  0x75   : > { %p2745_p0 = pnand %p2743_p13, %p3163_p8 }
  0x77   : > { %p2746_p2 = pneg %p2745_p0 }
  0x79   : > { %p2751_p7 = pnand %p2749_p5, %p2746_p2 }
  0x7b   : > { %2754 = shalt.err (!%p2751_p7)
}
  0x7c   : > { %s2755_s22 = scalar_lea.vmem %s354_s27, 4096  ;;  %p2763_p11 = scmp.lt.s32.totalorder %s354_s27, %s354_s27 }
  0x7d   : > { %p2756_p9 = scmp.ne.s32.totalorder %s354_s27, %s2755_s22  ;;  %p2764_p12 = scmp.lt.s32.totalorder %s2755_s22, %s2755_s22 }
  0x7f   : > { %p2758_p10 = pnand %p2756_p9, %p3163_p8  ;;  %p2765_p1 = por %p2764_p12, %p2763_p11 }
  0x81   : > { %p2759_p4 = pneg %p2758_p10 }
  0x83   : > { %p2766_p3 = pnand %p2765_p1, %p2759_p4 }
  0x85   : > { %2769 = shalt.err (!%p2766_p3)
}
  0x86   : > { %s3038_s24 = smov 256   ;;  %s3039_s18 = smov 16  }
  0x87   : > { %2406 = dma.hbm_to_vmem [thread:$0]  (!%p3147_p6), %s3690_s7, 4096, %s354_s27, [#allocation15], %s3038_s24, %s3038_s24, %s3039_s18  }
  0x88   : > { %s3040_s29 = smov [#allocation10]   ;;  %s3041_s11 = smov [#allocation13]  }
  0x89   : > { %s319_s30 = sshll.u32 %s3040_s29, 4  ;;  %s340_s12 = sshll.u32 %s3041_s11, 4  ;;  %s320_s30 = int_to_ptr.vmem [resolvable:$true] %s319_s30  ;;  %s3250_s12 = int_to_ptr.vmem [resolvable:$true] %s340_s12 }
  0x8a   : > { %s3691_s4 = sld [smem:[#allocation30_spill]] }
  0x90   : > { %s2770_s26 = scalar_lea.hbm %s3691_s4, 16 }
  0x91   : > { %p2771_p1 = scmp.ne.s32.totalorder %s3691_s4, %s2770_s26  ;;  %p2777_p0 = scmp.lt.u32.totalorder %s2770_s26, %s3691_s4 }
  0x93   : > { %p2773_p3 = pnand %p2771_p1, %p3163_p8 }
  0x95   : > { %p2774_p13 = pneg %p2773_p3 }
  0x97   : > { %p2779_p2 = pnand %p2777_p0, %p2774_p13 }
  0x99   : > { %2782 = shalt.err (!%p2779_p2)
}
  0x9a   : > { %s2783_s24 = scalar_lea.vmem %s320_s30, 16  ;;  %s2790_s18 = scalar_lea.vmem %s320_s30, 32 }
  0x9b   : > { %p2784_p5 = scmp.ne.s32.totalorder %s320_s30, %s2783_s24  ;;  %p2791_p10 = scmp.lt.s32.totalorder %s320_s30, %s320_s30 }
  0x9c   : > { %p2792_p4 = scmp.lt.s32.totalorder %s2790_s18, %s2783_s24 }
  0x9d   : > { %p2786_p7 = pnand %p2784_p5, %p3163_p8 }
  0x9e   : > { %p2793_p11 = por %p2792_p4, %p2791_p10 }
  0x9f   : > { %p2787_p9 = pneg %p2786_p7 }
  0xa1   : > { %p2794_p12 = pnand %p2793_p11, %p2787_p9 }
  0xa3   : > { %2797 = shalt.err (!%p2794_p12)
}
  0xa4   : > { %2397 = dma.hbm_to_vmem [thread:$0]  (!%p3147_p6), %s3691_s4, 16, %s320_s30, [#allocation9]  }
  0xa5   : > { %s3692_s6 = sld [smem:[#allocation32_spill]] }
  0xab   : > { %s2798_s21 = scalar_lea.hbm %s3692_s6, 4096 }
  0xac   : > { %p2799_p1 = scmp.ne.s32.totalorder %s3692_s6, %s2798_s21  ;;  %p2805_p0 = scmp.lt.u32.totalorder %s2798_s21, %s3692_s6 }
  0xae   : > { %p2801_p3 = pnand %p2799_p1, %p3163_p8 }
  0xb0   : > { %p2802_p13 = pneg %p2801_p3 }
  0xb2   : > { %p2807_p2 = pnand %p2805_p0, %p2802_p13 }
  0xb4   : > { %2810 = shalt.err (!%p2807_p2)
}
  0xb5   : > { %s2811_s30 = scalar_lea.vmem %s3250_s12, 4096  ;;  %p2819_p10 = scmp.lt.s32.totalorder %s3250_s12, %s3250_s12 }
  0xb6   : > { %p2812_p5 = scmp.ne.s32.totalorder %s3250_s12, %s2811_s30  ;;  %p2820_p4 = scmp.lt.s32.totalorder %s2811_s30, %s2811_s30 }
  0xb8   : > { %p2814_p7 = pnand %p2812_p5, %p3163_p8  ;;  %p2821_p11 = por %p2820_p4, %p2819_p10 }
  0xba   : > { %p2815_p9 = pneg %p2814_p7 }
  0xbc   : > { %p2822_p12 = pnand %p2821_p11, %p2815_p9 }
  0xbe   : > { %2825 = shalt.err (!%p2822_p12)
}
  0xbf   : > { %s3674_s27 = smov 128   ;;  %s3675_s24 = smov 8  }
  0xc0   : > { %2403 = dma.hbm_to_vmem [thread:$0]  (!%p3147_p6), %s3692_s6, 4096, %s3250_s12, [#allocation12], %s3674_s27, %s3674_s27, %s3675_s24  }
  0xc1   : > { %s3044_s28 = smov [#allocation16]   ;;  %s3045_s11 = smov [#allocation17]  }
  0xc2   : > { %s366_s29 = sshll.u32 %s3044_s28, 4  ;;  %s380_s21 = sshll.u32 %s3045_s11, 4  ;;  %s367_s29 = int_to_ptr.vmem [resolvable:$true] %s366_s29  ;;  %s3296_s21 = int_to_ptr.vmem [resolvable:$true] %s380_s21 }
  0xc3   : > { %s2826_s22 = scalar_lea.hbm %s3668_s8, 4096 }
  0xc4   : > { %p2827_p1 = scmp.ne.s32.totalorder %s3668_s8, %s2826_s22  ;;  %p2833_p0 = scmp.lt.u32.totalorder %s2826_s22, %s3668_s8 }
  0xc6   : > { %p2829_p3 = pnand %p2827_p1, %p3163_p8 }
  0xc8   : > { %p2830_p13 = pneg %p2829_p3 }
  0xca   : > { %p2835_p2 = pnand %p2833_p0, %p2830_p13 }
  0xcc   : > { %2838 = shalt.err (!%p2835_p2)
}
  0xcd   : > { %s2839_s2 = scalar_lea.vmem %s367_s29, 4096  ;;  %p2847_p10 = scmp.lt.s32.totalorder %s367_s29, %s367_s29 }
  0xce   : > { %p2840_p5 = scmp.ne.s32.totalorder %s367_s29, %s2839_s2  ;;  %p2848_p4 = scmp.lt.s32.totalorder %s2839_s2, %s2839_s2 }
  0xd0   : > { %p2842_p7 = pnand %p2840_p5, %p3163_p8  ;;  %p2849_p11 = por %p2848_p4, %p2847_p10 }
  0xd2   : > { %p2843_p9 = pneg %p2842_p7 }
  0xd4   : > { %p2850_p12 = pnand %p2849_p11, %p2843_p9 }
  0xd6   : > { %2853 = shalt.err (!%p2850_p12)
}
  0xd7   : > { %2409 = dma.hbm_to_vmem [thread:$0]  (!%p3147_p6), %s3668_s8, 4096, %s367_s29, [#allocation15], %s3674_s27, %s3674_s27, %s3675_s24  }
  0xd8   : > { %s2854_s22 = scalar_lea.hbm %s3669_s9, 32 }
  0xd9   : > { %p2855_p1 = scmp.ne.s32.totalorder %s3669_s9, %s2854_s22  ;;  %p2861_p0 = scmp.lt.u32.totalorder %s2854_s22, %s3669_s9 }
  0xdb   : > { %p2857_p3 = pnand %p2855_p1, %p3163_p8 }
  0xdd   : > { %p2858_p13 = pneg %p2857_p3 }
  0xdf   : > { %p2863_p2 = pnand %p2861_p0, %p2858_p13 }
  0xe1   : > { %2866 = shalt.err (!%p2863_p2)
}
  0xe2   : > { %s2867_s29 = scalar_lea.vmem %s3296_s21, 32  ;;  %p2875_p10 = scmp.lt.s32.totalorder %s3296_s21, %s3296_s21 }
  0xe3   : > { %p2868_p5 = scmp.ne.s32.totalorder %s3296_s21, %s2867_s29  ;;  %p2876_p4 = scmp.lt.s32.totalorder %s2867_s29, %s2867_s29 }
  0xe5   : > { %p2870_p7 = pnand %p2868_p5, %p3163_p8  ;;  %p2877_p11 = por %p2876_p4, %p2875_p10 }
  0xe7   : > { %p2871_p9 = pneg %p2870_p7 }
  0xe9   : > { %p2878_p12 = pnand %p2877_p11, %p2871_p9 }
  0xeb   : > { %2881 = shalt.err (!%p2878_p12)
}
  0xec   : > { %2412 = dma.hbm_to_vmem [thread:$0]  (!%p3147_p6), %s3669_s9, 32, %s3296_s21, [#allocation18]  }
  0xed   : > { %s2139_s25 = sadd.s32 4294967294, %s3032_s16   ;;  %s3344_s17 = sadd.s32 1, %s3032_s16  }
  0xee   : > { %s37_s11 = ssub.s32 %s3032_s16, %s3344_s17  ;;  %s40_s23 = sadd.s32 1, %s3028_s15 }
  0xef   : > { %p38_p8 = scmp.eq.s32.totalorder %s37_s11, 0  ;;  %p47_p1 = scmp.ne.s32.totalorder %s3028_s15, %s3024_s14 }
  0xf0   : > { %p48_p3 = scmp.eq.s32.totalorder %s3032_s16, 0  ;;  %p53_p13 = scmp.ne.s32.totalorder %s3024_s14, %s3020_s13 }
  0xf1   : > { %s3355_s26 = scalar_select %p38_p8, %s3028_s15, %s40_s23  }
  0xf2   : > { %p3357_p0 = por %p48_p3, %p47_p1  ;;  %p3694_p2 = scmp.eq.s32.totalorder %s3129_s19, 0 }
  0xf3   : > { %p271_p5 = scmp.eq.s32.totalorder %s3129_s19, 1  ;;  %p277_p7 = scmp.eq.s32.totalorder %s2139_s25, 1 }
  0xf4   : > { %p3363_p6 = por %p3694_p2, %p53_p13  ;;  %p2432_p9 = scmp.lt.s32.totalorder %s3032_s16, 2 }
  0xf5   : > { %s391_s10 = sand.u32 1, %s3028_s15   ;;  %p3370_p10 = por %p271_p5, %p47_p1 }
  0xf6   : > { %p3374_p4 = por %p277_p7, %p53_p13  ;;  %s2150_s12 = sshll.u32 %s391_s10, 4 }
  0xf7   : > { %s3696_s30 = scalar_select %p3370_p10, 1, 0 }
  0xf8   : > { %s3697_s18 = scalar_select %p3374_p4, 1, 0 }
  0xf9   : > { %s2283_s29 = sshll.u32 %s3032_s16, 8  ;;  %s395_s25 = scalar_lea.vmem [#allocation2], %s2150_s12 }
  0xfa   : > { %s3382_s11 = scalar_lea.hbm %s3660_s0, %s2283_s29  ;;  %s403_s23 = sshll.u32 %s395_s25, 4  ;;  %s3384_s23 = int_to_ptr.vmem [resolvable:$true] %s403_s23 }
  0xfb   : > { %p3388_p11 = pnand %p2432_p9, %p3357_p0  ;;  %s3395_s2 = scalar_lea.hbm %s3661_s1, %s2283_s29 }
  0xfc   : > { %s414_s28 = scalar_lea.vmem [#allocation5], %s2150_s12  ;;  %s392_s5 = scalar_lea.sflag [#allocation3], %s391_s10 }
  0xfd   : > { %s3397_s4 = sshll.u32 %s414_s28, 4  ;;  %s2882_s25 = scalar_lea.hbm %s3382_s11, 256  ;;  %s3425_s4 = int_to_ptr.vmem [resolvable:$true] %s3397_s4 }
  0xfe   : > { %p2883_p12 = scmp.ne.s32.totalorder %s3382_s11, %s2882_s25  ;;  %p2884_p8 = pneg %p3388_p11 }
  0xff   : > { %s2887_s3 = scalar_lea.hbm %s3660_s0, 512  ;;  %p2888_p13 = scmp.lt.u32.totalorder %s3382_s11, %s3660_s0 }
 0x100   : > { %p2885_p1 = pnand %p2884_p8, %p2883_p12  ;;  %p2889_p0 = scmp.lt.u32.totalorder %s2887_s3, %s2882_s25 }
 0x101   : > { %p2891_p5 = scmp.lt.u32.totalorder %s2882_s25, %s3382_s11 }
 0x102   : > { %p2886_p3 = pneg %p2885_p1  ;;  %p2890_p2 = por %p2889_p0, %p2888_p13 }
 0x104   : > { %p2892_p7 = por %p2891_p5, %p2890_p2 }
 0x106   : > { %p2893_p9 = pnand %p2892_p7, %p2886_p3 }
 0x108   : > { %2896 = shalt.err (!%p2893_p9)
}
 0x109   : > { %s2897_s10 = scalar_lea.vmem %s3384_s23, 256  ;;  %s3046_s6 = smov [#allocation2]  }
 0x10a   : > { %p2898_p12 = scmp.ne.s32.totalorder %s3384_s23, %s2897_s10  ;;  %s2902_s12 = sshll.u32 %s3046_s6, 4  ;;  %s2903_s12 = int_to_ptr.vmem [resolvable:$false] %s2902_s12 }
 0x10b   : > { %s2904_s7 = scalar_lea.vmem %s2903_s12, 512  ;;  %p2905_p10 = scmp.lt.s32.totalorder %s3384_s23, %s2903_s12 }
 0x10c   : > { %p2900_p1 = pnand %p2898_p12, %p2884_p8  ;;  %p2906_p13 = scmp.lt.s32.totalorder %s2904_s7, %s2897_s10 }
 0x10e   : > { %p2901_p4 = pneg %p2900_p1  ;;  %p2907_p0 = por %p2906_p13, %p2905_p10 }
 0x110   : > { %p2908_p2 = pnand %p2907_p0, %p2901_p4 }
 0x112   : > { %2911 = shalt.err (!%p2908_p2)
}
 0x113   : > { %2416 = dma.hbm_to_vmem [thread:$0]  (!%p3388_p11), %s3382_s11, 256, %s3384_s23, %s392_s5  }
 0x114   : > { %s410_s29 = sand.u32 1, %s3032_s16   ;;  %s2912_s25 = scalar_lea.hbm %s3395_s2, 256 }
 0x115   : > { %s3428_s28 = scalar_lea.sflag [#allocation6], %s410_s29  ;;  %p2913_p10 = scmp.ne.s32.totalorder %s3395_s2, %s2912_s25 }
 0x116   : > { %s2917_s24 = scalar_lea.hbm %s3661_s1, 512  ;;  %p2918_p5 = scmp.lt.u32.totalorder %s3395_s2, %s3661_s1 }
 0x117   : > { %p2915_p4 = pnand %p2913_p10, %p2884_p8  ;;  %p2919_p7 = scmp.lt.u32.totalorder %s2917_s24, %s2912_s25 }
 0x118   : > { %p2921_p12 = scmp.lt.u32.totalorder %s2912_s25, %s3395_s2 }
 0x119   : > { %p2916_p3 = pneg %p2915_p4  ;;  %p2920_p9 = por %p2919_p7, %p2918_p5 }
 0x11b   : > { %p2922_p1 = por %p2921_p12, %p2920_p9 }
 0x11d   : > { %p2923_p13 = pnand %p2922_p1, %p2916_p3 }
 0x11f   : > { %2926 = shalt.err (!%p2923_p13)
}
 0x120   : > { %s2927_s5 = scalar_lea.vmem %s3425_s4, 256  ;;  %s3047_s11 = smov [#allocation5]  }
 0x121   : > { %p2928_p0 = scmp.ne.s32.totalorder %s3425_s4, %s2927_s5  ;;  %s2932_s23 = sshll.u32 %s3047_s11, 4  ;;  %s2933_s23 = int_to_ptr.vmem [resolvable:$false] %s2932_s23 }
 0x122   : > { %s2934_s12 = scalar_lea.vmem %s2933_s23, 512  ;;  %p2935_p4 = scmp.lt.s32.totalorder %s3425_s4, %s2933_s23 }
 0x123   : > { %p2930_p2 = pnand %p2928_p0, %p2884_p8  ;;  %p2936_p5 = scmp.lt.s32.totalorder %s2934_s12, %s2927_s5 }
 0x125   : > { %p2931_p10 = pneg %p2930_p2  ;;  %p2937_p7 = por %p2936_p5, %p2935_p4 }
 0x127   : > { %p2938_p9 = pnand %p2937_p7, %p2931_p10 }
 0x129   : > { %2941 = shalt.err (!%p2938_p9)
}
 0x12a   : > { %s3699_s7 = smov 8   ;;  %s3700_s29 = smov 128  }
 0x12b   : > { %2419 = dma.hbm_to_vmem [thread:$0]  (!%p3388_p11), %s3395_s2, 256, %s3425_s4, %s3428_s28, %s3700_s29, %s3700_s29, %s3699_s7  }
 0x12c   : > { %p3701_p8 = scmp.ne.s32.totalorder %s3684_s20, 0 }
 0x12d   : > { %s3460_s25 = sand.u32 (!%p3701_p8), 1, %s3024_s14  }
 0x12e   : > { %433 = sbr.rel (%p3701_p8) target bundleno = 3247 (0xcaf), region = 60  ;;  %s3463_s22 = sshll.u32 (!%p3701_p8), %s3460_s25, 4 }
 0x12f   : > { %s436_s27 = scalar_lea.sflag (!%p3701_p8), [#allocation3], %s3460_s25  ;;  %s3467_s3 = scalar_lea.vmem (!%p3701_p8), [#allocation2], %s3463_s22 }
 0x135   : > { %2987 = dma.done.wait (%p3363_p6), %s436_s27, 256  }
 0x136   : > { %2989 = vsyncadd (%p3363_p6), %s436_s27, 4294967040  ;;  %s444_s4 = sand.u32 1, %s3129_s19   ;;  %s448_s2 = scalar_lea.vmem [#allocation5], %s3463_s22 }
 0x137   : > { %s445_s20 = scalar_lea.sflag [#allocation6], %s444_s4 }
 0x138   : > { %2991 = dma.done.wait (%p3363_p6), %s445_s20, 256  }
 0x139   : > { %2993 = vsyncadd (%p3363_p6), %s445_s20, 4294967040  ;;  %p3702_p11 = scmp.eq.s32.totalorder %s3129_s19, 0 }
 0x13b   : > { %2995 = dma.done.wait (%p3702_p11), [#allocation6], 32   ;;  %p3703_p3 = pmov %p3702_p11 }
 0x13d   : > { %2997 = vsyncadd (%p3703_p3), [#allocation6], 4294967264  ;;  %p3704_p12 = pmov %p3703_p3 }
 0x13e   : > { %p3705_p1 = pmov %p3703_p3 }
 0x13f   : > { %2999 = dma.done.wait (%p3704_p12), [#allocation9], 48  }
 0x140   : > { %3001 = vsyncadd (%p3705_p1), [#allocation9], 4294967248  ;;  %p3706_p13 = pmov %p3705_p1 }
 0x141   : > { %p3707_p0 = pmov %p3705_p1 }
 0x142   : > { %3003 = dma.done.wait (%p3706_p13), [#allocation12], 4112  }
 0x143   : > { %3005 = vsyncadd (%p3707_p0), [#allocation12], 4294963184  ;;  %p3708_p6 = pmov %p3707_p0 }
 0x144   : > { %p3709_p2 = pmov %p3707_p0 }
 0x145   : > { %3007 = dma.done.wait (%p3708_p6), [#allocation15], 8192  }
 0x146   : > { %3009 = vsyncadd (%p3709_p2), [#allocation15], 4294959104  ;;  %p3710_p10 = pmov %p3707_p0 }
 0x147   : > { %p3711_p4 = pmov %p3707_p0 }
 0x148   : > { %3011 = dma.done.wait (%p3710_p10), [#allocation18], 32  }
 0x149   : > { %3013 = vsyncadd (%p3711_p4), [#allocation18], 4294967264  ;;  %v525_v0 = vld [vmem:[%s448_s2] sm:$0xff]  ;;  %v524_v2 = vld [vmem:[%s3467_s3 + $0x8] sm:$0xff]  ;;  %v3048_v62 = vmov 0   ;;  %vm3050_vm0 = vmmov 0  }
 0x14a   : > { %v523_v1 = vld [vmem:[%s3467_s3] sm:$0xff]  ;;  %576 = vadd.xlane.f32.xlu0 %v525_v0  ;;  %v526_v4 = vld [vmem:[%s448_s2 + $0x8] sm:$0xff]  ;;  %1073 = vmatprep.mubr.bf16.mxu1 %v3048_v62  ;;  %vm1164_vm1 = vcmask 523264   ;;  %s3051_s21 = smov 64   ;;  %vm1211_vm2 = vcmask 130048   ;;  %s2285_s28 = sshll.u32 %s3129_s19, 8 }
 0x14b   : > { %v529_v3 = vadd.f32 %v524_v2, %v523_v1  ;;  %v2490_v5 = vld [vmem:[#allocation13 + $0x4] ss:$8 sps:$4 sm:$0xff]   ;;  %v2492_v6 = vld [vmem:[#allocation13] ss:$8 sps:$4 sm:$0xff]   ;;  %v2493_v7 = vld [vmem:[#allocation13 + $0x14] ss:$8 sps:$4 sm:$0xff]  }
 0x14c   : > { %808 = vmatprep.subr.bf16.mxu0 %v2490_v5  ;;  %v2495_v8 = vld [vmem:[#allocation13 + $0x10] ss:$8 sps:$4 sm:$0xff]   ;;  %v2496_v9 = vld [vmem:[#allocation13 + $0x24] ss:$8 sps:$4 sm:$0xff]   ;;  %v2498_v12 = vld [vmem:[#allocation13 + $0x20] ss:$8 sps:$4 sm:$0xff]  }
 0x14d   : > { %530 = vadd.xlane.f32.xlu1 %v529_v3  ;;  %809 = vmatpush1.bf16.msra.mxu0 %v2492_v6  ;;  %v2514_v10 = vld [vmem:[#allocation14 + $0x4] ss:$16 sps:$4 sm:$0xff]   ;;  %v2516_v11 = vld [vmem:[#allocation14] ss:$16 sps:$4 sm:$0xff]   ;;  %s521_s24 = scalar_lea.vmem [#allocation19], %s3463_s22  ;;  %s3712_s11 = sld [smem:[#allocation34_spill]] }
 0x14e   : > { %578 = vadd.xlane.f32.xlu0 %v526_v4  ;;  %810 = vmatprep.subr.bf16.mxu0 %v2493_v7  ;;  %v2499_v13 = vld [vmem:[#allocation13 + $0x34] ss:$8 sps:$4 sm:$0xff]   ;;  %v2522_v15 = vld [vmem:[#allocation14 + $0x20] ss:$16 sps:$4 sm:$0xff]   ;;  %v2502_v17 = vld [vmem:[#allocation13 + $0x44] ss:$8 sps:$4 sm:$0xff]  }
 0x14f   : > { %v2520_v14 = vld [vmem:[#allocation14 + $0x24] ss:$16 sps:$4 sm:$0xff]   ;;  %1041 = vmatprep.subr.bf16.mxu1 %v2514_v10  ;;  %v2501_v16 = vld [vmem:[#allocation13 + $0x30] ss:$8 sps:$4 sm:$0xff]   ;;  %v2504_v18 = vld [vmem:[#allocation13 + $0x40] ss:$8 sps:$4 sm:$0xff]  }
 0x150   : > { %1042 = vmatpush1.bf16.msra.mxu1 %v2516_v11  ;;  %v2505_v19 = vld [vmem:[#allocation13 + $0x54] ss:$8 sps:$4 sm:$0xff]   ;;  %v2507_v20 = vld [vmem:[#allocation13 + $0x50] ss:$8 sps:$4 sm:$0xff]   ;;  %v2508_v21 = vld [vmem:[#allocation13 + $0x64] ss:$8 sps:$4 sm:$0xff]  }
 0x151   : > { %811 = vmatpush1.bf16.msra.mxu0 %v2495_v8  ;;  %1043 = vmatprep.subr.bf16.mxu1 %v2520_v14  ;;  %v2510_v22 = vld [vmem:[#allocation13 + $0x60] ss:$8 sps:$4 sm:$0xff]   ;;  %v2511_v23 = vld [vmem:[#allocation13 + $0x74] ss:$8 sps:$4 sm:$0xff]   ;;  %v2513_v24 = vld [vmem:[#allocation13 + $0x70] ss:$8 sps:$4 sm:$0xff]  }
 0x152   : > { %812 = vmatprep.subr.bf16.mxu0 %v2496_v9  ;;  %v2517_v25 = vld [vmem:[#allocation13 + $0x84] ss:$8 sps:$4 sm:$0xff]   ;;  %v2519_v26 = vld [vmem:[#allocation13 + $0x80] ss:$8 sps:$4 sm:$0xff]   ;;  %v2523_v42 = vld [vmem:[#allocation13 + $0x94] ss:$8 sps:$4 sm:$0xff]  }
 0x153   : > { %v2525_v43 = vld [vmem:[#allocation13 + $0x90] ss:$8 sps:$4 sm:$0xff]   ;;  %v2526_v44 = vld [vmem:[#allocation14 + $0x44] ss:$16 sps:$4 sm:$0xff]   ;;  %v2531_v47 = vld [vmem:[#allocation13 + $0xa0] ss:$8 sps:$4 sm:$0xff]   ;;  %s3616_s23 = scalar_lea.hbm %s3712_s11, %s2285_s28 }
 0x154   : > { %1044 = vmatpush1.bf16.msra.mxu1 %v2522_v15  ;;  %v2528_v45 = vld [vmem:[#allocation14 + $0x40] ss:$16 sps:$4 sm:$0xff]   ;;  %v2529_v46 = vld [vmem:[#allocation13 + $0xa4] ss:$8 sps:$4 sm:$0xff]   ;;  %v2535_v50 = vld [vmem:[#allocation13 + $0xb4] ss:$8 sps:$4 sm:$0xff]   ;;  %v547_v15 = vlaneseq }
 0x155   : > { %813 = vmatpush1.bf16.msra.mxu0 %v2498_v12  ;;  %1045 = vmatprep.subr.bf16.mxu1 %v2526_v44  ;;  %v2532_v48 = vld [vmem:[#allocation14 + $0x64] ss:$16 sps:$4 sm:$0xff]   ;;  %v2534_v49 = vld [vmem:[#allocation14 + $0x60] ss:$16 sps:$4 sm:$0xff]   ;;  %s1970_s10 = sshll.u32 %s521_s24, 4  ;;  %s1956_s19 = scalar_lea.sflag [#allocation4], %s3460_s25  ;;  %s3618_s10 = int_to_ptr.vmem [resolvable:$true] %s1970_s10 }
 0x156   : > { %814 = vmatprep.subr.bf16.mxu0 %v2499_v13  ;;  %v2537_v51 = vld [vmem:[#allocation13 + $0xb0] ss:$8 sps:$4 sm:$0xff]   ;;  %v2538_v52 = vld [vmem:[#allocation14 + $0x84] ss:$16 sps:$4 sm:$0xff]   ;;  %v2543_v55 = vld [vmem:[#allocation13 + $0xc0] ss:$8 sps:$4 sm:$0xff]  }
 0x157   : > { %v2540_v53 = vld [vmem:[#allocation14 + $0x80] ss:$16 sps:$4 sm:$0xff]   ;;  %v2541_v54 = vld [vmem:[#allocation13 + $0xc4] ss:$8 sps:$4 sm:$0xff]   ;;  %v2547_v57 = vld [vmem:[#allocation13 + $0xd4] ss:$8 sps:$4 sm:$0xff]  }
 0x158   : > { %1046 = vmatpush1.bf16.msra.mxu1 %v2528_v45  ;;  %v2544_v56 = vld [vmem:[#allocation14 + $0xa4] ss:$16 sps:$4 sm:$0xff]   ;;  %v2546_v58 = vld [vmem:[#allocation14 + $0xa0] ss:$16 sps:$4 sm:$0xff]   ;;  %s2942_s12 = scalar_lea.vmem %s3618_s10, 256  ;;  %p3713_p7 = scmp.ne.s32.totalorder %s3696_s30, 0 }
 0x159   : > { %815 = vmatpush1.bf16.msra.mxu0 %v2501_v16  ;;  %1047 = vmatprep.subr.bf16.mxu1 %v2532_v48  ;;  %v2550_v59 = vld [vmem:[#allocation14 + $0xc4] ss:$16 sps:$4 sm:$0xff]   ;;  %v2549_v60 = vld [vmem:[#allocation13 + $0xd0] ss:$8 sps:$4 sm:$0xff]   ;;  %v548_v16 = vshrl.u32 %v547_v15, 7  ;;  %p2943_p5 = scmp.ne.s32.totalorder %s3618_s10, %s2942_s12  ;;  %s3052_s7 = smov [#allocation19]  }
 0x15a   : > { %816 = vmatprep.subr.bf16.mxu0 %v2502_v17  ;;  %v2553_v61 = vld [vmem:[#allocation13 + $0xe4] ss:$8 sps:$4 sm:$0xff]   ;;  %v2552_v63 = vld [vmem:[#allocation14 + $0xc0] ss:$16 sps:$4 sm:$0xff]   ;;  %s2946_s29 = sshll.u32 %s3052_s7, 4  ;;  %s2947_s29 = int_to_ptr.vmem [resolvable:$false] %s2946_s29 }
 0x15b   : > { %v2558_v3 = vld [vmem:[#allocation14 + $0xe0] ss:$16 sps:$4 sm:$0xff]   ;;  %p2944_p9 = pnand %p2943_p5, %p3713_p7  ;;  %s2948_s22 = scalar_lea.vmem %s2947_s29, 512 }
 0x15c   : > { %1048 = vmatpush1.bf16.msra.mxu1 %v2534_v49  ;;  %v2561_v5 = vld [vmem:[#allocation13 + $0xf0] ss:$8 sps:$4 sm:$0xff]   ;;  %v2570_v49 = vld [vmem:[#allocation14 + $0x4c] ss:$16 sps:$4 sm:$0xff]   ;;  %p2949_p11 = scmp.lt.s32.totalorder %s3618_s10, %s2947_s29  ;;  %p2950_p3 = scmp.lt.s32.totalorder %s2948_s22, %s2942_s12 }
 0x15d   : > { %817 = vmatpush1.bf16.msra.mxu0 %v2504_v18  ;;  %1049 = vmatprep.subr.bf16.mxu1 %v2538_v52  ;;  %v3518_v18 = vsub.s32 0, %v548_v16  ;;  %v2576_v52 = vld [vmem:[#allocation14 + $0x8c] ss:$16 sps:$4 sm:$0xff]   ;;  %p2945_p8 = pneg %p2944_p9 }
 0x15e   : > { %818 = vmatprep.subr.bf16.mxu0 %v2505_v19  ;;  %v3520_v19 = vsub.s32 1, %v548_v16  ;;  %p2951_p12 = por %p2950_p3, %p2949_p11 }
 0x160   : > { %1050 = vmatpush1.bf16.msra.mxu1 %v2540_v53  ;;  %v2574_v53 = vld [vmem:[#allocation14 + $0x88] ss:$16 sps:$4 sm:$0xff]   ;;  %p2952_p1 = pnand %p2951_p12, %p2945_p8 }
 0x161   : > { %819 = vmatpush1.bf16.msra.mxu0 %v2507_v20  ;;  %1051 = vmatprep.subr.bf16.mxu1 %v2544_v56  ;;  %v527_v20 = vld [vmem:[#allocation7] sm:$0x3]  ;;  %v2582_v56 = vld [vmem:[#allocation14 + $0xcc] ss:$16 sps:$4 sm:$0xff]  }
 0x162   : > { %820 = vmatprep.subr.bf16.mxu0 %v2508_v21 }
 0x164   : > { %1052 = vmatpush1.bf16.msra.mxu1 %v2546_v58  ;;  %v2585_v58 = vld [vmem:[#allocation14 + $0xec] ss:$16 sps:$4 sm:$0xff]  }
 0x165   : > { %821 = vmatpush1.bf16.msra.mxu0 %v2510_v22  ;;  %1053 = vmatprep.subr.bf16.mxu1 %v2550_v59  ;;  %v2168_v22 = vld [vmem:[#allocation10] ss:$0 sm:$0xff]  ;;  %v2583_v59 = vld [vmem:[#allocation14 + $0xe8] ss:$16 sps:$4 sm:$0xff]  }
 0x166   : > { %822 = vmatprep.subr.bf16.mxu0 %v2511_v23  ;;  %v528_v23 = vld [vmem:[#allocation8] sm:$0x3] }
 0x168   : > { %1054 = vmatpush1.bf16.msra.mxu1 %v2552_v63 }
 0x169   : > { %823 = vmatpush1.bf16.msra.mxu0 %v2513_v24 }
 0x16a   : > { %824 = vmatprep.subr.bf16.mxu0 %v2517_v25  ;;  %v550_v25 = vrot.slane %v527_v20, %v3518_v18 }
 0x16d   : > { %825 = vmatpush1.bf16.msra.mxu0 %v2519_v26  ;;  %v554_v26 = vrot.slane %v527_v20, %v3520_v19 }
 0x16e   : > { %826 = vmatprep.subr.bf16.mxu0 %v2523_v42 }
 0x171   : > { %827 = vmatpush1.bf16.msra.mxu0 %v2525_v43  ;;  %v2562_v43 = vld [vmem:[#allocation14 + $0x8] ss:$16 sps:$4 sm:$0xff]  }
 0x172   : > { %828 = vmatprep.subr.bf16.mxu0 %v2529_v46 }
 0x175   : > { %829 = vmatpush1.bf16.msra.mxu0 %v2531_v47 }
 0x176   : > { %830 = vmatprep.subr.bf16.mxu0 %v2535_v50  ;;  %v2573_v50 = vld [vmem:[#allocation14 + $0x6c] ss:$16 sps:$4 sm:$0xff]  }
 0x179   : > { %831 = vmatpush1.bf16.msra.mxu0 %v2537_v51  ;;  %v2571_v51 = vld [vmem:[#allocation14 + $0x68] ss:$16 sps:$4 sm:$0xff]  }
 0x17a   : > { %832 = vmatprep.subr.bf16.mxu0 %v2541_v54  ;;  %v2579_v54 = vld [vmem:[#allocation14 + $0xac] ss:$16 sps:$4 sm:$0xff]  }
 0x17d   : > { %833 = vmatpush1.bf16.msra.mxu0 %v2543_v55  ;;  %v2577_v55 = vld [vmem:[#allocation14 + $0xa8] ss:$16 sps:$4 sm:$0xff]  }
 0x17e   : > { %834 = vmatprep.subr.bf16.mxu0 %v2547_v57  ;;  %v2580_v57 = vld [vmem:[#allocation14 + $0xc8] ss:$16 sps:$4 sm:$0xff]  }
 0x181   : > { %835 = vmatpush1.bf16.msra.mxu0 %v2549_v60  ;;  %v3049_v60 = vmov 0.0  }
 0x182   : > { %836 = vmatprep.subr.bf16.mxu0 %v2553_v61 }
 0x1d7   : > { %v577_v27 = vpop.xlane.xlu0 %576 }
 0x1d8   : > { %v581_v28 = vmul.f32 0.0078125, %v577_v27 }
 0x1da   : > { %v531_v29 = vpop.xlane.xlu1 %530  ;;  %v3501_v30 = vsub.f32 %v525_v0, %v581_v28  ;;  %v2556_v0 = vld [vmem:[#allocation14 + $0xe4] ss:$16 sps:$4 sm:$0xff]  }
 0x1db   : > { %v533_v31 = vmul.f32 0.00390625, %v531_v29  ;;  %v579_v32 = vpop.xlane.xlu0 %578  ;;  %1055 = vmatprep.subr.bf16.mxu1 %v2556_v0 }
 0x1dc   : > { %v582_v35 = vmul.f32 0.0078125, %v579_v32  ;;  %v585_v36 = vmul.f32 %v3501_v30, %v3501_v30  ;;  %1056 = vmatpush1.bf16.msra.mxu1 %v2558_v3  ;;  %v563_v32 = vrot.slane %v528_v23, %v3518_v18 }
 0x1dd   : > { %v3503_v33 = vsub.f32 %v523_v1, %v533_v31  ;;  %v3505_v34 = vsub.f32 %v524_v2, %v533_v31  ;;  %v2555_v1 = vld [vmem:[#allocation13 + $0xe0] ss:$8 sps:$4 sm:$0xff]   ;;  %v2559_v2 = vld [vmem:[#allocation13 + $0xf4] ss:$8 sps:$4 sm:$0xff]  }
 0x1de   : > { %v3509_v37 = vsub.f32 %v526_v4, %v582_v35  ;;  %587 = vadd.xlane.f32.xlu1 %v585_v36  ;;  %v2564_v4 = vld [vmem:[#allocation14 + $0xc] ss:$16 sps:$4 sm:$0xff]   ;;  %837 = vmatpush1.bf16.msra.mxu0 %v2555_v1  ;;  %v567_v35 = vrot.slane %v528_v23, %v3520_v19 }
 0x1df   : > { %v536_v38 = vmul.f32 %v3503_v33, %v3503_v33  ;;  %v537_v39 = vmul.f32 %v3505_v34, %v3505_v34  ;;  %838 = vmatprep.subr.bf16.mxu0 %v2559_v2  ;;  %1084 = vmatprep.subr.bf16.mxu1 %v2564_v4  ;;  %v2169_v36 = vld [vmem:[#allocation11] ss:$0 sm:$0xff] }
 0x1e0   : > { %v586_v40 = vmul.f32 %v3509_v37, %v3509_v37 }
 0x1e1   : > { %v538_v41 = vadd.f32 %v537_v39, %v536_v38 }
 0x1e2   : > { %589 = vadd.xlane.f32.xlu0 %v586_v40  ;;  %839 = vmatpush1.bf16.msra.mxu0 %v2561_v5 }
 0x1e3   : > { %539 = vadd.xlane.f32.xlu1 %v538_v41  ;;  %2314 = vmatprep.subr.bf16.mxu0 %v3049_v60 }
 0x26b   : > { %v588_v6 = vpop.xlane.xlu1 %587 }
 0x26c   : > { %v591_v7 = vmul.f32 0.0078125, %v588_v6 }
 0x26e   : > { %v593_v8 = vadd.f32 1e-05, %v591_v7 }
 0x26f   : > { %v590_v9 = vpop.xlane.xlu0 %589 }
 0x270   : > { %v540_v10 = vpop.xlane.xlu1 %539  ;;  %2634 = vrsqrt.f32 %v593_v8  ;;  %v592_v11 = vmul.f32 0.0078125, %v590_v9 }
 0x271   : > { %v541_v12 = vmul.f32 0.00390625, %v540_v10 }
 0x272   : > { %v594_v13 = vadd.f32 1e-05, %v592_v11 }
 0x273   : > { %v542_v14 = vadd.f32 1e-05, %v541_v12 }
 0x274   : > { %2636 = vrsqrt.f32 %v594_v13 }
 0x275   : > { %2638 = vrsqrt.f32 %v542_v14 }
 0x27a   : > { %v2635_v17 = vpop.eup %2634 }
 0x27b   : > { %v597_v21 = vmul.f32 %v2635_v17, %v3501_v30 }
 0x27d   : > { %v605_v29 = vmul.f32 %v2168_v22, %v597_v21 }
 0x27e   : > { %v2637_v24 = vpop.eup %2636 }
 0x27f   : > { %v2639_v27 = vpop.eup %2638  ;;  %v598_v28 = vmul.f32 %v2637_v24, %v3509_v37  ;;  %v613_v41 = vadd.f32 %v2169_v36, %v605_v29  ;;  %v2567_v37 = vld [vmem:[#allocation14 + $0x2c] ss:$16 sps:$4 sm:$0xff]  }
 0x280   : > { %v545_v31 = vmul.f32 %v2639_v27, %v3505_v34  ;;  %v544_v30 = vmul.f32 %v2639_v27, %v3503_v33  ;;  %v2565_v34 = vld [vmem:[#allocation14 + $0x28] ss:$16 sps:$4 sm:$0xff]  }
 0x281   : > { %v606_v38 = vmul.f32 %v2168_v22, %v598_v28  ;;  %v2568_v33 = vld [vmem:[#allocation14 + $0x48] ss:$16 sps:$4 sm:$0xff]  }
 0x282   : > { %v558_v39 = vmul.f32 %v554_v26, %v545_v31  ;;  %v557_v40 = vmul.f32 %v550_v25, %v544_v30 }
 0x283   : > { %v614_v42 = vadd.f32 %v2169_v36, %v606_v38 }
 0x284   : > { %v571_v44 = vadd.f32 %v567_v35, %v558_v39  ;;  %v570_v45 = vadd.f32 %v563_v32, %v557_v40 }
 0x285   : > { %v615_v46 = vpack.c.bf16 %v614_v42, %v613_v41 }
 0x286   : > { %v573_v47 = vpack.c.bf16 %v571_v44, %v571_v44  ;;  %v572_v48 = vpack.c.bf16 %v570_v45, %v570_v45 }
 0x287   : > { %1074 = vmatmul.mubr.bf16.vlgmr.msra.gmra.mrb[0].mxu1 %v615_v46 }
 0x288   : > { %840 = vmatprep.mubr.bf16.mxu0 %v573_v47  ;;  %1085 = vmatpush1.bf16.msra.mxu1 %v2562_v43 }
 0x289   : > { %841 = vmatmul.mubr.bf16.vlgmr.msra.gmra.mrb[0].mxu0 %v572_v48  ;;  %1086 = vmatprep.subr.bf16.mxu1 %v2567_v37 }
 0x28a   : > { %1116 = vmatprep.mubr.bf16.mxu1 %v3048_v62  ;;  %2316 = vmatprep.mubr.msk.bf16.mxu0 %vm3050_vm0, %v3049_v60 }
 0x28c   : > { %1087 = vmatpush1.bf16.msra.mxu1 %v2565_v34 }
 0x28d   : > { %1088 = vmatprep.subr.bf16.mxu1 %v2570_v49  ;;  %v2588_v49 = vld [vmem:[#allocation16 + $0x4] ss:$8 sps:$4 sm:$0xff]  }
 0x290   : > { %1089 = vmatpush1.bf16.msra.mxu1 %v2568_v33 }
 0x291   : > { %1090 = vmatprep.subr.bf16.mxu1 %v2573_v50  ;;  %v2598_v50 = vld [vmem:[#allocation16 + $0x40] ss:$8 sps:$4 sm:$0xff]  }
 0x294   : > { %1091 = vmatpush1.bf16.msra.mxu1 %v2571_v51  ;;  %v2600_v51 = vld [vmem:[#allocation16 + $0x44] ss:$8 sps:$4 sm:$0xff]  }
 0x295   : > { %1092 = vmatprep.subr.bf16.mxu1 %v2576_v52  ;;  %v2603_v52 = vld [vmem:[#allocation16 + $0x54] ss:$8 sps:$4 sm:$0xff]  }
 0x298   : > { %1093 = vmatpush1.bf16.msra.mxu1 %v2574_v53  ;;  %v2601_v53 = vld [vmem:[#allocation16 + $0x50] ss:$8 sps:$4 sm:$0xff]  }
 0x299   : > { %1094 = vmatprep.subr.bf16.mxu1 %v2579_v54  ;;  %v2606_v54 = vld [vmem:[#allocation16 + $0x64] ss:$8 sps:$4 sm:$0xff]  }
 0x29c   : > { %1095 = vmatpush1.bf16.msra.mxu1 %v2577_v55  ;;  %v2604_v55 = vld [vmem:[#allocation16 + $0x60] ss:$8 sps:$4 sm:$0xff]  }
 0x29d   : > { %1096 = vmatprep.subr.bf16.mxu1 %v2582_v56  ;;  %v2609_v56 = vld [vmem:[#allocation16 + $0x74] ss:$8 sps:$4 sm:$0xff]  }
 0x2a0   : > { %1097 = vmatpush1.bf16.msra.mxu1 %v2580_v57  ;;  %v2607_v57 = vld [vmem:[#allocation16 + $0x70] ss:$8 sps:$4 sm:$0xff]  }
 0x2a1   : > { %1098 = vmatprep.subr.bf16.mxu1 %v2585_v58 }
 0x2a4   : > { %1099 = vmatpush1.bf16.msra.mxu1 %v2583_v59 }
 0x2a5   : > { %2302 = vmatprep.subr.bf16.mxu1 %v3049_v60 }
 0x2a7   : > { %1117 = vmatmul.mubr.bf16.vlgmr.msra.gmra.mrb[4].mxu1 %v615_v46 }
 0x2a8   : > { %2304 = vmatprep.mubr.msk.bf16.mxu1 %vm3050_vm0, %v3049_v60 }
 0x35a   : > { %v1075_v61 = vpop.f32.mrb[0].mxu1 }
 0x35b   : > { %v1077_v63 = vpop.f32.mrb[1].mxu1 }
 0x35c   : > { %v842_v0 = vpop.f32.mrb[0].mxu0  ;;  %v1079_v1 = vpop.f32.mrb[2].mxu1 }
 0x35d   : > { %v1160_v2 = vmul.f32 0.125, %v842_v0  ;;  %v844_v3 = vpop.f32.mrb[1].mxu0  ;;  %v1162_v4 = vpack.c.bf16 %v1079_v1, %v1075_v61  ;;  %v1081_v5 = vpop.f32.mrb[3].mxu1  ;;  %v2591_v1 = vld [vmem:[#allocation16 + $0x14] ss:$8 sps:$4 sm:$0xff]  }
 0x35e   : > { %v846_v6 = vpop.f32.mrb[2].mxu0  ;;  %v3537_v7 = vpack.c.bf16 %v1081_v5, %v1077_v63  ;;  %v1548_v40 = vmul.f32 0.125, %v844_v3  ;;  %v2586_v63 = vld [vmem:[#allocation16] ss:$8 sps:$4 sm:$0xff]   ;;  %v2594_v3 = vld [vmem:[#allocation16 + $0x24] ss:$8 sps:$4 sm:$0xff]  }
 0x35f   : > { %v1161_v8 = vpack.c.bf16 %v1160_v2, %v1160_v2  ;;  %v1169_v9 = vsel %vm1164_vm1, %v1162_v4, 0  ;;  %v847_v10 = vpop.f32.mrb[3].mxu0  ;;  %1272 = vrot.lane.b32.xlu0 %v1162_v4, %s3051_s21  ;;  %v2589_v2 = vld [vmem:[#allocation16 + $0x10] ss:$8 sps:$4 sm:$0xff]   ;;  %v2592_v4 = vld [vmem:[#allocation16 + $0x20] ss:$8 sps:$4 sm:$0xff]  }
 0x360   : > { %2303 = vmatpush3.bf16.xpose.msra.mxu1 %v1169_v9  ;;  %v3556_v41 = vpack.c.bf16 %v1548_v40, %v1548_v40  ;;  %v2597_v5 = vld [vmem:[#allocation16 + $0x34] ss:$8 sps:$4 sm:$0xff]   ;;  %v2595_v6 = vld [vmem:[#allocation16 + $0x30] ss:$8 sps:$4 sm:$0xff]  }
 0x361   : > { %1269 = vrot.lane.b32.xlu1 %v1161_v8, %s3051_s21  ;;  %2308 = vmatprep.subr.bf16.mxu1 %v3049_v60 }
 0x367   : > { %2305 = vmatmul.mubr.msk.bf16.vlgmr.msra.gmra.mrb[8].mxu1 %vm1164_vm1, %v1161_v8 }
 0x368   : > { %2310 = vmatprep.mubr.msk.bf16.mxu1 %vm3050_vm0, %v3049_v60 }
 0x37a   : > { %v1118_v11 = vpop.f32.mrb[4].mxu1 }
 0x37b   : > { %v1120_v12 = vpop.f32.mrb[5].mxu1 }
 0x37c   : > { %v1122_v13 = vpop.f32.mrb[6].mxu1 }
 0x37d   : > { %v1163_v14 = vpack.c.bf16 %v1122_v13, %v1118_v11  ;;  %v1124_v15 = vpop.f32.mrb[7].mxu1 }
 0x37e   : > { %v3546_v16 = vpack.c.bf16 %v1124_v15, %v1120_v12 }
 0x37f   : > { %2309 = vmatpush3.bf16.msra.mxu1 %v1163_v14 }
 0x380   : > { %2320 = vmatprep.subr.bf16.mxu1 %v3049_v60 }
 0x3d1   : > { %v1273_v17 = vpop.permute.xlu0 %1272 }
 0x3d2   : > { %v1278_v20 = vsel %vm1164_vm1, %v1273_v17, 0 }
 0x3d3   : > { %2315 = vmatpush3.bf16.xpose.msra.mxu0 %v1278_v20  ;;  %v1270_v21 = vpop.permute.xlu1 %1269  ;;  %v1556_v20 = vsel %vm1164_vm1, %v3537_v7, 0 }
 0x3d4   : > { %1423 = vmatprep.subr.bf16.mxu0 %v2600_v51 }
 0x3da   : > { %2317 = vmatmul.mubr.msk.bf16.vlgmr.msra.gmra.mrb[4].mxu0 %vm1164_vm1, %v1270_v21 }
 0x3db   : > { %1455 = vmatprep.mubr.bf16.mxu0 %v3048_v62  ;;  %1424 = vmatpush1.bf16.msra.mxu0 %v2598_v50 }
 0x3dc   : > { %1425 = vmatprep.subr.bf16.mxu0 %v2603_v52 }
 0x3df   : > { %1426 = vmatpush1.bf16.msra.mxu0 %v2601_v53 }
 0x3e0   : > { %1427 = vmatprep.subr.bf16.mxu0 %v2606_v54 }
 0x3e3   : > { %1428 = vmatpush1.bf16.msra.mxu0 %v2604_v55 }
 0x3e4   : > { %1429 = vmatprep.subr.bf16.mxu0 %v2609_v56 }
 0x3e7   : > { %1430 = vmatpush1.bf16.msra.mxu0 %v2607_v57 }
 0x3e8   : > { %2326 = vmatprep.subr.bf16.mxu0 %v3049_v60 }
 0x43a   : > { %v1205_v22 = vpop.f32.mrb[8].mxu1 }
 0x43b   : > { %v2306_v23 = vpop.f32.mrb[9].mxu1  ;;  %v1212_v24 = vsel %vm1211_vm2, %v1205_v22, -inf }
 0x43c   : > { %1213 = vmax.xlane.f32.xlu1 %v1212_v24  ;;  %v1208_v25 = vpop.f32.mrb[10].mxu1 }
 0x43d   : > { %v2307_v26 = vpop.f32.mrb[11].mxu1 }
 0x4ad   : > { %v1314_v27 = vpop.f32.mrb[4].mxu0 }
 0x4ae   : > { %v2318_v28 = vpop.f32.mrb[5].mxu0  ;;  %v1320_v29 = vsel %vm1211_vm2, %v1314_v27, -inf }
 0x4af   : > { %1321 = vmax.xlane.f32.xlu0 %v1320_v29  ;;  %v1317_v31 = vpop.f32.mrb[6].mxu0 }
 0x4b0   : > { %v2319_v32 = vpop.f32.mrb[7].mxu0 }
 0x4c9   : > { %v1214_v35 = vpop.xlane.xlu1 %1213 }
 0x4ca   : > { %v1215_v36 = vsub.f32 %v1205_v22, %v1214_v35 }
 0x4cc   : > { %v1216_v30 = vmul.f32 1.442695, %v1215_v36 }
 0x4ce   : > { %2640 = vpow2.f32 %v1216_v30 }
 0x4d8   : > { %v2641_v38 = vpop.eup %2640 }
 0x4d9   : > { %v1218_v39 = vsel %vm1211_vm2, %v2641_v38, 0.0 }
 0x4da   : > { %1219 = vadd.xlane.f32.xlu0 %v1218_v39 }
 0x4f0   : > { %1333 = vrot.lane.b32.xlu0 %v1163_v14, %s3051_s21 }
 0x4f4   : > { %1741 = vrot.lane.b32.xlu0 %v3556_v41, %s3051_s21 }
 0x53c   : > { %v1322_v42 = vpop.xlane.xlu0 %1321 }
 0x53d   : > { %v1323_v43 = vsub.f32 %v1314_v27, %v1322_v42 }
 0x53f   : > { %v1324_v44 = vmul.f32 1.442695, %v1323_v43 }
 0x541   : > { %2642 = vpow2.f32 %v1324_v44 }
 0x54b   : > { %v2643_v45 = vpop.eup %2642 }
 0x54c   : > { %v1326_v46 = vsel %vm1211_vm2, %v2643_v45, 0.0 }
 0x54d   : > { %1327 = vadd.xlane.f32.xlu1 %v1326_v46  ;;  %v2612_v46 = vld [vmem:[#allocation16 + $0x84] ss:$8 sps:$4 sm:$0xff]  }
 0x567   : > { %v1220_v37 = vpop.xlane.xlu0 %1219 }
 0x568   : > { %2644 = vrcp.f32 %v1220_v37  ;;  %v2615_v37 = vld [vmem:[#allocation16 + $0x94] ss:$8 sps:$4 sm:$0xff]  }
 0x56b   : > { %v1334_v33 = vpop.permute.xlu0 %1333 }
 0x56f   : > { %v1742_v55 = vpop.permute.xlu0 %1741 }
 0x572   : > { %v2645_v47 = vpop.eup %2644 }
 0x573   : > { %v1222_v48 = vmul.f32 %v2645_v47, %v2641_v38  ;;  %v2613_v47 = vld [vmem:[#allocation16 + $0x90] ss:$8 sps:$4 sm:$0xff]  }
 0x575   : > { %v1223_v34 = vpack.c.bf16 %v1222_v48, %v1222_v48  ;;  %v2618_v48 = vld [vmem:[#allocation16 + $0xa4] ss:$8 sps:$4 sm:$0xff]  }
 0x577   : > { %2311 = vmatmul.mubr.msk.bf16.vlgmr.msra.gmra.mrb[12].mxu1 %vm1211_vm2, %v1223_v34  ;;  %v2616_v34 = vld [vmem:[#allocation16 + $0xa0] ss:$8 sps:$4 sm:$0xff]  }
 0x578   : > { %2321 = vmatpush3.bf16.msra.mxu1 %v1334_v33  ;;  %2322 = vmatprep.mubr.msk.bf16.mxu1 %vm3050_vm0, %v3049_v60  ;;  %v2619_v33 = vld [vmem:[#allocation16 + $0xb0] ss:$8 sps:$4 sm:$0xff]  }
 0x579   : > { %1507 = vmatprep.subr.bf16.mxu1 %v2588_v49  ;;  %v2621_v49 = vld [vmem:[#allocation16 + $0xb4] ss:$8 sps:$4 sm:$0xff]  }
 0x5da   : > { %v1328_v58 = vpop.xlane.xlu1 %1327 }
 0x5db   : > { %2646 = vrcp.f32 %v1328_v58 }
 0x5e5   : > { %v2647_v59 = vpop.eup %2646 }
 0x5e6   : > { %v1330_v61 = vmul.f32 %v2647_v59, %v2643_v45  ;;  %v2610_v45 = vld [vmem:[#allocation16 + $0x80] ss:$8 sps:$4 sm:$0xff]  }
 0x5e8   : > { %v1331_v0 = vpack.c.bf16 %v1330_v61, %v1330_v61 }
 0x5ea   : > { %2323 = vmatmul.mubr.msk.bf16.vlgmr.msra.gmra.mrb[16].mxu1 %vm1211_vm2, %v1331_v0 }
 0x5eb   : > { %1508 = vmatpush1.bf16.msra.mxu1 %v2586_v63  ;;  %1539 = vmatprep.mubr.bf16.mxu1 %v3048_v62 }
 0x5ec   : > { %1509 = vmatprep.subr.bf16.mxu1 %v2591_v1 }
 0x5ef   : > { %1510 = vmatpush1.bf16.msra.mxu1 %v2589_v2 }
 0x5f0   : > { %1511 = vmatprep.subr.bf16.mxu1 %v2594_v3 }
 0x5f3   : > { %1512 = vmatpush1.bf16.msra.mxu1 %v2592_v4 }
 0x5f4   : > { %1513 = vmatprep.subr.bf16.mxu1 %v2597_v5 }
 0x5f7   : > { %1514 = vmatpush1.bf16.msra.mxu1 %v2595_v6 }
 0x5f8   : > { %2332 = vmatprep.subr.bf16.mxu1 %v3049_v60 }
 0x64a   : > { %v1261_v8 = vpop.f32.mrb[12].mxu1 }
 0x64b   : > { %v1267_v9 = vpack.c.bf16 %v1261_v8, %v1261_v8  ;;  %v2312_v10 = vpop.f32.mrb[13].mxu1 }
 0x64c   : > { %v1264_v11 = vpop.f32.mrb[14].mxu1  ;;  %v2627_v10 = vld [vmem:[#allocation16 + $0xd4] ss:$8 sps:$4 sm:$0xff]  }
 0x64d   : > { %v2313_v12 = vpop.f32.mrb[15].mxu1  ;;  %2255 = vmatmul.mubr.msk.bf16.vlgmr.msra.gmra.mrb[20].mxu1 %vm1164_vm1, %v1267_v9  ;;  %v2622_v9 = vld [vmem:[#allocation16 + $0xc0] ss:$8 sps:$4 sm:$0xff]   ;;  %v2625_v11 = vld [vmem:[#allocation16 + $0xd0] ss:$8 sps:$4 sm:$0xff]  }
 0x64e   : > { %2333 = vmatpush3.bf16.msra.mxu1 %v3546_v16  ;;  %2334 = vmatprep.mubr.msk.bf16.mxu1 %vm3050_vm0, %v3049_v60  ;;  %v2630_v12 = vld [vmem:[#allocation16 + $0xe4] ss:$8 sps:$4 sm:$0xff]  }
 0x64f   : > { %2338 = vmatprep.subr.bf16.mxu1 %v3049_v60 }
 0x6bd   : > { %v1373_v13 = vpop.f32.mrb[16].mxu1 }
 0x6be   : > { %v1379_v14 = vpack.c.bf16 %v1373_v13, %v1373_v13  ;;  %v2324_v15 = vpop.f32.mrb[17].mxu1  ;;  %v2628_v13 = vld [vmem:[#allocation16 + $0xe0] ss:$8 sps:$4 sm:$0xff]  }
 0x6bf   : > { %v1376_v17 = vpop.f32.mrb[18].mxu1  ;;  %v2631_v15 = vld [vmem:[#allocation16 + $0xf0] ss:$8 sps:$4 sm:$0xff]  }
 0x6c0   : > { %v2325_v21 = vpop.f32.mrb[19].mxu1  ;;  %2246 = vmatmul.mubr.msk.bf16.vlgmr.msra.gmra.mrb[8].mxu0 %vm1164_vm1, %v1379_v14  ;;  %v2633_v14 = vld [vmem:[#allocation16 + $0xf4] ss:$8 sps:$4 sm:$0xff]  }
 0x6c1   : > { %2327 = vmatpush3.bf16.xpose.msra.mxu0 %v1556_v20  ;;  %2328 = vmatprep.mubr.msk.bf16.mxu0 %vm3050_vm0, %v3049_v60 }
 0x6c2   : > { %1697 = vmatprep.subr.bf16.mxu0 %v2612_v46 }
 0x6c8   : > { %2329 = vmatmul.mubr.msk.bf16.vlgmr.msra.gmra.mrb[12].mxu0 %vm1164_vm1, %v3556_v41 }
 0x6c9   : > { %1729 = vmatprep.mubr.bf16.mxu0 %v3048_v62  ;;  %1698 = vmatpush1.bf16.msra.mxu0 %v2610_v45 }
 0x6ca   : > { %1699 = vmatprep.subr.bf16.mxu0 %v2615_v37 }
 0x6cd   : > { %1700 = vmatpush1.bf16.msra.mxu0 %v2613_v47  ;;  %v2656_v47 = vld [vmem:[%s3467_s3] sm:$0xff] }
 0x6ce   : > { %1701 = vmatprep.subr.bf16.mxu0 %v2618_v48 }
 0x6d1   : > { %1702 = vmatpush1.bf16.msra.mxu0 %v2616_v34  ;;  %v2657_v34 = vld [vmem:[%s3467_s3 + $0x8] sm:$0xff] }
 0x6d2   : > { %1703 = vmatprep.subr.bf16.mxu0 %v2621_v49 }
 0x6d5   : > { %1704 = vmatpush1.bf16.msra.mxu0 %v2619_v33 }
 0x720   : > { %v1541_v22 = vpop.f32.mrb[20].mxu1 }
 0x721   : > { %v1543_v23 = vpop.f32.mrb[21].mxu1 }
 0x722   : > { %v1545_v24 = vpop.f32.mrb[22].mxu1 }
 0x723   : > { %v1546_v25 = vpop.f32.mrb[23].mxu1 }
 0x793   : > { %v1457_v26 = vpop.f32.mrb[8].mxu0 }
 0x794   : > { %v3581_v27 = vadd.f32 %v1541_v22, %v1457_v26  ;;  %v1459_v28 = vpop.f32.mrb[9].mxu0 }
 0x795   : > { %v3583_v29 = vadd.f32 %v1543_v23, %v1459_v28  ;;  %v1461_v31 = vpop.f32.mrb[10].mxu0 }
 0x796   : > { %v1462_v32 = vpop.f32.mrb[11].mxu0 }
 0x79b   : > { %v1592_v35 = vpop.f32.mrb[12].mxu0 }
 0x79c   : > { %v2330_v36 = vpop.f32.mrb[13].mxu0  ;;  %v1598_v30 = vsel %vm1211_vm2, %v1592_v35, -inf }
 0x79d   : > { %1599 = vmax.xlane.f32.xlu1 %v1598_v30  ;;  %v1595_v38 = vpop.f32.mrb[14].mxu0 }
 0x79e   : > { %v2331_v39 = vpop.f32.mrb[15].mxu0 }
 0x82a   : > { %v1600_v40 = vpop.xlane.xlu1 %1599 }
 0x82b   : > { %v1601_v41 = vsub.f32 %v1592_v35, %v1600_v40 }
 0x82d   : > { %v1602_v42 = vmul.f32 1.442695, %v1601_v41 }
 0x82f   : > { %2648 = vpow2.f32 %v1602_v42 }
 0x839   : > { %v2649_v43 = vpop.eup %2648 }
 0x83a   : > { %v1604_v44 = vsel %vm1211_vm2, %v2649_v43, 0.0 }
 0x83b   : > { %1605 = vadd.xlane.f32.xlu1 %v1604_v44 }
 0x84c   : > { %1744 = vrot.lane.b32.xlu1 %v3537_v7, %s3051_s21 }
 0x8c8   : > { %v1606_v50 = vpop.xlane.xlu1 %1605 }
 0x8c9   : > { %2650 = vrcp.f32 %v1606_v50 }
 0x8cc   : > { %v1745_v52 = vpop.permute.xlu1 %1744 }
 0x8cd   : > { %v1750_v54 = vsel %vm1164_vm1, %v1745_v52, 0 }
 0x8d3   : > { %v2651_v51 = vpop.eup %2650 }
 0x8d4   : > { %v1608_v7 = vmul.f32 %v2651_v51, %v2649_v43 }
 0x8d6   : > { %v1609_v53 = vpack.c.bf16 %v1608_v7, %v1608_v7 }
 0x8d8   : > { %2335 = vmatmul.mubr.msk.bf16.vlgmr.msra.gmra.mrb[24].mxu1 %vm1211_vm2, %v1609_v53 }
 0x8d9   : > { %2339 = vmatpush3.bf16.xpose.msra.mxu1 %v1750_v54  ;;  %2340 = vmatprep.mubr.msk.bf16.mxu1 %vm3050_vm0, %v3049_v60 }
 0x8da   : > { %2344 = vmatprep.subr.bf16.mxu1 %v3049_v60 }
 0x8e0   : > { %2341 = vmatmul.mubr.msk.bf16.vlgmr.msra.gmra.mrb[28].mxu1 %vm1164_vm1, %v1742_v55 }
 0x8e1   : > { %2346 = vmatprep.mubr.msk.bf16.mxu1 %vm3050_vm0, %v3049_v60 }
 0x9ab   : > { %v1647_v56 = vpop.f32.mrb[24].mxu1 }
 0x9ac   : > { %v1653_v57 = vpack.c.bf16 %v1647_v56, %v1647_v56  ;;  %v2336_v58 = vpop.f32.mrb[25].mxu1 }
 0x9ad   : > { %v1650_v59 = vpop.f32.mrb[26].mxu1 }
 0x9ae   : > { %v2337_v61 = vpop.f32.mrb[27].mxu1  ;;  %2266 = vmatmul.mubr.msk.bf16.vlgmr.msra.gmra.mrb[16].mxu0 %vm1164_vm1, %v1653_v57 }
 0x9af   : > { %1927 = vmatprep.mubr.bf16.mxu0 %v3048_v62  ;;  %v2624_v62 = vld [vmem:[#allocation16 + $0xc4] ss:$8 sps:$4 sm:$0xff]  }
 0x9b0   : > { %1895 = vmatprep.subr.bf16.mxu0 %v2624_v62 }
 0x9b1   : > { %1896 = vmatpush1.bf16.msra.mxu0 %v2622_v9 }
 0x9b2   : > { %1897 = vmatprep.subr.bf16.mxu0 %v2627_v10 }
 0x9b3   : > { %v1786_v63 = vpop.f32.mrb[28].mxu1 }
 0x9b4   : > { %v2342_v0 = vpop.f32.mrb[29].mxu1  ;;  %v1792_v1 = vsel %vm1211_vm2, %v1786_v63, -inf }
 0x9b5   : > { %1793 = vmax.xlane.f32.xlu1 %v1792_v1  ;;  %v1789_v2 = vpop.f32.mrb[30].mxu1  ;;  %1898 = vmatpush1.bf16.msra.mxu0 %v2625_v11 }
 0x9b6   : > { %v2343_v3 = vpop.f32.mrb[31].mxu1  ;;  %1899 = vmatprep.subr.bf16.mxu0 %v2630_v12 }
 0x9b9   : > { %1900 = vmatpush1.bf16.msra.mxu0 %v2628_v13 }
 0x9ba   : > { %1901 = vmatprep.subr.bf16.mxu0 %v2633_v14 }
 0x9bd   : > { %1902 = vmatpush1.bf16.msra.mxu0 %v2631_v15 }
 0xa42   : > { %v1794_v4 = vpop.xlane.xlu1 %1793 }
 0xa43   : > { %v1795_v5 = vsub.f32 %v1786_v63, %v1794_v4 }
 0xa45   : > { %v1796_v6 = vmul.f32 1.442695, %v1795_v5 }
 0xa47   : > { %2652 = vpow2.f32 %v1796_v6 }
 0xa51   : > { %v2653_v60 = vpop.eup %2652 }
 0xa52   : > { %v1798_v8 = vsel %vm1211_vm2, %v2653_v60, 0.0 }
 0xa53   : > { %1799 = vadd.xlane.f32.xlu0 %v1798_v8 }
 0xa69   : > { %1805 = vrot.lane.b32.xlu0 %v3546_v16, %s3051_s21 }
 0xa81   : > { %v1731_v17 = vpop.f32.mrb[16].mxu0 }
 0xa82   : > { %v1738_v20 = vadd.f32 %v1731_v17, %v3581_v27  ;;  %v1733_v16 = vpop.f32.mrb[17].mxu0 }
 0xa83   : > { %v1739_v21 = vadd.f32 %v1733_v16, %v3583_v29  ;;  %v1735_v22 = vpop.f32.mrb[18].mxu0  ;;  %v1159_v29 = vld [vmem:[#allocation17] sm:$0x3] }
 0xa84   : > { %v1736_v23 = vpop.f32.mrb[19].mxu0  ;;  %v1942_v38 = vrot.slane %v1159_v29, %v3518_v18  ;;  %v1946_v40 = vrot.slane %v1159_v29, %v3520_v19 }
 0xae0   : > { %v1800_v24 = vpop.xlane.xlu0 %1799 }
 0xae1   : > { %2654 = vrcp.f32 %v1800_v24 }
 0xae4   : > { %v1806_v25 = vpop.permute.xlu0 %1805 }
 0xae5   : > { %2345 = vmatpush3.bf16.msra.mxu1 %v1806_v25 }
 0xaeb   : > { %v2655_v26 = vpop.eup %2654 }
 0xaec   : > { %v1802_v28 = vmul.f32 %v2655_v26, %v2653_v60 }
 0xaee   : > { %v1803_v31 = vpack.c.bf16 %v1802_v28, %v1802_v28 }
 0xaf0   : > { %2347 = vmatmul.mubr.msk.bf16.vlgmr.msra.gmra.mrb[32].mxu1 %vm1211_vm2, %v1803_v31 }
 0xbc3   : > { %v1845_v32 = vpop.f32.mrb[32].mxu1 }
 0xbc4   : > { %v1851_v35 = vpack.c.bf16 %v1845_v32, %v1845_v32  ;;  %v2348_v36 = vpop.f32.mrb[33].mxu1 }
 0xbc5   : > { %v1848_v27 = vpop.f32.mrb[34].mxu1 }
 0xbc6   : > { %v2349_v30 = vpop.f32.mrb[35].mxu1  ;;  %2277 = vmatmul.mubr.msk.bf16.vlgmr.msra.gmra.mrb[20].mxu0 %vm1164_vm1, %v1851_v35 }
 0xc99   : > { %v1929_v39 = vpop.f32.mrb[20].mxu0 }
 0xc9a   : > { %v1936_v41 = vadd.f32 %v1929_v39, %v1738_v20  ;;  %v1931_v42 = vpop.f32.mrb[21].mxu0 }
 0xc9b   : > { %v1937_v43 = vadd.f32 %v1931_v42, %v1739_v21  ;;  %v1933_v44 = vpop.f32.mrb[22].mxu0 }
 0xc9c   : > { %v1949_v45 = vadd.f32 %v1942_v38, %v1936_v41  ;;  %v1934_v46 = vpop.f32.mrb[23].mxu0 }
 0xc9d   : > { %v1950_v37 = vadd.f32 %v1946_v40, %v1937_v43 }
 0xc9e   : > { %v1951_v48 = vadd.f32 %v2656_v47, %v1949_v45 }
 0xc9f   : > { %v1952_v49 = vadd.f32 %v2657_v34, %v1950_v37 }
 0xca0   : > { %1953 = vst [vmem:[%s521_s24] sm:$0xff] %v1951_v48 }
 0xca1   : > { %1954 = vst [vmem:[%s521_s24 + $0x8] sm:$0xff] %v1952_v49 }
 0xca2   : > { %2955 = shalt.err (!%p2952_p1)
}
 0xca3   : > { %s2956_s25 = scalar_lea.hbm %s3616_s23, 256  ;;  %s2960_s4 = scalar_lea.hbm %s3712_s11, 512 }
 0xca4   : > { %p2957_p13 = scmp.ne.s32.totalorder %s3616_s23, %s2956_s25  ;;  %p2961_p2 = scmp.lt.u32.totalorder %s3616_s23, %s3712_s11 }
 0xca5   : > { %p2962_p10 = scmp.lt.u32.totalorder %s2960_s4, %s2956_s25  ;;  %p2964_p5 = scmp.lt.u32.totalorder %s2956_s25, %s3616_s23 }
 0xca6   : > { %p2958_p0 = pnand %p2957_p13, %p3713_p7 }
 0xca7   : > { %p2963_p4 = por %p2962_p10, %p2961_p2 }
 0xca8   : > { %p2959_p6 = pneg %p2958_p0 }
 0xca9   : > { %p2965_p9 = por %p2964_p5, %p2963_p4 }
 0xcab   : > { %p2966_p8 = pnand %p2965_p9, %p2959_p6 }
 0xcad   : > { %2969 = shalt.err (!%p2966_p8)
}
 0xcae   : > { %2386 = dma.vmem_to_hbm [thread:$0]  (%p3713_p7), %s3618_s10, 256, %s3616_s23, %s1956_s19  }
 0xcaf PF: > { %s1982_s21 = sand.u32 1, %s3020_s13   ;;  %p3714_p11 = scmp.ne.s32.totalorder %s3697_s18, 0 }
 0xcb0   : > { %p3715_p3 = scmp.ge.s32.totalorder %s3032_s16, 2  ;;  %s1983_s28 = scalar_lea.sflag [#allocation4], %s1982_s21 }
 0xcb2   : > { %p2421_p12 = pnand %p3715_p3, %p3714_p11 }
 0xcb4   : > { %3015 = dma.done.wait (!%p2421_p12), %s1983_s28, 256  }
 0xcb5   : > { %3017 = vsyncadd (!%p2421_p12), %s1983_s28, 4294967040  ;;  %p30_p1 = scmp.ge.s32.totalorder %s3344_s17, 4   ;;  %s3716_s13 = smov %s3024_s14 }
 0xcb6   : > { %s3717_s14 = smov %s3028_s15  ;;  %s3718_s15 = smov %s3355_s26 }
 0xcb7   : > { %s3719_s16 = smov %s3344_s17  ;;  %32 = sbr.rel (!%p30_p1) target bundleno = 19 (0x13), region = 150 }
 0xcbe   :  { %1988 = vsyncpa [#allocation3], 1 }
 0xcbf   :  { %1990 = vsyncpa [#allocation3 + $0x1], 1 }
 0xcc0   :  { %1991 = vsyncpa [#allocation6], 1 }
 0xcc1   :  { %1993 = vsyncpa [#allocation6 + $0x1], 1 }
 0xcc2   :  { %1994 = vsyncpa [#allocation9], 1 }
 0xcc3   :  { %1995 = vsyncpa [#allocation12], 1 }
 0xcc4   :  { %1996 = vsyncpa [#allocation15], 1 }
 0xcc5   :  { %1997 = vsyncpa [#allocation18], 1 }
 0xcc6   :  { %1998 = vsyncpa [#allocation4], 1 }
 0xcc7   :  { %2000 = vsyncpa [#allocation4 + $0x1], 1 }

// kernel: encoder_forward.14
= control target key start
LH: loop header
LB: loop body
LE: loop exit
PB: predicated region body
PF: predicated region fallthrough
CT: control target
= control target key end

     0   :  { %s3422_s0 = inlined_call_operand.hbm [shape: f32[2,16,128], index: 0, kind: input, shape index: {}]   ;;  %s3423_s1 = inlined_call_operand.hbm [shape: f32[2,8,256], index: 1, kind: input, shape index: {}]   ;;  %s3424_s2 = inlined_call_operand.hbm [shape: f32[1,128], index: 2, kind: input, shape index: {}]   ;;  %s3425_s3 = inlined_call_operand.hbm [shape: f32[1,128], index: 3, kind: input, shape index: {}]   ;;  %s3426_s4 = inlined_call_operand.hbm [shape: f32[1,256], index: 4, kind: input, shape index: {}]   ;;  %s3427_s5 = inlined_call_operand.hbm [shape: f32[1,256], index: 5, kind: input, shape index: {}]   ;;  %s3428_s6 = inlined_call_operand.hbm [shape: bf16[128,128], index: 6, kind: input, shape index: {}]   ;;  %s3429_s7 = inlined_call_operand.hbm [shape: bf16[256,256], index: 7, kind: input, shape index: {}]   ;;  %s3430_s8 = inlined_call_operand.hbm [shape: bf16[128,128], index: 8, kind: input, shape index: {}]   ;;  %s3431_s9 = inlined_call_operand.hbm [shape: f32[1,128], index: 9, kind: input, shape index: {}]   ;;  %s3432_s10 = inlined_call_operand.hbm [shape: f32[2,16,128], index: 10, kind: output, shape index: {}]  }
   0x1   :  { %3441 = sst [smem:[#allocation28_spill]] %s3422_s0 }
   0x2   :  { %3442 = sst [smem:[#allocation29_spill]] %s3424_s2 }
   0x3   :  { %3443 = sst [smem:[#allocation30_spill]] %s3425_s3 }
   0x4   :  { %3444 = sst [smem:[#allocation31_spill]] %s3426_s4 }
   0x5   :  { %3445 = sst [smem:[#allocation32_spill]] %s3427_s5 }
   0x6   :  { %3446 = sst [smem:[#allocation33_spill]] %s3428_s6 }
   0x7   :  { %3447 = sst [smem:[#allocation34_spill]] %s3432_s10 }
   0x8   :  { %15 = vsyncpa [#allocation3], 0 }
   0x9   :  { %17 = vsyncpa [#allocation3 + $0x1], 0 }
   0xa   :  { %18 = vsyncpa [#allocation6], 0 }
   0xb   :  { %20 = vsyncpa [#allocation6 + $0x1], 0 }
   0xc   :  { %21 = vsyncpa [#allocation9], 0 }
   0xd   :  { %22 = vsyncpa [#allocation12], 0 }
   0xe   :  { %23 = vsyncpa [#allocation15], 0 }
   0xf   :  { %24 = vsyncpa [#allocation18], 0 }
  0x10   :  { %25 = vsyncpa [#allocation4], 0 }
  0x11   :  { %27 = vsyncpa [#allocation4 + $0x1], 0  ;;  %s2833_s13 = smov 0   ;;  %s2835_s14 = smov 0  }
  0x12   :  { %s2837_s15 = smov 0   ;;  %s2839_s16 = smov 0  }
  0x13 LB: > { %s2756_s17 = smov [#allocation7]   ;;  %s2854_s19 = sadd.s32 4294967295, %s2754_s16   ;;  %s2754_s16 = sphi %s2839_s16, %s3486_s16   ;;  %s2750_s15 = sphi %s2837_s15, %s3485_s15   ;;  %s2746_s14 = sphi %s2835_s14, %s3484_s14   ;;  %s2742_s13 = sphi %s2833_s13, %s3483_s13  }
  0x14   : > { %s297_s18 = sshll.u32 %s2756_s17, 4  ;;  %p1899_p0 = scmp.ge.s32.totalorder %s2754_s16, 1  ;;  %s2859_s18 = int_to_ptr.vmem [resolvable:$true] %s297_s18 }
  0x15   : > { %p3434_p1 = scmp.eq.s32.totalorder %s2854_s19, 0  ;;  %p284_p2 = scmp.lt.s32.totalorder %s2754_s16, 3 }
  0x16   : > { %s2757_s21 = smov [#allocation8]   ;;  %s2758_s23 = smov [#allocation11]  }
  0x17   : > { %p2861_p3 = pnand %p1899_p0, %p284_p2  ;;  %s308_s22 = sshll.u32 %s2757_s21, 4  ;;  %s2868_s22 = int_to_ptr.vmem [resolvable:$true] %s308_s22 }
  0x18   : > { %s330_s24 = sshll.u32 %s2758_s23, 4  ;;  %s2759_s26 = smov [#allocation14]   ;;  %s2876_s24 = int_to_ptr.vmem [resolvable:$true] %s330_s24 }
  0x19   : > { %s3448_s20 = scalar_select %p2861_p3, 1, 0 }
  0x1a   : > { %p2173_p5 = pneg %p2861_p3  ;;  %s2878_s27 = sshll.u32 %s2759_s26, 4  ;;  %s354_s27 = int_to_ptr.vmem [resolvable:$true] %s2878_s27 }
  0x1b   : > { %s3450_s2 = sld [smem:[#allocation29_spill]] }
  0x1c   : > { %p2872_p6 = pnand %p2173_p5, %p3434_p1 }
  0x1e   : > { %p2888_p8 = pneg %p2872_p6 }
  0x21   : > { %s2380_s30 = scalar_lea.hbm %s3450_s2, 16 }
  0x22   : > { %p2381_p7 = scmp.ne.s32.totalorder %s3450_s2, %s2380_s30  ;;  %p2387_p11 = scmp.lt.u32.totalorder %s2380_s30, %s3450_s2 }
  0x24   : > { %p2383_p9 = pnand %p2888_p8, %p2381_p7 }
  0x26   : > { %p2384_p10 = pneg %p2383_p9 }
  0x28   : > { %p2389_p12 = pnand %p2387_p11, %p2384_p10 }
  0x2a   : > { %2392 = shalt.err (!%p2389_p12)
}
  0x2b   : > { %s2393_s26 = scalar_lea.vmem %s2859_s18, 16  ;;  %s2400_s28 = scalar_lea.vmem %s2859_s18, 32 }
  0x2c   : > { %p2394_p13 = scmp.ne.s32.totalorder %s2859_s18, %s2393_s26  ;;  %p2401_p5 = scmp.lt.s32.totalorder %s2859_s18, %s2859_s18 }
  0x2d   : > { %p2402_p7 = scmp.lt.s32.totalorder %s2400_s28, %s2393_s26 }
  0x2e   : > { %p2396_p0 = pnand %p2394_p13, %p2888_p8 }
  0x2f   : > { %p2403_p9 = por %p2402_p7, %p2401_p5 }
  0x30   : > { %p2397_p2 = pneg %p2396_p0 }
  0x32   : > { %p2404_p4 = pnand %p2403_p9, %p2397_p2 }
  0x34   : > { %2407 = shalt.err (!%p2404_p4)
}
  0x35   : > { %2176 = dma.hbm_to_vmem [thread:$0]  (!%p2872_p6), %s3450_s2, 16, %s2859_s18, [#allocation6]  }
  0x36   : > { %s3452_s3 = sld [smem:[#allocation30_spill]] }
  0x3c   : > { %s2408_s21 = scalar_lea.hbm %s3452_s3, 16 }
  0x3d   : > { %p2409_p10 = scmp.ne.s32.totalorder %s3452_s3, %s2408_s21  ;;  %p2415_p4 = scmp.lt.u32.totalorder %s2408_s21, %s3452_s3 }
  0x3f   : > { %p2411_p11 = pnand %p2409_p10, %p2888_p8 }
  0x41   : > { %p2412_p12 = pneg %p2411_p11 }
  0x43   : > { %p2417_p13 = pnand %p2415_p4, %p2412_p12 }
  0x45   : > { %2420 = shalt.err (!%p2417_p13)
}
  0x46   : > { %s2421_s18 = scalar_lea.vmem %s2868_s22, 16  ;;  %s2428_s10 = scalar_lea.vmem %s2868_s22, 32 }
  0x47   : > { %p2422_p0 = scmp.ne.s32.totalorder %s2868_s22, %s2421_s18  ;;  %p2429_p7 = scmp.lt.s32.totalorder %s2868_s22, %s2868_s22 }
  0x48   : > { %p2430_p9 = scmp.lt.s32.totalorder %s2428_s10, %s2421_s18 }
  0x49   : > { %p2424_p2 = pnand %p2422_p0, %p2888_p8 }
  0x4a   : > { %p2431_p10 = por %p2430_p9, %p2429_p7 }
  0x4b   : > { %p2425_p5 = pneg %p2424_p2 }
  0x4d   : > { %p2432_p11 = pnand %p2431_p10, %p2425_p5 }
  0x4f   : > { %2435 = shalt.err (!%p2432_p11)
}
  0x50   : > { %2179 = dma.hbm_to_vmem [thread:$0]  (!%p2872_p6), %s3452_s3, 16, %s2868_s22, [#allocation9]  }
  0x51   : > { %s3453_s5 = sld [smem:[#allocation32_spill]] }
  0x57   : > { %s2436_s21 = scalar_lea.hbm %s3453_s5, 32 }
  0x58   : > { %p2437_p12 = scmp.ne.s32.totalorder %s3453_s5, %s2436_s21  ;;  %p2443_p0 = scmp.lt.u32.totalorder %s2436_s21, %s3453_s5 }
  0x5a   : > { %p2439_p4 = pnand %p2437_p12, %p2888_p8 }
  0x5c   : > { %p2440_p13 = pneg %p2439_p4 }
  0x5e   : > { %p2445_p2 = pnand %p2443_p0, %p2440_p13 }
  0x60   : > { %2448 = shalt.err (!%p2445_p2)
}
  0x61   : > { %s2449_s22 = scalar_lea.vmem %s2876_s24, 32  ;;  %p2457_p10 = scmp.lt.s32.totalorder %s2876_s24, %s2876_s24 }
  0x62   : > { %p2450_p5 = scmp.ne.s32.totalorder %s2876_s24, %s2449_s22  ;;  %p2458_p11 = scmp.lt.s32.totalorder %s2449_s22, %s2449_s22 }
  0x64   : > { %p2452_p7 = pnand %p2450_p5, %p2888_p8  ;;  %p2459_p12 = por %p2458_p11, %p2457_p10 }
  0x66   : > { %p2453_p9 = pneg %p2452_p7 }
  0x68   : > { %p2460_p4 = pnand %p2459_p12, %p2453_p9 }
  0x6a   : > { %2463 = shalt.err (!%p2460_p4)
}
  0x6b   : > { %2185 = dma.hbm_to_vmem [thread:$0]  (!%p2872_p6), %s3453_s5, 32, %s2876_s24, [#allocation12]  }
  0x6c   : > { %s2464_s12 = scalar_lea.hbm %s3429_s7, 4096 }
  0x6d   : > { %p2465_p13 = scmp.ne.s32.totalorder %s3429_s7, %s2464_s12  ;;  %p2471_p5 = scmp.lt.u32.totalorder %s2464_s12, %s3429_s7 }
  0x6f   : > { %p2467_p0 = pnand %p2465_p13, %p2888_p8 }
  0x71   : > { %p2468_p2 = pneg %p2467_p0 }
  0x73   : > { %p2473_p7 = pnand %p2471_p5, %p2468_p2 }
  0x75   : > { %2476 = shalt.err (!%p2473_p7)
}
  0x76   : > { %s2477_s18 = scalar_lea.vmem %s354_s27, 4096  ;;  %p2485_p12 = scmp.lt.s32.totalorder %s354_s27, %s354_s27 }
  0x77   : > { %p2478_p9 = scmp.ne.s32.totalorder %s354_s27, %s2477_s18  ;;  %p2486_p4 = scmp.lt.s32.totalorder %s2477_s18, %s2477_s18 }
  0x79   : > { %p2480_p10 = pnand %p2478_p9, %p2888_p8  ;;  %p2487_p1 = por %p2486_p4, %p2485_p12 }
  0x7b   : > { %p2481_p11 = pneg %p2480_p10 }
  0x7d   : > { %p2488_p3 = pnand %p2487_p1, %p2481_p11 }
  0x7f   : > { %2491 = shalt.err (!%p2488_p3)
}
  0x80   : > { %s3436_s24 = smov 128   ;;  %s3437_s22 = smov 8  }
  0x81   : > { %2191 = dma.hbm_to_vmem [thread:$0]  (!%p2872_p6), %s3429_s7, 4096, %s354_s27, [#allocation15], %s3436_s24, %s3436_s24, %s3437_s22  }
  0x82   : > { %s2762_s30 = smov [#allocation10]   ;;  %s2763_s12 = smov [#allocation13]  }
  0x83   : > { %s319_s11 = sshll.u32 %s2762_s30, 4  ;;  %s340_s21 = sshll.u32 %s2763_s12, 4  ;;  %s320_s11 = int_to_ptr.vmem [resolvable:$true] %s319_s11  ;;  %s2979_s21 = int_to_ptr.vmem [resolvable:$true] %s340_s21 }
  0x84   : > { %s3454_s4 = sld [smem:[#allocation31_spill]] }
  0x8a   : > { %s2492_s28 = scalar_lea.hbm %s3454_s4, 32 }
  0x8b   : > { %p2493_p1 = scmp.ne.s32.totalorder %s3454_s4, %s2492_s28  ;;  %p2499_p0 = scmp.lt.u32.totalorder %s2492_s28, %s3454_s4 }
  0x8d   : > { %p2495_p3 = pnand %p2493_p1, %p2888_p8 }
  0x8f   : > { %p2496_p13 = pneg %p2495_p3 }
  0x91   : > { %p2501_p2 = pnand %p2499_p0, %p2496_p13 }
  0x93   : > { %2504 = shalt.err (!%p2501_p2)
}
  0x94   : > { %s2505_s29 = scalar_lea.vmem %s320_s11, 32  ;;  %p2513_p10 = scmp.lt.s32.totalorder %s320_s11, %s320_s11 }
  0x95   : > { %p2506_p5 = scmp.ne.s32.totalorder %s320_s11, %s2505_s29  ;;  %p2514_p11 = scmp.lt.s32.totalorder %s2505_s29, %s2505_s29 }
  0x97   : > { %p2508_p7 = pnand %p2506_p5, %p2888_p8  ;;  %p2515_p12 = por %p2514_p11, %p2513_p10 }
  0x99   : > { %p2509_p9 = pneg %p2508_p7 }
  0x9b   : > { %p2516_p4 = pnand %p2515_p12, %p2509_p9 }
  0x9d   : > { %2519 = shalt.err (!%p2516_p4)
}
  0x9e   : > { %2182 = dma.hbm_to_vmem [thread:$0]  (!%p2872_p6), %s3454_s4, 32, %s320_s11, [#allocation9]  }
  0x9f   : > { %s3455_s6 = sld [smem:[#allocation33_spill]] }
  0xa5   : > { %s2520_s26 = scalar_lea.hbm %s3455_s6, 1024 }
  0xa6   : > { %p2521_p1 = scmp.ne.s32.totalorder %s3455_s6, %s2520_s26  ;;  %p2527_p0 = scmp.lt.u32.totalorder %s2520_s26, %s3455_s6 }
  0xa8   : > { %p2523_p3 = pnand %p2521_p1, %p2888_p8 }
  0xaa   : > { %p2524_p13 = pneg %p2523_p3 }
  0xac   : > { %p2529_p2 = pnand %p2527_p0, %p2524_p13 }
  0xae   : > { %2532 = shalt.err (!%p2529_p2)
}
  0xaf   : > { %s2533_s11 = scalar_lea.vmem %s2979_s21, 1024  ;;  %p2541_p10 = scmp.lt.s32.totalorder %s2979_s21, %s2979_s21 }
  0xb0   : > { %p2534_p5 = scmp.ne.s32.totalorder %s2979_s21, %s2533_s11  ;;  %p2542_p11 = scmp.lt.s32.totalorder %s2533_s11, %s2533_s11 }
  0xb2   : > { %p2536_p7 = pnand %p2534_p5, %p2888_p8  ;;  %p2543_p12 = por %p2542_p11, %p2541_p10 }
  0xb4   : > { %p2537_p9 = pneg %p2536_p7 }
  0xb6   : > { %p2544_p4 = pnand %p2543_p12, %p2537_p9 }
  0xb8   : > { %2547 = shalt.err (!%p2544_p4)
}
  0xb9   : > { %s2764_s29 = smov 64   ;;  %s2765_s2 = smov 4  }
  0xba   : > { %2188 = dma.hbm_to_vmem [thread:$0]  (!%p2872_p6), %s3455_s6, 1024, %s2979_s21, [#allocation12], %s2764_s29, %s2764_s29, %s2765_s2  }
  0xbb   : > { %s2766_s23 = smov [#allocation16]   ;;  %s2767_s28 = smov [#allocation17]  }
  0xbc   : > { %s366_s26 = sshll.u32 %s2766_s23, 4  ;;  %s380_s18 = sshll.u32 %s2767_s28, 4  ;;  %s367_s26 = int_to_ptr.vmem [resolvable:$true] %s366_s26  ;;  %s3022_s18 = int_to_ptr.vmem [resolvable:$true] %s380_s18 }
  0xbd   : > { %s2548_s11 = scalar_lea.hbm %s3430_s8, 1024 }
  0xbe   : > { %p2549_p1 = scmp.ne.s32.totalorder %s3430_s8, %s2548_s11  ;;  %p2555_p0 = scmp.lt.u32.totalorder %s2548_s11, %s3430_s8 }
  0xc0   : > { %p2551_p3 = pnand %p2549_p1, %p2888_p8 }
  0xc2   : > { %p2552_p13 = pneg %p2551_p3 }
  0xc4   : > { %p2557_p2 = pnand %p2555_p0, %p2552_p13 }
  0xc6   : > { %2560 = shalt.err (!%p2557_p2)
}
  0xc7   : > { %s2561_s12 = scalar_lea.vmem %s367_s26, 1024  ;;  %p2569_p10 = scmp.lt.s32.totalorder %s367_s26, %s367_s26 }
  0xc8   : > { %p2562_p5 = scmp.ne.s32.totalorder %s367_s26, %s2561_s12  ;;  %p2570_p11 = scmp.lt.s32.totalorder %s2561_s12, %s2561_s12 }
  0xca   : > { %p2564_p7 = pnand %p2562_p5, %p2888_p8  ;;  %p2571_p12 = por %p2570_p11, %p2569_p10 }
  0xcc   : > { %p2565_p9 = pneg %p2564_p7 }
  0xce   : > { %p2572_p4 = pnand %p2571_p12, %p2565_p9 }
  0xd0   : > { %2575 = shalt.err (!%p2572_p4)
}
  0xd1   : > { %2194 = dma.hbm_to_vmem [thread:$0]  (!%p2872_p6), %s3430_s8, 1024, %s367_s26, [#allocation15], %s2764_s29, %s2764_s29, %s2765_s2  }
  0xd2   : > { %s2576_s10 = scalar_lea.hbm %s3431_s9, 16 }
  0xd3   : > { %p2577_p1 = scmp.ne.s32.totalorder %s3431_s9, %s2576_s10  ;;  %p2583_p0 = scmp.lt.u32.totalorder %s2576_s10, %s3431_s9 }
  0xd5   : > { %p2579_p3 = pnand %p2577_p1, %p2888_p8 }
  0xd7   : > { %p2580_p13 = pneg %p2579_p3 }
  0xd9   : > { %p2585_p2 = pnand %p2583_p0, %p2580_p13 }
  0xdb   : > { %2588 = shalt.err (!%p2585_p2)
}
  0xdc   : > { %s2589_s29 = scalar_lea.vmem %s3022_s18, 16  ;;  %s2596_s2 = scalar_lea.vmem %s3022_s18, 32 }
  0xdd   : > { %p2590_p5 = scmp.ne.s32.totalorder %s3022_s18, %s2589_s29  ;;  %p2597_p10 = scmp.lt.s32.totalorder %s3022_s18, %s3022_s18 }
  0xde   : > { %p2598_p11 = scmp.lt.s32.totalorder %s2596_s2, %s2589_s29 }
  0xdf   : > { %p2592_p7 = pnand %p2590_p5, %p2888_p8 }
  0xe0   : > { %p2599_p12 = por %p2598_p11, %p2597_p10 }
  0xe1   : > { %p2593_p9 = pneg %p2592_p7 }
  0xe3   : > { %p2600_p4 = pnand %p2599_p12, %p2593_p9 }
  0xe5   : > { %2603 = shalt.err (!%p2600_p4)
}
  0xe6   : > { %2197 = dma.hbm_to_vmem [thread:$0]  (!%p2872_p6), %s3431_s9, 16, %s3022_s18, [#allocation18]  }
  0xe7   : > { %s1898_s25 = sadd.s32 4294967294, %s2754_s16   ;;  %s3068_s17 = sadd.s32 1, %s2754_s16  }
  0xe8   : > { %s37_s24 = ssub.s32 %s2754_s16, %s3068_s17  ;;  %s40_s22 = sadd.s32 1, %s2750_s15 }
  0xe9   : > { %p38_p8 = scmp.eq.s32.totalorder %s37_s24, 0  ;;  %p47_p1 = scmp.ne.s32.totalorder %s2750_s15, %s2746_s14 }
  0xea   : > { %p48_p3 = scmp.eq.s32.totalorder %s2754_s16, 0  ;;  %p53_p13 = scmp.ne.s32.totalorder %s2746_s14, %s2742_s13 }
  0xeb   : > { %s3079_s23 = scalar_select %p38_p8, %s2750_s15, %s40_s22  }
  0xec   : > { %p3081_p0 = por %p48_p3, %p47_p1  ;;  %p3457_p6 = scmp.eq.s32.totalorder %s2854_s19, 0 }
  0xed   : > { %p271_p5 = scmp.eq.s32.totalorder %s2854_s19, 1  ;;  %p277_p7 = scmp.eq.s32.totalorder %s1898_s25, 1 }
  0xee   : > { %p3087_p2 = por %p3457_p6, %p53_p13  ;;  %p2217_p9 = scmp.lt.s32.totalorder %s2754_s16, 2 }
  0xef   : > { %s391_s10 = sand.u32 1, %s2750_s15   ;;  %p3094_p10 = por %p271_p5, %p47_p1 }
  0xf0   : > { %s3458_s18 = scalar_select %p3087_p2, 1, 0 }
  0xf1   : > { %s3459_s27 = scalar_select %p3094_p10, 1, 0 }
  0xf2   : > { %p3098_p11 = por %p277_p7, %p53_p13  ;;  %s3102_s30 = sshll.u32 %s391_s10, 4 }
  0xf3   : > { %s3438_s21 = sshll.u32 %s2754_s16, 8  ;;  %s3461_s0 = sld [smem:[#allocation28_spill]] }
  0xf4   : > { %s3460_s11 = scalar_select %p3098_p11, 1, 0 }
  0xf5   : > { %s395_s12 = scalar_lea.vmem [#allocation2], %s3102_s30  ;;  %p3117_p12 = pnand %p2217_p9, %p3081_p0 }
  0xf6   : > { %s402_s25 = sshll.u32 %s395_s12, 4  ;;  %s3122_s3 = scalar_lea.sflag [#allocation3], %s391_s10  ;;  %s3113_s25 = int_to_ptr.vmem [resolvable:$true] %s402_s25 }
  0xf7   : > { %p2606_p8 = pneg %p3117_p12 }
  0xf9   : > { %s3110_s26 = scalar_lea.hbm %s3461_s0, %s3438_s21  ;;  %s2609_s28 = scalar_lea.hbm %s3461_s0, 512 }
  0xfa   : > { %s2604_s29 = scalar_lea.hbm %s3110_s26, 256  ;;  %p2610_p13 = scmp.lt.u32.totalorder %s3110_s26, %s3461_s0 }
  0xfb   : > { %p2605_p4 = scmp.ne.s32.totalorder %s3110_s26, %s2604_s29  ;;  %p2611_p0 = scmp.lt.u32.totalorder %s2609_s28, %s2604_s29 }
  0xfc   : > { %p2613_p5 = scmp.lt.u32.totalorder %s2604_s29, %s3110_s26 }
  0xfd   : > { %p2607_p1 = pnand %p2606_p8, %p2605_p4  ;;  %p2612_p6 = por %p2611_p0, %p2610_p13 }
  0xff   : > { %p2608_p3 = pneg %p2607_p1  ;;  %p2614_p7 = por %p2613_p5, %p2612_p6 }
 0x101   : > { %p2615_p9 = pnand %p2614_p7, %p2608_p3 }
 0x103   : > { %2618 = shalt.err (!%p2615_p9)
}
 0x104   : > { %s2619_s10 = scalar_lea.vmem %s3113_s25, 256  ;;  %s2768_s2 = smov [#allocation2]  }
 0x105   : > { %p2620_p4 = scmp.ne.s32.totalorder %s3113_s25, %s2619_s10  ;;  %s2624_s12 = sshll.u32 %s2768_s2, 4  ;;  %s2625_s12 = int_to_ptr.vmem [resolvable:$false] %s2624_s12 }
 0x106   : > { %s2626_s4 = scalar_lea.vmem %s2625_s12, 512  ;;  %p2627_p10 = scmp.lt.s32.totalorder %s3113_s25, %s2625_s12 }
 0x107   : > { %p2622_p1 = pnand %p2620_p4, %p2606_p8  ;;  %p2628_p13 = scmp.lt.s32.totalorder %s2626_s4, %s2619_s10 }
 0x109   : > { %p2623_p11 = pneg %p2622_p1  ;;  %p2629_p0 = por %p2628_p13, %p2627_p10 }
 0x10b   : > { %p2630_p6 = pnand %p2629_p0, %p2623_p11 }
 0x10d   : > { %2633 = shalt.err (!%p2630_p6)
}
 0x10e   : > { %s3463_s21 = smov 8   ;;  %s3464_s29 = smov 128  }
 0x10f   : > { %2201 = dma.hbm_to_vmem [thread:$0]  (!%p3117_p12), %s3110_s26, 256, %s3113_s25, %s3122_s3, %s3464_s29, %s3464_s29, %s3463_s21  }
 0x110   : > { %s3465_s28 = sshll.u32 %s2754_s16, 8  ;;  %s416_s4 = scalar_lea.vmem [#allocation5], %s3102_s30 }
 0x111   : > { %s3158_s10 = scalar_lea.hbm %s3423_s1, %s3465_s28  ;;  %s424_s22 = sshll.u32 %s416_s4, 4  ;;  %s425_s22 = int_to_ptr.vmem [resolvable:$true] %s424_s22 }
 0x112   : > { %s3466_s0 = sand.u32 1, %s2754_s16   ;;  %s2634_s6 = scalar_lea.hbm %s3158_s10, 256 }
 0x113   : > { %s413_s5 = scalar_lea.sflag [#allocation6], %s3466_s0  ;;  %p2635_p10 = scmp.ne.s32.totalorder %s3158_s10, %s2634_s6 }
 0x114   : > { %s2639_s25 = scalar_lea.hbm %s3423_s1, 512  ;;  %p2640_p5 = scmp.lt.u32.totalorder %s3158_s10, %s3423_s1 }
 0x115   : > { %p2637_p11 = pnand %p2635_p10, %p2606_p8  ;;  %p2641_p7 = scmp.lt.u32.totalorder %s2639_s25, %s2634_s6 }
 0x116   : > { %p2643_p4 = scmp.lt.u32.totalorder %s2634_s6, %s3158_s10 }
 0x117   : > { %p2638_p3 = pneg %p2637_p11  ;;  %p2642_p9 = por %p2641_p7, %p2640_p5 }
 0x119   : > { %p2644_p1 = por %p2643_p4, %p2642_p9 }
 0x11b   : > { %p2645_p13 = pnand %p2644_p1, %p2638_p3 }
 0x11d   : > { %2648 = shalt.err (!%p2645_p13)
}
 0x11e   : > { %s2649_s0 = scalar_lea.vmem %s425_s22, 256  ;;  %s2769_s30 = smov [#allocation5]  }
 0x11f   : > { %p2650_p0 = scmp.ne.s32.totalorder %s425_s22, %s2649_s0  ;;  %s2654_s28 = sshll.u32 %s2769_s30, 4  ;;  %s2655_s28 = int_to_ptr.vmem [resolvable:$false] %s2654_s28 }
 0x120   : > { %s2656_s2 = scalar_lea.vmem %s2655_s28, 512  ;;  %p2657_p11 = scmp.lt.s32.totalorder %s425_s22, %s2655_s28 }
 0x121   : > { %p2652_p6 = pnand %p2650_p0, %p2606_p8  ;;  %p2658_p2 = scmp.lt.s32.totalorder %s2656_s2, %s2649_s0 }
 0x123   : > { %p2653_p10 = pneg %p2652_p6  ;;  %p2659_p5 = por %p2658_p2, %p2657_p11 }
 0x125   : > { %p2660_p7 = pnand %p2659_p5, %p2653_p10 }
 0x127   : > { %2663 = shalt.err (!%p2660_p7)
}
 0x128   : > { %2204 = dma.hbm_to_vmem [thread:$0]  (!%p3117_p12), %s3158_s10, 256, %s425_s22, %s413_s5  }
 0x129   : > { %p3467_p3 = scmp.ne.s32.totalorder %s3448_s20, 0 }
 0x12a   : > { %s3185_s6 = sand.u32 (!%p3467_p3), 1, %s2746_s14   ;;  %p3468_p2 = scmp.ne.s32.totalorder (!%p3467_p3), %s3458_s18, 0 }
 0x12b   : > { %433 = sbr.rel (%p3467_p3) target bundleno = 3680 (0xe60), region = 60  ;;  %s3188_s12 = sshll.u32 (!%p3467_p3), %s3185_s6, 4 }
 0x12c   : > { %s436_s4 = scalar_lea.sflag (!%p3467_p3), [#allocation3], %s3185_s6  ;;  %s439_s3 = scalar_lea.vmem (!%p3467_p3), [#allocation2], %s3188_s12 }
 0x132   : > { %2709 = dma.done.wait (%p3468_p2), %s436_s4, 256  }
 0x133   : > { %2711 = vsyncadd (%p3468_p2), %s436_s4, 4294967040  ;;  %s444_s5 = sand.u32 1, %s2854_s19   ;;  %s448_s24 = scalar_lea.vmem [#allocation5], %s3188_s12 }
 0x134   : > { %s445_s20 = scalar_lea.sflag [#allocation6], %s444_s5 }
 0x135   : > { %2713 = dma.done.wait (%p3468_p2), %s445_s20, 256  }
 0x136   : > { %2715 = vsyncadd (%p3468_p2), %s445_s20, 4294967040  ;;  %p3469_p12 = scmp.eq.s32.totalorder %s2854_s19, 0 }
 0x138   : > { %2717 = dma.done.wait (%p3469_p12), [#allocation6], 16   ;;  %p3470_p8 = pmov %p3469_p12 }
 0x13a   : > { %2719 = vsyncadd (%p3470_p8), [#allocation6], 4294967280  ;;  %p3471_p9 = pmov %p3470_p8 }
 0x13b   : > { %p3472_p4 = pmov %p3470_p8 }
 0x13c   : > { %2721 = dma.done.wait (%p3471_p9), [#allocation9], 48  }
 0x13d   : > { %2723 = vsyncadd (%p3472_p4), [#allocation9], 4294967248  ;;  %p3473_p1 = pmov %p3472_p4 }
 0x13f   : > { %2725 = dma.done.wait (%p3473_p1), [#allocation12], 1056   ;;  %p3474_p13 = pmov %p3473_p1 }
 0x140   : > { %p3475_p0 = pmov %p3473_p1 }
 0x141   : > { %2727 = vsyncadd (%p3474_p13), [#allocation12], 4294966240 }
 0x142   : > { %2729 = dma.done.wait (%p3475_p0), [#allocation15], 5120   ;;  %p3476_p6 = pmov %p3475_p0 }
 0x143   : > { %p3477_p10 = pmov %p3475_p0 }
 0x144   : > { %2731 = vsyncadd (%p3476_p6), [#allocation15], 4294962176 }
 0x145   : > { %2733 = dma.done.wait (%p3477_p10), [#allocation18], 16   ;;  %p3478_p11 = pmov %p3475_p0 }
 0x146   : > { %v525_v0 = vld [vmem:[%s448_s24] sm:$0xff]  ;;  %v526_v1 = vld [vmem:[%s448_s24 + $0x8] sm:$0xff]  ;;  %v2770_v12 = vmov 0.0   ;;  %vm2771_vm0 = vmmov 0   ;;  %vm976_vm1 = vcmask 261120   ;;  %vm1051_vm2 = vcmask 1043456  }
 0x147   : > { %2735 = vsyncadd (%p3478_p11), [#allocation18], 4294967280  ;;  %v571_v2 = vadd.f32 %v526_v1, %v525_v0  ;;  %v3222_v3 = vld [vmem:[%s439_s3 + $0x8] sm:$0xff]  ;;  %v3224_v4 = vld [vmem:[%s439_s3] sm:$0xff]  ;;  %2035 = vmatprep.subr.bf16.mxu0 %v2770_v12  ;;  %2051 = vmatprep.mubr.msk.bf16.mxu0 %vm2771_vm0, %v2770_v12  ;;  %vm1024_vm3 = vcmask 64512   ;;  %s2772_s18 = smov 96  }
 0x148   : > { %531 = vadd.xlane.f32.xlu1 %v3222_v3  ;;  %v2278_v5 = vld [vmem:[#allocation14 + $0x4] ss:$8 sps:$4 sm:$0xff]   ;;  %v2280_v6 = vld [vmem:[#allocation14] ss:$8 sps:$4 sm:$0xff]   ;;  %v2281_v7 = vld [vmem:[#allocation14 + $0x14] ss:$8 sps:$4 sm:$0xff]  }
 0x149   : > { %572 = vadd.xlane.f32.xlu0 %v571_v2  ;;  %913 = vmatprep.subr.bf16.mxu1 %v2278_v5  ;;  %v2283_v8 = vld [vmem:[#allocation14 + $0x10] ss:$8 sps:$4 sm:$0xff]   ;;  %v2284_v9 = vld [vmem:[#allocation14 + $0x24] ss:$8 sps:$4 sm:$0xff]   ;;  %v2286_v11 = vld [vmem:[#allocation14 + $0x20] ss:$8 sps:$4 sm:$0xff]  }
 0x14a   : > { %914 = vmatpush1.bf16.msra.mxu1 %v2280_v6  ;;  %v2305_v10 = vld [vmem:[#allocation13] sm:$0xff]   ;;  %v2287_v13 = vld [vmem:[#allocation14 + $0x34] ss:$8 sps:$4 sm:$0xff]   ;;  %v2289_v14 = vld [vmem:[#allocation14 + $0x30] ss:$8 sps:$4 sm:$0xff]   ;;  %s2773_s22 = smov 64  }
 0x14b   : > { %915 = vmatprep.subr.bf16.mxu1 %v2281_v7  ;;  %2036 = vmatpush3.bf16.msra.mxu0 %v2305_v10  ;;  %v2290_v15 = vld [vmem:[#allocation14 + $0x44] ss:$8 sps:$4 sm:$0xff]   ;;  %v2292_v16 = vld [vmem:[#allocation14 + $0x40] ss:$8 sps:$4 sm:$0xff]   ;;  %v2293_v17 = vld [vmem:[#allocation14 + $0x54] ss:$8 sps:$4 sm:$0xff]  }
 0x14c   : > { %2037 = vmatprep.subr.bf16.mxu0 %v2770_v12  ;;  %v2295_v18 = vld [vmem:[#allocation14 + $0x50] ss:$8 sps:$4 sm:$0xff]   ;;  %v2296_v19 = vld [vmem:[#allocation14 + $0x64] ss:$8 sps:$4 sm:$0xff]   ;;  %v2298_v20 = vld [vmem:[#allocation14 + $0x60] ss:$8 sps:$4 sm:$0xff]  }
 0x14d   : > { %529 = vadd.xlane.f32.xlu0 %v3224_v4  ;;  %v2299_v21 = vld [vmem:[#allocation14 + $0x74] ss:$8 sps:$4 sm:$0xff]   ;;  %v2301_v22 = vld [vmem:[#allocation14 + $0x70] ss:$8 sps:$4 sm:$0xff]   ;;  %v2302_v23 = vld [vmem:[#allocation14 + $0x84] ss:$8 sps:$4 sm:$0xff]  }
 0x14e   : > { %916 = vmatpush1.bf16.msra.mxu1 %v2283_v8  ;;  %v2304_v24 = vld [vmem:[#allocation14 + $0x80] ss:$8 sps:$4 sm:$0xff]   ;;  %v2306_v25 = vld [vmem:[#allocation14 + $0x94] ss:$8 sps:$4 sm:$0xff]   ;;  %v2308_v26 = vld [vmem:[#allocation14 + $0x90] ss:$8 sps:$4 sm:$0xff]  }
 0x14f   : > { %917 = vmatprep.subr.bf16.mxu1 %v2284_v9  ;;  %v2309_v42 = vld [vmem:[#allocation13 + $0x8] sm:$0xff]   ;;  %v2313_v45 = vld [vmem:[#allocation13 + $0x10] sm:$0xff]   ;;  %v2317_v48 = vld [vmem:[#allocation13 + $0x18] sm:$0xff]   ;;  %s2774_s10 = smov 32   ;;  %s521_s26 = scalar_lea.vmem [#allocation19], %s3188_s12 }
 0x150   : > { %v2310_v43 = vld [vmem:[#allocation14 + $0xa4] ss:$8 sps:$4 sm:$0xff]   ;;  %v2312_v44 = vld [vmem:[#allocation14 + $0xa0] ss:$8 sps:$4 sm:$0xff]   ;;  %2038 = vmatpush3.bf16.msra.mxu0 %v2309_v42  ;;  %v2314_v46 = vld [vmem:[#allocation14 + $0xb4] ss:$8 sps:$4 sm:$0xff]  }
 0x151   : > { %2039 = vmatprep.subr.bf16.mxu0 %v2770_v12  ;;  %v2316_v47 = vld [vmem:[#allocation14 + $0xb0] ss:$8 sps:$4 sm:$0xff]   ;;  %v2318_v49 = vld [vmem:[#allocation14 + $0xc4] ss:$8 sps:$4 sm:$0xff]   ;;  %v2320_v50 = vld [vmem:[#allocation14 + $0xc0] ss:$8 sps:$4 sm:$0xff]  }
 0x152   : > { %918 = vmatpush1.bf16.msra.mxu1 %v2286_v11  ;;  %v2321_v51 = vld [vmem:[#allocation13 + $0x20] sm:$0xff]   ;;  %v2322_v52 = vld [vmem:[#allocation14 + $0xd4] ss:$8 sps:$4 sm:$0xff]   ;;  %v2324_v53 = vld [vmem:[#allocation14 + $0xd0] ss:$8 sps:$4 sm:$0xff]   ;;  %s1726_s25 = sshll.u32 %s521_s26, 4  ;;  %s3372_s25 = int_to_ptr.vmem [resolvable:$true] %s1726_s25 }
 0x153   : > { %919 = vmatprep.subr.bf16.mxu1 %v2287_v13  ;;  %v2326_v54 = vld [vmem:[#allocation14 + $0xe4] ss:$8 sps:$4 sm:$0xff]   ;;  %v2328_v56 = vld [vmem:[#allocation14 + $0xe0] ss:$8 sps:$4 sm:$0xff]   ;;  %v2330_v57 = vld [vmem:[#allocation14 + $0xf4] ss:$8 sps:$4 sm:$0xff]  }
 0x154   : > { %2040 = vmatpush3.bf16.msra.mxu0 %v2313_v45  ;;  %v2325_v55 = vld [vmem:[#allocation13 + $0x28] sm:$0xff]   ;;  %v2329_v58 = vld [vmem:[#allocation13 + $0x30] sm:$0xff]   ;;  %v2333_v60 = vld [vmem:[#allocation13 + $0x38] sm:$0xff]   ;;  %s1997_s21 = sshll.u32 %s2854_s19, 8  ;;  %s3479_s30 = sld [smem:[#allocation34_spill]] }
 0x155   : > { %2041 = vmatprep.subr.bf16.mxu0 %v2770_v12  ;;  %v2332_v59 = vld [vmem:[#allocation14 + $0xf0] ss:$8 sps:$4 sm:$0xff]   ;;  %v569_v13 = vld [vmem:[#allocation10] sm:$0x3]  ;;  %s1713_s2 = scalar_lea.sflag [#allocation4], %s3185_s6  ;;  %s2664_s12 = scalar_lea.vmem %s3372_s25, 256 }
 0x156   : > { %920 = vmatpush1.bf16.msra.mxu1 %v2289_v14  ;;  %v570_v14 = vld [vmem:[#allocation11] sm:$0x3]  ;;  %p2665_p5 = scmp.ne.s32.totalorder %s3372_s25, %s2664_s12  ;;  %p3480_p7 = scmp.ne.s32.totalorder %s3459_s27, 0 }
 0x157   : > { %921 = vmatprep.subr.bf16.mxu1 %v2290_v15  ;;  %s2775_s19 = smov [#allocation19]  }
 0x158   : > { %2042 = vmatpush3.bf16.msra.mxu0 %v2317_v48  ;;  %p2666_p3 = pnand %p2665_p5, %p3480_p7  ;;  %s2668_s4 = sshll.u32 %s2775_s19, 4  ;;  %s2669_s4 = int_to_ptr.vmem [resolvable:$false] %s2668_s4 }
 0x159   : > { %2043 = vmatprep.subr.bf16.mxu0 %v2770_v12  ;;  %s2670_s3 = scalar_lea.vmem %s2669_s4, 512  ;;  %p2671_p12 = scmp.lt.s32.totalorder %s3372_s25, %s2669_s4 }
 0x15a   : > { %922 = vmatpush1.bf16.msra.mxu1 %v2292_v16  ;;  %s3377_s28 = scalar_lea.hbm %s3479_s30, %s1997_s21  ;;  %p2667_p2 = pneg %p2666_p3 }
 0x15b   : > { %923 = vmatprep.subr.bf16.mxu1 %v2293_v17  ;;  %p2672_p8 = scmp.lt.s32.totalorder %s2670_s3, %s2664_s12 }
 0x15c   : > { %2044 = vmatpush3.bf16.msra.mxu0 %v2321_v51 }
 0x15d   : > { %2045 = vmatprep.subr.bf16.mxu0 %v2770_v12  ;;  %p2673_p9 = por %p2672_p8, %p2671_p12 }
 0x15e   : > { %924 = vmatpush1.bf16.msra.mxu1 %v2295_v18 }
 0x15f   : > { %925 = vmatprep.subr.bf16.mxu1 %v2296_v19  ;;  %p2674_p4 = pnand %p2673_p9, %p2667_p2 }
 0x160   : > { %2046 = vmatpush3.bf16.msra.mxu0 %v2325_v55 }
 0x161   : > { %2047 = vmatprep.subr.bf16.mxu0 %v2770_v12 }
 0x162   : > { %926 = vmatpush1.bf16.msra.mxu1 %v2298_v20 }
 0x163   : > { %927 = vmatprep.subr.bf16.mxu1 %v2299_v21 }
 0x164   : > { %2048 = vmatpush3.bf16.msra.mxu0 %v2329_v58 }
 0x165   : > { %2049 = vmatprep.subr.bf16.mxu0 %v2770_v12 }
 0x166   : > { %928 = vmatpush1.bf16.msra.mxu1 %v2301_v22 }
 0x167   : > { %929 = vmatprep.subr.bf16.mxu1 %v2302_v23  ;;  %v1927_v23 = vld [vmem:[#allocation7] ss:$0 sm:$0xff] }
 0x168   : > { %2050 = vmatpush3.bf16.msra.mxu0 %v2333_v60 }
 0x169   : > { %2055 = vmatprep.subr.bf16.mxu0 %v2770_v12 }
 0x16a   : > { %930 = vmatpush1.bf16.msra.mxu1 %v2304_v24 }
 0x16b   : > { %931 = vmatprep.subr.bf16.mxu1 %v2306_v25 }
 0x16e   : > { %932 = vmatpush1.bf16.msra.mxu1 %v2308_v26 }
 0x16f   : > { %933 = vmatprep.subr.bf16.mxu1 %v2310_v43 }
 0x172   : > { %934 = vmatpush1.bf16.msra.mxu1 %v2312_v44 }
 0x173   : > { %935 = vmatprep.subr.bf16.mxu1 %v2314_v46 }
 0x176   : > { %936 = vmatpush1.bf16.msra.mxu1 %v2316_v47 }
 0x177   : > { %937 = vmatprep.subr.bf16.mxu1 %v2318_v49 }
 0x17a   : > { %938 = vmatpush1.bf16.msra.mxu1 %v2320_v50 }
 0x17b   : > { %939 = vmatprep.subr.bf16.mxu1 %v2322_v52 }
 0x17e   : > { %940 = vmatpush1.bf16.msra.mxu1 %v2324_v53 }
 0x17f   : > { %941 = vmatprep.subr.bf16.mxu1 %v2326_v54 }
 0x182   : > { %942 = vmatpush1.bf16.msra.mxu1 %v2328_v56 }
 0x183   : > { %943 = vmatprep.subr.bf16.mxu1 %v2330_v57 }
 0x186   : > { %944 = vmatpush1.bf16.msra.mxu1 %v2332_v59 }
 0x187   : > { %2087 = vmatprep.subr.bf16.mxu1 %v2770_v12 }
 0x1d5   : > { %v532_v27 = vpop.xlane.xlu1 %531 }
 0x1d6   : > { %v573_v28 = vpop.xlane.xlu0 %572  ;;  %v535_v30 = vmul.f32 0.0078125, %v532_v27 }
 0x1d7   : > { %v575_v29 = vmul.f32 0.00390625, %v573_v28 }
 0x1d8   : > { %v3235_v35 = vsub.f32 %v3222_v3, %v535_v30 }
 0x1d9   : > { %v3230_v31 = vsub.f32 %v525_v0, %v575_v29  ;;  %v3232_v32 = vsub.f32 %v526_v1, %v575_v29  ;;  %v589_v0 = vlaneseq }
 0x1da   : > { %v530_v33 = vpop.xlane.xlu0 %529  ;;  %v539_v41 = vmul.f32 %v3235_v35, %v3235_v35 }
 0x1db   : > { %v534_v34 = vmul.f32 0.0078125, %v530_v33  ;;  %v578_v36 = vmul.f32 %v3230_v31, %v3230_v31  ;;  %v579_v37 = vmul.f32 %v3232_v32, %v3232_v32  ;;  %v590_v8 = vshrl.u32 %v589_v0, 7 }
 0x1dd   : > { %v3242_v38 = vsub.f32 %v3224_v4, %v534_v34  ;;  %v580_v39 = vadd.f32 %v579_v37, %v578_v36  ;;  %v591_v10 = vsub.s32 0, %v590_v8  ;;  %v595_v11 = vsub.s32 1, %v590_v8  ;;  %v1928_v34 = vld [vmem:[#allocation8] ss:$0 sm:$0xff]  ;;  %v2334_v8 = vld [vmem:[#allocation16] sm:$0xff]  }
 0x1df   : > { %581 = vadd.xlane.f32.xlu1 %v580_v39  ;;  %v538_v40 = vmul.f32 %v3242_v38, %v3242_v38  ;;  %v592_v15 = vrot.slane %v569_v13, %v591_v10  ;;  %v596_v16 = vrot.slane %v569_v13, %v595_v11  ;;  %v605_v19 = vrot.slane %v570_v14, %v591_v10 }
 0x1e0   : > { %v609_v20 = vrot.slane %v570_v14, %v595_v11 }
 0x1e1   : > { %540 = vadd.xlane.f32.xlu0 %v538_v40 }
 0x1e3   : > { %542 = vadd.xlane.f32.xlu1 %v539_v41 }
 0x26c   : > { %v582_v61 = vpop.xlane.xlu1 %581 }
 0x26d   : > { %v583_v62 = vmul.f32 0.00390625, %v582_v61 }
 0x26e   : > { %v541_v63 = vpop.xlane.xlu0 %540 }
 0x26f   : > { %v584_v1 = vadd.f32 1e-05, %v583_v62  ;;  %v544_v2 = vmul.f32 0.0078125, %v541_v63 }
 0x270   : > { %v543_v5 = vpop.xlane.xlu1 %542 }
 0x271   : > { %2342 = vrsqrt.f32 %v584_v1  ;;  %v546_v6 = vadd.f32 1e-05, %v544_v2  ;;  %v545_v7 = vmul.f32 0.0078125, %v543_v5 }
 0x273   : > { %2344 = vrsqrt.f32 %v546_v6  ;;  %v547_v9 = vadd.f32 1e-05, %v545_v7 }
 0x275   : > { %2346 = vrsqrt.f32 %v547_v9 }
 0x27b   : > { %v2343_v17 = vpop.eup %2342 }
 0x27c   : > { %v587_v18 = vmul.f32 %v2343_v17, %v3232_v32  ;;  %v586_v21 = vmul.f32 %v2343_v17, %v3230_v31 }
 0x27d   : > { %v2345_v22 = vpop.eup %2344 }
 0x27e   : > { %v600_v24 = vmul.f32 %v596_v16, %v587_v18  ;;  %v599_v25 = vmul.f32 %v592_v15, %v586_v21  ;;  %v550_v26 = vmul.f32 %v2345_v22, %v3242_v38 }
 0x27f   : > { %v2347_v27 = vpop.eup %2346 }
 0x280   : > { %v613_v28 = vadd.f32 %v609_v20, %v600_v24  ;;  %v612_v29 = vadd.f32 %v605_v19, %v599_v25  ;;  %v551_v30 = vmul.f32 %v2347_v27, %v3235_v35  ;;  %v558_v33 = vmul.f32 %v1927_v23, %v550_v26  ;;  %v2335_v20 = vld [vmem:[#allocation16 + $0x8] sm:$0xff]  }
 0x282   : > { %v615_v36 = vpack.c.bf16 %v613_v28, %v613_v28  ;;  %v614_v37 = vpack.c.bf16 %v612_v29, %v612_v29  ;;  %v559_v32 = vmul.f32 %v1927_v23, %v551_v30  ;;  %v566_v39 = vadd.f32 %v1928_v34, %v558_v33 }
 0x284   : > { %945 = vmatprep.mubr.bf16.mxu1 %v615_v36  ;;  %v567_v40 = vadd.f32 %v1928_v34, %v559_v32 }
 0x285   : > { %946 = vmatmul.mubr.bf16.vlgmr.msra.gmra.mrb[0].mxu1 %v614_v37 }
 0x286   : > { %v568_v31 = vpack.c.bf16 %v567_v40, %v566_v39  ;;  %2091 = vmatprep.mubr.msk.bf16.mxu1 %vm2771_vm0, %v2770_v12  ;;  %2088 = vmatpush3.bf16.msra.mxu1 %v2334_v8 }
 0x287   : > { %2089 = vmatprep.subr.bf16.mxu1 %v2770_v12 }
 0x288   : > { %2052 = vmatmul.mubr.bf16.vlgmr.msra.gmra.mrb[0].mxu0 %v568_v31 }
 0x289   : > { %2057 = vmatprep.mubr.msk.bf16.mxu0 %vm2771_vm0, %v2770_v12 }
 0x28a   : > { %2090 = vmatpush3.bf16.msra.mxu1 %v2335_v20 }
 0x28b   : > { %2101 = vmatprep.subr.bf16.mxu1 %v2770_v12 }
 0x358   : > { %v947_v38 = vpop.f32.mrb[0].mxu1 }
 0x359   : > { %v3266_v35 = vpack.c.bf16 %v947_v38, %v947_v38  ;;  %v949_v41 = vpop.f32.mrb[1].mxu1 }
 0x35a   : > { %v951_v42 = vpop.f32.mrb[2].mxu1  ;;  %v3271_v51 = vpack.c.bf16 %v949_v41, %v949_v41 }
 0x35b   : > { %v714_v43 = vpop.f32.mrb[0].mxu0  ;;  %v952_v44 = vpop.f32.mrb[3].mxu1  ;;  %v981_v45 = vsel %vm976_vm1, %v3266_v35, 0 }
 0x35c   : > { %v2053_v46 = vpop.f32.mrb[1].mxu0  ;;  %2056 = vmatpush3.bf16.xpose.msra.mxu0 %v981_v45  ;;  %v971_v48 = vmul.f32 0.17677669, %v714_v43  ;;  %v1053_v53 = vsel %vm1051_vm2, %v3271_v51, 0 }
 0x35d   : > { %v717_v47 = vpop.f32.mrb[2].mxu0  ;;  %2061 = vmatprep.subr.bf16.mxu0 %v2770_v12 }
 0x35e   : > { %v972_v49 = vmul.f32 0.17677669, %v717_v47  ;;  %v2054_v50 = vpop.f32.mrb[3].mxu0 }
 0x360   : > { %v3273_v52 = vpack.c.bf16 %v972_v49, %v971_v48 }
 0x363   : > { %2058 = vmatmul.mubr.msk.bf16.vlgmr.msra.gmra.mrb[4].mxu0 %vm976_vm1, %v3273_v52 }
 0x364   : > { %2062 = vmatpush3.bf16.msra.mxu0 %v1053_v53  ;;  %2063 = vmatprep.mubr.msk.bf16.mxu0 %vm2771_vm0, %v2770_v12 }
 0x365   : > { %2067 = vmatprep.subr.bf16.mxu0 %v2770_v12 }
 0x436   : > { %v1017_v54 = vpop.f32.mrb[4].mxu0 }
 0x437   : > { %v2059_v55 = vpop.f32.mrb[5].mxu0  ;;  %v1025_v56 = vsel %vm1024_vm3, %v1017_v54, -inf }
 0x438   : > { %1026 = vmax.xlane.f32.xlu0 %v1025_v56  ;;  %v1020_v57 = vpop.f32.mrb[6].mxu0 }
 0x439   : > { %v2060_v58 = vpop.f32.mrb[7].mxu0  ;;  %v1028_v59 = vsel %vm1024_vm3, %v1020_v57, -inf }
 0x43a   : > { %1029 = vmax.xlane.f32.xlu1 %v1028_v59  ;;  %v2337_v59 = vld [vmem:[#allocation16 + $0x18] sm:$0xff]  }
 0x4c5   : > { %v1027_v60 = vpop.xlane.xlu0 %1026 }
 0x4c6   : > { %v1031_v61 = vsub.f32 %v1017_v54, %v1027_v60 }
 0x4c7   : > { %v1030_v62 = vpop.xlane.xlu1 %1029 }
 0x4c8   : > { %v1033_v63 = vmul.f32 1.442695, %v1031_v61  ;;  %v1032_v0 = vsub.f32 %v1020_v57, %v1030_v62  ;;  %v2336_v57 = vld [vmem:[#allocation16 + $0x10] sm:$0xff]  }
 0x4ca   : > { %2348 = vpow2.f32 %v1033_v63  ;;  %v1035_v1 = vmul.f32 1.442695, %v1032_v0 }
 0x4cc   : > { %2350 = vpow2.f32 %v1035_v1 }
 0x4d4   : > { %v2349_v2 = vpop.eup %2348 }
 0x4d5   : > { %v1037_v5 = vsel %vm1024_vm3, %v2349_v2, 0.0 }
 0x4d6   : > { %v2351_v6 = vpop.eup %2350  ;;  %1038 = vadd.xlane.f32.xlu0 %v1037_v5 }
 0x4d7   : > { %v1040_v7 = vsel %vm1024_vm3, %v2351_v6, 0.0 }
 0x4d8   : > { %1041 = vadd.xlane.f32.xlu1 %v1040_v7 }
 0x4e9   : > { %1098 = vrot.lane.b32.xlu1 %v3273_v52, %s2772_s18 }
 0x4ec   : > { %1101 = vrot.lane.b32.xlu0 %v3266_v35, %s2772_s18 }
 0x563   : > { %v1039_v9 = vpop.xlane.xlu0 %1038 }
 0x564   : > { %2352 = vrcp.f32 %v1039_v9 }
 0x565   : > { %v1042_v10 = vpop.xlane.xlu1 %1041 }
 0x566   : > { %2354 = vrcp.f32 %v1042_v10 }
 0x567   : > { %v1102_v16 = vpop.permute.xlu0 %1101 }
 0x568   : > { %v1107_v18 = vsel %vm976_vm1, %v1102_v16, 0 }
 0x569   : > { %v1099_v19 = vpop.permute.xlu1 %1098 }
 0x56e   : > { %v2353_v11 = vpop.eup %2352 }
 0x56f   : > { %v1045_v14 = vmul.f32 %v2353_v11, %v2349_v2 }
 0x570   : > { %v2355_v13 = vpop.eup %2354 }
 0x571   : > { %v1046_v15 = vmul.f32 %v2355_v13, %v2351_v6 }
 0x573   : > { %v1047_v17 = vpack.c.bf16 %v1046_v15, %v1045_v14 }
 0x575   : > { %2064 = vmatmul.mubr.msk.bf16.vlgmr.msra.gmra.mrb[8].mxu0 %vm1024_vm3, %v1047_v17 }
 0x576   : > { %2068 = vmatpush3.bf16.xpose.msra.mxu0 %v1107_v18  ;;  %2069 = vmatprep.mubr.msk.bf16.mxu0 %vm2771_vm0, %v2770_v12 }
 0x577   : > { %2073 = vmatprep.subr.bf16.mxu0 %v2770_v12 }
 0x57d   : > { %2070 = vmatmul.mubr.msk.bf16.vlgmr.msra.gmra.mrb[12].mxu0 %vm976_vm1, %v1099_v19 }
 0x57e   : > { %2075 = vmatprep.mubr.msk.bf16.mxu0 %vm2771_vm0, %v2770_v12 }
 0x648   : > { %v1089_v21 = vpop.f32.mrb[8].mxu0 }
 0x649   : > { %v2065_v22 = vpop.f32.mrb[9].mxu0 }
 0x64a   : > { %v1092_v23 = vpop.f32.mrb[10].mxu0 }
 0x64b   : > { %v1096_v24 = vpack.c.bf16 %v1092_v23, %v1089_v21  ;;  %v2066_v25 = vpop.f32.mrb[11].mxu0 }
 0x64d   : > { %2092 = vmatmul.mubr.msk.bf16.vlgmr.msra.gmra.mrb[4].mxu1 %vm976_vm1, %v1096_v24 }
 0x64e   : > { %2103 = vmatprep.mubr.msk.bf16.mxu1 %vm2771_vm0, %v2770_v12 }
 0x650   : > { %v1143_v26 = vpop.f32.mrb[12].mxu0 }
 0x651   : > { %v2071_v27 = vpop.f32.mrb[13].mxu0  ;;  %v1150_v28 = vsel %vm1024_vm3, %v1143_v26, -inf }
 0x652   : > { %1151 = vmax.xlane.f32.xlu1 %v1150_v28  ;;  %v1146_v29 = vpop.f32.mrb[14].mxu0 }
 0x653   : > { %v2072_v30 = vpop.f32.mrb[15].mxu0  ;;  %v1153_v33 = vsel %vm1024_vm3, %v1146_v29, -inf }
 0x654   : > { %1154 = vmax.xlane.f32.xlu0 %v1153_v33  ;;  %v2338_v30 = vld [vmem:[#allocation16 + $0x20] sm:$0xff]  }
 0x6df   : > { %v1152_v34 = vpop.xlane.xlu1 %1151 }
 0x6e0   : > { %v1156_v36 = vsub.f32 %v1143_v26, %v1152_v34 }
 0x6e1   : > { %v1155_v37 = vpop.xlane.xlu0 %1154 }
 0x6e2   : > { %v1158_v32 = vmul.f32 1.442695, %v1156_v36  ;;  %v1157_v39 = vsub.f32 %v1146_v29, %v1155_v37 }
 0x6e4   : > { %2356 = vpow2.f32 %v1158_v32  ;;  %v1160_v40 = vmul.f32 1.442695, %v1157_v39 }
 0x6e6   : > { %2358 = vpow2.f32 %v1160_v40 }
 0x6ee   : > { %v2357_v31 = vpop.eup %2356 }
 0x6ef   : > { %v1162_v38 = vsel %vm1024_vm3, %v2357_v31, 0.0 }
 0x6f0   : > { %v2359_v41 = vpop.eup %2358  ;;  %1163 = vadd.xlane.f32.xlu0 %v1162_v38 }
 0x6f1   : > { %v1165_v42 = vsel %vm1024_vm3, %v2359_v41, 0.0 }
 0x6f2   : > { %1166 = vadd.xlane.f32.xlu1 %v1165_v42 }
 0x703   : > { %1338 = vrot.lane.b32.xlu1 %v3266_v35, %s2773_s22 }
 0x706   : > { %1174 = vrot.lane.b32.xlu0 %v3271_v51, %s2772_s18 }
 0x707   : > { %1336 = vrot.lane.b32.xlu1 %v3273_v52, %s2773_s22 }
 0x720   : > { %v1329_v43 = vpop.f32.mrb[4].mxu1 }
 0x721   : > { %v2093_v44 = vpop.f32.mrb[5].mxu1 }
 0x722   : > { %v1332_v45 = vpop.f32.mrb[6].mxu1 }
 0x723   : > { %v2094_v46 = vpop.f32.mrb[7].mxu1 }
 0x77d   : > { %v1164_v47 = vpop.xlane.xlu0 %1163 }
 0x77e   : > { %2360 = vrcp.f32 %v1164_v47 }
 0x77f   : > { %v1167_v48 = vpop.xlane.xlu1 %1166 }
 0x780   : > { %2362 = vrcp.f32 %v1167_v48 }
 0x781   : > { %v1175_v49 = vpop.permute.xlu0 %1174 }
 0x782   : > { %v1180_v50 = vsel %vm1051_vm2, %v1175_v49, 0 }
 0x783   : > { %2074 = vmatpush3.bf16.msra.mxu0 %v1180_v50  ;;  %v1339_v62 = vpop.permute.xlu1 %1338 }
 0x784   : > { %2079 = vmatprep.subr.bf16.mxu0 %v2770_v12  ;;  %v1344_v2 = vsel %vm976_vm1, %v1339_v62, 0 }
 0x787   : > { %v1337_v5 = vpop.permute.xlu1 %1336 }
 0x788   : > { %v2361_v53 = vpop.eup %2360 }
 0x789   : > { %v1170_v55 = vmul.f32 %v2361_v53, %v2357_v31 }
 0x78a   : > { %v2363_v54 = vpop.eup %2362 }
 0x78b   : > { %v1171_v56 = vmul.f32 %v2363_v54, %v2359_v41  ;;  %v2339_v41 = vld [vmem:[#allocation16 + $0x28] sm:$0xff]  }
 0x78d   : > { %v1172_v58 = vpack.c.bf16 %v1171_v56, %v1170_v55 }
 0x78f   : > { %2076 = vmatmul.mubr.msk.bf16.vlgmr.msra.gmra.mrb[16].mxu0 %vm1024_vm3, %v1172_v58 }
 0x790   : > { %2080 = vmatpush3.bf16.msra.mxu0 %v2336_v57  ;;  %2083 = vmatprep.mubr.msk.bf16.mxu0 %vm2771_vm0, %v2770_v12 }
 0x791   : > { %2081 = vmatprep.subr.bf16.mxu0 %v2770_v12 }
 0x794   : > { %2082 = vmatpush3.bf16.msra.mxu0 %v2337_v59 }
 0x795   : > { %2095 = vmatprep.subr.bf16.mxu0 %v2770_v12 }
 0x862   : > { %v1216_v60 = vpop.f32.mrb[16].mxu0 }
 0x863   : > { %v2077_v61 = vpop.f32.mrb[17].mxu0 }
 0x864   : > { %v1219_v63 = vpop.f32.mrb[18].mxu0 }
 0x865   : > { %v1223_v0 = vpack.c.bf16 %v1219_v63, %v1216_v60  ;;  %v2078_v1 = vpop.f32.mrb[19].mxu0 }
 0x866   : > { %v2340_v1 = vld [vmem:[#allocation16 + $0x30] sm:$0xff]  }
 0x867   : > { %2084 = vmatmul.mubr.msk.bf16.vlgmr.msra.gmra.mrb[20].mxu0 %vm976_vm1, %v1223_v0 }
 0x868   : > { %2096 = vmatpush3.bf16.xpose.msra.mxu0 %v1344_v2  ;;  %2097 = vmatprep.mubr.msk.bf16.mxu0 %vm2771_vm0, %v2770_v12 }
 0x869   : > { %2107 = vmatprep.subr.bf16.mxu0 %v2770_v12 }
 0x86f   : > { %2098 = vmatmul.mubr.msk.bf16.vlgmr.msra.gmra.mrb[24].mxu0 %vm976_vm1, %v1337_v5 }
 0x870   : > { %2111 = vmatprep.mubr.msk.bf16.mxu0 %vm2771_vm0, %v2770_v12  ;;  %2108 = vmatpush3.bf16.msra.mxu0 %v2338_v30 }
 0x871   : > { %2109 = vmatprep.subr.bf16.mxu0 %v2770_v12 }
 0x874   : > { %2110 = vmatpush3.bf16.msra.mxu0 %v2339_v41 }
 0x875   : > { %2121 = vmatprep.subr.bf16.mxu0 %v2770_v12 }
 0x93a   : > { %v1273_v6 = vpop.f32.mrb[20].mxu0 }
 0x93b   : > { %v3328_v7 = vadd.f32 %v1329_v43, %v1273_v6  ;;  %v2085_v8 = vpop.f32.mrb[21].mxu0 }
 0x93c   : > { %v1276_v9 = vpop.f32.mrb[22].mxu0 }
 0x93d   : > { %v3330_v10 = vadd.f32 %v1332_v45, %v1276_v9  ;;  %v2086_v11 = vpop.f32.mrb[23].mxu0 }
 0x942   : > { %v1380_v13 = vpop.f32.mrb[24].mxu0 }
 0x943   : > { %v2099_v14 = vpop.f32.mrb[25].mxu0  ;;  %v1387_v15 = vsel %vm1024_vm3, %v1380_v13, -inf }
 0x944   : > { %1388 = vmax.xlane.f32.xlu1 %v1387_v15  ;;  %v1383_v16 = vpop.f32.mrb[26].mxu0 }
 0x945   : > { %v2100_v17 = vpop.f32.mrb[27].mxu0  ;;  %v1390_v18 = vsel %vm1024_vm3, %v1383_v16, -inf }
 0x946   : > { %1391 = vmax.xlane.f32.xlu0 %v1390_v18 }
 0x955   : > { %1410 = vrot.lane.b32.xlu1 %v3271_v51, %s2773_s22 }
 0x959   : > { %1518 = vrot.lane.b32.xlu1 %v3273_v52, %s2774_s10 }
 0x9d1   : > { %v1389_v19 = vpop.xlane.xlu1 %1388 }
 0x9d2   : > { %v1393_v20 = vsub.f32 %v1380_v13, %v1389_v19 }
 0x9d3   : > { %v1392_v21 = vpop.xlane.xlu0 %1391 }
 0x9d4   : > { %v1395_v22 = vmul.f32 1.442695, %v1393_v20  ;;  %v1394_v23 = vsub.f32 %v1383_v16, %v1392_v21 }
 0x9d5   : > { %v1411_v24 = vpop.permute.xlu1 %1410 }
 0x9d6   : > { %2364 = vpow2.f32 %v1395_v22  ;;  %v1397_v25 = vmul.f32 1.442695, %v1394_v23  ;;  %v1416_v26 = vsel %vm1051_vm2, %v1411_v24, 0  ;;  %v1989_v24 = vld [vmem:[#allocation17] ss:$0 sm:$0xff] }
 0x9d7   : > { %2102 = vmatpush3.bf16.msra.mxu1 %v1416_v26 }
 0x9d8   : > { %2366 = vpow2.f32 %v1397_v25  ;;  %2115 = vmatprep.subr.bf16.mxu1 %v2770_v12 }
 0x9e0   : > { %v2365_v27 = vpop.eup %2364 }
 0x9e1   : > { %v1399_v28 = vsel %vm1024_vm3, %v2365_v27, 0.0 }
 0x9e2   : > { %v2367_v29 = vpop.eup %2366  ;;  %1400 = vadd.xlane.f32.xlu0 %v1399_v28 }
 0x9e3   : > { %v1402_v52 = vsel %vm1024_vm3, %v2367_v29, 0.0 }
 0x9e6   : > { %1403 = vadd.xlane.f32.xlu0 %v1402_v52 }
 0x9fc   : > { %1520 = vrot.lane.b32.xlu0 %v3266_v35, %s2774_s10  ;;  %v1519_v35 = vpop.permute.xlu1 %1518 }
 0xa6f   : > { %v1401_v33 = vpop.xlane.xlu0 %1400 }
 0xa70   : > { %2368 = vrcp.f32 %v1401_v33 }
 0xa73   : > { %v1404_v34 = vpop.xlane.xlu0 %1403 }
 0xa74   : > { %2370 = vrcp.f32 %v1404_v34 }
 0xa77   : > { %v1521_v40 = vpop.permute.xlu0 %1520 }
 0xa78   : > { %v1526_v38 = vsel %vm976_vm1, %v1521_v40, 0 }
 0xa7a   : > { %v2369_v36 = vpop.eup %2368 }
 0xa7b   : > { %v1407_v32 = vmul.f32 %v2369_v36, %v2365_v27 }
 0xa7e   : > { %v2371_v37 = vpop.eup %2370 }
 0xa7f   : > { %v1408_v39 = vmul.f32 %v2371_v37, %v2367_v29 }
 0xa81   : > { %v1409_v31 = vpack.c.bf16 %v1408_v39, %v1407_v32 }
 0xa83   : > { %2104 = vmatmul.mubr.msk.bf16.vlgmr.msra.gmra.mrb[8].mxu1 %vm1024_vm3, %v1409_v31 }
 0xa84   : > { %2116 = vmatpush3.bf16.xpose.msra.mxu1 %v1526_v38  ;;  %2117 = vmatprep.mubr.msk.bf16.mxu1 %vm2771_vm0, %v2770_v12 }
 0xa85   : > { %2127 = vmatprep.subr.bf16.mxu1 %v2770_v12 }
 0xa8b   : > { %2118 = vmatmul.mubr.msk.bf16.vlgmr.msra.gmra.mrb[12].mxu1 %vm976_vm1, %v1519_v35 }
 0xa8c   : > { %2131 = vmatprep.mubr.msk.bf16.mxu1 %vm2771_vm0, %v2770_v12  ;;  %2128 = vmatpush3.bf16.msra.mxu1 %v2340_v1 }
 0xa8d   : > { %2129 = vmatprep.subr.bf16.mxu1 %v2770_v12 }
 0xb56   : > { %v1452_v42 = vpop.f32.mrb[8].mxu1 }
 0xb57   : > { %v2105_v43 = vpop.f32.mrb[9].mxu1 }
 0xb58   : > { %v1455_v44 = vpop.f32.mrb[10].mxu1 }
 0xb59   : > { %v1459_v45 = vpack.c.bf16 %v1455_v44, %v1452_v42  ;;  %v2106_v46 = vpop.f32.mrb[11].mxu1 }
 0xb5b   : > { %2112 = vmatmul.mubr.msk.bf16.vlgmr.msra.gmra.mrb[28].mxu0 %vm976_vm1, %v1459_v45 }
 0xb5c   : > { %2123 = vmatprep.mubr.msk.bf16.mxu0 %vm2771_vm0, %v2770_v12 }
 0xb5e   : > { %v1562_v47 = vpop.f32.mrb[12].mxu1 }
 0xb5f   : > { %v2119_v48 = vpop.f32.mrb[13].mxu1  ;;  %v1569_v49 = vsel %vm1024_vm3, %v1562_v47, -inf }
 0xb60   : > { %1570 = vmax.xlane.f32.xlu1 %v1569_v49  ;;  %v1565_v50 = vpop.f32.mrb[14].mxu1 }
 0xb61   : > { %v2120_v53 = vpop.f32.mrb[15].mxu1  ;;  %v1572_v54 = vsel %vm1024_vm3, %v1565_v50, -inf }
 0xb62   : > { %1573 = vmax.xlane.f32.xlu0 %v1572_v54 }
 0xbed   : > { %v1571_v55 = vpop.xlane.xlu1 %1570 }
 0xbee   : > { %v1575_v56 = vsub.f32 %v1562_v47, %v1571_v55 }
 0xbef   : > { %v1574_v57 = vpop.xlane.xlu0 %1573 }
 0xbf0   : > { %v1577_v58 = vmul.f32 1.442695, %v1575_v56  ;;  %v1576_v59 = vsub.f32 %v1565_v50, %v1574_v57 }
 0xbf2   : > { %2372 = vpow2.f32 %v1577_v58  ;;  %v1579_v60 = vmul.f32 1.442695, %v1576_v59 }
 0xbf4   : > { %2374 = vpow2.f32 %v1579_v60 }
 0xbfc   : > { %v2373_v61 = vpop.eup %2372 }
 0xbfd   : > { %v1581_v62 = vsel %vm1024_vm3, %v2373_v61, 0.0 }
 0xbfe   : > { %v2375_v63 = vpop.eup %2374  ;;  %1582 = vadd.xlane.f32.xlu0 %v1581_v62 }
 0xbff   : > { %v1584_v0 = vsel %vm1024_vm3, %v2375_v63, 0.0 }
 0xc00   : > { %1585 = vadd.xlane.f32.xlu1 %v1584_v0 }
 0xc14   : > { %1592 = vrot.lane.b32.xlu0 %v3271_v51, %s2774_s10 }
 0xc2e   : > { %v1509_v2 = vpop.f32.mrb[28].mxu0 }
 0xc2f   : > { %v1516_v5 = vadd.f32 %v1509_v2, %v3328_v7  ;;  %v2113_v6 = vpop.f32.mrb[29].mxu0  ;;  %v2341_v7 = vld [vmem:[#allocation16 + $0x38] sm:$0xff]  }
 0xc30   : > { %v1512_v8 = vpop.f32.mrb[30].mxu0  ;;  %2130 = vmatpush3.bf16.msra.mxu1 %v2341_v7 }
 0xc31   : > { %v1517_v9 = vadd.f32 %v1512_v8, %v3330_v10  ;;  %v2114_v11 = vpop.f32.mrb[31].mxu0 }
 0xc8b   : > { %v1583_v13 = vpop.xlane.xlu0 %1582 }
 0xc8c   : > { %2376 = vrcp.f32 %v1583_v13 }
 0xc8d   : > { %v1586_v14 = vpop.xlane.xlu1 %1585 }
 0xc8e   : > { %2378 = vrcp.f32 %v1586_v14 }
 0xc8f   : > { %v1593_v15 = vpop.permute.xlu0 %1592 }
 0xc90   : > { %v1598_v16 = vsel %vm1051_vm2, %v1593_v15, 0 }
 0xc91   : > { %2122 = vmatpush3.bf16.msra.mxu0 %v1598_v16 }
 0xc96   : > { %v2377_v51 = vpop.eup %2376 }
 0xc97   : > { %v1589_v18 = vmul.f32 %v2377_v51, %v2373_v61 }
 0xc98   : > { %v2379_v17 = vpop.eup %2378 }
 0xc99   : > { %v1590_v12 = vmul.f32 %v2379_v17, %v2375_v63 }
 0xc9b   : > { %v1591_v19 = vpack.c.bf16 %v1590_v12, %v1589_v18 }
 0xc9d   : > { %2124 = vmatmul.mubr.msk.bf16.vlgmr.msra.gmra.mrb[32].mxu0 %vm1024_vm3, %v1591_v19 }
 0xd70   : > { %v1634_v10 = vpop.f32.mrb[32].mxu0 }
 0xd71   : > { %v2125_v20 = vpop.f32.mrb[33].mxu0 }
 0xd72   : > { %v1637_v21 = vpop.f32.mrb[34].mxu0 }
 0xd73   : > { %v1641_v22 = vpack.c.bf16 %v1637_v21, %v1634_v10  ;;  %v2126_v23 = vpop.f32.mrb[35].mxu0 }
 0xd75   : > { %2132 = vmatmul.mubr.msk.bf16.vlgmr.msra.gmra.mrb[16].mxu1 %vm976_vm1, %v1641_v22 }
 0xe48   : > { %v1691_v25 = vpop.f32.mrb[16].mxu1 }
 0xe49   : > { %v1698_v26 = vadd.f32 %v1691_v25, %v1516_v5  ;;  %v2133_v27 = vpop.f32.mrb[17].mxu1 }
 0xe4a   : > { %v1694_v28 = vpop.f32.mrb[18].mxu1 }
 0xe4b   : > { %v1706_v29 = vadd.f32 %v1989_v24, %v1698_v26  ;;  %v1699_v52 = vadd.f32 %v1694_v28, %v1517_v9  ;;  %v2134_v30 = vpop.f32.mrb[19].mxu1 }
 0xe4d   : > { %v1708_v33 = vadd.f32 %v1706_v29, %v3224_v4  ;;  %v1707_v34 = vadd.f32 %v1989_v24, %v1699_v52 }
 0xe4f   : > { %1710 = vst [vmem:[%s521_s26] sm:$0xff] %v1708_v33  ;;  %v1709_v36 = vadd.f32 %v1707_v34, %v3222_v3 }
 0xe51   : > { %1711 = vst [vmem:[%s521_s26 + $0x8] sm:$0xff] %v1709_v36 }
 0xe52   : > { %2677 = shalt.err (!%p2674_p4)
}
 0xe53   : > { %s2678_s5 = scalar_lea.hbm %s3377_s28, 256  ;;  %s2682_s18 = scalar_lea.hbm %s3479_s30, 512 }
 0xe54   : > { %p2679_p1 = scmp.ne.s32.totalorder %s3377_s28, %s2678_s5  ;;  %p2683_p6 = scmp.lt.u32.totalorder %s3377_s28, %s3479_s30 }
 0xe55   : > { %p2684_p10 = scmp.lt.u32.totalorder %s2682_s18, %s2678_s5  ;;  %p2686_p5 = scmp.lt.u32.totalorder %s2678_s5, %s3377_s28 }
 0xe56   : > { %p2680_p13 = pnand %p2679_p1, %p3480_p7 }
 0xe57   : > { %p2685_p11 = por %p2684_p10, %p2683_p6 }
 0xe58   : > { %p2681_p0 = pneg %p2680_p13 }
 0xe59   : > { %p2687_p3 = por %p2686_p5, %p2685_p11 }
 0xe5b   : > { %p2688_p2 = pnand %p2687_p3, %p2681_p0 }
 0xe5d   : > { %2691 = shalt.err (!%p2688_p2)
}
 0xe5e   : > { %s2776_s26 = smov 128   ;;  %s2777_s21 = smov 8  }
 0xe5f   : > { %2171 = dma.vmem_to_hbm [thread:$0]  (%p3480_p7), %s3372_s25, 256, %s3377_s28, %s1713_s2, %s2776_s26, %s2776_s26, %s2777_s21  }
 0xe60 PF: > { %s1741_s29 = sand.u32 1, %s2742_s13   ;;  %p3481_p12 = scmp.ne.s32.totalorder %s3460_s11, 0 }
 0xe61   : > { %p3482_p8 = scmp.ge.s32.totalorder %s2754_s16, 2  ;;  %s1742_s0 = scalar_lea.sflag [#allocation4], %s1741_s29 }
 0xe63   : > { %p2206_p9 = pnand %p3482_p8, %p3481_p12 }
 0xe65   : > { %2737 = dma.done.wait (!%p2206_p9), %s1742_s0, 256  }
 0xe66   : > { %2739 = vsyncadd (!%p2206_p9), %s1742_s0, 4294967040  ;;  %p30_p4 = scmp.ge.s32.totalorder %s3068_s17, 4   ;;  %s3483_s13 = smov %s2746_s14 }
 0xe67   : > { %s3484_s14 = smov %s2750_s15  ;;  %s3485_s15 = smov %s3079_s23 }
 0xe68   : > { %s3486_s16 = smov %s3068_s17  ;;  %32 = sbr.rel (!%p30_p4) target bundleno = 19 (0x13), region = 150 }
 0xe6f   :  { %1747 = vsyncpa [#allocation3], 1 }
 0xe70   :  { %1749 = vsyncpa [#allocation3 + $0x1], 1 }
 0xe71   :  { %1750 = vsyncpa [#allocation6], 1 }
 0xe72   :  { %1752 = vsyncpa [#allocation6 + $0x1], 1 }
 0xe73   :  { %1753 = vsyncpa [#allocation9], 1 }
 0xe74   :  { %1754 = vsyncpa [#allocation12], 1 }
 0xe75   :  { %1755 = vsyncpa [#allocation15], 1 }
 0xe76   :  { %1756 = vsyncpa [#allocation18], 1 }
 0xe77   :  { %1757 = vsyncpa [#allocation4], 1 }
 0xe78   :  { %1759 = vsyncpa [#allocation4 + $0x1], 1 }

// kernel: encoder_forward.26
= control target key start
LH: loop header
LB: loop body
LE: loop exit
PB: predicated region body
PF: predicated region fallthrough
CT: control target
= control target key end

     0   :  { %8 = vsyncpa [#allocation3], 0  ;;  %s886_s0 = inlined_call_operand.hbm [shape: f32[32,128], index: 0, kind: input, shape index: {}]   ;;  %s887_s1 = inlined_call_operand.hbm [shape: f32[1,128], index: 1, kind: input, shape index: {}]   ;;  %s888_s2 = inlined_call_operand.hbm [shape: f32[1,128], index: 2, kind: input, shape index: {}]   ;;  %s889_s3 = inlined_call_operand.hbm [shape: f32[32,128], index: 3, kind: output, shape index: {}]  }
   0x1   :  { %10 = vsyncpa [#allocation3 + $0x1], 0 }
   0x2   :  { %11 = vsyncpa [#allocation6], 0 }
   0x3   :  { %12 = vsyncpa [#allocation4], 0 }
   0x4   :  { %14 = vsyncpa [#allocation4 + $0x1], 0  ;;  %s650_s12 = smov 0   ;;  %s652_s13 = smov 0  }
   0x5   :  { %s654_s14 = smov 0   ;;  %s656_s15 = smov 0  }
   0x6 LB: > { %s671_s16 = sadd.s32 4294967295, %s620_s15   ;;  %s367_s17 = sadd.s32 4294967294, %s620_s15   ;;  %s620_s15 = sphi %s656_s15, %s914_s15   ;;  %s616_s14 = sphi %s654_s14, %s913_s14   ;;  %s612_s13 = sphi %s652_s13, %s912_s13   ;;  %s608_s12 = sphi %s650_s12, %s911_s12  }
   0x7   : > { %s675_s18 = sadd.s32 1, %s620_s15   ;;  %s27_s19 = sadd.s32 1, %s616_s14 }
   0x8   : > { %s24_s20 = ssub.s32 %s620_s15, %s675_s18  ;;  %p34_p0 = scmp.ne.s32.totalorder %s616_s14, %s612_s13 }
   0x9   : > { %p25_p1 = scmp.eq.s32.totalorder %s24_s20, 0  ;;  %p35_p2 = scmp.eq.s32.totalorder %s620_s15, 0 }
   0xa   : > { %p40_p3 = scmp.ne.s32.totalorder %s612_s13, %s608_s12  ;;  %p890_p4 = scmp.eq.s32.totalorder %s671_s16, 0 }
   0xb   : > { %s687_s21 = scalar_select %p25_p1, %s616_s14, %s27_s19  }
   0xc   : > { %p689_p5 = por %p35_p2, %p34_p0  ;;  %p695_p6 = por %p890_p4, %p40_p3 }
   0xd   : > { %p106_p7 = scmp.eq.s32.totalorder %s671_s16, 1  ;;  %p112_p8 = scmp.eq.s32.totalorder %s367_s17, 1 }
   0xe   : > { %s896_s23 = scalar_select %p695_p6, 1, 0 }
   0xf   : > { %p368_p9 = scmp.ge.s32.totalorder %s620_s15, 1  ;;  %p119_p10 = scmp.lt.s32.totalorder %s620_s15, 3 }
  0x10   : > { %p702_p11 = por %p106_p7, %p34_p0  ;;  %p706_p12 = por %p112_p8, %p40_p3 }
  0x11   : > { %p710_p13 = pnand %p368_p9, %p119_p10  ;;  %s622_s27 = smov [#allocation5]  }
  0x12   : > { %s897_s24 = scalar_select %p702_p11, 1, 0 }
  0x13   : > { %s898_s25 = scalar_select %p706_p12, 1, 0 }
  0x14   : > { %s899_s26 = scalar_select %p710_p13, 1, 0 }
  0x15   : > { %p401_p2 = pneg %p710_p13  ;;  %s132_s28 = sshll.u32 %s622_s27, 4  ;;  %s133_s28 = int_to_ptr.vmem [resolvable:$true] %s132_s28 }
  0x16   : > { %p418_p4 = scmp.lt.s32.totalorder %s620_s15, 2  ;;  %p900_p0 = scmp.eq.s32.totalorder %s671_s16, 0 }
  0x17   : > { %s623_s4 = smov [#allocation7]   ;;  %s464_s8 = scalar_lea.hbm %s887_s1, 16 }
  0x18   : > { %p720_p7 = pnand %p401_p2, %p900_p0  ;;  %p726_p3 = pnand %p418_p4, %p689_p5 }
  0x19   : > { %s143_s5 = sshll.u32 %s623_s4, 4  ;;  %p465_p8 = scmp.ne.s32.totalorder %s887_s1, %s464_s8  ;;  %s730_s5 = int_to_ptr.vmem [resolvable:$true] %s143_s5 }
  0x1a   : > { %s902_s30 = scalar_select %p726_p3, 1, 0 }
  0x1b   : > { %p466_p9 = pneg %p720_p7  ;;  %p471_p10 = scmp.lt.u32.totalorder %s464_s8, %s887_s1 }
  0x1d   : > { %p467_p4 = pnand %p466_p9, %p465_p8 }
  0x1f   : > { %p468_p5 = pneg %p467_p4 }
  0x21   : > { %p473_p2 = pnand %p471_p10, %p468_p5 }
  0x23   : > { %476 = shalt.err (!%p473_p2)
}
  0x24   : > { %s477_s19 = scalar_lea.vmem %s133_s28, 16  ;;  %s484_s20 = scalar_lea.vmem %s133_s28, 32 }
  0x25   : > { %p478_p0 = scmp.ne.s32.totalorder %s133_s28, %s477_s19  ;;  %p485_p11 = scmp.lt.s32.totalorder %s133_s28, %s133_s28 }
  0x26   : > { %p486_p6 = scmp.lt.s32.totalorder %s484_s20, %s477_s19 }
  0x27   : > { %p480_p1 = pnand %p478_p0, %p466_p9 }
  0x28   : > { %p487_p13 = por %p486_p6, %p485_p11 }
  0x29   : > { %p481_p12 = pneg %p480_p1 }
  0x2b   : > { %p488_p3 = pnand %p487_p13, %p481_p12 }
  0x2d   : > { %491 = shalt.err (!%p488_p3)
}
  0x2e   : > { %404 = dma.hbm_to_vmem [thread:$0]  (!%p720_p7), %s887_s1, 16, %s133_s28, [#allocation6]  }
  0x2f   : > { %s154_s4 = sand.u32 1, %s616_s14   ;;  %s492_s8 = scalar_lea.hbm %s888_s2, 16 }
  0x30   : > { %p493_p1 = scmp.ne.s32.totalorder %s888_s2, %s492_s8  ;;  %p499_p12 = scmp.lt.u32.totalorder %s492_s8, %s888_s2 }
  0x32   : > { %p495_p6 = pnand %p493_p1, %p466_p9 }
  0x34   : > { %p496_p11 = pneg %p495_p6 }
  0x36   : > { %p501_p13 = pnand %p499_p12, %p496_p11 }
  0x38   : > { %504 = shalt.err (!%p501_p13)
}
  0x39   : > { %s505_s28 = scalar_lea.vmem %s730_s5, 16  ;;  %s512_s19 = scalar_lea.vmem %s730_s5, 32 }
  0x3a   : > { %p506_p3 = scmp.ne.s32.totalorder %s730_s5, %s505_s28  ;;  %p513_p5 = scmp.lt.s32.totalorder %s730_s5, %s730_s5 }
  0x3b   : > { %p514_p10 = scmp.lt.s32.totalorder %s512_s19, %s505_s28 }
  0x3c   : > { %p508_p8 = pnand %p506_p3, %p466_p9 }
  0x3d   : > { %p515_p2 = por %p514_p10, %p513_p5 }
  0x3e   : > { %p509_p4 = pneg %p508_p8 }
  0x40   : > { %p516_p0 = pnand %p515_p2, %p509_p4 }
  0x42   : > { %519 = shalt.err (!%p516_p0)
}
  0x43   : > { %407 = dma.hbm_to_vmem [thread:$0]  (!%p720_p7), %s888_s2, 16, %s730_s5, [#allocation6]  }
  0x44   : > { %s372_s27 = sshll.u32 %s154_s4, 4  ;;  %s387_s6 = sshll.u32 %s620_s15, 8 }
  0x45   : > { %s785_s9 = scalar_lea.hbm %s886_s0, %s387_s6  ;;  %s158_s29 = scalar_lea.vmem [#allocation2], %s372_s27 }
  0x46   : > { %s165_s10 = sshll.u32 %s158_s29, 4  ;;  %s789_s11 = scalar_lea.sflag [#allocation3], %s154_s4  ;;  %s787_s10 = int_to_ptr.vmem [resolvable:$true] %s165_s10 }
  0x47   : > { %s520_s17 = scalar_lea.hbm %s785_s9, 256  ;;  %p903_p7 = scmp.ne.s32.totalorder %s902_s30, 0 }
  0x48   : > { %p521_p9 = scmp.ne.s32.totalorder %s785_s9, %s520_s17  ;;  %s525_s19 = scalar_lea.hbm %s886_s0, 512 }
  0x49   : > { %p522_p1 = pneg %p903_p7  ;;  %p526_p12 = scmp.lt.u32.totalorder %s785_s9, %s886_s0 }
  0x4a   : > { %p527_p13 = scmp.lt.u32.totalorder %s525_s19, %s520_s17  ;;  %p529_p8 = scmp.lt.u32.totalorder %s520_s17, %s785_s9 }
  0x4b   : > { %p523_p6 = pnand %p522_p1, %p521_p9 }
  0x4c   : > { %p528_p3 = por %p527_p13, %p526_p12 }
  0x4d   : > { %p524_p11 = pneg %p523_p6 }
  0x4e   : > { %p530_p4 = por %p529_p8, %p528_p3 }
  0x50   : > { %p531_p5 = pnand %p530_p4, %p524_p11 }
  0x52   : > { %534 = shalt.err (!%p531_p5)
}
  0x53   : > { %s535_s4 = scalar_lea.vmem %s787_s10, 256  ;;  %s624_s27 = smov [#allocation2]  }
  0x54   : > { %p536_p10 = scmp.ne.s32.totalorder %s787_s10, %s535_s4  ;;  %s540_s6 = sshll.u32 %s624_s27, 4  ;;  %s541_s6 = int_to_ptr.vmem [resolvable:$false] %s540_s6 }
  0x55   : > { %s542_s7 = scalar_lea.vmem %s541_s6, 512  ;;  %p543_p9 = scmp.lt.s32.totalorder %s787_s10, %s541_s6 }
  0x56   : > { %p538_p2 = pnand %p536_p10, %p522_p1  ;;  %p544_p6 = scmp.lt.s32.totalorder %s542_s7, %s535_s4 }
  0x58   : > { %p539_p0 = pneg %p538_p2  ;;  %p545_p12 = por %p544_p6, %p543_p9 }
  0x5a   : > { %p546_p13 = pnand %p545_p12, %p539_p0 }
  0x5c   : > { %549 = shalt.err (!%p546_p13)
}
  0x5d   : > { %s625_s8 = smov 128   ;;  %s626_s29 = smov 8  }
  0x5e   : > { %411 = dma.hbm_to_vmem [thread:$0]  (!%p903_p7), %s785_s9, 256, %s787_s10, %s789_s11, %s625_s8, %s625_s8, %s626_s29  }
  0x5f   : > { %p904_p1 = scmp.ne.s32.totalorder %s899_s26, 0 }
  0x60   : > { %s820_s17 = sand.u32 (!%p904_p1), 1, %s612_s13   ;;  %p905_p11 = scmp.ne.s32.totalorder (!%p904_p1), %s896_s23, 0 }
  0x61   : > { %177 = sbr.rel (%p904_p1) target bundleno = 439 (0x1b7), region = 32  ;;  %s376_s5 = sshll.u32 (!%p904_p1), %s820_s17, 4 }
  0x62   : > { %s180_s28 = scalar_lea.sflag (!%p904_p1), [#allocation3], %s820_s17  ;;  %s183_s19 = scalar_lea.vmem (!%p904_p1), [#allocation2], %s376_s5 }
  0x68   : > { %595 = dma.done.wait (%p905_p11), %s180_s28, 256  }
  0x69   : > { %597 = vsyncadd (%p905_p11), %s180_s28, 4294967040  ;;  %p906_p7 = scmp.eq.s32.totalorder %s671_s16, 0 }
  0x6b   : > { %599 = dma.done.wait (%p906_p7), [#allocation6], 32   ;;  %p907_p3 = pmov %p906_p7 }
  0x6c   : > { %v216_v0 = vld [vmem:[%s183_s19] sm:$0xff]  ;;  %v217_v1 = vld [vmem:[%s183_s19 + $0x8] sm:$0xff]  ;;  %s388_s23 = sshll.u32 %s671_s16, 8  ;;  %s213_s26 = scalar_lea.vmem [#allocation8], %s376_s5 }
  0x6d   : > { %601 = vsyncadd (%p907_p3), [#allocation6], 4294967264  ;;  %220 = vadd.xlane.f32.xlu0 %v216_v0  ;;  %v380_v17 = vld [vmem:[#allocation5] ss:$0 sm:$0xff]  ;;  %v381_v19 = vld [vmem:[#allocation7] ss:$0 sm:$0xff]  ;;  %s840_s11 = scalar_lea.hbm %s889_s3, %s388_s23 }
  0x6e   : > { %s275_s30 = sshll.u32 %s213_s26, 4  ;;  %s262_s20 = scalar_lea.sflag [#allocation4], %s820_s17  ;;  %s842_s30 = int_to_ptr.vmem [resolvable:$true] %s275_s30 }
  0x6f   : > { %s550_s22 = scalar_lea.vmem %s842_s30, 256  ;;  %p908_p4 = scmp.ne.s32.totalorder %s897_s24, 0 }
  0x70   : > { %p551_p8 = scmp.ne.s32.totalorder %s842_s30, %s550_s22  ;;  %s627_s16 = smov [#allocation8]  }
  0x71   : > { %222 = vadd.xlane.f32.xlu0 %v217_v1  ;;  %s554_s4 = sshll.u32 %s627_s16, 4  ;;  %s555_s4 = int_to_ptr.vmem [resolvable:$false] %s554_s4 }
  0x72   : > { %p552_p5 = pnand %p551_p8, %p908_p4  ;;  %s556_s27 = scalar_lea.vmem %s555_s4, 512 }
  0x73   : > { %p557_p2 = scmp.lt.s32.totalorder %s842_s30, %s555_s4  ;;  %p558_p0 = scmp.lt.s32.totalorder %s556_s27, %s550_s22 }
  0x74   : > { %p553_p10 = pneg %p552_p5 }
  0x75   : > { %p559_p9 = por %p558_p0, %p557_p2 }
  0x77   : > { %p560_p6 = pnand %p559_p9, %p553_p10 }
  0xfa   : > { %v221_v2 = vpop.xlane.xlu0 %220 }
  0xfb   : > { %v225_v3 = vmul.f32 0.0078125, %v221_v2 }
  0xfd   : > { %v227_v4 = vsub.f32 %v216_v0, %v225_v3 }
  0xfe   : > { %v223_v5 = vpop.xlane.xlu0 %222 }
  0xff   : > { %v226_v6 = vmul.f32 0.0078125, %v223_v5  ;;  %v229_v7 = vmul.f32 %v227_v4, %v227_v4 }
 0x101   : > { %v228_v8 = vsub.f32 %v217_v1, %v226_v6  ;;  %231 = vadd.xlane.f32.xlu1 %v229_v7 }
 0x103   : > { %v230_v9 = vmul.f32 %v228_v8, %v228_v8 }
 0x105   : > { %233 = vadd.xlane.f32.xlu1 %v230_v9 }
 0x18e   : > { %v232_v10 = vpop.xlane.xlu1 %231 }
 0x18f   : > { %v235_v11 = vmul.f32 0.0078125, %v232_v10 }
 0x191   : > { %v237_v12 = vadd.f32 1e-05, %v235_v11 }
 0x192   : > { %v234_v13 = vpop.xlane.xlu1 %233 }
 0x193   : > { %460 = vrsqrt.f32 %v237_v12  ;;  %v236_v14 = vmul.f32 0.0078125, %v234_v13 }
 0x195   : > { %v238_v15 = vadd.f32 1e-05, %v236_v14 }
 0x197   : > { %462 = vrsqrt.f32 %v238_v15 }
 0x19d   : > { %v461_v16 = vpop.eup %460 }
 0x19e   : > { %v241_v18 = vmul.f32 %v461_v16, %v227_v4 }
 0x1a0   : > { %v249_v20 = vmul.f32 %v380_v17, %v241_v18 }
 0x1a1   : > { %v463_v21 = vpop.eup %462 }
 0x1a2   : > { %v257_v22 = vadd.f32 %v381_v19, %v249_v20  ;;  %v242_v23 = vmul.f32 %v463_v21, %v228_v8 }
 0x1a4   : > { %v250_v24 = vmul.f32 %v380_v17, %v242_v23  ;;  %259 = vst [vmem:[%s213_s26] sm:$0xff] %v257_v22 }
 0x1a6   : > { %v258_v25 = vadd.f32 %v381_v19, %v250_v24 }
 0x1a8   : > { %260 = vst [vmem:[%s213_s26 + $0x8] sm:$0xff] %v258_v25 }
 0x1a9   : > { %563 = shalt.err (!%p560_p6)
}
 0x1aa   : > { %s564_s6 = scalar_lea.hbm %s840_s11, 256  ;;  %s568_s29 = scalar_lea.hbm %s889_s3, 512 }
 0x1ab   : > { %p565_p12 = scmp.ne.s32.totalorder %s840_s11, %s564_s6  ;;  %p569_p11 = scmp.lt.u32.totalorder %s840_s11, %s889_s3 }
 0x1ac   : > { %p570_p7 = scmp.lt.u32.totalorder %s568_s29, %s564_s6  ;;  %p572_p8 = scmp.lt.u32.totalorder %s564_s6, %s840_s11 }
 0x1ad   : > { %p566_p13 = pnand %p565_p12, %p908_p4 }
 0x1ae   : > { %p571_p3 = por %p570_p7, %p569_p11 }
 0x1af   : > { %p567_p1 = pneg %p566_p13 }
 0x1b0   : > { %p573_p5 = por %p572_p8, %p571_p3 }
 0x1b2   : > { %p574_p10 = pnand %p573_p5, %p567_p1 }
 0x1b4   : > { %577 = shalt.err (!%p574_p10)
}
 0x1b5   : > { %s628_s19 = smov 128   ;;  %s629_s23 = smov 8  }
 0x1b6   : > { %399 = dma.vmem_to_hbm [thread:$0]  (%p908_p4), %s842_s30, 256, %s840_s11, %s262_s20, %s628_s19, %s628_s19, %s629_s23  }
 0x1b7 PF: > { %s290_s26 = sand.u32 1, %s608_s12   ;;  %p909_p2 = scmp.ne.s32.totalorder %s898_s25, 0 }
 0x1b8   : > { %p910_p0 = scmp.ge.s32.totalorder %s620_s15, 2  ;;  %s291_s9 = scalar_lea.sflag [#allocation4], %s290_s26 }
 0x1ba   : > { %p413_p9 = pnand %p910_p0, %p909_p2 }
 0x1bc   : > { %603 = dma.done.wait (!%p413_p9), %s291_s9, 256  }
 0x1bd   : > { %605 = vsyncadd (!%p413_p9), %s291_s9, 4294967040  ;;  %p17_p6 = scmp.ge.s32.totalorder %s675_s18, 4   ;;  %s911_s12 = smov %s612_s13 }
 0x1be   : > { %s912_s13 = smov %s616_s14  ;;  %s913_s14 = smov %s687_s21 }
 0x1bf   : > { %s914_s15 = smov %s675_s18  ;;  %19 = sbr.rel (!%p17_p6) target bundleno = 6 (0x6), region = 85 }
 0x1c6   :  { %296 = vsyncpa [#allocation3], 1 }
 0x1c7   :  { %298 = vsyncpa [#allocation3 + $0x1], 1 }
 0x1c8   :  { %299 = vsyncpa [#allocation6], 1 }
 0x1c9   :  { %300 = vsyncpa [#allocation4], 1 }
 0x1ca   :  { %302 = vsyncpa [#allocation4 + $0x1], 1 }

// kernel: encoder_forward.27
= control target key start
LH: loop header
LB: loop body
LE: loop exit
PB: predicated region body
PF: predicated region fallthrough
CT: control target
= control target key end

     0   :  { %8 = vsyncpa [#allocation3], 0  ;;  %s865_s0 = inlined_call_operand.hbm [shape: f32[16,256], index: 0, kind: input, shape index: {}]   ;;  %s866_s1 = inlined_call_operand.hbm [shape: f32[1,256], index: 1, kind: input, shape index: {}]   ;;  %s867_s2 = inlined_call_operand.hbm [shape: f32[1,256], index: 2, kind: input, shape index: {}]   ;;  %s868_s3 = inlined_call_operand.hbm [shape: f32[16,256], index: 3, kind: output, shape index: {}]  }
   0x1   :  { %10 = vsyncpa [#allocation3 + $0x1], 0 }
   0x2   :  { %11 = vsyncpa [#allocation6], 0 }
   0x3   :  { %12 = vsyncpa [#allocation4], 0 }
   0x4   :  { %14 = vsyncpa [#allocation4 + $0x1], 0  ;;  %s636_s12 = smov 0   ;;  %s638_s13 = smov 0  }
   0x5   :  { %s640_s14 = smov 0   ;;  %s642_s15 = smov 0  }
   0x6 LB: > { %s657_s16 = sadd.s32 4294967295, %s610_s15   ;;  %s365_s17 = sadd.s32 4294967294, %s610_s15   ;;  %s610_s15 = sphi %s642_s15, %s888_s15   ;;  %s606_s14 = sphi %s640_s14, %s887_s14   ;;  %s602_s13 = sphi %s638_s13, %s886_s13   ;;  %s598_s12 = sphi %s636_s12, %s885_s12  }
   0x7   : > { %p40_p0 = scmp.ne.s32.totalorder %s602_s13, %s598_s12  ;;  %p869_p1 = scmp.eq.s32.totalorder %s657_s16, 0 }
   0x8   : > { %p112_p3 = scmp.eq.s32.totalorder %s365_s17, 1  ;;  %p366_p5 = scmp.ge.s32.totalorder %s610_s15, 1 }
   0x9   : > { %p666_p4 = por %p869_p1, %p40_p0  ;;  %p119_p7 = scmp.lt.s32.totalorder %s610_s15, 3 }
   0xa   : > { %p671_p6 = por %p112_p3, %p40_p0  ;;  %s612_s21 = smov [#allocation5]  }
   0xb   : > { %s872_s18 = scalar_select %p666_p4, 1, 0 }
   0xc   : > { %s873_s19 = scalar_select %p671_p6, 1, 0 }
   0xd   : > { %p676_p8 = pnand %p366_p5, %p119_p7  ;;  %s132_s22 = sshll.u32 %s612_s21, 4  ;;  %s133_s22 = int_to_ptr.vmem [resolvable:$true] %s132_s22 }
   0xe   : > { %s613_s23 = smov [#allocation7]   ;;  %s692_s26 = sadd.s32 1, %s610_s15  }
   0xf   : > { %s874_s20 = scalar_select %p676_p8, 1, 0 }
  0x10   : > { %p397_p10 = pneg %p676_p8  ;;  %s143_s24 = sshll.u32 %s613_s23, 4  ;;  %s689_s24 = int_to_ptr.vmem [resolvable:$true] %s143_s24 }
  0x11   : > { %s24_s27 = ssub.s32 %s610_s15, %s692_s26  ;;  %s454_s30 = scalar_lea.hbm %s866_s1, 32 }
  0x12   : > { %p685_p11 = pnand %p397_p10, %p869_p1  ;;  %p455_p12 = scmp.ne.s32.totalorder %s866_s1, %s454_s30 }
  0x13   : > { %p461_p5 = scmp.lt.u32.totalorder %s454_s30, %s866_s1 }
  0x14   : > { %p456_p13 = pneg %p685_p11 }
  0x16   : > { %p457_p0 = pnand %p456_p13, %p455_p12 }
  0x18   : > { %p458_p3 = pneg %p457_p0 }
  0x1a   : > { %p463_p7 = pnand %p461_p5, %p458_p3 }
  0x1c   : > { %466 = shalt.err (!%p463_p7)
}
  0x1d   : > { %s467_s8 = scalar_lea.vmem %s133_s22, 32  ;;  %p475_p2 = scmp.lt.s32.totalorder %s133_s22, %s133_s22 }
  0x1e   : > { %p468_p10 = scmp.ne.s32.totalorder %s133_s22, %s467_s8  ;;  %p476_p6 = scmp.lt.s32.totalorder %s467_s8, %s467_s8 }
  0x20   : > { %p470_p9 = pnand %p468_p10, %p456_p13  ;;  %p477_p4 = por %p476_p6, %p475_p2 }
  0x22   : > { %p471_p1 = pneg %p470_p9 }
  0x24   : > { %p478_p8 = pnand %p477_p4, %p471_p1 }
  0x26   : > { %481 = shalt.err (!%p478_p8)
}
  0x27   : > { %400 = dma.hbm_to_vmem [thread:$0]  (!%p685_p11), %s866_s1, 32, %s133_s22, [#allocation6]  }
  0x28   : > { %s482_s21 = scalar_lea.hbm %s867_s2, 32 }
  0x29   : > { %p483_p9 = scmp.ne.s32.totalorder %s867_s2, %s482_s21  ;;  %p489_p4 = scmp.lt.u32.totalorder %s482_s21, %s867_s2 }
  0x2b   : > { %p485_p2 = pnand %p483_p9, %p456_p13 }
  0x2d   : > { %p486_p1 = pneg %p485_p2 }
  0x2f   : > { %p491_p6 = pnand %p489_p4, %p486_p1 }
  0x31   : > { %494 = shalt.err (!%p491_p6)
}
  0x32   : > { %s495_s22 = scalar_lea.vmem %s689_s24, 32  ;;  %p503_p3 = scmp.lt.s32.totalorder %s689_s24, %s689_s24 }
  0x33   : > { %p496_p8 = scmp.ne.s32.totalorder %s689_s24, %s495_s22  ;;  %p504_p5 = scmp.lt.s32.totalorder %s495_s22, %s495_s22 }
  0x35   : > { %p498_p12 = pnand %p496_p8, %p456_p13  ;;  %p505_p7 = por %p504_p5, %p503_p3 }
  0x37   : > { %p499_p0 = pneg %p498_p12 }
  0x39   : > { %p506_p10 = pnand %p505_p7, %p499_p0 }
  0x3b   : > { %509 = shalt.err (!%p506_p10)
}
  0x3c   : > { %403 = dma.hbm_to_vmem [thread:$0]  (!%p685_p11), %s867_s2, 32, %s689_s24, [#allocation6]  }
  0x3d   : > { %p25_p13 = scmp.eq.s32.totalorder %s24_s27, 0  ;;  %s27_s6 = sadd.s32 1, %s606_s14 }
  0x3e   : > { %p34_p9 = scmp.ne.s32.totalorder %s606_s14, %s602_s13  ;;  %p35_p2 = scmp.eq.s32.totalorder %s610_s15, 0 }
  0x3f   : > { %s751_s25 = scalar_select %p25_p13, %s606_s14, %s27_s6  }
  0x40   : > { %p36_p1 = por %p35_p2, %p34_p9  ;;  %p876_p4 = scmp.eq.s32.totalorder %s657_s16, 1 }
  0x41   : > { %p414_p8 = scmp.lt.s32.totalorder %s610_s15, 2  ;;  %s154_s8 = sand.u32 1, %s606_s14  }
  0x42   : > { %p755_p6 = por %p876_p4, %p34_p9  ;;  %s370_s9 = sshll.u32 %s154_s8, 4 }
  0x43   : > { %s383_s10 = sshll.u32 %s610_s15, 8  ;;  %s158_s27 = scalar_lea.vmem [#allocation2], %s370_s9 }
  0x44   : > { %s765_s24 = scalar_lea.hbm %s865_s0, %s383_s10  ;;  %s166_s21 = sshll.u32 %s158_s27, 4  ;;  %s767_s21 = int_to_ptr.vmem [resolvable:$true] %s166_s21 }
  0x45   : > { %p769_p11 = pnand %p414_p8, %p36_p1  ;;  %s155_s28 = scalar_lea.sflag [#allocation3], %s154_s8 }
  0x46   : > { %s510_s29 = scalar_lea.hbm %s765_s24, 256  ;;  %s515_s4 = scalar_lea.hbm %s865_s0, 512 }
  0x47   : > { %p511_p12 = scmp.ne.s32.totalorder %s765_s24, %s510_s29  ;;  %p512_p0 = pneg %p769_p11 }
  0x48   : > { %p516_p7 = scmp.lt.u32.totalorder %s765_s24, %s865_s0  ;;  %p517_p10 = scmp.lt.u32.totalorder %s515_s4, %s510_s29 }
  0x49   : > { %p513_p3 = pnand %p512_p0, %p511_p12  ;;  %p519_p9 = scmp.lt.u32.totalorder %s510_s29, %s765_s24 }
  0x4a   : > { %p518_p13 = por %p517_p10, %p516_p7 }
  0x4b   : > { %p514_p5 = pneg %p513_p3 }
  0x4c   : > { %p520_p2 = por %p519_p9, %p518_p13 }
  0x4e   : > { %p521_p1 = pnand %p520_p2, %p514_p5 }
  0x50   : > { %524 = shalt.err (!%p521_p1)
}
  0x51   : > { %s525_s8 = scalar_lea.vmem %s767_s21, 256  ;;  %s614_s9 = smov [#allocation2]  }
  0x52   : > { %p526_p4 = scmp.ne.s32.totalorder %s767_s21, %s525_s8  ;;  %s530_s10 = sshll.u32 %s614_s9, 4  ;;  %s531_s10 = int_to_ptr.vmem [resolvable:$false] %s530_s10 }
  0x53   : > { %s532_s11 = scalar_lea.vmem %s531_s10, 512  ;;  %p533_p3 = scmp.lt.s32.totalorder %s767_s21, %s531_s10 }
  0x54   : > { %p528_p8 = pnand %p526_p4, %p512_p0  ;;  %p534_p7 = scmp.lt.s32.totalorder %s532_s11, %s525_s8 }
  0x56   : > { %p529_p12 = pneg %p528_p8  ;;  %p535_p10 = por %p534_p7, %p533_p3 }
  0x58   : > { %p536_p13 = pnand %p535_p10, %p529_p12 }
  0x5a   : > { %539 = shalt.err (!%p536_p13)
}
  0x5b   : > { %407 = dma.hbm_to_vmem [thread:$0]  (!%p769_p11), %s765_s24, 256, %s767_s21, %s155_s28  }
  0x5c   : > { %p879_p5 = scmp.ne.s32.totalorder %s874_s20, 0 }
  0x5d   : > { %s801_s17 = sand.u32 (!%p879_p5), 1, %s602_s13   ;;  %p880_p0 = scmp.ne.s32.totalorder (!%p879_p5), %s872_s18, 0 }
  0x5e   : > { %175 = sbr.rel (%p879_p5) target bundleno = 435 (0x1b3), region = 32  ;;  %s374_s27 = sshll.u32 (!%p879_p5), %s801_s17, 4 }
  0x5f   : > { %s178_s29 = scalar_lea.sflag (!%p879_p5), [#allocation3], %s801_s17  ;;  %s181_s30 = scalar_lea.vmem (!%p879_p5), [#allocation2], %s374_s27 }
  0x65   : > { %585 = dma.done.wait (%p880_p0), %s178_s29, 256  }
  0x66   : > { %587 = vsyncadd (%p880_p0), %s178_s29, 4294967040  ;;  %p881_p11 = scmp.eq.s32.totalorder %s657_s16, 0 }
  0x68   : > { %589 = dma.done.wait (%p881_p11), [#allocation6], 64   ;;  %p882_p9 = pmov %p881_p11 }
  0x69   : > { %v212_v0 = vld [vmem:[%s181_s30] sm:$0xff]  ;;  %v213_v1 = vld [vmem:[%s181_s30 + $0x8] sm:$0xff]  ;;  %v234_v12 = vlaneseq  ;;  %s384_s18 = sshll.u32 %s657_s16, 8  ;;  %s211_s20 = scalar_lea.vmem [#allocation8], %s374_s27 }
  0x6a   : > { %591 = vsyncadd (%p882_p9), [#allocation6], 4294967232  ;;  %v216_v2 = vadd.f32 %v213_v1, %v212_v0  ;;  %v214_v17 = vld [vmem:[#allocation5] sm:$0x3]  ;;  %v215_v18 = vld [vmem:[#allocation7] sm:$0x3]  ;;  %s821_s28 = scalar_lea.hbm %s868_s3, %s384_s18 }
  0x6b   : > { %v235_v14 = vshrl.u32 %v234_v12, 7  ;;  %s276_s24 = sshll.u32 %s211_s20, 4  ;;  %s262_s16 = scalar_lea.sflag [#allocation4], %s801_s17  ;;  %s823_s24 = int_to_ptr.vmem [resolvable:$true] %s276_s24 }
  0x6c   : > { %217 = vadd.xlane.f32.xlu0 %v216_v2  ;;  %s540_s22 = scalar_lea.vmem %s823_s24, 256  ;;  %s615_s4 = smov [#allocation8]  }
  0x6d   : > { %v236_v15 = vsub.s32 0, %v235_v14  ;;  %v240_v16 = vsub.s32 1, %v235_v14  ;;  %p541_p2 = scmp.ne.s32.totalorder %s823_s24, %s540_s22  ;;  %s544_s5 = sshll.u32 %s615_s4, 4  ;;  %s545_s5 = int_to_ptr.vmem [resolvable:$false] %s544_s5 }
  0x6e   : > { %s546_s6 = scalar_lea.vmem %s545_s5, 512  ;;  %p547_p8 = scmp.lt.s32.totalorder %s823_s24, %s545_s5 }
  0x6f   : > { %v237_v19 = vrot.slane %v214_v17, %v236_v15  ;;  %v241_v20 = vrot.slane %v214_v17, %v240_v16  ;;  %v250_v24 = vrot.slane %v215_v18, %v236_v15  ;;  %v254_v25 = vrot.slane %v215_v18, %v240_v16  ;;  %p542_p1 = pnand %p541_p2, %p755_p6  ;;  %p548_p12 = scmp.lt.s32.totalorder %s546_s6, %s540_s22 }
  0x71   : > { %p543_p4 = pneg %p542_p1  ;;  %p549_p3 = por %p548_p12, %p547_p8 }
  0x73   : > { %p550_p7 = pnand %p549_p3, %p543_p4 }
  0xf9   : > { %v218_v3 = vpop.xlane.xlu0 %217 }
  0xfa   : > { %v220_v4 = vmul.f32 0.00390625, %v218_v3 }
  0xfc   : > { %v221_v5 = vsub.f32 %v212_v0, %v220_v4  ;;  %v222_v6 = vsub.f32 %v213_v1, %v220_v4 }
  0xfe   : > { %v223_v7 = vmul.f32 %v221_v5, %v221_v5  ;;  %v224_v8 = vmul.f32 %v222_v6, %v222_v6 }
 0x100   : > { %v225_v9 = vadd.f32 %v224_v8, %v223_v7 }
 0x102   : > { %226 = vadd.xlane.f32.xlu0 %v225_v9 }
 0x18f   : > { %v227_v10 = vpop.xlane.xlu0 %226 }
 0x190   : > { %v228_v11 = vmul.f32 0.00390625, %v227_v10 }
 0x192   : > { %v229_v13 = vadd.f32 1e-05, %v228_v11 }
 0x194   : > { %452 = vrsqrt.f32 %v229_v13 }
 0x19e   : > { %v453_v21 = vpop.eup %452 }
 0x19f   : > { %v231_v22 = vmul.f32 %v453_v21, %v221_v5  ;;  %v232_v23 = vmul.f32 %v453_v21, %v222_v6 }
 0x1a1   : > { %v244_v26 = vmul.f32 %v237_v19, %v231_v22  ;;  %v245_v27 = vmul.f32 %v241_v20, %v232_v23 }
 0x1a3   : > { %v257_v28 = vadd.f32 %v250_v24, %v244_v26  ;;  %v258_v29 = vadd.f32 %v254_v25, %v245_v27 }
 0x1a5   : > { %259 = vst [vmem:[%s211_s20] sm:$0xff] %v257_v28  ;;  %260 = vst [vmem:[%s211_s20 + $0x8] sm:$0xff] %v258_v29 }
 0x1a6   : > { %553 = shalt.err (!%p550_p7)
}
 0x1a7   : > { %s554_s8 = scalar_lea.hbm %s821_s28, 256  ;;  %s558_s11 = scalar_lea.hbm %s868_s3, 512 }
 0x1a8   : > { %p555_p10 = scmp.ne.s32.totalorder %s821_s28, %s554_s8  ;;  %p559_p0 = scmp.lt.u32.totalorder %s821_s28, %s868_s3 }
 0x1a9   : > { %p560_p11 = scmp.lt.u32.totalorder %s558_s11, %s554_s8  ;;  %p562_p2 = scmp.lt.u32.totalorder %s554_s8, %s821_s28 }
 0x1aa   : > { %p556_p13 = pnand %p555_p10, %p755_p6 }
 0x1ab   : > { %p561_p9 = por %p560_p11, %p559_p0 }
 0x1ac   : > { %p557_p5 = pneg %p556_p13 }
 0x1ad   : > { %p563_p1 = por %p562_p2, %p561_p9 }
 0x1af   : > { %p564_p4 = pnand %p563_p1, %p557_p5 }
 0x1b1   : > { %567 = shalt.err (!%p564_p4)
}
 0x1b2   : > { %395 = dma.vmem_to_hbm [thread:$0]  (%p755_p6), %s823_s24, 256, %s821_s28, %s262_s16  }
 0x1b3 PF: > { %s288_s29 = sand.u32 1, %s598_s12   ;;  %p883_p8 = scmp.ne.s32.totalorder %s873_s19, 0 }
 0x1b4   : > { %p884_p12 = scmp.ge.s32.totalorder %s610_s15, 2  ;;  %s289_s30 = scalar_lea.sflag [#allocation4], %s288_s29 }
 0x1b6   : > { %p409_p3 = pnand %p884_p12, %p883_p8 }
 0x1b8   : > { %593 = dma.done.wait (!%p409_p3), %s289_s30, 256  }
 0x1b9   : > { %595 = vsyncadd (!%p409_p3), %s289_s30, 4294967040  ;;  %p17_p7 = scmp.ge.s32.totalorder %s692_s26, 4   ;;  %s885_s12 = smov %s602_s13 }
 0x1ba   : > { %s886_s13 = smov %s606_s14  ;;  %s887_s14 = smov %s751_s25 }
 0x1bb   : > { %s888_s15 = smov %s692_s26  ;;  %19 = sbr.rel (!%p17_p7) target bundleno = 6 (0x6), region = 85 }
 0x1c2   :  { %294 = vsyncpa [#allocation3], 1 }
 0x1c3   :  { %296 = vsyncpa [#allocation3 + $0x1], 1 }
 0x1c4   :  { %297 = vsyncpa [#allocation6], 1 }
 0x1c5   :  { %298 = vsyncpa [#allocation4], 1 }
 0x1c6   :  { %300 = vsyncpa [#allocation4 + $0x1], 1 }

// kernel: encoder_forward.18
= control target key start
LH: loop header
LB: loop body
LE: loop exit
PB: predicated region body
PF: predicated region fallthrough
CT: control target
= control target key end

     0   :  { %11 = vsyncpa [#allocation3], 0  ;;  %s3326_s0 = inlined_call_operand.hbm [shape: f32[2,8,256], index: 0, kind: input, shape index: {}]   ;;  %s3327_s1 = inlined_call_operand.hbm [shape: f32[1,256], index: 1, kind: input, shape index: {}]   ;;  %s3328_s2 = inlined_call_operand.hbm [shape: f32[1,256], index: 2, kind: input, shape index: {}]   ;;  %s3329_s3 = inlined_call_operand.hbm [shape: bf16[256,768], index: 3, kind: input, shape index: {}]   ;;  %s3330_s4 = inlined_call_operand.hbm [shape: bf16[256,256], index: 4, kind: input, shape index: {}]   ;;  %s3331_s5 = inlined_call_operand.hbm [shape: f32[1,256], index: 5, kind: input, shape index: {}]   ;;  %s3332_s6 = inlined_call_operand.hbm [shape: f32[2,8,256], index: 6, kind: output, shape index: {}]  }
   0x1   :  { %13 = vsyncpa [#allocation3 + $0x1], 0 }
   0x2   :  { %14 = vsyncpa [#allocation6], 0 }
   0x3   :  { %15 = vsyncpa [#allocation9], 0 }
   0x4   :  { %16 = vsyncpa [#allocation12], 0 }
   0x5   :  { %17 = vsyncpa [#allocation4], 0 }
   0x6   :  { %19 = vsyncpa [#allocation4 + $0x1], 0  ;;  %s2903_s21 = smov 0   ;;  %s2905_s22 = smov 0  }
   0x7   :  { %s2907_s23 = smov 0   ;;  %s2909_s24 = smov 0  }
   0x8 LB: > { %s2853_s25 = smov [#allocation5]   ;;  %s2924_s27 = sadd.s32 4294967295, %s2851_s24   ;;  %s2851_s24 = sphi %s2909_s24, %s3357_s24   ;;  %s2847_s23 = sphi %s2907_s23, %s3356_s23   ;;  %s2843_s22 = sphi %s2905_s22, %s3355_s22   ;;  %s2839_s21 = sphi %s2903_s21, %s3354_s21  }
   0x9   : > { %s200_s26 = sshll.u32 %s2853_s25, 4  ;;  %p2057_p0 = scmp.ge.s32.totalorder %s2851_s24, 1  ;;  %s201_s26 = int_to_ptr.vmem [resolvable:$true] %s200_s26 }
   0xa   : > { %p3333_p1 = scmp.eq.s32.totalorder %s2924_s27, 0  ;;  %p187_p2 = scmp.lt.s32.totalorder %s2851_s24, 3 }
   0xb   : > { %s2854_s29 = smov [#allocation8]   ;;  %s2855_s8 = smov [#allocation7]  }
   0xc   : > { %p2929_p3 = pnand %p2057_p0, %p187_p2  ;;  %s221_s30 = sshll.u32 %s2854_s29, 4  ;;  %s2936_s30 = int_to_ptr.vmem [resolvable:$true] %s221_s30 }
   0xd   : > { %s211_s9 = sshll.u32 %s2855_s8, 4  ;;  %s2603_s12 = scalar_lea.hbm %s3327_s1, 32  ;;  %s2944_s9 = int_to_ptr.vmem [resolvable:$true] %s211_s9 }
   0xe   : > { %s3336_s28 = scalar_select %p2929_p3, 1, 0 }
   0xf   : > { %p2310_p5 = pneg %p2929_p3  ;;  %p2604_p7 = scmp.ne.s32.totalorder %s3327_s1, %s2603_s12 }
  0x10   : > { %p2610_p11 = scmp.lt.u32.totalorder %s2603_s12, %s3327_s1 }
  0x11   : > { %p2940_p6 = pnand %p2310_p5, %p3333_p1 }
  0x13   : > { %p2954_p8 = pneg %p2940_p6 }
  0x15   : > { %p2606_p9 = pnand %p2954_p8, %p2604_p7 }
  0x17   : > { %p2607_p10 = pneg %p2606_p9 }
  0x19   : > { %p2612_p12 = pnand %p2610_p11, %p2607_p10 }
  0x1b   : > { %2615 = shalt.err (!%p2612_p12)
}
  0x1c   : > { %s2616_s18 = scalar_lea.vmem %s201_s26, 32  ;;  %p2624_p5 = scmp.lt.s32.totalorder %s201_s26, %s201_s26 }
  0x1d   : > { %p2617_p13 = scmp.ne.s32.totalorder %s201_s26, %s2616_s18  ;;  %p2625_p4 = scmp.lt.s32.totalorder %s2616_s18, %s2616_s18 }
  0x1f   : > { %p2619_p0 = pnand %p2617_p13, %p2954_p8  ;;  %p2626_p1 = por %p2625_p4, %p2624_p5 }
  0x21   : > { %p2620_p2 = pneg %p2619_p0 }
  0x23   : > { %p2627_p3 = pnand %p2626_p1, %p2620_p2 }
  0x25   : > { %2630 = shalt.err (!%p2627_p3)
}
  0x26   : > { %2313 = dma.hbm_to_vmem [thread:$0]  (!%p2940_p6), %s3327_s1, 32, %s201_s26, [#allocation6]  }
  0x27   : > { %s2631_s8 = scalar_lea.hbm %s3329_s3, 12288 }
  0x28   : > { %p2632_p7 = scmp.ne.s32.totalorder %s3329_s3, %s2631_s8  ;;  %p2638_p1 = scmp.lt.u32.totalorder %s2631_s8, %s3329_s3 }
  0x2a   : > { %p2634_p9 = pnand %p2632_p7, %p2954_p8 }
  0x2c   : > { %p2635_p4 = pneg %p2634_p9 }
  0x2e   : > { %p2640_p3 = pnand %p2638_p1, %p2635_p4 }
  0x30   : > { %2643 = shalt.err (!%p2640_p3)
}
  0x31   : > { %s2644_s26 = scalar_lea.vmem %s2936_s30, 12288  ;;  %p2652_p13 = scmp.lt.s32.totalorder %s2936_s30, %s2936_s30 }
  0x32   : > { %p2645_p10 = scmp.ne.s32.totalorder %s2936_s30, %s2644_s26  ;;  %p2653_p0 = scmp.lt.s32.totalorder %s2644_s26, %s2644_s26 }
  0x34   : > { %p2647_p11 = pnand %p2645_p10, %p2954_p8  ;;  %p2654_p2 = por %p2653_p0, %p2652_p13 }
  0x36   : > { %p2648_p12 = pneg %p2647_p11 }
  0x38   : > { %p2655_p5 = pnand %p2654_p2, %p2648_p12 }
  0x3a   : > { %2658 = shalt.err (!%p2655_p5)
}
  0x3b   : > { %s2856_s14 = smov 384   ;;  %s2857_s16 = smov 24  }
  0x3c   : > { %2319 = dma.hbm_to_vmem [thread:$0]  (!%p2940_p6), %s3329_s3, 12288, %s2936_s30, [#allocation9], %s2856_s14, %s2856_s14, %s2857_s16  }
  0x3d   : > { %s2659_s25 = scalar_lea.hbm %s3328_s2, 32 }
  0x3e   : > { %p2660_p7 = scmp.ne.s32.totalorder %s3328_s2, %s2659_s25  ;;  %p2666_p1 = scmp.lt.u32.totalorder %s2659_s25, %s3328_s2 }
  0x40   : > { %p2662_p9 = pnand %p2660_p7, %p2954_p8 }
  0x42   : > { %p2663_p4 = pneg %p2662_p9 }
  0x44   : > { %p2668_p3 = pnand %p2666_p1, %p2663_p4 }
  0x46   : > { %2671 = shalt.err (!%p2668_p3)
}
  0x47   : > { %s2672_s30 = scalar_lea.vmem %s2944_s9, 32  ;;  %p2680_p13 = scmp.lt.s32.totalorder %s2944_s9, %s2944_s9 }
  0x48   : > { %p2673_p10 = scmp.ne.s32.totalorder %s2944_s9, %s2672_s30  ;;  %p2681_p0 = scmp.lt.s32.totalorder %s2672_s30, %s2672_s30 }
  0x4a   : > { %p2675_p11 = pnand %p2673_p10, %p2954_p8  ;;  %p2682_p2 = por %p2681_p0, %p2680_p13 }
  0x4c   : > { %p2676_p12 = pneg %p2675_p11 }
  0x4e   : > { %p2683_p5 = pnand %p2682_p2, %p2676_p12 }
  0x50   : > { %2686 = shalt.err (!%p2683_p5)
}
  0x51   : > { %2316 = dma.hbm_to_vmem [thread:$0]  (!%p2940_p6), %s3328_s2, 32, %s2944_s9, [#allocation6]  }
  0x52   : > { %s2858_s26 = smov [#allocation10]   ;;  %s2687_s18 = scalar_lea.hbm %s3330_s4, 4096 }
  0x53   : > { %s234_s14 = sshll.u32 %s2858_s26, 4  ;;  %p2688_p7 = scmp.ne.s32.totalorder %s3330_s4, %s2687_s18  ;;  %s235_s14 = int_to_ptr.vmem [resolvable:$true] %s234_s14 }
  0x54   : > { %p2694_p1 = scmp.lt.u32.totalorder %s2687_s18, %s3330_s4 }
  0x55   : > { %p2690_p9 = pnand %p2688_p7, %p2954_p8 }
  0x57   : > { %p2691_p4 = pneg %p2690_p9 }
  0x59   : > { %p2696_p3 = pnand %p2694_p1, %p2691_p4 }
  0x5b   : > { %2699 = shalt.err (!%p2696_p3)
}
  0x5c   : > { %s2700_s9 = scalar_lea.vmem %s235_s14, 4096  ;;  %p2708_p13 = scmp.lt.s32.totalorder %s235_s14, %s235_s14 }
  0x5d   : > { %p2701_p10 = scmp.ne.s32.totalorder %s235_s14, %s2700_s9  ;;  %p2709_p0 = scmp.lt.s32.totalorder %s2700_s9, %s2700_s9 }
  0x5f   : > { %p2703_p11 = pnand %p2701_p10, %p2954_p8  ;;  %p2710_p2 = por %p2709_p0, %p2708_p13 }
  0x61   : > { %p2704_p12 = pneg %p2703_p11 }
  0x63   : > { %p2711_p5 = pnand %p2710_p2, %p2704_p12 }
  0x65   : > { %2714 = shalt.err (!%p2711_p5)
}
  0x66   : > { %s2859_s8 = smov 128   ;;  %s2860_s10 = smov 8  }
  0x67   : > { %2322 = dma.hbm_to_vmem [thread:$0]  (!%p2940_p6), %s3330_s4, 4096, %s235_s14, [#allocation9], %s2859_s8, %s2859_s8, %s2860_s10  }
  0x68   : > { %s2861_s12 = smov [#allocation11]   ;;  %s2715_s17 = scalar_lea.hbm %s3331_s5, 32 }
  0x69   : > { %s248_s13 = sshll.u32 %s2861_s12, 4  ;;  %p2716_p7 = scmp.ne.s32.totalorder %s3331_s5, %s2715_s17  ;;  %s249_s13 = int_to_ptr.vmem [resolvable:$true] %s248_s13 }
  0x6a   : > { %p2722_p1 = scmp.lt.u32.totalorder %s2715_s17, %s3331_s5 }
  0x6b   : > { %p2718_p9 = pnand %p2716_p7, %p2954_p8 }
  0x6d   : > { %p2719_p4 = pneg %p2718_p9 }
  0x6f   : > { %p2724_p3 = pnand %p2722_p1, %p2719_p4 }
  0x71   : > { %2727 = shalt.err (!%p2724_p3)
}
  0x72   : > { %s2728_s14 = scalar_lea.vmem %s249_s13, 32  ;;  %p2736_p13 = scmp.lt.s32.totalorder %s249_s13, %s249_s13 }
  0x73   : > { %p2729_p10 = scmp.ne.s32.totalorder %s249_s13, %s2728_s14  ;;  %p2737_p0 = scmp.lt.s32.totalorder %s2728_s14, %s2728_s14 }
  0x75   : > { %p2731_p11 = pnand %p2729_p10, %p2954_p8  ;;  %p2738_p2 = por %p2737_p0, %p2736_p13 }
  0x77   : > { %p2732_p12 = pneg %p2731_p11 }
  0x79   : > { %p2739_p5 = pnand %p2738_p2, %p2732_p12 }
  0x7b   : > { %2742 = shalt.err (!%p2739_p5)
}
  0x7c   : > { %2325 = dma.hbm_to_vmem [thread:$0]  (!%p2940_p6), %s3331_s5, 32, %s249_s13, [#allocation12]  }
  0x7d   : > { %s2056_s15 = sadd.s32 4294967294, %s2851_s24   ;;  %s3054_s7 = sadd.s32 1, %s2851_s24  }
  0x7e   : > { %s32_s8 = sadd.s32 1, %s2847_s23  ;;  %s29_s10 = ssub.s32 %s2851_s24, %s3054_s7 }
  0x7f   : > { %p39_p8 = scmp.ne.s32.totalorder %s2847_s23, %s2843_s22  ;;  %p30_p7 = scmp.eq.s32.totalorder %s29_s10, 0 }
  0x80   : > { %p40_p9 = scmp.eq.s32.totalorder %s2851_s24, 0  ;;  %p45_p4 = scmp.ne.s32.totalorder %s2843_s22, %s2839_s21 }
  0x81   : > { %p174_p1 = scmp.eq.s32.totalorder %s2924_s27, 1  ;;  %p3339_p10 = scmp.eq.s32.totalorder %s2924_s27, 0 }
  0x82   : > { %s3066_s11 = scalar_select %p30_p7, %s2847_s23, %s32_s8  }
  0x83   : > { %p41_p3 = por %p40_p9, %p39_p8  ;;  %p3070_p11 = por %p3339_p10, %p45_p4 }
  0x84   : > { %p3074_p6 = por %p174_p1, %p39_p8  ;;  %p180_p12 = scmp.eq.s32.totalorder %s2056_s15, 1 }
  0x85   : > { %p2339_p13 = scmp.lt.s32.totalorder %s2851_s24, 2  ;;  %s259_s13 = sand.u32 1, %s2847_s23  }
  0x86   : > { %s3341_s12 = scalar_select %p3074_p6, 1, 0 }
  0x87   : > { %p3080_p0 = por %p180_p12, %p45_p4  ;;  %s2064_s16 = sshll.u32 %s259_s13, 4 }
  0x88   : > { %s2220_s17 = sshll.u32 %s2851_s24, 8  ;;  %s263_s25 = scalar_lea.vmem [#allocation2], %s2064_s16 }
  0x89   : > { %s3342_s26 = scalar_select %p3080_p0, 1, 0 }
  0x8a   : > { %s3088_s20 = scalar_lea.hbm %s3326_s0, %s2220_s17  ;;  %s271_s14 = sshll.u32 %s263_s25, 4  ;;  %s3094_s14 = int_to_ptr.vmem [resolvable:$true] %s271_s14 }
  0x8b   : > { %p3090_p2 = pnand %p2339_p13, %p41_p3  ;;  %s260_s9 = scalar_lea.sflag [#allocation3], %s259_s13 }
  0x8c   : > { %s2743_s15 = scalar_lea.hbm %s3088_s20, 256  ;;  %s2748_s16 = scalar_lea.hbm %s3326_s0, 512 }
  0x8d   : > { %p2744_p5 = scmp.ne.s32.totalorder %s3088_s20, %s2743_s15  ;;  %p2745_p8 = pneg %p3090_p2 }
  0x8e   : > { %p2749_p4 = scmp.lt.u32.totalorder %s3088_s20, %s3326_s0  ;;  %p2750_p1 = scmp.lt.u32.totalorder %s2748_s16, %s2743_s15 }
  0x8f   : > { %p2746_p7 = pnand %p2745_p8, %p2744_p5  ;;  %p2752_p10 = scmp.lt.u32.totalorder %s2743_s15, %s3088_s20 }
  0x90   : > { %p2751_p3 = por %p2750_p1, %p2749_p4 }
  0x91   : > { %p2747_p9 = pneg %p2746_p7 }
  0x92   : > { %p2753_p12 = por %p2752_p10, %p2751_p3 }
  0x94   : > { %p2754_p13 = pnand %p2753_p12, %p2747_p9 }
  0x96   : > { %2757 = shalt.err (!%p2754_p13)
}
  0x97   : > { %s2758_s13 = scalar_lea.vmem %s3094_s14, 256  ;;  %s2862_s19 = smov [#allocation2]  }
  0x98   : > { %p2759_p5 = scmp.ne.s32.totalorder %s3094_s14, %s2758_s13  ;;  %s2763_s25 = sshll.u32 %s2862_s19, 4  ;;  %s2764_s25 = int_to_ptr.vmem [resolvable:$false] %s2763_s25 }
  0x99   : > { %s2765_s8 = scalar_lea.vmem %s2764_s25, 512  ;;  %p2766_p6 = scmp.lt.s32.totalorder %s3094_s14, %s2764_s25 }
  0x9a   : > { %p2761_p7 = pnand %p2759_p5, %p2745_p8  ;;  %p2767_p4 = scmp.lt.s32.totalorder %s2765_s8, %s2758_s13 }
  0x9c   : > { %p2762_p0 = pneg %p2761_p7  ;;  %p2768_p1 = por %p2767_p4, %p2766_p6 }
  0x9e   : > { %p2769_p3 = pnand %p2768_p1, %p2762_p0 }
  0xa0   : > { %2772 = shalt.err (!%p2769_p3)
}
  0xa1   : > { %2329 = dma.hbm_to_vmem [thread:$0]  (!%p3090_p2), %s3088_s20, 256, %s3094_s14, %s260_s9  }
  0xa2   : > { %p3344_p9 = scmp.ne.s32.totalorder %s3336_s28, 0 }
  0xa3   : > { %s3124_s15 = sand.u32 (!%p3344_p9), 1, %s2843_s22  }
  0xa4   : > { %280 = sbr.rel (%p3344_p9) target bundleno = 3541 (0xdd5), region = 44  ;;  %s2068_s10 = sshll.u32 (!%p3344_p9), %s3124_s15, 4 }
  0xa5   : > { %s283_s16 = scalar_lea.sflag (!%p3344_p9), [#allocation3], %s3124_s15  ;;  %s3130_s17 = scalar_lea.vmem (!%p3344_p9), [#allocation2], %s2068_s10 }
  0xab   : > { %2818 = dma.done.wait (%p3070_p11), %s283_s16, 256  }
  0xac   : > { %2820 = vsyncadd (%p3070_p11), %s283_s16, 4294967040  ;;  %p3345_p6 = scmp.eq.s32.totalorder %s2924_s27, 0 }
  0xae   : > { %2822 = dma.done.wait (%p3345_p6), [#allocation6], 64   ;;  %p3346_p0 = pmov %p3345_p6 }
  0xb0   : > { %2824 = vsyncadd (%p3346_p0), [#allocation6], 4294967232  ;;  %p3347_p2 = pmov %p3346_p0 }
  0xb1   : > { %p3348_p8 = pmov %p3346_p0 }
  0xb2   : > { %2826 = dma.done.wait (%p3347_p2), [#allocation9], 16384  }
  0xb3   : > { %2828 = vsyncadd (%p3348_p8), [#allocation9], 4294950912  ;;  %p3349_p10 = pmov %p3346_p0 }
  0xb4   : > { %p3350_p12 = pmov %p3346_p0 }
  0xb5   : > { %2830 = dma.done.wait (%p3349_p10), [#allocation12], 32  }
  0xb6   : > { %2832 = vsyncadd (%p3350_p12), [#allocation12], 4294967264  ;;  %v3149_v0 = vld [vmem:[%s3130_s17] sm:$0xff]  ;;  %v3152_v1 = vld [vmem:[%s3130_s17 + $0x8] sm:$0xff]  ;;  %vm2864_vm0 = vmmov 0   ;;  %vm1121_vm1 = vcmask 523264  }
  0xb7   : > { %v340_v2 = vadd.f32 %v3152_v1, %v3149_v0  ;;  %v2391_v3 = vld [vmem:[#allocation8 + $0x4] ss:$24 sps:$4 sm:$0xff]   ;;  %v2393_v4 = vld [vmem:[#allocation8] ss:$24 sps:$4 sm:$0xff]   ;;  %v2397_v7 = vld [vmem:[#allocation8 + $0x34] ss:$24 sps:$4 sm:$0xff]  }
  0xb8   : > { %v2394_v5 = vld [vmem:[#allocation8 + $0xc] ss:$24 sps:$4 sm:$0xff]   ;;  %v2396_v6 = vld [vmem:[#allocation8 + $0x8] ss:$24 sps:$4 sm:$0xff]   ;;  %961 = vmatprep.subr.bf16.mxu0 %v2391_v3  ;;  %v2400_v8 = vld [vmem:[#allocation8 + $0x3c] ss:$24 sps:$4 sm:$0xff]  }
  0xb9   : > { %341 = vadd.xlane.f32.xlu0 %v340_v2  ;;  %1002 = vmatprep.subr.bf16.mxu1 %v2394_v5  ;;  %v2399_v9 = vld [vmem:[#allocation8 + $0x30] ss:$24 sps:$4 sm:$0xff]   ;;  %v2403_v11 = vld [vmem:[#allocation8 + $0x64] ss:$24 sps:$4 sm:$0xff]   ;;  %v2405_v13 = vld [vmem:[#allocation8 + $0x60] ss:$24 sps:$4 sm:$0xff]  }
  0xba   : > { %962 = vmatpush1.bf16.msra.mxu0 %v2393_v4  ;;  %1003 = vmatpush1.bf16.msra.mxu1 %v2396_v6  ;;  %v2402_v10 = vld [vmem:[#allocation8 + $0x38] ss:$24 sps:$4 sm:$0xff]   ;;  %v2406_v12 = vld [vmem:[#allocation8 + $0x6c] ss:$24 sps:$4 sm:$0xff]   ;;  %v2408_v14 = vld [vmem:[#allocation8 + $0x68] ss:$24 sps:$4 sm:$0xff]  }
  0xbb   : > { %963 = vmatprep.subr.bf16.mxu0 %v2397_v7  ;;  %1004 = vmatprep.subr.bf16.mxu1 %v2400_v8  ;;  %v2409_v15 = vld [vmem:[#allocation8 + $0x94] ss:$24 sps:$4 sm:$0xff]   ;;  %v2411_v17 = vld [vmem:[#allocation8 + $0x90] ss:$24 sps:$4 sm:$0xff]   ;;  %v2415_v19 = vld [vmem:[#allocation8 + $0xc4] ss:$24 sps:$4 sm:$0xff]  }
  0xbc   : > { %v2412_v16 = vld [vmem:[#allocation8 + $0x9c] ss:$24 sps:$4 sm:$0xff]   ;;  %v2414_v18 = vld [vmem:[#allocation8 + $0x98] ss:$24 sps:$4 sm:$0xff]   ;;  %v2418_v20 = vld [vmem:[#allocation8 + $0xcc] ss:$24 sps:$4 sm:$0xff]  }
  0xbd   : > { %v2417_v21 = vld [vmem:[#allocation8 + $0xc0] ss:$24 sps:$4 sm:$0xff]   ;;  %v2421_v23 = vld [vmem:[#allocation8 + $0xf4] ss:$24 sps:$4 sm:$0xff]   ;;  %v2423_v25 = vld [vmem:[#allocation8 + $0xf0] ss:$24 sps:$4 sm:$0xff]  }
  0xbe   : > { %964 = vmatpush1.bf16.msra.mxu0 %v2399_v9  ;;  %1005 = vmatpush1.bf16.msra.mxu1 %v2402_v10  ;;  %v2420_v22 = vld [vmem:[#allocation8 + $0xc8] ss:$24 sps:$4 sm:$0xff]   ;;  %v2424_v24 = vld [vmem:[#allocation8 + $0xfc] ss:$24 sps:$4 sm:$0xff]   ;;  %v2426_v26 = vld [vmem:[#allocation8 + $0xf8] ss:$24 sps:$4 sm:$0xff]  }
  0xbf   : > { %965 = vmatprep.subr.bf16.mxu0 %v2403_v11  ;;  %1006 = vmatprep.subr.bf16.mxu1 %v2406_v12  ;;  %v2427_v27 = vld [vmem:[#allocation8 + $0x124] ss:$24 sps:$4 sm:$0xff]   ;;  %v2429_v29 = vld [vmem:[#allocation8 + $0x120] ss:$24 sps:$4 sm:$0xff]   ;;  %v2433_v31 = vld [vmem:[#allocation8 + $0x154] ss:$24 sps:$4 sm:$0xff]  }
  0xc0   : > { %v2430_v28 = vld [vmem:[#allocation8 + $0x12c] ss:$24 sps:$4 sm:$0xff]   ;;  %v2432_v30 = vld [vmem:[#allocation8 + $0x128] ss:$24 sps:$4 sm:$0xff]   ;;  %v2436_v32 = vld [vmem:[#allocation8 + $0x15c] ss:$24 sps:$4 sm:$0xff]  }
  0xc1   : > { %v2435_v33 = vld [vmem:[#allocation8 + $0x150] ss:$24 sps:$4 sm:$0xff]   ;;  %v2439_v35 = vld [vmem:[#allocation8 + $0x184] ss:$24 sps:$4 sm:$0xff]   ;;  %v2441_v37 = vld [vmem:[#allocation8 + $0x180] ss:$24 sps:$4 sm:$0xff]  }
  0xc2   : > { %966 = vmatpush1.bf16.msra.mxu0 %v2405_v13  ;;  %1007 = vmatpush1.bf16.msra.mxu1 %v2408_v14  ;;  %v2438_v34 = vld [vmem:[#allocation8 + $0x158] ss:$24 sps:$4 sm:$0xff]   ;;  %v2442_v36 = vld [vmem:[#allocation8 + $0x18c] ss:$24 sps:$4 sm:$0xff]   ;;  %v2444_v38 = vld [vmem:[#allocation8 + $0x188] ss:$24 sps:$4 sm:$0xff]   ;;  %v358_v13 = vlaneseq }
  0xc3   : > { %967 = vmatprep.subr.bf16.mxu0 %v2409_v15  ;;  %1008 = vmatprep.subr.bf16.mxu1 %v2412_v16  ;;  %v2445_v39 = vld [vmem:[#allocation8 + $0x1b4] ss:$24 sps:$4 sm:$0xff]   ;;  %v2447_v41 = vld [vmem:[#allocation8 + $0x1b0] ss:$24 sps:$4 sm:$0xff]   ;;  %v2451_v43 = vld [vmem:[#allocation8 + $0x1e4] ss:$24 sps:$4 sm:$0xff]  }
  0xc4   : > { %v2448_v40 = vld [vmem:[#allocation8 + $0x1bc] ss:$24 sps:$4 sm:$0xff]   ;;  %v2450_v42 = vld [vmem:[#allocation8 + $0x1b8] ss:$24 sps:$4 sm:$0xff]   ;;  %v2454_v52 = vld [vmem:[#allocation8 + $0x1ec] ss:$24 sps:$4 sm:$0xff]  }
  0xc5   : > { %v2453_v51 = vld [vmem:[#allocation8 + $0x1e0] ss:$24 sps:$4 sm:$0xff]   ;;  %v2457_v54 = vld [vmem:[#allocation8 + $0x214] ss:$24 sps:$4 sm:$0xff]   ;;  %v2459_v55 = vld [vmem:[#allocation8 + $0x210] ss:$24 sps:$4 sm:$0xff]  }
  0xc6   : > { %968 = vmatpush1.bf16.msra.mxu0 %v2411_v17  ;;  %1009 = vmatpush1.bf16.msra.mxu1 %v2414_v18  ;;  %v2456_v53 = vld [vmem:[#allocation8 + $0x1e8] ss:$24 sps:$4 sm:$0xff]   ;;  %v2460_v56 = vld [vmem:[#allocation8 + $0x21c] ss:$24 sps:$4 sm:$0xff]   ;;  %v2462_v57 = vld [vmem:[#allocation8 + $0x218] ss:$24 sps:$4 sm:$0xff]  }
  0xc7   : > { %969 = vmatprep.subr.bf16.mxu0 %v2415_v19  ;;  %1010 = vmatprep.subr.bf16.mxu1 %v2418_v20  ;;  %v2463_v58 = vld [vmem:[#allocation8 + $0x244] ss:$24 sps:$4 sm:$0xff]   ;;  %v2465_v59 = vld [vmem:[#allocation8 + $0x240] ss:$24 sps:$4 sm:$0xff]   ;;  %v2469_v62 = vld [vmem:[#allocation8 + $0x274] ss:$24 sps:$4 sm:$0xff]  }
  0xc8   : > { %v2466_v60 = vld [vmem:[#allocation8 + $0x24c] ss:$24 sps:$4 sm:$0xff]   ;;  %v2468_v61 = vld [vmem:[#allocation8 + $0x248] ss:$24 sps:$4 sm:$0xff]   ;;  %v2472_v63 = vld [vmem:[#allocation8 + $0x27c] ss:$24 sps:$4 sm:$0xff]  }
  0xc9   : > { %v2475_v2 = vld [vmem:[#allocation8 + $0x2a4] ss:$24 sps:$4 sm:$0xff]   ;;  %v2477_v4 = vld [vmem:[#allocation8 + $0x2a0] ss:$24 sps:$4 sm:$0xff]   ;;  %v2481_v6 = vld [vmem:[#allocation8 + $0x2d4] ss:$24 sps:$4 sm:$0xff]  }
  0xca   : > { %970 = vmatpush1.bf16.msra.mxu0 %v2417_v21  ;;  %1011 = vmatpush1.bf16.msra.mxu1 %v2420_v22  ;;  %v2478_v3 = vld [vmem:[#allocation8 + $0x2ac] ss:$24 sps:$4 sm:$0xff]   ;;  %v2480_v5 = vld [vmem:[#allocation8 + $0x2a8] ss:$24 sps:$4 sm:$0xff]   ;;  %v2484_v7 = vld [vmem:[#allocation8 + $0x2dc] ss:$24 sps:$4 sm:$0xff]  }
  0xcb   : > { %971 = vmatprep.subr.bf16.mxu0 %v2421_v23  ;;  %1012 = vmatprep.subr.bf16.mxu1 %v2424_v24  ;;  %v2483_v8 = vld [vmem:[#allocation8 + $0x2d0] ss:$24 sps:$4 sm:$0xff]   ;;  %v2489_v10 = vld [vmem:[#allocation8 + $0x14] ss:$24 sps:$4 sm:$0xff]   ;;  %v359_v15 = vshrl.u32 %v358_v13, 7  ;;  %s2865_s28 = smov 64  }
  0xcc   : > { %v2486_v9 = vld [vmem:[#allocation8 + $0x2d8] ss:$24 sps:$4 sm:$0xff]   ;;  %v338_v18 = vld [vmem:[#allocation5] sm:$0x3]  ;;  %v339_v19 = vld [vmem:[#allocation7] sm:$0x3] }
  0xcd   : > { %v3166_v16 = vsub.s32 1, %v359_v15  ;;  %v3168_v17 = vsub.s32 0, %v359_v15  ;;  %vm1184_vm2 = vcmask 1043456   ;;  %vm1168_vm3 = vcmask 64512   ;;  %s2221_s30 = sshll.u32 %s2924_s27, 8  ;;  %s334_s20 = scalar_lea.vmem [#allocation13], %s2068_s10 }
  0xce   : > { %972 = vmatpush1.bf16.msra.mxu0 %v2423_v25  ;;  %1013 = vmatpush1.bf16.msra.mxu1 %v2426_v26  ;;  %s1938_s14 = sshll.u32 %s334_s20, 4  ;;  %s3282_s18 = scalar_lea.hbm %s3332_s6, %s2221_s30  ;;  %s3284_s14 = int_to_ptr.vmem [resolvable:$true] %s1938_s14 }
  0xcf   : > { %973 = vmatprep.subr.bf16.mxu0 %v2427_v27  ;;  %1014 = vmatprep.subr.bf16.mxu1 %v2430_v28  ;;  %v365_v20 = vrot.slane %v338_v18, %v3166_v16  ;;  %v361_v21 = vrot.slane %v338_v18, %v3168_v17  ;;  %v378_v24 = vrot.slane %v339_v19, %v3166_v16  ;;  %s1924_s27 = scalar_lea.sflag [#allocation4], %s3124_s15  ;;  %s2773_s13 = scalar_lea.vmem %s3284_s14, 256 }
  0xd0   : > { %v374_v26 = vrot.slane %v339_v19, %v3168_v17  ;;  %p2774_p11 = scmp.ne.s32.totalorder %s3284_s14, %s2773_s13  ;;  %p3351_p13 = scmp.ne.s32.totalorder %s3341_s12, 0 }
  0xd1   : > { %s2867_s19 = smov [#allocation13]  }
  0xd2   : > { %974 = vmatpush1.bf16.msra.mxu0 %v2429_v29  ;;  %1015 = vmatpush1.bf16.msra.mxu1 %v2432_v30  ;;  %p2775_p5 = pnand %p2774_p11, %p3351_p13  ;;  %s2777_s25 = sshll.u32 %s2867_s19, 4  ;;  %s2778_s25 = int_to_ptr.vmem [resolvable:$false] %s2777_s25 }
  0xd3   : > { %975 = vmatprep.subr.bf16.mxu0 %v2433_v31  ;;  %1016 = vmatprep.subr.bf16.mxu1 %v2436_v32  ;;  %v2487_v32 = vld [vmem:[#allocation8 + $0x10] ss:$24 sps:$4 sm:$0xff]   ;;  %s2779_s8 = scalar_lea.vmem %s2778_s25, 512  ;;  %p2780_p4 = scmp.lt.s32.totalorder %s3284_s14, %s2778_s25 }
  0xd4   : > { %p2776_p7 = pneg %p2775_p5  ;;  %p2781_p1 = scmp.lt.s32.totalorder %s2779_s8, %s2773_s13 }
  0xd6   : > { %976 = vmatpush1.bf16.msra.mxu0 %v2435_v33  ;;  %1017 = vmatpush1.bf16.msra.mxu1 %v2438_v34  ;;  %v2492_v34 = vld [vmem:[#allocation8 + $0x44] ss:$24 sps:$4 sm:$0xff]   ;;  %p2782_p3 = por %p2781_p1, %p2780_p4 }
  0xd7   : > { %977 = vmatprep.subr.bf16.mxu0 %v2439_v35  ;;  %1018 = vmatprep.subr.bf16.mxu1 %v2442_v36  ;;  %v2490_v35 = vld [vmem:[#allocation8 + $0x40] ss:$24 sps:$4 sm:$0xff]   ;;  %v2495_v36 = vld [vmem:[#allocation8 + $0x74] ss:$24 sps:$4 sm:$0xff]  }
  0xd8   : > { %p2783_p9 = pnand %p2782_p3, %p2776_p7 }
  0xda   : > { %978 = vmatpush1.bf16.msra.mxu0 %v2441_v37  ;;  %1019 = vmatpush1.bf16.msra.mxu1 %v2444_v38  ;;  %v2493_v37 = vld [vmem:[#allocation8 + $0x70] ss:$24 sps:$4 sm:$0xff]   ;;  %v2498_v38 = vld [vmem:[#allocation8 + $0xa4] ss:$24 sps:$4 sm:$0xff]  }
  0xdb   : > { %979 = vmatprep.subr.bf16.mxu0 %v2445_v39  ;;  %1020 = vmatprep.subr.bf16.mxu1 %v2448_v40  ;;  %v2496_v39 = vld [vmem:[#allocation8 + $0xa0] ss:$24 sps:$4 sm:$0xff]   ;;  %v2501_v40 = vld [vmem:[#allocation8 + $0xd4] ss:$24 sps:$4 sm:$0xff]  }
  0xde   : > { %980 = vmatpush1.bf16.msra.mxu0 %v2447_v41  ;;  %1021 = vmatpush1.bf16.msra.mxu1 %v2450_v42  ;;  %v2499_v41 = vld [vmem:[#allocation8 + $0xd0] ss:$24 sps:$4 sm:$0xff]   ;;  %v2504_v42 = vld [vmem:[#allocation8 + $0x104] ss:$24 sps:$4 sm:$0xff]  }
  0xdf   : > { %981 = vmatprep.subr.bf16.mxu0 %v2451_v43  ;;  %1022 = vmatprep.subr.bf16.mxu1 %v2454_v52  ;;  %v2502_v43 = vld [vmem:[#allocation8 + $0x100] ss:$24 sps:$4 sm:$0xff]   ;;  %v2519_v52 = vld [vmem:[#allocation8 + $0x1f4] ss:$24 sps:$4 sm:$0xff]  }
  0xe2   : > { %982 = vmatpush1.bf16.msra.mxu0 %v2453_v51  ;;  %1023 = vmatpush1.bf16.msra.mxu1 %v2456_v53  ;;  %v2514_v51 = vld [vmem:[#allocation8 + $0x1c0] ss:$24 sps:$4 sm:$0xff]   ;;  %v2517_v53 = vld [vmem:[#allocation8 + $0x1f0] ss:$24 sps:$4 sm:$0xff]  }
  0xe3   : > { %983 = vmatprep.subr.bf16.mxu0 %v2457_v54  ;;  %1024 = vmatprep.subr.bf16.mxu1 %v2460_v56  ;;  %v2522_v54 = vld [vmem:[#allocation8 + $0x224] ss:$24 sps:$4 sm:$0xff]   ;;  %v2525_v56 = vld [vmem:[#allocation8 + $0x254] ss:$24 sps:$4 sm:$0xff]  }
  0xe6   : > { %984 = vmatpush1.bf16.msra.mxu0 %v2459_v55  ;;  %1025 = vmatpush1.bf16.msra.mxu1 %v2462_v57  ;;  %v2520_v55 = vld [vmem:[#allocation8 + $0x220] ss:$24 sps:$4 sm:$0xff]   ;;  %v2523_v57 = vld [vmem:[#allocation8 + $0x250] ss:$24 sps:$4 sm:$0xff]  }
  0xe7   : > { %985 = vmatprep.subr.bf16.mxu0 %v2463_v58  ;;  %1026 = vmatprep.subr.bf16.mxu1 %v2466_v60  ;;  %v2528_v58 = vld [vmem:[#allocation8 + $0x284] ss:$24 sps:$4 sm:$0xff]   ;;  %v2531_v60 = vld [vmem:[#allocation8 + $0x2b4] ss:$24 sps:$4 sm:$0xff]  }
  0xea   : > { %986 = vmatpush1.bf16.msra.mxu0 %v2465_v59  ;;  %1027 = vmatpush1.bf16.msra.mxu1 %v2468_v61  ;;  %v2526_v59 = vld [vmem:[#allocation8 + $0x280] ss:$24 sps:$4 sm:$0xff]   ;;  %v2529_v61 = vld [vmem:[#allocation8 + $0x2b0] ss:$24 sps:$4 sm:$0xff]  }
  0xeb   : > { %987 = vmatprep.subr.bf16.mxu0 %v2469_v62  ;;  %1028 = vmatprep.subr.bf16.mxu1 %v2472_v63  ;;  %v2534_v62 = vld [vmem:[#allocation8 + $0x2e4] ss:$24 sps:$4 sm:$0xff]   ;;  %v2532_v63 = vld [vmem:[#allocation8 + $0x2e0] ss:$24 sps:$4 sm:$0xff]  }
 0x146   : > { %v342_v44 = vpop.xlane.xlu0 %341 }
 0x147   : > { %v344_v45 = vmul.f32 0.00390625, %v342_v44  ;;  %v2507_v44 = vld [vmem:[#allocation8 + $0x134] ss:$24 sps:$4 sm:$0xff]  }
 0x149   : > { %v3157_v46 = vsub.f32 %v3149_v0, %v344_v45  ;;  %v3160_v47 = vsub.f32 %v3152_v1, %v344_v45  ;;  %v2471_v0 = vld [vmem:[#allocation8 + $0x270] ss:$24 sps:$4 sm:$0xff]  }
 0x14a   : > { %v2474_v1 = vld [vmem:[#allocation8 + $0x278] ss:$24 sps:$4 sm:$0xff]   ;;  %988 = vmatpush1.bf16.msra.mxu0 %v2471_v0  ;;  %v2863_v0 = vmov 0.0  }
 0x14b   : > { %v347_v48 = vmul.f32 %v3157_v46, %v3157_v46  ;;  %v348_v49 = vmul.f32 %v3160_v47, %v3160_v47  ;;  %1029 = vmatpush1.bf16.msra.mxu1 %v2474_v1  ;;  %989 = vmatprep.subr.bf16.mxu0 %v2475_v2  ;;  %v2505_v45 = vld [vmem:[#allocation8 + $0x130] ss:$24 sps:$4 sm:$0xff]  }
 0x14c   : > { %1030 = vmatprep.subr.bf16.mxu1 %v2478_v3 }
 0x14d   : > { %v349_v50 = vadd.f32 %v348_v49, %v347_v48  ;;  %v2513_v48 = vld [vmem:[#allocation8 + $0x194] ss:$24 sps:$4 sm:$0xff]   ;;  %v2511_v49 = vld [vmem:[#allocation8 + $0x190] ss:$24 sps:$4 sm:$0xff]  }
 0x14e   : > { %990 = vmatpush1.bf16.msra.mxu0 %v2477_v4 }
 0x14f   : > { %350 = vadd.xlane.f32.xlu0 %v349_v50  ;;  %1031 = vmatpush1.bf16.msra.mxu1 %v2480_v5  ;;  %v2516_v50 = vld [vmem:[#allocation8 + $0x1c4] ss:$24 sps:$4 sm:$0xff]  }
 0x150   : > { %991 = vmatprep.subr.bf16.mxu0 %v2481_v6  ;;  %1032 = vmatprep.subr.bf16.mxu1 %v2484_v7 }
 0x152   : > { %992 = vmatpush1.bf16.msra.mxu0 %v2483_v8 }
 0x153   : > { %1033 = vmatpush1.bf16.msra.mxu1 %v2486_v9  ;;  %1043 = vmatprep.subr.bf16.mxu0 %v2489_v10 }
 0x154   : > { %2238 = vmatprep.subr.bf16.mxu1 %v2863_v0 }
 0x1dc   : > { %v351_v11 = vpop.xlane.xlu0 %350 }
 0x1dd   : > { %v352_v12 = vmul.f32 0.00390625, %v351_v11 }
 0x1df   : > { %v353_v14 = vadd.f32 1e-05, %v352_v12 }
 0x1e1   : > { %2583 = vrsqrt.f32 %v353_v14 }
 0x1eb   : > { %v2584_v22 = vpop.eup %2583 }
 0x1ec   : > { %v356_v23 = vmul.f32 %v2584_v22, %v3160_v47  ;;  %v355_v25 = vmul.f32 %v2584_v22, %v3157_v46  ;;  %v2510_v46 = vld [vmem:[#allocation8 + $0x164] ss:$24 sps:$4 sm:$0xff]   ;;  %v2508_v47 = vld [vmem:[#allocation8 + $0x160] ss:$24 sps:$4 sm:$0xff]  }
 0x1ee   : > { %v369_v27 = vmul.f32 %v365_v20, %v356_v23  ;;  %v368_v28 = vmul.f32 %v361_v21, %v355_v25 }
 0x1f0   : > { %v382_v29 = vadd.f32 %v378_v24, %v369_v27  ;;  %v381_v30 = vadd.f32 %v374_v26, %v368_v28 }
 0x1f2   : > { %v384_v31 = vpack.c.bf16 %v382_v29, %v382_v29  ;;  %v3176_v33 = vpack.c.bf16 %v381_v30, %v381_v30 }
 0x1f4   : > { %993 = vmatprep.mubr.bf16.mxu0 %v384_v31  ;;  %1034 = vmatprep.mubr.bf16.mxu1 %v384_v31 }
 0x1f5   : > { %994 = vmatmul.mubr.bf16.vlgmr.msra.gmra.mrb[0].mxu0 %v3176_v33  ;;  %1035 = vmatmul.mubr.bf16.vlgmr.msra.gmra.mrb[0].mxu1 %v3176_v33 }
 0x1f6   : > { %1044 = vmatpush1.bf16.msra.mxu0 %v2487_v32  ;;  %1075 = vmatprep.mubr.bf16.mxu0 %v384_v31 }
 0x1f7   : > { %1045 = vmatprep.subr.bf16.mxu0 %v2492_v34  ;;  %2240 = vmatprep.mubr.msk.bf16.mxu1 %vm2864_vm0, %v2863_v0 }
 0x1fa   : > { %1046 = vmatpush1.bf16.msra.mxu0 %v2490_v35 }
 0x1fb   : > { %1047 = vmatprep.subr.bf16.mxu0 %v2495_v36 }
 0x1fe   : > { %1048 = vmatpush1.bf16.msra.mxu0 %v2493_v37 }
 0x1ff   : > { %1049 = vmatprep.subr.bf16.mxu0 %v2498_v38 }
 0x202   : > { %1050 = vmatpush1.bf16.msra.mxu0 %v2496_v39 }
 0x203   : > { %1051 = vmatprep.subr.bf16.mxu0 %v2501_v40 }
 0x206   : > { %1052 = vmatpush1.bf16.msra.mxu0 %v2499_v41 }
 0x207   : > { %1053 = vmatprep.subr.bf16.mxu0 %v2504_v42 }
 0x20a   : > { %1054 = vmatpush1.bf16.msra.mxu0 %v2502_v43 }
 0x20b   : > { %1055 = vmatprep.subr.bf16.mxu0 %v2507_v44 }
 0x20e   : > { %1056 = vmatpush1.bf16.msra.mxu0 %v2505_v45 }
 0x20f   : > { %1057 = vmatprep.subr.bf16.mxu0 %v2510_v46 }
 0x212   : > { %1058 = vmatpush1.bf16.msra.mxu0 %v2508_v47 }
 0x213   : > { %1059 = vmatprep.subr.bf16.mxu0 %v2513_v48 }
 0x216   : > { %1060 = vmatpush1.bf16.msra.mxu0 %v2511_v49 }
 0x217   : > { %1061 = vmatprep.subr.bf16.mxu0 %v2516_v50 }
 0x21a   : > { %1062 = vmatpush1.bf16.msra.mxu0 %v2514_v51 }
 0x21b   : > { %1063 = vmatprep.subr.bf16.mxu0 %v2519_v52 }
 0x21e   : > { %1064 = vmatpush1.bf16.msra.mxu0 %v2517_v53 }
 0x21f   : > { %1065 = vmatprep.subr.bf16.mxu0 %v2522_v54 }
 0x222   : > { %1066 = vmatpush1.bf16.msra.mxu0 %v2520_v55  ;;  %v2537_v55 = vld [vmem:[#allocation10 + $0x44] ss:$8 sps:$4 sm:$0xff]  }
 0x223   : > { %1067 = vmatprep.subr.bf16.mxu0 %v2525_v56 }
 0x226   : > { %1068 = vmatpush1.bf16.msra.mxu0 %v2523_v57 }
 0x227   : > { %1069 = vmatprep.subr.bf16.mxu0 %v2528_v58 }
 0x22a   : > { %1070 = vmatpush1.bf16.msra.mxu0 %v2526_v59 }
 0x22b   : > { %1071 = vmatprep.subr.bf16.mxu0 %v2531_v60  ;;  %v2535_v60 = vld [vmem:[#allocation10 + $0x40] ss:$8 sps:$4 sm:$0xff]  }
 0x22e   : > { %1072 = vmatpush1.bf16.msra.mxu0 %v2529_v61 }
 0x22f   : > { %1073 = vmatprep.subr.bf16.mxu0 %v2534_v62  ;;  %v2540_v62 = vld [vmem:[#allocation10 + $0x54] ss:$8 sps:$4 sm:$0xff]  }
 0x232   : > { %1074 = vmatpush1.bf16.msra.mxu0 %v2532_v63  ;;  %v2538_v63 = vld [vmem:[#allocation10 + $0x50] ss:$8 sps:$4 sm:$0xff]  }
 0x235   : > { %1076 = vmatmul.mubr.bf16.vlgmr.msra.gmra.mrb[4].mxu0 %v3176_v33 }
 0x2c8   : > { %v995_v1 = vpop.f32.mrb[0].mxu0  ;;  %v1036_v2 = vpop.f32.mrb[0].mxu1 }
 0x2c9   : > { %v1119_v3 = vpack.c.bf16 %v1036_v2, %v1036_v2  ;;  %v3184_v4 = vpop.f32.mrb[1].mxu0  ;;  %v3186_v5 = vpop.f32.mrb[1].mxu1  ;;  %v1117_v11 = vmul.f32 0.125, %v995_v1  ;;  %v2543_v1 = vld [vmem:[#allocation10 + $0x64] ss:$8 sps:$4 sm:$0xff]  }
 0x2ca   : > { %v999_v6 = vpop.f32.mrb[2].mxu0  ;;  %v1040_v7 = vpop.f32.mrb[2].mxu1  ;;  %v1511_v52 = vmul.f32 0.125, %v3184_v4  ;;  %v2541_v2 = vld [vmem:[#allocation10 + $0x60] ss:$8 sps:$4 sm:$0xff]  }
 0x2cb   : > { %v1126_v8 = vsel %vm1121_vm1, %v1119_v3, 0  ;;  %1233 = vrot.lane.b32.xlu0 %v1119_v3, %s2865_s28  ;;  %v1000_v9 = vpop.f32.mrb[3].mxu0  ;;  %v1041_v10 = vpop.f32.mrb[3].mxu1  ;;  %v1118_v12 = vpack.c.bf16 %v1117_v11, %v1117_v11  ;;  %v2546_v3 = vld [vmem:[#allocation10 + $0x74] ss:$8 sps:$4 sm:$0xff]   ;;  %v2866_v7 = vmov 0  }
 0x2cc   : > { %2239 = vmatpush3.bf16.xpose.msra.mxu1 %v1126_v8  ;;  %v3215_v53 = vpack.c.bf16 %v1511_v52, %v1511_v52  ;;  %v2544_v4 = vld [vmem:[#allocation10 + $0x70] ss:$8 sps:$4 sm:$0xff]   ;;  %v2549_v6 = vld [vmem:[#allocation10 + $0x4] ss:$8 sps:$4 sm:$0xff]   ;;  %1695 = vmatprep.mubr.bf16.mxu0 %v2866_v7  ;;  %v2547_v9 = vld [vmem:[#allocation10] ss:$8 sps:$4 sm:$0xff]  }
 0x2cd   : > { %2244 = vmatprep.subr.bf16.mxu1 %v2863_v0  ;;  %v2570_v52 = vld [vmem:[#allocation10 + $0xb4] ss:$8 sps:$4 sm:$0xff]  }
 0x2d3   : > { %2241 = vmatmul.mubr.msk.bf16.vlgmr.msra.gmra.mrb[4].mxu1 %vm1121_vm1, %v1118_v12 }
 0x2d4   : > { %2246 = vmatprep.mubr.msk.bf16.mxu1 %vm2864_vm0, %v2863_v0 }
 0x308   : > { %v1077_v13 = vpop.f32.mrb[4].mxu0 }
 0x309   : > { %v1120_v14 = vpack.c.bf16 %v1077_v13, %v1077_v13  ;;  %v3194_v15 = vpop.f32.mrb[5].mxu0 }
 0x30a   : > { %v1081_v18 = vpop.f32.mrb[6].mxu0 }
 0x30b   : > { %v1186_v19 = vsel %vm1184_vm2, %v1120_v14, 0  ;;  %v1082_v20 = vpop.f32.mrb[7].mxu0  ;;  %v2550_v18 = vld [vmem:[#allocation10 + $0x10] ss:$8 sps:$4 sm:$0xff]  }
 0x30c   : > { %2245 = vmatpush3.bf16.msra.mxu1 %v1186_v19  ;;  %v2555_v19 = vld [vmem:[#allocation10 + $0x24] ss:$8 sps:$4 sm:$0xff]   ;;  %v2553_v20 = vld [vmem:[#allocation10 + $0x20] ss:$8 sps:$4 sm:$0xff]  }
 0x30d   : > { %2250 = vmatprep.subr.bf16.mxu1 %v2863_v0 }
 0x33d   : > { %v1234_v34 = vpop.permute.xlu0 %1233 }
 0x33e   : > { %v1239_v36 = vsel %vm1121_vm1, %v1234_v34, 0 }
 0x3a6   : > { %v1162_v21 = vpop.f32.mrb[4].mxu1 }
 0x3a7   : > { %v2242_v22 = vpop.f32.mrb[5].mxu1  ;;  %v1169_v23 = vsel %vm1168_vm3, %v1162_v21, -inf }
 0x3a8   : > { %1170 = vmax.xlane.f32.xlu1 %v1169_v23  ;;  %v1165_v24 = vpop.f32.mrb[6].mxu1  ;;  %v2556_v22 = vld [vmem:[#allocation10 + $0x30] ss:$8 sps:$4 sm:$0xff]  }
 0x3a9   : > { %v2243_v25 = vpop.f32.mrb[7].mxu1  ;;  %v1513_v24 = vpack.c.bf16 %v3186_v5, %v3186_v5 }
 0x3ab   : > { %v1519_v25 = vsel %vm1121_vm1, %v1513_v24, 0 }
 0x435   : > { %v1171_v26 = vpop.xlane.xlu1 %1170 }
 0x436   : > { %v1172_v27 = vsub.f32 %v1162_v21, %v1171_v26  ;;  %v2558_v21 = vld [vmem:[#allocation10 + $0x34] ss:$8 sps:$4 sm:$0xff]   ;;  %v3237_v26 = vpack.c.bf16 %v3194_v15, %v3194_v15 }
 0x438   : > { %v1173_v28 = vmul.f32 1.442695, %v1172_v27  ;;  %v1577_v27 = vsel %vm1184_vm2, %v3237_v26, 0 }
 0x43a   : > { %2585 = vpow2.f32 %v1173_v28 }
 0x444   : > { %v2586_v29 = vpop.eup %2585 }
 0x445   : > { %v1175_v30 = vsel %vm1168_vm3, %v2586_v29, 0.0 }
 0x446   : > { %1176 = vadd.xlane.f32.xlu1 %v1175_v30 }
 0x457   : > { %1230 = vrot.lane.b32.xlu1 %v1118_v12, %s2865_s28  ;;  %v2552_v12 = vld [vmem:[#allocation10 + $0x14] ss:$8 sps:$4 sm:$0xff]  }
 0x4d3   : > { %v1177_v31 = vpop.xlane.xlu1 %1176 }
 0x4d4   : > { %2587 = vrcp.f32 %v1177_v31 }
 0x4d7   : > { %v1231_v37 = vpop.permute.xlu1 %1230 }
 0x4de   : > { %v2588_v32 = vpop.eup %2587 }
 0x4df   : > { %v1179_v33 = vmul.f32 %v2588_v32, %v2586_v29 }
 0x4e1   : > { %v1180_v35 = vpack.c.bf16 %v1179_v33, %v1179_v33 }
 0x4e3   : > { %2247 = vmatmul.mubr.msk.bf16.vlgmr.msra.gmra.mrb[8].mxu1 %vm1168_vm3, %v1180_v35 }
 0x4e4   : > { %2251 = vmatpush3.bf16.xpose.msra.mxu1 %v1239_v36  ;;  %2252 = vmatprep.mubr.msk.bf16.mxu1 %vm2864_vm0, %v2863_v0 }
 0x4e5   : > { %2256 = vmatprep.subr.bf16.mxu1 %v2863_v0 }
 0x4eb   : > { %2253 = vmatmul.mubr.msk.bf16.vlgmr.msra.gmra.mrb[12].mxu1 %vm1121_vm1, %v1231_v37 }
 0x4ec   : > { %2258 = vmatprep.mubr.msk.bf16.mxu1 %vm2864_vm0, %v2863_v0 }
 0x5b6   : > { %v3209_v38 = vpop.f32.mrb[8].mxu1 }
 0x5b7   : > { %v2248_v39 = vpop.f32.mrb[9].mxu1  ;;  %v1228_v23 = vpack.c.bf16 %v3209_v38, %v3209_v38 }
 0x5b8   : > { %v1225_v40 = vpop.f32.mrb[10].mxu1 }
 0x5b9   : > { %v2249_v41 = vpop.f32.mrb[11].mxu1 }
 0x5be   : > { %v1275_v42 = vpop.f32.mrb[12].mxu1 }
 0x5bf   : > { %v2254_v43 = vpop.f32.mrb[13].mxu1  ;;  %v1281_v44 = vsel %vm1168_vm3, %v1275_v42, -inf }
 0x5c0   : > { %1282 = vmax.xlane.f32.xlu1 %v1281_v44  ;;  %v1278_v45 = vpop.f32.mrb[14].mxu1 }
 0x5c1   : > { %v2255_v46 = vpop.f32.mrb[15].mxu1 }
 0x5c2   : > { %v2559_v46 = vld [vmem:[#allocation10 + $0x80] ss:$8 sps:$4 sm:$0xff]  }
 0x64d   : > { %v1283_v47 = vpop.xlane.xlu1 %1282 }
 0x64e   : > { %v1284_v48 = vsub.f32 %v1275_v42, %v1283_v47  ;;  %v2561_v47 = vld [vmem:[#allocation10 + $0x84] ss:$8 sps:$4 sm:$0xff]  }
 0x64f   : > { %1663 = vmatprep.subr.bf16.mxu0 %v2561_v47 }
 0x650   : > { %v1285_v49 = vmul.f32 1.442695, %v1284_v48  ;;  %v2564_v48 = vld [vmem:[#allocation10 + $0x94] ss:$8 sps:$4 sm:$0xff]   ;;  %1664 = vmatpush1.bf16.msra.mxu0 %v2559_v46 }
 0x651   : > { %1665 = vmatprep.subr.bf16.mxu0 %v2564_v48 }
 0x652   : > { %2589 = vpow2.f32 %v1285_v49  ;;  %v2562_v49 = vld [vmem:[#allocation10 + $0x90] ss:$8 sps:$4 sm:$0xff]  }
 0x654   : > { %1666 = vmatpush1.bf16.msra.mxu0 %v2562_v49 }
 0x65c   : > { %v2590_v50 = vpop.eup %2589 }
 0x65d   : > { %v1287_v51 = vsel %vm1168_vm3, %v2590_v50, 0.0 }
 0x65e   : > { %1288 = vadd.xlane.f32.xlu0 %v1287_v51  ;;  %v2565_v51 = vld [vmem:[#allocation10 + $0xa0] ss:$8 sps:$4 sm:$0xff]  }
 0x674   : > { %1294 = vrot.lane.b32.xlu0 %v1120_v14, %s2865_s28 }
 0x678   : > { %1707 = vrot.lane.b32.xlu0 %v3215_v53, %s2865_s28 }
 0x6eb   : > { %v1289_v54 = vpop.xlane.xlu0 %1288 }
 0x6ec   : > { %2591 = vrcp.f32 %v1289_v54 }
 0x6ef   : > { %v1295_v56 = vpop.permute.xlu0 %1294 }
 0x6f0   : > { %v1300_v57 = vsel %vm1184_vm2, %v1295_v56, 0 }
 0x6f1   : > { %2257 = vmatpush3.bf16.msra.mxu1 %v1300_v57 }
 0x6f2   : > { %1386 = vmatprep.subr.bf16.mxu1 %v2537_v55 }
 0x6f6   : > { %v2592_v58 = vpop.eup %2591 }
 0x6f7   : > { %v1291_v59 = vmul.f32 %v2592_v58, %v2590_v50  ;;  %v2567_v50 = vld [vmem:[#allocation10 + $0xa4] ss:$8 sps:$4 sm:$0xff]  }
 0x6f8   : > { %1667 = vmatprep.subr.bf16.mxu0 %v2567_v50  ;;  %v2601_v50 = vld [vmem:[%s3130_s17] sm:$0xff] }
 0x6f9   : > { %v1292_v61 = vpack.c.bf16 %v1291_v59, %v1291_v59  ;;  %1668 = vmatpush1.bf16.msra.mxu0 %v2565_v51 }
 0x6fa   : > { %1669 = vmatprep.subr.bf16.mxu0 %v2570_v52  ;;  %v2602_v52 = vld [vmem:[%s3130_s17 + $0x8] sm:$0xff] }
 0x6fb   : > { %2259 = vmatmul.mubr.msk.bf16.vlgmr.msra.gmra.mrb[16].mxu1 %vm1168_vm3, %v1292_v61 }
 0x6fc   : > { %1387 = vmatpush1.bf16.msra.mxu1 %v2535_v60  ;;  %1418 = vmatprep.mubr.bf16.mxu1 %v2866_v7  ;;  %v1708_v60 = vpop.permute.xlu0 %1707 }
 0x6fd   : > { %1388 = vmatprep.subr.bf16.mxu1 %v2540_v62 }
 0x700   : > { %1389 = vmatpush1.bf16.msra.mxu1 %v2538_v63 }
 0x701   : > { %1390 = vmatprep.subr.bf16.mxu1 %v2543_v1 }
 0x704   : > { %1391 = vmatpush1.bf16.msra.mxu1 %v2541_v2 }
 0x705   : > { %1392 = vmatprep.subr.bf16.mxu1 %v2546_v3 }
 0x708   : > { %1393 = vmatpush1.bf16.msra.mxu1 %v2544_v4 }
 0x709   : > { %1470 = vmatprep.subr.bf16.mxu1 %v2549_v6 }
 0x7ce   : > { %v1336_v8 = vpop.f32.mrb[16].mxu1 }
 0x7cf   : > { %v1342_v10 = vpack.c.bf16 %v1336_v8, %v1336_v8  ;;  %v2260_v11 = vpop.f32.mrb[17].mxu1 }
 0x7d0   : > { %v1339_v13 = vpop.f32.mrb[18].mxu1 }
 0x7d1   : > { %v2261_v14 = vpop.f32.mrb[19].mxu1  ;;  %2183 = vmatmul.mubr.msk.bf16.vlgmr.msra.gmra.mrb[20].mxu1 %vm1121_vm1, %v1342_v10 }
 0x7d2   : > { %1471 = vmatpush1.bf16.msra.mxu1 %v2547_v9  ;;  %1502 = vmatprep.mubr.bf16.mxu1 %v2866_v7  ;;  %v2571_v14 = vld [vmem:[#allocation10 + $0xc0] ss:$8 sps:$4 sm:$0xff]  }
 0x7d3   : > { %1472 = vmatprep.subr.bf16.mxu1 %v2552_v12 }
 0x7d6   : > { %1473 = vmatpush1.bf16.msra.mxu1 %v2550_v18  ;;  %v2576_v18 = vld [vmem:[#allocation10 + $0xd4] ss:$8 sps:$4 sm:$0xff]  }
 0x7d7   : > { %1474 = vmatprep.subr.bf16.mxu1 %v2555_v19  ;;  %v2574_v19 = vld [vmem:[#allocation10 + $0xd0] ss:$8 sps:$4 sm:$0xff]  }
 0x7da   : > { %1475 = vmatpush1.bf16.msra.mxu1 %v2553_v20  ;;  %v2579_v20 = vld [vmem:[#allocation10 + $0xe4] ss:$8 sps:$4 sm:$0xff]  }
 0x7db   : > { %1476 = vmatprep.subr.bf16.mxu1 %v2558_v21  ;;  %v2577_v21 = vld [vmem:[#allocation10 + $0xe0] ss:$8 sps:$4 sm:$0xff]  }
 0x7de   : > { %1477 = vmatpush1.bf16.msra.mxu1 %v2556_v22  ;;  %v2582_v22 = vld [vmem:[#allocation10 + $0xf4] ss:$8 sps:$4 sm:$0xff]  }
 0x7df   : > { %2262 = vmatprep.subr.bf16.mxu1 %v2863_v0 }
 0x7e1   : > { %2192 = vmatmul.mubr.msk.bf16.vlgmr.msra.gmra.mrb[24].mxu1 %vm1121_vm1, %v1228_v23  ;;  %v2580_v23 = vld [vmem:[#allocation10 + $0xf0] ss:$8 sps:$4 sm:$0xff]  }
 0x7e2   : > { %2264 = vmatprep.mubr.msk.bf16.mxu1 %vm2864_vm0, %v2863_v0 }
 0x7e7   : > { %2263 = vmatpush3.bf16.xpose.msra.mxu1 %v1519_v25 }
 0x7e8   : > { %2268 = vmatprep.subr.bf16.mxu1 %v2863_v0 }
 0x7ee   : > { %2265 = vmatmul.mubr.msk.bf16.vlgmr.msra.gmra.mrb[28].mxu1 %vm1121_vm1, %v3215_v53  ;;  %v2568_v53 = vld [vmem:[#allocation10 + $0xb0] ss:$8 sps:$4 sm:$0xff]  }
 0x7ef   : > { %2269 = vmatpush3.bf16.msra.mxu1 %v1577_v27  ;;  %2270 = vmatprep.mubr.msk.bf16.mxu1 %vm2864_vm0, %v2863_v0 }
 0x7f0   : > { %2274 = vmatprep.subr.bf16.mxu1 %v2863_v0  ;;  %1670 = vmatpush1.bf16.msra.mxu0 %v2568_v53 }
 0x8a4   : > { %v1420_v5 = vpop.f32.mrb[20].mxu1 }
 0x8a5   : > { %v1422_v28 = vpop.f32.mrb[21].mxu1 }
 0x8a6   : > { %v1424_v29 = vpop.f32.mrb[22].mxu1 }
 0x8a7   : > { %v1425_v30 = vpop.f32.mrb[23].mxu1 }
 0x8b4   : > { %v1504_v31 = vpop.f32.mrb[24].mxu1 }
 0x8b5   : > { %v3246_v32 = vadd.f32 %v1504_v31, %v1420_v5  ;;  %v1506_v15 = vpop.f32.mrb[25].mxu1 }
 0x8b6   : > { %v3248_v33 = vadd.f32 %v1506_v15, %v1422_v28  ;;  %v1508_v34 = vpop.f32.mrb[26].mxu1 }
 0x8b7   : > { %v1509_v35 = vpop.f32.mrb[27].mxu1 }
 0x8c1   : > { %v1555_v36 = vpop.f32.mrb[28].mxu1 }
 0x8c2   : > { %v2266_v37 = vpop.f32.mrb[29].mxu1  ;;  %v1561_v38 = vsel %vm1168_vm3, %v1555_v36, -inf }
 0x8c3   : > { %1562 = vmax.xlane.f32.xlu1 %v1561_v38  ;;  %v1558_v39 = vpop.f32.mrb[30].mxu1 }
 0x8c4   : > { %v2267_v40 = vpop.f32.mrb[31].mxu1  ;;  %v1116_v39 = vld [vmem:[#allocation11] sm:$0x3] }
 0x8c5   : > { %v1910_v40 = vrot.slane %v1116_v39, %v3168_v17 }
 0x950   : > { %v1563_v41 = vpop.xlane.xlu1 %1562 }
 0x951   : > { %v1564_v42 = vsub.f32 %v1555_v36, %v1563_v41 }
 0x953   : > { %v1565_v43 = vmul.f32 1.442695, %v1564_v42  ;;  %v1914_v42 = vrot.slane %v1116_v39, %v3166_v16 }
 0x955   : > { %2593 = vpow2.f32 %v1565_v43 }
 0x95f   : > { %v2594_v44 = vpop.eup %2593 }
 0x960   : > { %v1567_v45 = vsel %vm1168_vm3, %v2594_v44, 0.0 }
 0x961   : > { %1568 = vadd.xlane.f32.xlu1 %v1567_v45 }
 0x972   : > { %1710 = vrot.lane.b32.xlu1 %v1513_v24, %s2865_s28 }
 0x9ee   : > { %v1569_v54 = vpop.xlane.xlu1 %1568 }
 0x9ef   : > { %2595 = vrcp.f32 %v1569_v54 }
 0x9f2   : > { %v1711_v57 = vpop.permute.xlu1 %1710 }
 0x9f3   : > { %v1716_v59 = vsel %vm1121_vm1, %v1711_v57, 0 }
 0x9f9   : > { %v2596_v55 = vpop.eup %2595 }
 0x9fa   : > { %v1571_v56 = vmul.f32 %v2596_v55, %v2594_v44 }
 0x9fc   : > { %v1572_v58 = vpack.c.bf16 %v1571_v56, %v1571_v56 }
 0x9fe   : > { %2271 = vmatmul.mubr.msk.bf16.vlgmr.msra.gmra.mrb[32].mxu1 %vm1168_vm3, %v1572_v58 }
 0x9ff   : > { %2275 = vmatpush3.bf16.xpose.msra.mxu1 %v1716_v59  ;;  %2276 = vmatprep.mubr.msk.bf16.mxu1 %vm2864_vm0, %v2863_v0 }
 0xa00   : > { %2280 = vmatprep.subr.bf16.mxu1 %v2863_v0 }
 0xa06   : > { %2277 = vmatmul.mubr.msk.bf16.vlgmr.msra.gmra.mrb[36].mxu1 %vm1121_vm1, %v1708_v60 }
 0xa07   : > { %2282 = vmatprep.mubr.msk.bf16.mxu1 %vm2864_vm0, %v2863_v0 }
 0xad1   : > { %v1613_v61 = vpop.f32.mrb[32].mxu1 }
 0xad2   : > { %v1619_v62 = vpack.c.bf16 %v1613_v61, %v1613_v61  ;;  %v2272_v63 = vpop.f32.mrb[33].mxu1 }
 0xad3   : > { %v1616_v1 = vpop.f32.mrb[34].mxu1 }
 0xad4   : > { %v2273_v2 = vpop.f32.mrb[35].mxu1  ;;  %2203 = vmatmul.mubr.msk.bf16.vlgmr.msra.gmra.mrb[8].mxu0 %vm1121_vm1, %v1619_v62 }
 0xad5   : > { %1895 = vmatprep.mubr.bf16.mxu0 %v2866_v7  ;;  %v2573_v7 = vld [vmem:[#allocation10 + $0xc4] ss:$8 sps:$4 sm:$0xff]  }
 0xad6   : > { %1863 = vmatprep.subr.bf16.mxu0 %v2573_v7 }
 0xad7   : > { %1864 = vmatpush1.bf16.msra.mxu0 %v2571_v14 }
 0xad8   : > { %1865 = vmatprep.subr.bf16.mxu0 %v2576_v18 }
 0xad9   : > { %v1752_v3 = vpop.f32.mrb[36].mxu1 }
 0xada   : > { %v2278_v4 = vpop.f32.mrb[37].mxu1  ;;  %v1758_v6 = vsel %vm1168_vm3, %v1752_v3, -inf }
 0xadb   : > { %1759 = vmax.xlane.f32.xlu1 %v1758_v6  ;;  %v1755_v8 = vpop.f32.mrb[38].mxu1  ;;  %1866 = vmatpush1.bf16.msra.mxu0 %v2574_v19 }
 0xadc   : > { %v2279_v9 = vpop.f32.mrb[39].mxu1  ;;  %1867 = vmatprep.subr.bf16.mxu0 %v2579_v20 }
 0xadf   : > { %1868 = vmatpush1.bf16.msra.mxu0 %v2577_v21 }
 0xae0   : > { %1869 = vmatprep.subr.bf16.mxu0 %v2582_v22 }
 0xae3   : > { %1870 = vmatpush1.bf16.msra.mxu0 %v2580_v23 }
 0xb68   : > { %v1760_v10 = vpop.xlane.xlu1 %1759 }
 0xb69   : > { %v1761_v11 = vsub.f32 %v1752_v3, %v1760_v10 }
 0xb6b   : > { %v1762_v12 = vmul.f32 1.442695, %v1761_v11 }
 0xb6d   : > { %2597 = vpow2.f32 %v1762_v12 }
 0xb77   : > { %v2598_v0 = vpop.eup %2597 }
 0xb78   : > { %v1764_v13 = vsel %vm1168_vm3, %v2598_v0, 0.0 }
 0xb79   : > { %1765 = vadd.xlane.f32.xlu0 %v1764_v13 }
 0xb8f   : > { %1771 = vrot.lane.b32.xlu0 %v3237_v26, %s2865_s28 }
 0xba7   : > { %v1697_v24 = vpop.f32.mrb[8].mxu0 }
 0xba8   : > { %v1704_v25 = vadd.f32 %v1697_v24, %v3246_v32  ;;  %v1699_v26 = vpop.f32.mrb[9].mxu0 }
 0xba9   : > { %v1705_v27 = vadd.f32 %v1699_v26, %v3248_v33  ;;  %v1701_v5 = vpop.f32.mrb[10].mxu0 }
 0xbaa   : > { %v1702_v28 = vpop.f32.mrb[11].mxu0 }
 0xc06   : > { %v1766_v29 = vpop.xlane.xlu0 %1765 }
 0xc07   : > { %2599 = vrcp.f32 %v1766_v29 }
 0xc0a   : > { %v1772_v30 = vpop.permute.xlu0 %1771 }
 0xc0b   : > { %v1777_v31 = vsel %vm1184_vm2, %v1772_v30, 0 }
 0xc0c   : > { %2281 = vmatpush3.bf16.msra.mxu1 %v1777_v31 }
 0xc11   : > { %v2600_v15 = vpop.eup %2599 }
 0xc12   : > { %v1768_v34 = vmul.f32 %v2600_v15, %v2598_v0 }
 0xc14   : > { %v1769_v35 = vpack.c.bf16 %v1768_v34, %v1768_v34 }
 0xc16   : > { %2283 = vmatmul.mubr.msk.bf16.vlgmr.msra.gmra.mrb[40].mxu1 %vm1168_vm3, %v1769_v35 }
 0xce9   : > { %v1813_v36 = vpop.f32.mrb[40].mxu1 }
 0xcea   : > { %v1819_v37 = vpack.c.bf16 %v1813_v36, %v1813_v36  ;;  %v2284_v32 = vpop.f32.mrb[41].mxu1 }
 0xceb   : > { %v1816_v38 = vpop.f32.mrb[42].mxu1 }
 0xcec   : > { %v2285_v33 = vpop.f32.mrb[43].mxu1  ;;  %2214 = vmatmul.mubr.msk.bf16.vlgmr.msra.gmra.mrb[12].mxu0 %vm1121_vm1, %v1819_v37 }
 0xdbf   : > { %v1897_v41 = vpop.f32.mrb[12].mxu0 }
 0xdc0   : > { %v1904_v43 = vadd.f32 %v1897_v41, %v1704_v25  ;;  %v1899_v44 = vpop.f32.mrb[13].mxu0 }
 0xdc1   : > { %v1905_v45 = vadd.f32 %v1899_v44, %v1705_v27  ;;  %v1901_v46 = vpop.f32.mrb[14].mxu0 }
 0xdc2   : > { %v1917_v47 = vadd.f32 %v1910_v40, %v1904_v43  ;;  %v1902_v48 = vpop.f32.mrb[15].mxu0 }
 0xdc3   : > { %v1918_v49 = vadd.f32 %v1914_v42, %v1905_v45 }
 0xdc4   : > { %v1919_v51 = vadd.f32 %v2601_v50, %v1917_v47 }
 0xdc5   : > { %v1920_v17 = vadd.f32 %v2602_v52, %v1918_v49 }
 0xdc6   : > { %1921 = vst [vmem:[%s334_s20] sm:$0xff] %v1919_v51 }
 0xdc7   : > { %1922 = vst [vmem:[%s334_s20 + $0x8] sm:$0xff] %v1920_v17 }
 0xdc8   : > { %2786 = shalt.err (!%p2783_p9)
}
 0xdc9   : > { %s2787_s15 = scalar_lea.hbm %s3282_s18, 256  ;;  %s2791_s17 = scalar_lea.hbm %s3332_s6, 512 }
 0xdca   : > { %p2788_p6 = scmp.ne.s32.totalorder %s3282_s18, %s2787_s15  ;;  %p2792_p8 = scmp.lt.u32.totalorder %s3282_s18, %s3332_s6 }
 0xdcb   : > { %p2793_p10 = scmp.lt.u32.totalorder %s2791_s17, %s2787_s15  ;;  %p2795_p11 = scmp.lt.u32.totalorder %s2787_s15, %s3282_s18 }
 0xdcc   : > { %p2789_p0 = pnand %p2788_p6, %p3351_p13 }
 0xdcd   : > { %p2794_p12 = por %p2793_p10, %p2792_p8 }
 0xdce   : > { %p2790_p2 = pneg %p2789_p0 }
 0xdcf   : > { %p2796_p5 = por %p2795_p11, %p2794_p12 }
 0xdd1   : > { %p2797_p7 = pnand %p2796_p5, %p2790_p2 }
 0xdd3   : > { %2800 = shalt.err (!%p2797_p7)
}
 0xdd4   : > { %2308 = dma.vmem_to_hbm [thread:$0]  (%p3351_p13), %s3284_s14, 256, %s3282_s18, %s1924_s27  }
 0xdd5 PF: > { %s1950_s20 = sand.u32 1, %s2839_s21   ;;  %p3352_p4 = scmp.ne.s32.totalorder %s3342_s26, 0 }
 0xdd6   : > { %p3353_p1 = scmp.ge.s32.totalorder %s2851_s24, 2  ;;  %s1951_s29 = scalar_lea.sflag [#allocation4], %s1950_s20 }
 0xdd8   : > { %p2331_p3 = pnand %p3353_p1, %p3352_p4 }
 0xdda   : > { %2834 = dma.done.wait (!%p2331_p3), %s1951_s29, 256  }
 0xddb   : > { %2836 = vsyncadd (!%p2331_p3), %s1951_s29, 4294967040  ;;  %p22_p9 = scmp.ge.s32.totalorder %s3054_s7, 4   ;;  %s3354_s21 = smov %s2843_s22 }
 0xddc   : > { %s3355_s22 = smov %s2847_s23  ;;  %s3356_s23 = smov %s3066_s11 }
 0xddd   : > { %s3357_s24 = smov %s3054_s7  ;;  %24 = sbr.rel (!%p22_p9) target bundleno = 8 (0x8), region = 109 }
 0xde4   :  { %1956 = vsyncpa [#allocation3], 1 }
 0xde5   :  { %1958 = vsyncpa [#allocation3 + $0x1], 1 }
 0xde6   :  { %1959 = vsyncpa [#allocation6], 1 }
 0xde7   :  { %1960 = vsyncpa [#allocation9], 1 }
 0xde8   :  { %1961 = vsyncpa [#allocation12], 1 }
 0xde9   :  { %1962 = vsyncpa [#allocation4], 1 }
 0xdea   :  { %1964 = vsyncpa [#allocation4 + $0x1], 1 }

// kernel: encoder_forward.19
= control target key start
LH: loop header
LB: loop body
LE: loop exit
PB: predicated region body
PF: predicated region fallthrough
CT: control target
= control target key end

     0   :  { %s4144_s0 = inlined_call_operand.hbm [shape: f32[16,256], index: 0, kind: input, shape index: {}]   ;;  %s4145_s1 = inlined_call_operand.hbm [shape: f32[1,256], index: 1, kind: input, shape index: {}]   ;;  %s4146_s2 = inlined_call_operand.hbm [shape: f32[1,256], index: 2, kind: input, shape index: {}]   ;;  %s4147_s3 = inlined_call_operand.hbm [shape: bf16[256,1024], index: 3, kind: input, shape index: {}]   ;;  %s4148_s4 = inlined_call_operand.hbm [shape: f32[1,1024], index: 4, kind: input, shape index: {}]   ;;  %s4149_s5 = inlined_call_operand.hbm [shape: bf16[1024,256], index: 5, kind: input, shape index: {}]   ;;  %s4150_s6 = inlined_call_operand.hbm [shape: f32[1,256], index: 6, kind: input, shape index: {}]   ;;  %s4151_s7 = inlined_call_operand.hbm [shape: f32[16,256], index: 7, kind: output, shape index: {}]  }
   0x1   :  { %4155 = sst [smem:[#allocation20_spill]] %s4145_s1 }
   0x2   :  { %12 = vsyncpa [#allocation3], 0 }
   0x3   :  { %14 = vsyncpa [#allocation3 + $0x1], 0 }
   0x4   :  { %15 = vsyncpa [#allocation6], 0 }
   0x5   :  { %16 = vsyncpa [#allocation9], 0 }
   0x6   :  { %17 = vsyncpa [#allocation12], 0 }
   0x7   :  { %18 = vsyncpa [#allocation4], 0 }
   0x8   :  { %20 = vsyncpa [#allocation4 + $0x1], 0  ;;  %s3658_s24 = smov 0   ;;  %s3660_s25 = smov 0  }
   0x9   :  { %s3662_s26 = smov 0   ;;  %s3664_s27 = smov 0  }
   0xa LB: > { %s3605_s28 = smov [#allocation5]   ;;  %s3679_s30 = sadd.s32 4294967295, %s3603_s27   ;;  %s3603_s27 = sphi %s3664_s27, %s4179_s27   ;;  %s3599_s26 = sphi %s3662_s26, %s4178_s26   ;;  %s3595_s25 = sphi %s3660_s25, %s4177_s25   ;;  %s3591_s24 = sphi %s3658_s24, %s4176_s24  }
   0xb   : > { %s222_s29 = sshll.u32 %s3605_s28, 4  ;;  %p2704_p0 = scmp.ge.s32.totalorder %s3603_s27, 1  ;;  %s223_s29 = int_to_ptr.vmem [resolvable:$true] %s222_s29 }
   0xc   : > { %p4152_p1 = scmp.eq.s32.totalorder %s3679_s30, 0  ;;  %p209_p2 = scmp.lt.s32.totalorder %s3603_s27, 3 }
   0xd   : > { %s3606_s9 = smov [#allocation8]   ;;  %s3607_s12 = smov [#allocation11]  }
   0xe   : > { %p3684_p3 = pnand %p2704_p0, %p209_p2  ;;  %s243_s10 = sshll.u32 %s3606_s9, 4  ;;  %s3691_s10 = int_to_ptr.vmem [resolvable:$true] %s243_s10 }
   0xf   : > { %s267_s13 = sshll.u32 %s3607_s12, 4  ;;  %s4158_s1 = sld [smem:[#allocation20_spill]]  ;;  %s3699_s13 = int_to_ptr.vmem [resolvable:$true] %s267_s13 }
  0x10   : > { %s4156_s8 = scalar_select %p3684_p3, 1, 0 }
  0x11   : > { %p3015_p5 = pneg %p3684_p3 }
  0x13   : > { %p3695_p6 = pnand %p3015_p5, %p4152_p1 }
  0x15   : > { %s3327_s16 = scalar_lea.hbm %s4158_s1, 32  ;;  %p3709_p8 = pneg %p3695_p6 }
  0x16   : > { %p3328_p7 = scmp.ne.s32.totalorder %s4158_s1, %s3327_s16  ;;  %p3334_p11 = scmp.lt.u32.totalorder %s3327_s16, %s4158_s1 }
  0x18   : > { %p3330_p9 = pnand %p3709_p8, %p3328_p7 }
  0x1a   : > { %p3331_p10 = pneg %p3330_p9 }
  0x1c   : > { %p3336_p12 = pnand %p3334_p11, %p3331_p10 }
  0x1e   : > { %3339 = shalt.err (!%p3336_p12)
}
  0x1f   : > { %s3340_s22 = scalar_lea.vmem %s223_s29, 32  ;;  %p3348_p5 = scmp.lt.s32.totalorder %s223_s29, %s223_s29 }
  0x20   : > { %p3341_p13 = scmp.ne.s32.totalorder %s223_s29, %s3340_s22  ;;  %p3349_p4 = scmp.lt.s32.totalorder %s3340_s22, %s3340_s22 }
  0x22   : > { %p3343_p0 = pnand %p3341_p13, %p3709_p8  ;;  %p3350_p1 = por %p3349_p4, %p3348_p5 }
  0x24   : > { %p3344_p2 = pneg %p3343_p0 }
  0x26   : > { %p3351_p3 = pnand %p3350_p1, %p3344_p2 }
  0x28   : > { %3354 = shalt.err (!%p3351_p3)
}
  0x29   : > { %3018 = dma.hbm_to_vmem [thread:$0]  (!%p3695_p6), %s4158_s1, 32, %s223_s29, [#allocation6]  }
  0x2a   : > { %s3355_s14 = scalar_lea.hbm %s4147_s3, 16384 }
  0x2b   : > { %p3356_p7 = scmp.ne.s32.totalorder %s4147_s3, %s3355_s14  ;;  %p3362_p1 = scmp.lt.u32.totalorder %s3355_s14, %s4147_s3 }
  0x2d   : > { %p3358_p9 = pnand %p3356_p7, %p3709_p8 }
  0x2f   : > { %p3359_p4 = pneg %p3358_p9 }
  0x31   : > { %p3364_p3 = pnand %p3362_p1, %p3359_p4 }
  0x33   : > { %3367 = shalt.err (!%p3364_p3)
}
  0x34   : > { %s3368_s29 = scalar_lea.vmem %s3691_s10, 16384  ;;  %p3376_p13 = scmp.lt.s32.totalorder %s3691_s10, %s3691_s10 }
  0x35   : > { %p3369_p10 = scmp.ne.s32.totalorder %s3691_s10, %s3368_s29  ;;  %p3377_p0 = scmp.lt.s32.totalorder %s3368_s29, %s3368_s29 }
  0x37   : > { %p3371_p11 = pnand %p3369_p10, %p3709_p8  ;;  %p3378_p2 = por %p3377_p0, %p3376_p13 }
  0x39   : > { %p3372_p12 = pneg %p3371_p11 }
  0x3b   : > { %p3379_p5 = pnand %p3378_p2, %p3372_p12 }
  0x3d   : > { %3382 = shalt.err (!%p3379_p5)
}
  0x3e   : > { %s3608_s20 = smov 512   ;;  %s3609_s21 = smov 32  }
  0x3f   : > { %3024 = dma.hbm_to_vmem [thread:$0]  (!%p3695_p6), %s4147_s3, 16384, %s3691_s10, [#allocation9], %s3608_s20, %s3608_s20, %s3609_s21  }
  0x40   : > { %s3383_s12 = scalar_lea.hbm %s4149_s5, 16384 }
  0x41   : > { %p3384_p7 = scmp.ne.s32.totalorder %s4149_s5, %s3383_s12  ;;  %p3390_p1 = scmp.lt.u32.totalorder %s3383_s12, %s4149_s5 }
  0x43   : > { %p3386_p9 = pnand %p3384_p7, %p3709_p8 }
  0x45   : > { %p3387_p4 = pneg %p3386_p9 }
  0x47   : > { %p3392_p3 = pnand %p3390_p1, %p3387_p4 }
  0x49   : > { %3395 = shalt.err (!%p3392_p3)
}
  0x4a   : > { %s3396_s10 = scalar_lea.vmem %s3699_s13, 16384  ;;  %p3404_p13 = scmp.lt.s32.totalorder %s3699_s13, %s3699_s13 }
  0x4b   : > { %p3397_p10 = scmp.ne.s32.totalorder %s3699_s13, %s3396_s10  ;;  %p3405_p0 = scmp.lt.s32.totalorder %s3396_s10, %s3396_s10 }
  0x4d   : > { %p3399_p11 = pnand %p3397_p10, %p3709_p8  ;;  %p3406_p2 = por %p3405_p0, %p3404_p13 }
  0x4f   : > { %p3400_p12 = pneg %p3399_p11 }
  0x51   : > { %p3407_p5 = pnand %p3406_p2, %p3400_p12 }
  0x53   : > { %3410 = shalt.err (!%p3407_p5)
}
  0x54   : > { %s3610_s18 = smov 128   ;;  %s3611_s29 = smov 8  }
  0x55   : > { %3030 = dma.hbm_to_vmem [thread:$0]  (!%p3695_p6), %s4149_s5, 16384, %s3699_s13, [#allocation12], %s3610_s18, %s3610_s18, %s3611_s29  }
  0x56   : > { %s3612_s22 = smov [#allocation7]   ;;  %s3613_s28 = smov [#allocation10]  }
  0x57   : > { %s233_s23 = sshll.u32 %s3612_s22, 4  ;;  %s257_s9 = sshll.u32 %s3613_s28, 4  ;;  %s234_s23 = int_to_ptr.vmem [resolvable:$true] %s233_s23  ;;  %s258_s9 = int_to_ptr.vmem [resolvable:$true] %s257_s9 }
  0x58   : > { %s3411_s15 = scalar_lea.hbm %s4146_s2, 32 }
  0x59   : > { %p3412_p7 = scmp.ne.s32.totalorder %s4146_s2, %s3411_s15  ;;  %p3418_p1 = scmp.lt.u32.totalorder %s3411_s15, %s4146_s2 }
  0x5b   : > { %p3414_p9 = pnand %p3412_p7, %p3709_p8 }
  0x5d   : > { %p3415_p4 = pneg %p3414_p9 }
  0x5f   : > { %p3420_p3 = pnand %p3418_p1, %p3415_p4 }
  0x61   : > { %3423 = shalt.err (!%p3420_p3)
}
  0x62   : > { %s3424_s13 = scalar_lea.vmem %s234_s23, 32  ;;  %p3432_p13 = scmp.lt.s32.totalorder %s234_s23, %s234_s23 }
  0x63   : > { %p3425_p10 = scmp.ne.s32.totalorder %s234_s23, %s3424_s13  ;;  %p3433_p0 = scmp.lt.s32.totalorder %s3424_s13, %s3424_s13 }
  0x65   : > { %p3427_p11 = pnand %p3425_p10, %p3709_p8  ;;  %p3434_p2 = por %p3433_p0, %p3432_p13 }
  0x67   : > { %p3428_p12 = pneg %p3427_p11 }
  0x69   : > { %p3435_p5 = pnand %p3434_p2, %p3428_p12 }
  0x6b   : > { %3438 = shalt.err (!%p3435_p5)
}
  0x6c   : > { %3021 = dma.hbm_to_vmem [thread:$0]  (!%p3695_p6), %s4146_s2, 32, %s234_s23, [#allocation6]  }
  0x6d   : > { %s3439_s21 = scalar_lea.hbm %s4148_s4, 128 }
  0x6e   : > { %p3440_p7 = scmp.ne.s32.totalorder %s4148_s4, %s3439_s21  ;;  %p3446_p1 = scmp.lt.u32.totalorder %s3439_s21, %s4148_s4 }
  0x70   : > { %p3442_p9 = pnand %p3440_p7, %p3709_p8 }
  0x72   : > { %p3443_p4 = pneg %p3442_p9 }
  0x74   : > { %p3448_p3 = pnand %p3446_p1, %p3443_p4 }
  0x76   : > { %3451 = shalt.err (!%p3448_p3)
}
  0x77   : > { %s3452_s15 = scalar_lea.vmem %s258_s9, 128  ;;  %p3460_p13 = scmp.lt.s32.totalorder %s258_s9, %s258_s9 }
  0x78   : > { %p3453_p10 = scmp.ne.s32.totalorder %s258_s9, %s3452_s15  ;;  %p3461_p0 = scmp.lt.s32.totalorder %s3452_s15, %s3452_s15 }
  0x7a   : > { %p3455_p11 = pnand %p3453_p10, %p3709_p8  ;;  %p3462_p2 = por %p3461_p0, %p3460_p13 }
  0x7c   : > { %p3456_p12 = pneg %p3455_p11 }
  0x7e   : > { %p3463_p5 = pnand %p3462_p2, %p3456_p12 }
  0x80   : > { %3466 = shalt.err (!%p3463_p5)
}
  0x81   : > { %3027 = dma.hbm_to_vmem [thread:$0]  (!%p3695_p6), %s4148_s4, 128, %s258_s9, [#allocation9]  }
  0x82   : > { %s3614_s17 = smov [#allocation13]   ;;  %s3467_s29 = scalar_lea.hbm %s4150_s6, 32 }
  0x83   : > { %s281_s10 = sshll.u32 %s3614_s17, 4  ;;  %p3468_p7 = scmp.ne.s32.totalorder %s4150_s6, %s3467_s29  ;;  %s282_s10 = int_to_ptr.vmem [resolvable:$true] %s281_s10 }
  0x84   : > { %p3474_p1 = scmp.lt.u32.totalorder %s3467_s29, %s4150_s6 }
  0x85   : > { %p3470_p9 = pnand %p3468_p7, %p3709_p8 }
  0x87   : > { %p3471_p4 = pneg %p3470_p9 }
  0x89   : > { %p3476_p3 = pnand %p3474_p1, %p3471_p4 }
  0x8b   : > { %3479 = shalt.err (!%p3476_p3)
}
  0x8c   : > { %s3480_s9 = scalar_lea.vmem %s282_s10, 32  ;;  %p3488_p13 = scmp.lt.s32.totalorder %s282_s10, %s282_s10 }
  0x8d   : > { %p3481_p10 = scmp.ne.s32.totalorder %s282_s10, %s3480_s9  ;;  %p3489_p0 = scmp.lt.s32.totalorder %s3480_s9, %s3480_s9 }
  0x8f   : > { %p3483_p11 = pnand %p3481_p10, %p3709_p8  ;;  %p3490_p2 = por %p3489_p0, %p3488_p13 }
  0x91   : > { %p3484_p12 = pneg %p3483_p11 }
  0x93   : > { %p3491_p5 = pnand %p3490_p2, %p3484_p12 }
  0x95   : > { %3494 = shalt.err (!%p3491_p5)
}
  0x96   : > { %3033 = dma.hbm_to_vmem [thread:$0]  (!%p3695_p6), %s4150_s6, 32, %s282_s10, [#allocation12]  }
  0x97   : > { %s2703_s19 = sadd.s32 4294967294, %s3603_s27   ;;  %s3827_s11 = sadd.s32 1, %s3603_s27  }
  0x98   : > { %s30_s14 = ssub.s32 %s3603_s27, %s3827_s11  ;;  %s33_s15 = sadd.s32 1, %s3599_s26 }
  0x99   : > { %p31_p8 = scmp.eq.s32.totalorder %s30_s14, 0  ;;  %p40_p7 = scmp.ne.s32.totalorder %s3599_s26, %s3595_s25 }
  0x9a   : > { %p41_p9 = scmp.eq.s32.totalorder %s3603_s27, 0  ;;  %p46_p4 = scmp.ne.s32.totalorder %s3595_s25, %s3591_s24 }
  0x9b   : > { %s3838_s23 = scalar_select %p31_p8, %s3599_s26, %s33_s15  }
  0x9c   : > { %p3840_p1 = por %p41_p9, %p40_p7  ;;  %p4161_p3 = scmp.eq.s32.totalorder %s3679_s30, 0 }
  0x9d   : > { %p196_p10 = scmp.eq.s32.totalorder %s3679_s30, 1  ;;  %p202_p11 = scmp.eq.s32.totalorder %s2703_s19, 1 }
  0x9e   : > { %p3846_p6 = por %p4161_p3, %p46_p4  ;;  %p3048_p12 = scmp.lt.s32.totalorder %s3603_s27, 2 }
  0x9f   : > { %s292_s10 = sand.u32 1, %s3599_s26   ;;  %p3853_p13 = por %p196_p10, %p40_p7 }
  0xa0   : > { %p3857_p0 = por %p202_p11, %p46_p4  ;;  %s2712_s29 = sshll.u32 %s292_s10, 4 }
  0xa1   : > { %s4163_s13 = scalar_select %p3853_p13, 1, 0 }
  0xa2   : > { %s4164_s18 = scalar_select %p3857_p0, 1, 0 }
  0xa3   : > { %s2985_s1 = sshll.u32 %s3603_s27, 8  ;;  %s296_s9 = scalar_lea.vmem [#allocation2], %s2712_s29 }
  0xa4   : > { %s3865_s22 = scalar_lea.hbm %s4144_s0, %s2985_s1  ;;  %s304_s28 = sshll.u32 %s296_s9, 4  ;;  %s3867_s28 = int_to_ptr.vmem [resolvable:$true] %s304_s28 }
  0xa5   : > { %p3871_p2 = pnand %p3048_p12, %p3840_p1  ;;  %s293_s19 = scalar_lea.sflag [#allocation3], %s292_s10 }
  0xa6   : > { %s3495_s14 = scalar_lea.hbm %s3865_s22, 256  ;;  %s3500_s1 = scalar_lea.hbm %s4144_s0, 512 }
  0xa7   : > { %p3496_p5 = scmp.ne.s32.totalorder %s3865_s22, %s3495_s14  ;;  %p3497_p8 = pneg %p3871_p2 }
  0xa8   : > { %p3501_p4 = scmp.lt.u32.totalorder %s3865_s22, %s4144_s0  ;;  %p3502_p1 = scmp.lt.u32.totalorder %s3500_s1, %s3495_s14 }
  0xa9   : > { %p3498_p7 = pnand %p3497_p8, %p3496_p5  ;;  %p3504_p10 = scmp.lt.u32.totalorder %s3495_s14, %s3865_s22 }
  0xaa   : > { %p3503_p3 = por %p3502_p1, %p3501_p4 }
  0xab   : > { %p3499_p9 = pneg %p3498_p7 }
  0xac   : > { %p3505_p11 = por %p3504_p10, %p3503_p3 }
  0xae   : > { %p3506_p12 = pnand %p3505_p11, %p3499_p9 }
  0xb0   : > { %3509 = shalt.err (!%p3506_p12)
}
  0xb1   : > { %s3510_s10 = scalar_lea.vmem %s3867_s28, 256  ;;  %s3615_s21 = smov [#allocation2]  }
  0xb2   : > { %p3511_p5 = scmp.ne.s32.totalorder %s3867_s28, %s3510_s10  ;;  %s3515_s9 = sshll.u32 %s3615_s21, 4  ;;  %s3516_s9 = int_to_ptr.vmem [resolvable:$false] %s3515_s9 }
  0xb3   : > { %s3517_s15 = scalar_lea.vmem %s3516_s9, 512  ;;  %p3518_p13 = scmp.lt.s32.totalorder %s3867_s28, %s3516_s9 }
  0xb4   : > { %p3513_p7 = pnand %p3511_p5, %p3497_p8  ;;  %p3519_p4 = scmp.lt.s32.totalorder %s3517_s15, %s3510_s10 }
  0xb6   : > { %p3514_p0 = pneg %p3513_p7  ;;  %p3520_p1 = por %p3519_p4, %p3518_p13 }
  0xb8   : > { %p3521_p3 = pnand %p3520_p1, %p3514_p0 }
  0xba   : > { %3524 = shalt.err (!%p3521_p3)
}
  0xbb   : > { %3037 = dma.hbm_to_vmem [thread:$0]  (!%p3871_p2), %s3865_s22, 256, %s3867_s28, %s293_s19  }
  0xbc   : > { %p4166_p9 = scmp.ne.s32.totalorder %s4156_s8, 0 }
  0xbd   : > { %s3903_s14 = sand.u32 (!%p4166_p9), 1, %s3595_s25  }
  0xbe   : > { %313 = sbr.rel (%p4166_p9) target bundleno = 1090 (0x442), region = 48  ;;  %s2716_s29 = sshll.u32 (!%p4166_p9), %s3903_s14, 4 }
  0xbf   : > { %s316_s1 = scalar_lea.sflag (!%p4166_p9), [#allocation3], %s3903_s14  ;;  %s3909_s16 = scalar_lea.vmem (!%p4166_p9), [#allocation2], %s2716_s29 }
  0xc5   : > { %3570 = dma.done.wait (%p3846_p6), %s316_s1, 256  }
  0xc6   : > { %3572 = vsyncadd (%p3846_p6), %s316_s1, 4294967040  ;;  %p4167_p13 = scmp.eq.s32.totalorder %s3679_s30, 0 }
  0xc8   : > { %3574 = dma.done.wait (%p4167_p13), [#allocation6], 64   ;;  %p4168_p0 = pmov %p4167_p13 }
  0xca   : > { %3576 = vsyncadd (%p4168_p0), [#allocation6], 4294967232  ;;  %p4169_p2 = pmov %p4168_p0 }
  0xcb   : > { %p4170_p8 = pmov %p4168_p0 }
  0xcc   : > { %3578 = dma.done.wait (%p4169_p2), [#allocation9], 16512  }
  0xcd   : > { %3580 = vsyncadd (%p4170_p8), [#allocation9], 4294950784  ;;  %p4171_p10 = pmov %p4168_p0 }
  0xce   : > { %p4172_p11 = pmov %p4168_p0 }
  0xcf   : > { %3582 = dma.done.wait (%p4171_p10), [#allocation12], 16416  }
  0xd0   : > { %3584 = vsyncadd (%p4172_p11), [#allocation12], 4294950880  ;;  %v3928_v0 = vld [vmem:[%s3909_s16] sm:$0xff]  ;;  %v3931_v1 = vld [vmem:[%s3909_s16 + $0x8] sm:$0xff]  ;;  %s2986_s8 = sshll.u32 %s3679_s30, 8  ;;  %s373_s17 = scalar_lea.vmem [#allocation14], %s2716_s29 }
  0xd1   : > { %v378_v2 = vadd.f32 %v3931_v1, %v3928_v0  ;;  %v423_v3 = vld [vmem:[#allocation8] sm:$0xff]  ;;  %v424_v5 = vld [vmem:[#allocation8 + $0x8] sm:$0xff]  ;;  %s2576_s22 = sshll.u32 %s373_s17, 4  ;;  %s4100_s19 = scalar_lea.hbm %s4151_s7, %s2986_s8  ;;  %s4102_s22 = int_to_ptr.vmem [resolvable:$true] %s2576_s22 }
  0xd2   : > { %v427_v4 = vld [vmem:[#allocation8 + $0x20] sm:$0xff]  ;;  %v428_v7 = vld [vmem:[#allocation8 + $0x28] sm:$0xff]  ;;  %s2562_s30 = scalar_lea.sflag [#allocation4], %s3903_s14  ;;  %s3525_s20 = scalar_lea.vmem %s4102_s22, 256 }
  0xd3   : > { %379 = vadd.xlane.f32.xlu0 %v378_v2  ;;  %v2725_v6 = vcombine.high %v423_v3, %v427_v4  ;;  %v2724_v8 = vcombine.low %v423_v3, %v427_v4  ;;  %v431_v9 = vld [vmem:[#allocation8 + $0x40] sm:$0xff]  ;;  %v2727_v11 = vcombine.high %v424_v5, %v428_v7  ;;  %v2726_v12 = vcombine.low %v424_v5, %v428_v7  ;;  %v432_v14 = vld [vmem:[#allocation8 + $0x48] sm:$0xff]  ;;  %p3526_p6 = scmp.ne.s32.totalorder %s4102_s22, %s3525_s20  ;;  %p4173_p12 = scmp.ne.s32.totalorder %s4163_s13, 0 }
  0xd4   : > { %v435_v10 = vld [vmem:[#allocation8 + $0x60] sm:$0xff]  ;;  %v436_v15 = vld [vmem:[#allocation8 + $0x68] sm:$0xff]  ;;  %s3617_s10 = smov [#allocation14]  }
  0xd5   : > { %v2733_v13 = vcombine.high %v431_v9, %v435_v10  ;;  %v439_v16 = vld [vmem:[#allocation8 + $0x80] sm:$0xff]  ;;  %1233 = vmatprep.subr.bf16.mxu0 %v2725_v6  ;;  %v2735_v17 = vcombine.high %v432_v14, %v436_v15  ;;  %v440_v19 = vld [vmem:[#allocation8 + $0x88] sm:$0xff]  ;;  %1274 = vmatprep.subr.bf16.mxu1 %v2727_v11  ;;  %v2732_v21 = vcombine.low %v431_v9, %v435_v10  ;;  %p3527_p5 = pnand %p3526_p6, %p4173_p12  ;;  %s3529_s21 = sshll.u32 %s3617_s10, 4  ;;  %s3530_s21 = int_to_ptr.vmem [resolvable:$false] %s3529_s21 }
  0xd6   : > { %v443_v18 = vld [vmem:[#allocation8 + $0xa0] sm:$0xff]  ;;  %v444_v20 = vld [vmem:[#allocation8 + $0xa8] sm:$0xff]  ;;  %1234 = vmatpush1.bf16.msra.mxu0 %v2724_v8  ;;  %1275 = vmatpush1.bf16.msra.mxu1 %v2726_v12  ;;  %v2734_v22 = vcombine.low %v432_v14, %v436_v15  ;;  %s3531_s9 = scalar_lea.vmem %s3530_s21, 512  ;;  %p3532_p4 = scmp.lt.s32.totalorder %s4102_s22, %s3530_s21 }
  0xd7   : > { %1235 = vmatprep.subr.bf16.mxu0 %v2733_v13  ;;  %v2741_v23 = vcombine.high %v439_v16, %v443_v18  ;;  %1276 = vmatprep.subr.bf16.mxu1 %v2735_v17  ;;  %v2743_v24 = vcombine.high %v440_v19, %v444_v20  ;;  %v447_v25 = vld [vmem:[#allocation8 + $0xc0] sm:$0xff]  ;;  %v448_v27 = vld [vmem:[#allocation8 + $0xc8] sm:$0xff]  ;;  %v2740_v29 = vcombine.low %v439_v16, %v443_v18  ;;  %p3528_p7 = pneg %p3527_p5  ;;  %p3533_p1 = scmp.lt.s32.totalorder %s3531_s9, %s3525_s20 }
  0xd8   : > { %v451_v26 = vld [vmem:[#allocation8 + $0xe0] sm:$0xff]  ;;  %v452_v28 = vld [vmem:[#allocation8 + $0xe8] sm:$0xff]  ;;  %v2742_v30 = vcombine.low %v440_v19, %v444_v20 }
  0xd9   : > { %v2749_v31 = vcombine.high %v447_v25, %v451_v26  ;;  %v2751_v32 = vcombine.high %v448_v27, %v452_v28  ;;  %v455_v33 = vld [vmem:[#allocation8 + $0x100] sm:$0xff]  ;;  %v456_v35 = vld [vmem:[#allocation8 + $0x108] sm:$0xff]  ;;  %v2748_v37 = vcombine.low %v447_v25, %v451_v26  ;;  %v2750_v38 = vcombine.low %v448_v27, %v452_v28  ;;  %p3534_p3 = por %p3533_p1, %p3532_p4 }
  0xda   : > { %1236 = vmatpush1.bf16.msra.mxu0 %v2732_v21  ;;  %1277 = vmatpush1.bf16.msra.mxu1 %v2734_v22  ;;  %v459_v34 = vld [vmem:[#allocation8 + $0x120] sm:$0xff]  ;;  %v460_v36 = vld [vmem:[#allocation8 + $0x128] sm:$0xff] }
  0xdb   : > { %1237 = vmatprep.subr.bf16.mxu0 %v2741_v23  ;;  %1278 = vmatprep.subr.bf16.mxu1 %v2743_v24  ;;  %v2757_v39 = vcombine.high %v455_v33, %v459_v34  ;;  %v463_v40 = vld [vmem:[#allocation8 + $0x140] sm:$0xff]  ;;  %v2759_v42 = vcombine.high %v456_v35, %v460_v36  ;;  %v464_v43 = vld [vmem:[#allocation8 + $0x148] sm:$0xff]  ;;  %v2756_v45 = vcombine.low %v455_v33, %v459_v34  ;;  %p3535_p9 = pnand %p3534_p3, %p3528_p7 }
  0xdc   : > { %v467_v41 = vld [vmem:[#allocation8 + $0x160] sm:$0xff]  ;;  %v468_v44 = vld [vmem:[#allocation8 + $0x168] sm:$0xff]  ;;  %v2758_v48 = vcombine.low %v456_v35, %v460_v36 }
  0xdd   : > { %v471_v46 = vld [vmem:[#allocation8 + $0x180] sm:$0xff]  ;;  %v2765_v49 = vcombine.high %v463_v40, %v467_v41  ;;  %v472_v50 = vld [vmem:[#allocation8 + $0x188] sm:$0xff]  ;;  %v2767_v52 = vcombine.high %v464_v43, %v468_v44  ;;  %v2764_v53 = vcombine.low %v463_v40, %v467_v41  ;;  %v2766_v56 = vcombine.low %v464_v43, %v468_v44 }
  0xde   : > { %1238 = vmatpush1.bf16.msra.mxu0 %v2740_v29  ;;  %1279 = vmatpush1.bf16.msra.mxu1 %v2742_v30  ;;  %v475_v47 = vld [vmem:[#allocation8 + $0x1a0] sm:$0xff]  ;;  %v476_v51 = vld [vmem:[#allocation8 + $0x1a8] sm:$0xff] }
  0xdf   : > { %1239 = vmatprep.subr.bf16.mxu0 %v2749_v31  ;;  %1280 = vmatprep.subr.bf16.mxu1 %v2751_v32  ;;  %v479_v54 = vld [vmem:[#allocation8 + $0x1c0] sm:$0xff]  ;;  %v2773_v57 = vcombine.high %v471_v46, %v475_v47  ;;  %v480_v58 = vld [vmem:[#allocation8 + $0x1c8] sm:$0xff]  ;;  %v2775_v60 = vcombine.high %v472_v50, %v476_v51  ;;  %v2772_v61 = vcombine.low %v471_v46, %v475_v47 }
  0xe0   : > { %v483_v55 = vld [vmem:[#allocation8 + $0x1e0] sm:$0xff]  ;;  %v484_v59 = vld [vmem:[#allocation8 + $0x1e8] sm:$0xff]  ;;  %v2774_v2 = vcombine.low %v472_v50, %v476_v51 }
  0xe1   : > { %v487_v62 = vld [vmem:[#allocation8 + $0x200] sm:$0xff]  ;;  %v2781_v3 = vcombine.high %v479_v54, %v483_v55  ;;  %v488_v4 = vld [vmem:[#allocation8 + $0x208] sm:$0xff]  ;;  %v2783_v6 = vcombine.high %v480_v58, %v484_v59  ;;  %v2780_v7 = vcombine.low %v479_v54, %v483_v55  ;;  %v2782_v10 = vcombine.low %v480_v58, %v484_v59 }
  0xe2   : > { %1240 = vmatpush1.bf16.msra.mxu0 %v2748_v37  ;;  %1281 = vmatpush1.bf16.msra.mxu1 %v2750_v38  ;;  %v491_v63 = vld [vmem:[#allocation8 + $0x220] sm:$0xff]  ;;  %v492_v5 = vld [vmem:[#allocation8 + $0x228] sm:$0xff] }
  0xe3   : > { %1241 = vmatprep.subr.bf16.mxu0 %v2757_v39  ;;  %1282 = vmatprep.subr.bf16.mxu1 %v2759_v42  ;;  %v495_v8 = vld [vmem:[#allocation8 + $0x240] sm:$0xff]  ;;  %v2789_v11 = vcombine.high %v487_v62, %v491_v63  ;;  %v496_v12 = vld [vmem:[#allocation8 + $0x248] sm:$0xff]  ;;  %v2791_v14 = vcombine.high %v488_v4, %v492_v5  ;;  %v2788_v15 = vcombine.low %v487_v62, %v491_v63 }
  0xe4   : > { %v499_v9 = vld [vmem:[#allocation8 + $0x260] sm:$0xff]  ;;  %v500_v13 = vld [vmem:[#allocation8 + $0x268] sm:$0xff]  ;;  %v2790_v16 = vcombine.low %v488_v4, %v492_v5 }
  0xe5   : > { %v2797_v17 = vcombine.high %v495_v8, %v499_v9  ;;  %v2799_v18 = vcombine.high %v496_v12, %v500_v13  ;;  %v503_v19 = vld [vmem:[#allocation8 + $0x280] sm:$0xff]  ;;  %v504_v21 = vld [vmem:[#allocation8 + $0x288] sm:$0xff]  ;;  %v2796_v23 = vcombine.low %v495_v8, %v499_v9  ;;  %v2798_v24 = vcombine.low %v496_v12, %v500_v13  ;;  %v425_v12 = vld [vmem:[#allocation8 + $0x10] sm:$0xff] }
  0xe6   : > { %1242 = vmatpush1.bf16.msra.mxu0 %v2756_v45  ;;  %1283 = vmatpush1.bf16.msra.mxu1 %v2758_v48  ;;  %v507_v20 = vld [vmem:[#allocation8 + $0x2a0] sm:$0xff]  ;;  %v508_v22 = vld [vmem:[#allocation8 + $0x2a8] sm:$0xff]  ;;  %v429_v13 = vld [vmem:[#allocation8 + $0x30] sm:$0xff] }
  0xe7   : > { %1243 = vmatprep.subr.bf16.mxu0 %v2765_v49  ;;  %1284 = vmatprep.subr.bf16.mxu1 %v2767_v52  ;;  %v2805_v25 = vcombine.high %v503_v19, %v507_v20  ;;  %v2807_v26 = vcombine.high %v504_v21, %v508_v22  ;;  %v2804_v34 = vcombine.low %v503_v19, %v507_v20  ;;  %v511_v36 = vld [vmem:[#allocation8 + $0x2c0] sm:$0xff]  ;;  %v512_v38 = vld [vmem:[#allocation8 + $0x2c8] sm:$0xff] }
  0xe8   : > { %v2806_v35 = vcombine.low %v504_v21, %v508_v22  ;;  %v515_v37 = vld [vmem:[#allocation8 + $0x2e0] sm:$0xff]  ;;  %v516_v39 = vld [vmem:[#allocation8 + $0x2e8] sm:$0xff]  ;;  %v396_v22 = vlaneseq }
  0xe9   : > { %v2815_v40 = vcombine.high %v512_v38, %v516_v39  ;;  %v2814_v41 = vcombine.low %v512_v38, %v516_v39  ;;  %v519_v42 = vld [vmem:[#allocation8 + $0x300] sm:$0xff]  ;;  %v520_v44 = vld [vmem:[#allocation8 + $0x308] sm:$0xff] }
  0xea   : > { %1244 = vmatpush1.bf16.msra.mxu0 %v2764_v53  ;;  %1285 = vmatpush1.bf16.msra.mxu1 %v2766_v56  ;;  %v523_v43 = vld [vmem:[#allocation8 + $0x320] sm:$0xff]  ;;  %v524_v46 = vld [vmem:[#allocation8 + $0x328] sm:$0xff] }
  0xeb   : > { %1245 = vmatprep.subr.bf16.mxu0 %v2773_v57  ;;  %1286 = vmatprep.subr.bf16.mxu1 %v2775_v60  ;;  %v2821_v45 = vcombine.high %v519_v42, %v523_v43  ;;  %v2823_v47 = vcombine.high %v520_v44, %v524_v46  ;;  %v2820_v48 = vcombine.low %v519_v42, %v523_v43  ;;  %v527_v50 = vld [vmem:[#allocation8 + $0x340] sm:$0xff]  ;;  %v528_v52 = vld [vmem:[#allocation8 + $0x348] sm:$0xff]  ;;  %v434_v42 = vld [vmem:[#allocation8 + $0x58] sm:$0xff] }
  0xec   : > { %v2822_v49 = vcombine.low %v520_v44, %v524_v46  ;;  %v531_v51 = vld [vmem:[#allocation8 + $0x360] sm:$0xff]  ;;  %v532_v54 = vld [vmem:[#allocation8 + $0x368] sm:$0xff]  ;;  %v438_v43 = vld [vmem:[#allocation8 + $0x78] sm:$0xff] }
  0xed   : > { %v2829_v53 = vcombine.high %v527_v50, %v531_v51  ;;  %v2831_v55 = vcombine.high %v528_v52, %v532_v54  ;;  %v2828_v56 = vcombine.low %v527_v50, %v531_v51  ;;  %v2830_v57 = vcombine.low %v528_v52, %v532_v54  ;;  %v535_v58 = vld [vmem:[#allocation8 + $0x380] sm:$0xff]  ;;  %v536_v60 = vld [vmem:[#allocation8 + $0x388] sm:$0xff]  ;;  %v441_v46 = vld [vmem:[#allocation8 + $0x90] sm:$0xff] }
  0xee   : > { %1246 = vmatpush1.bf16.msra.mxu0 %v2772_v61  ;;  %1287 = vmatpush1.bf16.msra.mxu1 %v2774_v2  ;;  %v539_v59 = vld [vmem:[#allocation8 + $0x3a0] sm:$0xff]  ;;  %v540_v62 = vld [vmem:[#allocation8 + $0x3a8] sm:$0xff]  ;;  %v2738_v51 = vcombine.low %v434_v42, %v438_v43  ;;  %v449_v54 = vld [vmem:[#allocation8 + $0xd0] sm:$0xff] }
  0xef   : > { %1247 = vmatprep.subr.bf16.mxu0 %v2781_v3  ;;  %1288 = vmatprep.subr.bf16.mxu1 %v2783_v6  ;;  %v2837_v61 = vcombine.high %v535_v58, %v539_v59  ;;  %v2839_v63 = vcombine.high %v536_v60, %v540_v62  ;;  %v2836_v2 = vcombine.low %v535_v58, %v539_v59  ;;  %v543_v4 = vld [vmem:[#allocation8 + $0x3c0] sm:$0xff]  ;;  %v544_v6 = vld [vmem:[#allocation8 + $0x3c8] sm:$0xff] }
  0xf0   : > { %v2838_v3 = vcombine.low %v536_v60, %v540_v62  ;;  %v547_v5 = vld [vmem:[#allocation8 + $0x3e0] sm:$0xff]  ;;  %v548_v8 = vld [vmem:[#allocation8 + $0x3e8] sm:$0xff]  ;;  %v457_v62 = vld [vmem:[#allocation8 + $0x110] sm:$0xff] }
  0xf1   : > { %v2844_v9 = vcombine.low %v543_v4, %v547_v5 }
  0xf2   : > { %1248 = vmatpush1.bf16.msra.mxu0 %v2780_v7  ;;  %1289 = vmatpush1.bf16.msra.mxu1 %v2782_v10  ;;  %v2845_v7 = vcombine.high %v543_v4, %v547_v5  ;;  %v2847_v10 = vcombine.high %v544_v6, %v548_v8 }
  0xf3   : > { %1249 = vmatprep.subr.bf16.mxu0 %v2789_v11  ;;  %1290 = vmatprep.subr.bf16.mxu1 %v2791_v14  ;;  %v2846_v11 = vcombine.low %v544_v6, %v548_v8  ;;  %v426_v14 = vld [vmem:[#allocation8 + $0x18] sm:$0xff]  ;;  %v465_v8 = vld [vmem:[#allocation8 + $0x150] sm:$0xff] }
  0xf6   : > { %1250 = vmatpush1.bf16.msra.mxu0 %v2788_v15  ;;  %1291 = vmatpush1.bf16.msra.mxu1 %v2790_v16  ;;  %v2729_v15 = vcombine.high %v425_v12, %v429_v13  ;;  %v430_v16 = vld [vmem:[#allocation8 + $0x38] sm:$0xff] }
  0xf7   : > { %1251 = vmatprep.subr.bf16.mxu0 %v2797_v17  ;;  %1292 = vmatprep.subr.bf16.mxu1 %v2799_v18  ;;  %v2728_v17 = vcombine.low %v425_v12, %v429_v13  ;;  %v2730_v18 = vcombine.low %v426_v14, %v430_v16  ;;  %v2731_v19 = vcombine.high %v426_v14, %v430_v16  ;;  %v473_v16 = vld [vmem:[#allocation8 + $0x190] sm:$0xff] }
  0xfa   : > { %1252 = vmatpush1.bf16.msra.mxu0 %v2796_v23  ;;  %1293 = vmatpush1.bf16.msra.mxu1 %v2798_v24  ;;  %v3945_v24 = vshrl.u32 %v396_v22, 7 }
  0xfb   : > { %1253 = vmatprep.subr.bf16.mxu0 %v2805_v25  ;;  %1294 = vmatprep.subr.bf16.mxu1 %v2807_v26 }
  0xfc   : > { %v3948_v25 = vsub.s32 1, %v3945_v24  ;;  %v3951_v26 = vsub.s32 0, %v3945_v24 }
  0xfe   : > { %1254 = vmatpush1.bf16.msra.mxu0 %v2804_v34  ;;  %1295 = vmatpush1.bf16.msra.mxu1 %v2806_v35 }
  0xff   : > { %1296 = vmatprep.subr.bf16.mxu1 %v2815_v40 }
 0x102   : > { %1297 = vmatpush1.bf16.msra.mxu1 %v2814_v41  ;;  %v437_v41 = vld [vmem:[#allocation8 + $0x70] sm:$0xff] }
 0x103   : > { %1298 = vmatprep.subr.bf16.mxu1 %v2823_v47  ;;  %v445_v47 = vld [vmem:[#allocation8 + $0xb0] sm:$0xff] }
 0x104   : > { %v2745_v52 = vcombine.high %v441_v46, %v445_v47  ;;  %v2744_v58 = vcombine.low %v441_v46, %v445_v47  ;;  %v498_v46 = vld [vmem:[#allocation8 + $0x258] sm:$0xff] }
 0x106   : > { %1299 = vmatpush1.bf16.msra.mxu1 %v2822_v49  ;;  %v446_v49 = vld [vmem:[#allocation8 + $0xb8] sm:$0xff] }
 0x107   : > { %1300 = vmatprep.subr.bf16.mxu1 %v2831_v55  ;;  %v453_v55 = vld [vmem:[#allocation8 + $0xf0] sm:$0xff] }
 0x108   : > { %v2753_v60 = vcombine.high %v449_v54, %v453_v55  ;;  %v2752_v4 = vcombine.low %v449_v54, %v453_v55 }
 0x10a   : > { %1301 = vmatpush1.bf16.msra.mxu1 %v2830_v57  ;;  %v454_v57 = vld [vmem:[#allocation8 + $0xf8] sm:$0xff] }
 0x10b   : > { %1302 = vmatprep.subr.bf16.mxu1 %v2839_v63  ;;  %v461_v63 = vld [vmem:[#allocation8 + $0x130] sm:$0xff] }
 0x10c   : > { %v2761_v6 = vcombine.high %v457_v62, %v461_v63  ;;  %v2760_v12 = vcombine.low %v457_v62, %v461_v63 }
 0x10e   : > { %1303 = vmatpush1.bf16.msra.mxu1 %v2838_v3  ;;  %v462_v3 = vld [vmem:[#allocation8 + $0x138] sm:$0xff] }
 0x10f   : > { %1304 = vmatprep.subr.bf16.mxu1 %v2847_v10  ;;  %v466_v10 = vld [vmem:[#allocation8 + $0x158] sm:$0xff] }
 0x112   : > { %1305 = vmatpush1.bf16.msra.mxu1 %v2846_v11  ;;  %v470_v11 = vld [vmem:[#allocation8 + $0x178] sm:$0xff] }
 0x113   : > { %1356 = vmatprep.subr.bf16.mxu1 %v2731_v19  ;;  %v478_v19 = vld [vmem:[#allocation8 + $0x1b8] sm:$0xff] }
 0x160   : > { %v380_v27 = vpop.xlane.xlu0 %379 }
 0x161   : > { %v382_v28 = vmul.f32 0.00390625, %v380_v27  ;;  %v376_v27 = vld [vmem:[#allocation5] sm:$0x3] }
 0x163   : > { %v3936_v29 = vsub.f32 %v3928_v0, %v382_v28  ;;  %v3939_v30 = vsub.f32 %v3931_v1, %v382_v28  ;;  %v2813_v0 = vcombine.high %v511_v36, %v515_v37  ;;  %v2812_v1 = vcombine.low %v511_v36, %v515_v37  ;;  %v377_v28 = vld [vmem:[#allocation7] sm:$0x3] }
 0x164   : > { %v416_v36 = vrot.slane %v377_v28, %v3948_v25  ;;  %v412_v37 = vrot.slane %v377_v28, %v3951_v26  ;;  %v485_v28 = vld [vmem:[#allocation8 + $0x1f0] sm:$0xff] }
 0x165   : > { %v385_v31 = vmul.f32 %v3936_v29, %v3936_v29  ;;  %v386_v32 = vmul.f32 %v3939_v30, %v3939_v30  ;;  %1255 = vmatprep.subr.bf16.mxu0 %v2813_v0 }
 0x166   : > { %1256 = vmatpush1.bf16.msra.mxu0 %v2812_v1  ;;  %v433_v1 = vld [vmem:[#allocation8 + $0x50] sm:$0xff] }
 0x167   : > { %v387_v33 = vadd.f32 %v386_v32, %v385_v31  ;;  %1257 = vmatprep.subr.bf16.mxu0 %v2821_v45  ;;  %v403_v31 = vrot.slane %v376_v27, %v3948_v25  ;;  %v399_v32 = vrot.slane %v376_v27, %v3951_v26  ;;  %v2736_v50 = vcombine.low %v433_v1, %v437_v41  ;;  %v481_v27 = vld [vmem:[#allocation8 + $0x1d0] sm:$0xff] }
 0x169   : > { %388 = vadd.xlane.f32.xlu0 %v387_v33 }
 0x16a   : > { %1258 = vmatpush1.bf16.msra.mxu0 %v2820_v48  ;;  %v442_v48 = vld [vmem:[#allocation8 + $0x98] sm:$0xff] }
 0x16b   : > { %1259 = vmatprep.subr.bf16.mxu0 %v2829_v53  ;;  %v2747_v53 = vcombine.high %v442_v48, %v446_v49  ;;  %v2746_v59 = vcombine.low %v442_v48, %v446_v49 }
 0x16e   : > { %1260 = vmatpush1.bf16.msra.mxu0 %v2828_v56  ;;  %v450_v56 = vld [vmem:[#allocation8 + $0xd8] sm:$0xff] }
 0x16f   : > { %1261 = vmatprep.subr.bf16.mxu0 %v2837_v61  ;;  %v2755_v61 = vcombine.high %v450_v56, %v454_v57  ;;  %v2754_v5 = vcombine.low %v450_v56, %v454_v57 }
 0x172   : > { %1262 = vmatpush1.bf16.msra.mxu0 %v2836_v2  ;;  %v458_v2 = vld [vmem:[#allocation8 + $0x118] sm:$0xff] }
 0x173   : > { %1263 = vmatprep.subr.bf16.mxu0 %v2845_v7  ;;  %v2763_v7 = vcombine.high %v458_v2, %v462_v3  ;;  %v2762_v13 = vcombine.low %v458_v2, %v462_v3 }
 0x176   : > { %1264 = vmatpush1.bf16.msra.mxu0 %v2844_v9  ;;  %v469_v9 = vld [vmem:[#allocation8 + $0x170] sm:$0xff] }
 0x177   : > { %1315 = vmatprep.subr.bf16.mxu0 %v2729_v15  ;;  %v2769_v14 = vcombine.high %v465_v8, %v469_v9  ;;  %v2771_v15 = vcombine.high %v466_v10, %v470_v11 }
 0x1f6   : > { %v389_v20 = vpop.xlane.xlu0 %388 }
 0x1f7   : > { %v390_v21 = vmul.f32 0.00390625, %v389_v20  ;;  %v2768_v20 = vcombine.low %v465_v8, %v469_v9 }
 0x1f9   : > { %v391_v23 = vadd.f32 1e-05, %v390_v21  ;;  %v2770_v21 = vcombine.low %v466_v10, %v470_v11 }
 0x1fb   : > { %3291 = vrsqrt.f32 %v391_v23 }
 0x205   : > { %v3292_v33 = vpop.eup %3291 }
 0x206   : > { %v393_v34 = vmul.f32 %v3292_v33, %v3936_v29  ;;  %v394_v35 = vmul.f32 %v3292_v33, %v3939_v30  ;;  %v2737_v29 = vcombine.high %v433_v1, %v437_v41  ;;  %v2739_v30 = vcombine.high %v434_v42, %v438_v43  ;;  %v497_v43 = vld [vmem:[#allocation8 + $0x250] sm:$0xff] }
 0x208   : > { %v407_v38 = vmul.f32 %v403_v31, %v394_v35  ;;  %v406_v0 = vmul.f32 %v399_v32, %v393_v34  ;;  %v482_v31 = vld [vmem:[#allocation8 + $0x1d8] sm:$0xff]  ;;  %v2785_v35 = vcombine.high %v481_v27, %v485_v28 }
 0x209   : > { %v486_v32 = vld [vmem:[#allocation8 + $0x1f8] sm:$0xff] }
 0x20a   : > { %v420_v39 = vadd.f32 %v416_v36, %v407_v38  ;;  %v419_v40 = vadd.f32 %v412_v37, %v406_v0  ;;  %v2787_v36 = vcombine.high %v482_v31, %v486_v32  ;;  %v489_v37 = vld [vmem:[#allocation8 + $0x210] sm:$0xff]  ;;  %v490_v0 = vld [vmem:[#allocation8 + $0x218] sm:$0xff]  ;;  %v2786_v1 = vcombine.low %v482_v31, %v486_v32 }
 0x20b   : > { %v493_v38 = vld [vmem:[#allocation8 + $0x230] sm:$0xff] }
 0x20c   : > { %v422_v44 = vpack.c.bf16 %v420_v39, %v420_v39  ;;  %v3959_v45 = vpack.c.bf16 %v419_v40, %v419_v40  ;;  %v494_v39 = vld [vmem:[#allocation8 + $0x238] sm:$0xff]  ;;  %v2784_v40 = vcombine.low %v481_v27, %v485_v28  ;;  %v2793_v41 = vcombine.high %v489_v37, %v493_v38 }
 0x20d   : > { %v2795_v42 = vcombine.high %v490_v0, %v494_v39  ;;  %v2794_v47 = vcombine.low %v490_v0, %v494_v39 }
 0x20e   : > { %1265 = vmatprep.mubr.bf16.mxu0 %v422_v44  ;;  %1306 = vmatprep.mubr.bf16.mxu1 %v422_v44 }
 0x20f   : > { %1266 = vmatmul.mubr.bf16.vlgmr.msra.gmra.mrb[0].mxu0 %v3959_v45  ;;  %1307 = vmatmul.mubr.bf16.vlgmr.msra.gmra.mrb[0].mxu1 %v3959_v45 }
 0x210   : > { %1316 = vmatpush1.bf16.msra.mxu0 %v2728_v17  ;;  %1357 = vmatpush1.bf16.msra.mxu1 %v2730_v18  ;;  %v477_v17 = vld [vmem:[#allocation8 + $0x1b0] sm:$0xff]  ;;  %v474_v18 = vld [vmem:[#allocation8 + $0x198] sm:$0xff] }
 0x211   : > { %1347 = vmatprep.mubr.bf16.mxu0 %v422_v44  ;;  %1388 = vmatprep.mubr.bf16.mxu1 %v422_v44  ;;  %v2777_v22 = vcombine.high %v473_v16, %v477_v17  ;;  %v2779_v23 = vcombine.high %v474_v18, %v478_v19  ;;  %v2776_v33 = vcombine.low %v473_v16, %v477_v17  ;;  %v501_v44 = vld [vmem:[#allocation8 + $0x270] sm:$0xff] }
 0x212   : > { %1317 = vmatprep.subr.bf16.mxu0 %v2737_v29  ;;  %1358 = vmatprep.subr.bf16.mxu1 %v2739_v30  ;;  %v2778_v34 = vcombine.low %v474_v18, %v478_v19  ;;  %v502_v29 = vld [vmem:[#allocation8 + $0x278] sm:$0xff]  ;;  %v2792_v30 = vcombine.low %v489_v37, %v493_v38  ;;  %v2801_v48 = vcombine.high %v497_v43, %v501_v44 }
 0x213   : > { %v2803_v49 = vcombine.high %v498_v46, %v502_v29  ;;  %v2800_v54 = vcombine.low %v497_v43, %v501_v44  ;;  %v2802_v55 = vcombine.low %v498_v46, %v502_v29  ;;  %v3099_v43 = vld [vmem:[#allocation11] ss:$8 sps:$4 sm:$0xff]   ;;  %v3107_v46 = vld [vmem:[#allocation11 + $0x14] ss:$8 sps:$4 sm:$0xff]  }
 0x214   : > { %1318 = vmatpush1.bf16.msra.mxu0 %v2736_v50  ;;  %1359 = vmatpush1.bf16.msra.mxu1 %v2738_v51  ;;  %v505_v50 = vld [vmem:[#allocation8 + $0x290] sm:$0xff]  ;;  %v3110_v29 = vld [vmem:[#allocation11 + $0x114] ss:$8 sps:$4 sm:$0xff]  }
 0x215   : > { %1319 = vmatprep.subr.bf16.mxu0 %v2745_v52  ;;  %1360 = vmatprep.subr.bf16.mxu1 %v2747_v53  ;;  %v509_v51 = vld [vmem:[#allocation8 + $0x2b0] sm:$0xff]  ;;  %v506_v52 = vld [vmem:[#allocation8 + $0x298] sm:$0xff] }
 0x216   : > { %v510_v53 = vld [vmem:[#allocation8 + $0x2b8] sm:$0xff]  ;;  %v2809_v56 = vcombine.high %v505_v50, %v509_v51  ;;  %v2808_v62 = vcombine.low %v505_v50, %v509_v51  ;;  %v3102_v44 = vld [vmem:[#allocation11 + $0x100] ss:$8 sps:$4 sm:$0xff]  }
 0x217   : > { %v2811_v57 = vcombine.high %v506_v52, %v510_v53  ;;  %v2810_v63 = vcombine.low %v506_v52, %v510_v53  ;;  %v3111_v50 = vld [vmem:[#allocation11 + $0x20] ss:$8 sps:$4 sm:$0xff]   ;;  %v3119_v52 = vld [vmem:[#allocation11 + $0x34] ss:$8 sps:$4 sm:$0xff]  }
 0x218   : > { %1320 = vmatpush1.bf16.msra.mxu0 %v2744_v58  ;;  %1361 = vmatpush1.bf16.msra.mxu1 %v2746_v59  ;;  %v513_v58 = vld [vmem:[#allocation8 + $0x2d0] sm:$0xff]  ;;  %v3122_v53 = vld [vmem:[#allocation11 + $0x134] ss:$8 sps:$4 sm:$0xff]  }
 0x219   : > { %1321 = vmatprep.subr.bf16.mxu0 %v2753_v60  ;;  %1362 = vmatprep.subr.bf16.mxu1 %v2755_v61  ;;  %v517_v59 = vld [vmem:[#allocation8 + $0x2f0] sm:$0xff]  ;;  %v514_v60 = vld [vmem:[#allocation8 + $0x2d8] sm:$0xff] }
 0x21a   : > { %v518_v61 = vld [vmem:[#allocation8 + $0x2f8] sm:$0xff]  ;;  %v2817_v2 = vcombine.high %v513_v58, %v517_v59  ;;  %v2816_v8 = vcombine.low %v513_v58, %v517_v59  ;;  %v3114_v51 = vld [vmem:[#allocation11 + $0x120] ss:$8 sps:$4 sm:$0xff]  }
 0x21b   : > { %v2819_v3 = vcombine.high %v514_v60, %v518_v61  ;;  %v2818_v9 = vcombine.low %v514_v60, %v518_v61  ;;  %v3126_v58 = vld [vmem:[#allocation11 + $0x140] ss:$8 sps:$4 sm:$0xff]   ;;  %v3131_v59 = vld [vmem:[#allocation11 + $0x54] ss:$8 sps:$4 sm:$0xff]   ;;  %v3129_v61 = vld [vmem:[#allocation11 + $0x50] ss:$8 sps:$4 sm:$0xff]  }
 0x21c   : > { %1322 = vmatpush1.bf16.msra.mxu0 %v2752_v4  ;;  %1363 = vmatpush1.bf16.msra.mxu1 %v2754_v5  ;;  %v521_v4 = vld [vmem:[#allocation8 + $0x310] sm:$0xff]  ;;  %v3134_v60 = vld [vmem:[#allocation11 + $0x154] ss:$8 sps:$4 sm:$0xff]  }
 0x21d   : > { %1323 = vmatprep.subr.bf16.mxu0 %v2761_v6  ;;  %1364 = vmatprep.subr.bf16.mxu1 %v2763_v7  ;;  %v525_v5 = vld [vmem:[#allocation8 + $0x330] sm:$0xff]  ;;  %v522_v6 = vld [vmem:[#allocation8 + $0x318] sm:$0xff] }
 0x21e   : > { %v526_v7 = vld [vmem:[#allocation8 + $0x338] sm:$0xff]  ;;  %v2825_v10 = vcombine.high %v521_v4, %v525_v5  ;;  %v2824_v16 = vcombine.low %v521_v4, %v525_v5  ;;  %v3138_v4 = vld [vmem:[#allocation11 + $0x160] ss:$8 sps:$4 sm:$0xff]  }
 0x21f   : > { %v2827_v11 = vcombine.high %v522_v6, %v526_v7  ;;  %v2826_v17 = vcombine.low %v522_v6, %v526_v7  ;;  %v3143_v5 = vld [vmem:[#allocation11 + $0x74] ss:$8 sps:$4 sm:$0xff]   ;;  %v3141_v7 = vld [vmem:[#allocation11 + $0x70] ss:$8 sps:$4 sm:$0xff]  }
 0x220   : > { %1324 = vmatpush1.bf16.msra.mxu0 %v2760_v12  ;;  %1365 = vmatpush1.bf16.msra.mxu1 %v2762_v13  ;;  %v529_v12 = vld [vmem:[#allocation8 + $0x350] sm:$0xff]  ;;  %v3146_v6 = vld [vmem:[#allocation11 + $0x174] ss:$8 sps:$4 sm:$0xff]  }
 0x221   : > { %1325 = vmatprep.subr.bf16.mxu0 %v2769_v14  ;;  %1366 = vmatprep.subr.bf16.mxu1 %v2771_v15  ;;  %v533_v13 = vld [vmem:[#allocation8 + $0x370] sm:$0xff]  ;;  %v530_v14 = vld [vmem:[#allocation8 + $0x358] sm:$0xff] }
 0x222   : > { %v534_v15 = vld [vmem:[#allocation8 + $0x378] sm:$0xff]  ;;  %v2833_v18 = vcombine.high %v529_v12, %v533_v13  ;;  %v2832_v27 = vcombine.low %v529_v12, %v533_v13  ;;  %v3150_v12 = vld [vmem:[#allocation11 + $0x180] ss:$8 sps:$4 sm:$0xff]  }
 0x223   : > { %v2835_v19 = vcombine.high %v530_v14, %v534_v15  ;;  %v2834_v28 = vcombine.low %v530_v14, %v534_v15  ;;  %v3155_v13 = vld [vmem:[#allocation11 + $0x94] ss:$8 sps:$4 sm:$0xff]   ;;  %v3153_v15 = vld [vmem:[#allocation11 + $0x90] ss:$8 sps:$4 sm:$0xff]  }
 0x224   : > { %1326 = vmatpush1.bf16.msra.mxu0 %v2768_v20  ;;  %1367 = vmatpush1.bf16.msra.mxu1 %v2770_v21  ;;  %v537_v20 = vld [vmem:[#allocation8 + $0x390] sm:$0xff]  ;;  %v3158_v14 = vld [vmem:[#allocation11 + $0x194] ss:$8 sps:$4 sm:$0xff]  }
 0x225   : > { %1327 = vmatprep.subr.bf16.mxu0 %v2777_v22  ;;  %1368 = vmatprep.subr.bf16.mxu1 %v2779_v23  ;;  %v541_v21 = vld [vmem:[#allocation8 + $0x3b0] sm:$0xff]  ;;  %v538_v22 = vld [vmem:[#allocation8 + $0x398] sm:$0xff] }
 0x226   : > { %v542_v23 = vld [vmem:[#allocation8 + $0x3b8] sm:$0xff]  ;;  %v2841_v31 = vcombine.high %v537_v20, %v541_v21  ;;  %v2840_v37 = vcombine.low %v537_v20, %v541_v21  ;;  %v3162_v20 = vld [vmem:[#allocation11 + $0x1a0] ss:$8 sps:$4 sm:$0xff]  }
 0x227   : > { %v2843_v32 = vcombine.high %v538_v22, %v542_v23  ;;  %v2842_v38 = vcombine.low %v538_v22, %v542_v23  ;;  %v3167_v21 = vld [vmem:[#allocation11 + $0xb4] ss:$8 sps:$4 sm:$0xff]   ;;  %v3165_v23 = vld [vmem:[#allocation11 + $0xb0] ss:$8 sps:$4 sm:$0xff]  }
 0x228   : > { %1328 = vmatpush1.bf16.msra.mxu0 %v2776_v33  ;;  %1369 = vmatpush1.bf16.msra.mxu1 %v2778_v34  ;;  %v545_v33 = vld [vmem:[#allocation8 + $0x3d0] sm:$0xff]  ;;  %v3170_v22 = vld [vmem:[#allocation11 + $0x1b4] ss:$8 sps:$4 sm:$0xff]  }
 0x229   : > { %1329 = vmatprep.subr.bf16.mxu0 %v2785_v35  ;;  %1370 = vmatprep.subr.bf16.mxu1 %v2787_v36  ;;  %v549_v34 = vld [vmem:[#allocation8 + $0x3f0] sm:$0xff]  ;;  %v546_v35 = vld [vmem:[#allocation8 + $0x3d8] sm:$0xff] }
 0x22a   : > { %v550_v36 = vld [vmem:[#allocation8 + $0x3f8] sm:$0xff]  ;;  %v2849_v0 = vcombine.high %v545_v33, %v549_v34 }
 0x22b   : > { %v2851_v39 = vcombine.high %v546_v35, %v550_v36 }
 0x22c   : > { %1330 = vmatpush1.bf16.msra.mxu0 %v2784_v40  ;;  %1371 = vmatpush1.bf16.msra.mxu1 %v2786_v1  ;;  %v2848_v40 = vcombine.low %v545_v33, %v549_v34  ;;  %v2850_v1 = vcombine.low %v546_v35, %v550_v36  ;;  %v3174_v33 = vld [vmem:[#allocation11 + $0x1c0] ss:$8 sps:$4 sm:$0xff]   ;;  %v3179_v34 = vld [vmem:[#allocation11 + $0xd4] ss:$8 sps:$4 sm:$0xff]   ;;  %v3177_v36 = vld [vmem:[#allocation11 + $0xd0] ss:$8 sps:$4 sm:$0xff]  }
 0x22d   : > { %1331 = vmatprep.subr.bf16.mxu0 %v2793_v41  ;;  %1372 = vmatprep.subr.bf16.mxu1 %v2795_v42  ;;  %v3101_v41 = vld [vmem:[#allocation11 + $0x4] ss:$8 sps:$4 sm:$0xff]   ;;  %v3182_v35 = vld [vmem:[#allocation11 + $0x1d4] ss:$8 sps:$4 sm:$0xff]  }
 0x22e   : > { %v3104_v42 = vld [vmem:[#allocation11 + $0x104] ss:$8 sps:$4 sm:$0xff]  }
 0x230   : > { %1332 = vmatpush1.bf16.msra.mxu0 %v2792_v30  ;;  %1373 = vmatpush1.bf16.msra.mxu1 %v2794_v47  ;;  %v3105_v30 = vld [vmem:[#allocation11 + $0x10] ss:$8 sps:$4 sm:$0xff]  }
 0x231   : > { %1333 = vmatprep.subr.bf16.mxu0 %v2801_v48  ;;  %1374 = vmatprep.subr.bf16.mxu1 %v2803_v49  ;;  %v3108_v47 = vld [vmem:[#allocation11 + $0x110] ss:$8 sps:$4 sm:$0xff]   ;;  %v3113_v48 = vld [vmem:[#allocation11 + $0x24] ss:$8 sps:$4 sm:$0xff]  }
 0x232   : > { %v3116_v49 = vld [vmem:[#allocation11 + $0x124] ss:$8 sps:$4 sm:$0xff]  }
 0x234   : > { %1334 = vmatpush1.bf16.msra.mxu0 %v2800_v54  ;;  %1375 = vmatpush1.bf16.msra.mxu1 %v2802_v55  ;;  %v3117_v54 = vld [vmem:[#allocation11 + $0x30] ss:$8 sps:$4 sm:$0xff]   ;;  %v3125_v55 = vld [vmem:[#allocation11 + $0x44] ss:$8 sps:$4 sm:$0xff]  }
 0x235   : > { %1335 = vmatprep.subr.bf16.mxu0 %v2809_v56  ;;  %1376 = vmatprep.subr.bf16.mxu1 %v2811_v57  ;;  %v3128_v56 = vld [vmem:[#allocation11 + $0x144] ss:$8 sps:$4 sm:$0xff]   ;;  %v3123_v57 = vld [vmem:[#allocation11 + $0x40] ss:$8 sps:$4 sm:$0xff]  }
 0x238   : > { %1336 = vmatpush1.bf16.msra.mxu0 %v2808_v62  ;;  %1377 = vmatpush1.bf16.msra.mxu1 %v2810_v63  ;;  %v3132_v62 = vld [vmem:[#allocation11 + $0x150] ss:$8 sps:$4 sm:$0xff]   ;;  %v3137_v63 = vld [vmem:[#allocation11 + $0x64] ss:$8 sps:$4 sm:$0xff]  }
 0x239   : > { %1337 = vmatprep.subr.bf16.mxu0 %v2817_v2  ;;  %1378 = vmatprep.subr.bf16.mxu1 %v2819_v3  ;;  %v3140_v2 = vld [vmem:[#allocation11 + $0x164] ss:$8 sps:$4 sm:$0xff]   ;;  %v3135_v3 = vld [vmem:[#allocation11 + $0x60] ss:$8 sps:$4 sm:$0xff]  }
 0x23c   : > { %1338 = vmatpush1.bf16.msra.mxu0 %v2816_v8  ;;  %1379 = vmatpush1.bf16.msra.mxu1 %v2818_v9  ;;  %v3144_v8 = vld [vmem:[#allocation11 + $0x170] ss:$8 sps:$4 sm:$0xff]   ;;  %v3149_v9 = vld [vmem:[#allocation11 + $0x84] ss:$8 sps:$4 sm:$0xff]  }
 0x23d   : > { %1339 = vmatprep.subr.bf16.mxu0 %v2825_v10  ;;  %1380 = vmatprep.subr.bf16.mxu1 %v2827_v11  ;;  %v3152_v10 = vld [vmem:[#allocation11 + $0x184] ss:$8 sps:$4 sm:$0xff]   ;;  %v3147_v11 = vld [vmem:[#allocation11 + $0x80] ss:$8 sps:$4 sm:$0xff]  }
 0x240   : > { %1340 = vmatpush1.bf16.msra.mxu0 %v2824_v16  ;;  %1381 = vmatpush1.bf16.msra.mxu1 %v2826_v17  ;;  %v3156_v16 = vld [vmem:[#allocation11 + $0x190] ss:$8 sps:$4 sm:$0xff]   ;;  %v3161_v17 = vld [vmem:[#allocation11 + $0xa4] ss:$8 sps:$4 sm:$0xff]  }
 0x241   : > { %1341 = vmatprep.subr.bf16.mxu0 %v2833_v18  ;;  %1382 = vmatprep.subr.bf16.mxu1 %v2835_v19  ;;  %v3164_v18 = vld [vmem:[#allocation11 + $0x1a4] ss:$8 sps:$4 sm:$0xff]   ;;  %v3159_v19 = vld [vmem:[#allocation11 + $0xa0] ss:$8 sps:$4 sm:$0xff]  }
 0x244   : > { %1342 = vmatpush1.bf16.msra.mxu0 %v2832_v27  ;;  %1383 = vmatpush1.bf16.msra.mxu1 %v2834_v28  ;;  %v3168_v27 = vld [vmem:[#allocation11 + $0x1b0] ss:$8 sps:$4 sm:$0xff]   ;;  %v3173_v28 = vld [vmem:[#allocation11 + $0xc4] ss:$8 sps:$4 sm:$0xff]  }
 0x245   : > { %1343 = vmatprep.subr.bf16.mxu0 %v2841_v31  ;;  %1384 = vmatprep.subr.bf16.mxu1 %v2843_v32  ;;  %v3176_v31 = vld [vmem:[#allocation11 + $0x1c4] ss:$8 sps:$4 sm:$0xff]   ;;  %v3171_v32 = vld [vmem:[#allocation11 + $0xc0] ss:$8 sps:$4 sm:$0xff]  }
 0x248   : > { %1344 = vmatpush1.bf16.msra.mxu0 %v2840_v37  ;;  %1385 = vmatpush1.bf16.msra.mxu1 %v2842_v38  ;;  %v3180_v37 = vld [vmem:[#allocation11 + $0x1d0] ss:$8 sps:$4 sm:$0xff]   ;;  %v3185_v38 = vld [vmem:[#allocation11 + $0xe4] ss:$8 sps:$4 sm:$0xff]  }
 0x249   : > { %1345 = vmatprep.subr.bf16.mxu0 %v2849_v0  ;;  %1386 = vmatprep.subr.bf16.mxu1 %v2851_v39  ;;  %v3188_v0 = vld [vmem:[#allocation11 + $0x1e4] ss:$8 sps:$4 sm:$0xff]   ;;  %v3183_v39 = vld [vmem:[#allocation11 + $0xe0] ss:$8 sps:$4 sm:$0xff]  }
 0x24c   : > { %1346 = vmatpush1.bf16.msra.mxu0 %v2848_v40  ;;  %1387 = vmatpush1.bf16.msra.mxu1 %v2850_v1  ;;  %v3186_v40 = vld [vmem:[#allocation11 + $0x1e0] ss:$8 sps:$4 sm:$0xff]   ;;  %v3189_v1 = vld [vmem:[#allocation11 + $0xf0] ss:$8 sps:$4 sm:$0xff]  }
 0x24d   : > { %2393 = vmatprep.subr.bf16.mxu0 %v3101_v41  ;;  %2434 = vmatprep.subr.bf16.mxu1 %v3104_v42  ;;  %v3191_v41 = vld [vmem:[#allocation11 + $0xf4] ss:$8 sps:$4 sm:$0xff]   ;;  %v3192_v42 = vld [vmem:[#allocation11 + $0x1f0] ss:$8 sps:$4 sm:$0xff]  }
 0x24f   : > { %1348 = vmatmul.mubr.bf16.vlgmr.msra.gmra.mrb[4].mxu0 %v3959_v45  ;;  %1389 = vmatmul.mubr.bf16.vlgmr.msra.gmra.mrb[4].mxu1 %v3959_v45  ;;  %v3120_v45 = vld [vmem:[#allocation11 + $0x130] ss:$8 sps:$4 sm:$0xff]  }
 0x250   : > { %2394 = vmatpush1.bf16.msra.mxu0 %v3099_v43  ;;  %2435 = vmatpush1.bf16.msra.mxu1 %v3102_v44  ;;  %v3194_v43 = vld [vmem:[#allocation11 + $0x1f4] ss:$8 sps:$4 sm:$0xff]   ;;  %v3197_v44 = vld [vmem:[#allocation11 + $0x204] ss:$8 sps:$4 sm:$0xff]  }
 0x251   : > { %2395 = vmatprep.subr.bf16.mxu0 %v3107_v46  ;;  %2436 = vmatprep.subr.bf16.mxu1 %v3110_v29  ;;  %v3200_v46 = vld [vmem:[#allocation11 + $0x304] ss:$8 sps:$4 sm:$0xff]   ;;  %v563_v29 = vsub.s32 2, %v3945_v24 }
 0x254   : > { %2396 = vmatpush1.bf16.msra.mxu0 %v3105_v30  ;;  %2437 = vmatpush1.bf16.msra.mxu1 %v3108_v47  ;;  %v3966_v30 = vld [vmem:[#allocation10] sm:$0xff]  ;;  %v567_v47 = vsub.s32 3, %v3945_v24 }
 0x255   : > { %2397 = vmatprep.subr.bf16.mxu0 %v3113_v48  ;;  %2438 = vmatprep.subr.bf16.mxu1 %v3116_v49  ;;  %v556_v48 = vrot.slane %v3966_v30, %v3951_v26  ;;  %v564_v49 = vrot.slane %v3966_v30, %v563_v29 }
 0x258   : > { %2398 = vmatpush1.bf16.msra.mxu0 %v3111_v50  ;;  %2439 = vmatpush1.bf16.msra.mxu1 %v3114_v51  ;;  %v560_v50 = vrot.slane %v3966_v30, %v3948_v25  ;;  %v568_v51 = vrot.slane %v3966_v30, %v567_v47 }
 0x259   : > { %2399 = vmatprep.subr.bf16.mxu0 %v3119_v52  ;;  %2440 = vmatprep.subr.bf16.mxu1 %v3122_v53 }
 0x25c   : > { %2400 = vmatpush1.bf16.msra.mxu0 %v3117_v54  ;;  %2441 = vmatpush1.bf16.msra.mxu1 %v3120_v45 }
 0x25d   : > { %2401 = vmatprep.subr.bf16.mxu0 %v3125_v55  ;;  %2442 = vmatprep.subr.bf16.mxu1 %v3128_v56 }
 0x260   : > { %2402 = vmatpush1.bf16.msra.mxu0 %v3123_v57  ;;  %2443 = vmatpush1.bf16.msra.mxu1 %v3126_v58 }
 0x261   : > { %2403 = vmatprep.subr.bf16.mxu0 %v3131_v59  ;;  %2444 = vmatprep.subr.bf16.mxu1 %v3134_v60 }
 0x264   : > { %2404 = vmatpush1.bf16.msra.mxu0 %v3129_v61  ;;  %2445 = vmatpush1.bf16.msra.mxu1 %v3132_v62 }
 0x265   : > { %2405 = vmatprep.subr.bf16.mxu0 %v3137_v63  ;;  %2446 = vmatprep.subr.bf16.mxu1 %v3140_v2 }
 0x268   : > { %2406 = vmatpush1.bf16.msra.mxu0 %v3135_v3  ;;  %2447 = vmatpush1.bf16.msra.mxu1 %v3138_v4 }
 0x269   : > { %2407 = vmatprep.subr.bf16.mxu0 %v3143_v5  ;;  %2448 = vmatprep.subr.bf16.mxu1 %v3146_v6 }
 0x26c   : > { %2408 = vmatpush1.bf16.msra.mxu0 %v3141_v7  ;;  %2449 = vmatpush1.bf16.msra.mxu1 %v3144_v8 }
 0x26d   : > { %2409 = vmatprep.subr.bf16.mxu0 %v3149_v9  ;;  %2450 = vmatprep.subr.bf16.mxu1 %v3152_v10 }
 0x270   : > { %2410 = vmatpush1.bf16.msra.mxu0 %v3147_v11  ;;  %2451 = vmatpush1.bf16.msra.mxu1 %v3150_v12 }
 0x271   : > { %2411 = vmatprep.subr.bf16.mxu0 %v3155_v13  ;;  %2452 = vmatprep.subr.bf16.mxu1 %v3158_v14 }
 0x274   : > { %2412 = vmatpush1.bf16.msra.mxu0 %v3153_v15  ;;  %2453 = vmatpush1.bf16.msra.mxu1 %v3156_v16 }
 0x275   : > { %2413 = vmatprep.subr.bf16.mxu0 %v3161_v17  ;;  %2454 = vmatprep.subr.bf16.mxu1 %v3164_v18 }
 0x278   : > { %2414 = vmatpush1.bf16.msra.mxu0 %v3159_v19  ;;  %2455 = vmatpush1.bf16.msra.mxu1 %v3162_v20 }
 0x279   : > { %2415 = vmatprep.subr.bf16.mxu0 %v3167_v21  ;;  %2456 = vmatprep.subr.bf16.mxu1 %v3170_v22 }
 0x27c   : > { %2416 = vmatpush1.bf16.msra.mxu0 %v3165_v23  ;;  %2457 = vmatpush1.bf16.msra.mxu1 %v3168_v27 }
 0x27d   : > { %2417 = vmatprep.subr.bf16.mxu0 %v3173_v28  ;;  %2458 = vmatprep.subr.bf16.mxu1 %v3176_v31 }
 0x280   : > { %2418 = vmatpush1.bf16.msra.mxu0 %v3171_v32  ;;  %2459 = vmatpush1.bf16.msra.mxu1 %v3174_v33 }
 0x281   : > { %2419 = vmatprep.subr.bf16.mxu0 %v3179_v34  ;;  %2460 = vmatprep.subr.bf16.mxu1 %v3182_v35 }
 0x284   : > { %2420 = vmatpush1.bf16.msra.mxu0 %v3177_v36  ;;  %2461 = vmatpush1.bf16.msra.mxu1 %v3180_v37 }
 0x285   : > { %2421 = vmatprep.subr.bf16.mxu0 %v3185_v38  ;;  %2462 = vmatprep.subr.bf16.mxu1 %v3188_v0 }
 0x288   : > { %2422 = vmatpush1.bf16.msra.mxu0 %v3183_v39  ;;  %2463 = vmatpush1.bf16.msra.mxu1 %v3186_v40 }
 0x289   : > { %2423 = vmatprep.subr.bf16.mxu0 %v3191_v41  ;;  %2464 = vmatprep.subr.bf16.mxu1 %v3194_v43 }
 0x28c   : > { %2424 = vmatpush1.bf16.msra.mxu0 %v3189_v1  ;;  %2465 = vmatpush1.bf16.msra.mxu1 %v3192_v42 }
 0x28d   : > { %2475 = vmatprep.subr.bf16.mxu0 %v3197_v44  ;;  %2516 = vmatprep.subr.bf16.mxu1 %v3200_v46 }
 0x2e2   : > { %v1267_v52 = vpop.f32.mrb[0].mxu0  ;;  %v1308_v53 = vpop.f32.mrb[0].mxu1 }
 0x2e3   : > { %v3975_v54 = vadd.f32 %v1267_v52, %v556_v48  ;;  %v3977_v45 = vadd.f32 %v1308_v53, %v564_v49  ;;  %v1269_v55 = vpop.f32.mrb[1].mxu0  ;;  %v1310_v56 = vpop.f32.mrb[1].mxu1 }
 0x2e4   : > { %v3979_v57 = vadd.f32 %v1269_v55, %v560_v50  ;;  %v3981_v58 = vadd.f32 %v1310_v56, %v568_v51  ;;  %v1271_v59 = vpop.f32.mrb[2].mxu0  ;;  %v1312_v60 = vpop.f32.mrb[2].mxu1 }
 0x2e5   : > { %v3984_v61 = vmul.f32 0.70710677, %v3975_v54  ;;  %v3987_v62 = vmul.f32 0.70710677, %v3977_v45  ;;  %v1272_v6 = vpop.f32.mrb[3].mxu0  ;;  %v1313_v10 = vpop.f32.mrb[3].mxu1 }
 0x2e6   : > { %v3990_v63 = vmul.f32 0.70710677, %v3979_v57  ;;  %v3996_v5 = vmul.f32 0.70710677, %v3981_v58 }
 0x2e7   : > { %v1429_v2 = vand.u32 2147483647, %v3984_v61  ;;  %v1431_v3 = vand.u32 2147483647, %v3987_v62  ;;  %vm1413_vm0 = vcmp.ge.f32.partialorder %v3984_v61, 0.0  ;;  %vm1415_vm1 = vcmp.ge.f32.partialorder %v3987_v62, 0.0 }
 0x2e8   : > { %v1430_v4 = vand.u32 2147483647, %v3990_v63  ;;  %v1432_v13 = vand.u32 2147483647, %v3996_v5  ;;  %vm1414_vm2 = vcmp.ge.f32.partialorder %v3990_v63, 0.0  ;;  %vm1416_vm3 = vcmp.ge.f32.partialorder %v3996_v5, 0.0 }
 0x2e9   : > { %v1437_v7 = vmul.f32 0.3275911, %v1429_v2  ;;  %v1439_v8 = vmul.f32 0.3275911, %v1431_v3  ;;  %v1533_v17 = vsub.f32 0.0, %v1429_v2  ;;  %v1535_v18 = vsub.f32 0.0, %v1431_v3 }
 0x2ea   : > { %v1438_v9 = vmul.f32 0.3275911, %v1430_v4  ;;  %v1440_v15 = vmul.f32 0.3275911, %v1432_v13  ;;  %v1534_v21 = vsub.f32 0.0, %v1430_v4  ;;  %v1536_v31 = vsub.f32 0.0, %v1432_v13 }
 0x2eb   : > { %v1445_v11 = vadd.f32 1.0, %v1437_v7  ;;  %v1447_v12 = vadd.f32 1.0, %v1439_v8  ;;  %v1541_v20 = vmul.f32 %v1533_v17, %v1429_v2  ;;  %v1543_v27 = vmul.f32 %v1535_v18, %v1431_v3 }
 0x2ec   : > { %v1446_v14 = vadd.f32 1.0, %v1438_v9  ;;  %v1448_v16 = vadd.f32 1.0, %v1440_v15  ;;  %v1542_v36 = vmul.f32 %v1534_v21, %v1430_v4  ;;  %v1544_v1 = vmul.f32 %v1536_v31, %v1432_v13 }
 0x2ed   : > { %3293 = vrcp.f32 %v1445_v11  ;;  %v1549_v34 = vmul.f32 1.442695, %v1541_v20  ;;  %v1553_v38 = vmul.f32 1.442695, %v1543_v27  ;;  %v3616_v27 = vmov -1.0  }
 0x2ee   : > { %3295 = vrcp.f32 %v1447_v12  ;;  %v1551_v46 = vmul.f32 1.442695, %v1542_v36  ;;  %v1555_v50 = vmul.f32 1.442695, %v1544_v1  ;;  %v1398_v63 = vmul.f32 0.5, %v3979_v57 }
 0x2ef   : > { %3297 = vrcp.f32 %v1446_v14  ;;  %v1400_v5 = vmul.f32 0.5, %v3981_v58  ;;  %v3206_v57 = vld [vmem:[#allocation11 + $0x314] ss:$8 sps:$4 sm:$0xff]   ;;  %v3201_v58 = vld [vmem:[#allocation11 + $0x210] ss:$8 sps:$4 sm:$0xff]  }
 0x2f0   : > { %3299 = vrcp.f32 %v1448_v16 }
 0x2f1   : > { %3301 = vpow2.f32 %v1549_v34 }
 0x2f2   : > { %3303 = vpow2.f32 %v1553_v38 }
 0x2f3   : > { %3305 = vpow2.f32 %v1551_v46 }
 0x2f4   : > { %3307 = vpow2.f32 %v1555_v50  ;;  %v3195_v50 = vld [vmem:[#allocation11 + $0x200] ss:$8 sps:$4 sm:$0xff]  }
 0x2f7   : > { %v3294_v19 = vpop.eup %3293 }
 0x2f8   : > { %v3296_v22 = vpop.eup %3295  ;;  %v1461_v23 = vmul.f32 1.0614054, %v3294_v19 }
 0x2f9   : > { %v1463_v28 = vmul.f32 1.0614054, %v3296_v22  ;;  %v3298_v33 = vpop.eup %3297 }
 0x2fa   : > { %v1469_v32 = vadd.f32 -1.4531521, %v1461_v23  ;;  %v1462_v0 = vmul.f32 1.0614054, %v3298_v33  ;;  %v3300_v39 = vpop.eup %3299 }
 0x2fb   : > { %v1471_v35 = vadd.f32 -1.4531521, %v1463_v28  ;;  %v1464_v43 = vmul.f32 1.0614054, %v3300_v39  ;;  %v3302_v11 = vpop.eup %3301  ;;  %v1423_v28 = vsel %vm1415_vm1, 1.0, %v3616_v27 }
 0x2fc   : > { %v1477_v37 = vmul.f32 %v3294_v19, %v1469_v32  ;;  %v1470_v42 = vadd.f32 -1.4531521, %v1462_v0  ;;  %v3304_v13 = vpop.eup %3303 }
 0x2fd   : > { %v1479_v40 = vmul.f32 %v3296_v22, %v1471_v35  ;;  %v1472_v48 = vadd.f32 -1.4531521, %v1464_v43  ;;  %v3306_v23 = vpop.eup %3305 }
 0x2fe   : > { %v1485_v41 = vadd.f32 1.4214138, %v1477_v37  ;;  %v1478_v47 = vmul.f32 %v3298_v33, %v1470_v42  ;;  %v3308_v34 = vpop.eup %3307  ;;  %v1422_v37 = vsel %vm1414_vm2, 1.0, %v3616_v27 }
 0x2ff   : > { %v1487_v44 = vadd.f32 1.4214138, %v1479_v40  ;;  %v1480_v53 = vmul.f32 %v3300_v39, %v1472_v48  ;;  %v1397_v40 = vmul.f32 0.5, %v3975_v54  ;;  %v3203_v54 = vld [vmem:[#allocation11 + $0x214] ss:$8 sps:$4 sm:$0xff]  }
 0x300   : > { %v1493_v29 = vmul.f32 %v3294_v19, %v1485_v41  ;;  %v1486_v52 = vadd.f32 1.4214138, %v1478_v47  ;;  %v1424_v41 = vsel %vm1416_vm3, 1.0, %v3616_v27 }
 0x301   : > { %v1495_v49 = vmul.f32 %v3296_v22, %v1487_v44  ;;  %v1488_v60 = vadd.f32 1.4214138, %v1480_v53  ;;  %v1399_v44 = vmul.f32 0.5, %v3977_v45  ;;  %v3198_v53 = vld [vmem:[#allocation11 + $0x300] ss:$8 sps:$4 sm:$0xff]   ;;  %v579_v45 = vsub.s32 6, %v3945_v24 }
 0x302   : > { %v1501_v51 = vadd.f32 -0.28449672, %v1493_v29  ;;  %v1494_v59 = vmul.f32 %v3298_v33, %v1486_v52 }
 0x303   : > { %v1503_v55 = vadd.f32 -0.28449672, %v1495_v49  ;;  %v1496_v6 = vmul.f32 %v3300_v39, %v1488_v60  ;;  %v583_v60 = vsub.s32 7, %v3945_v24 }
 0x304   : > { %v1509_v56 = vmul.f32 %v3294_v19, %v1501_v51  ;;  %v1502_v4 = vadd.f32 -0.28449672, %v1494_v59  ;;  %v575_v59 = vsub.s32 5, %v3945_v24 }
 0x305   : > { %v1511_v2 = vmul.f32 %v3296_v22, %v1503_v55  ;;  %v1504_v10 = vadd.f32 -0.28449672, %v1496_v6 }
 0x306   : > { %v1517_v3 = vadd.f32 0.2548296, %v1509_v56  ;;  %v1510_v9 = vmul.f32 %v3298_v33, %v1502_v4  ;;  %v571_v56 = vsub.s32 4, %v3945_v24  ;;  %v3212_v4 = vld [vmem:[#allocation11 + $0x324] ss:$8 sps:$4 sm:$0xff]  }
 0x307   : > { %v1519_v7 = vadd.f32 0.2548296, %v1511_v2  ;;  %v1512_v16 = vmul.f32 %v3300_v39, %v1504_v10  ;;  %v3209_v2 = vld [vmem:[#allocation11 + $0x224] ss:$8 sps:$4 sm:$0xff]   ;;  %v584_v10 = vrot.slane %v3966_v30, %v583_v60  ;;  %v3210_v24 = vld [vmem:[#allocation11 + $0x320] ss:$8 sps:$4 sm:$0xff]  }
 0x308   : > { %v1525_v8 = vmul.f32 %v3294_v19, %v1517_v3  ;;  %v1518_v15 = vadd.f32 0.2548296, %v1510_v9  ;;  %v1421_v19 = vsel %vm1413_vm0, 1.0, %v3616_v27  ;;  %v3204_v3 = vld [vmem:[#allocation11 + $0x310] ss:$8 sps:$4 sm:$0xff]   ;;  %v572_v6 = vrot.slane %v3966_v30, %v571_v56 }
 0x309   : > { %v1527_v12 = vmul.f32 %v3296_v22, %v1519_v7  ;;  %v1520_v21 = vadd.f32 0.2548296, %v1512_v16  ;;  %v580_v7 = vrot.slane %v3966_v30, %v579_v45  ;;  %v576_v9 = vrot.slane %v3966_v30, %v575_v59  ;;  %v3237_v45 = vld [vmem:[#allocation11 + $0x270] ss:$8 sps:$4 sm:$0xff]  }
 0x30a   : > { %v1565_v14 = vmul.f32 %v3302_v11, %v1525_v8  ;;  %v1526_v20 = vmul.f32 %v3298_v33, %v1518_v15  ;;  %v3207_v8 = vld [vmem:[#allocation11 + $0x220] ss:$8 sps:$4 sm:$0xff]   ;;  %v3215_v11 = vld [vmem:[#allocation11 + $0x234] ss:$8 sps:$4 sm:$0xff]   ;;  %v3240_v59 = vld [vmem:[#allocation11 + $0x370] ss:$8 sps:$4 sm:$0xff]  }
 0x30b   : > { %v1567_v17 = vmul.f32 %v3304_v13, %v1527_v12  ;;  %v1528_v22 = vmul.f32 %v3300_v39, %v1520_v21 }
 0x30c   : > { %v1573_v18 = vsub.f32 1.0, %v1565_v14  ;;  %v1566_v61 = vmul.f32 %v3306_v23, %v1526_v20 }
 0x30d   : > { %v1575_v31 = vsub.f32 1.0, %v1567_v17  ;;  %v1568_v36 = vmul.f32 %v3308_v34, %v1528_v22  ;;  %v3216_v22 = vld [vmem:[#allocation11 + $0x330] ss:$8 sps:$4 sm:$0xff]   ;;  %v3224_v34 = vld [vmem:[#allocation11 + $0x344] ss:$8 sps:$4 sm:$0xff]  }
 0x30e   : > { %v1581_v32 = vmul.f32 %v1573_v18, %v1421_v19  ;;  %v1574_v35 = vsub.f32 1.0, %v1566_v61  ;;  %v3218_v18 = vld [vmem:[#allocation11 + $0x334] ss:$8 sps:$4 sm:$0xff]   ;;  %v3213_v19 = vld [vmem:[#allocation11 + $0x230] ss:$8 sps:$4 sm:$0xff]  }
 0x30f   : > { %v1583_v62 = vmul.f32 %v1575_v31, %v1423_v28  ;;  %v1576_v0 = vsub.f32 1.0, %v1568_v36  ;;  %v3219_v36 = vld [vmem:[#allocation11 + $0x240] ss:$8 sps:$4 sm:$0xff]  }
 0x310   : > { %v1589_v33 = vadd.f32 1.0, %v1581_v32  ;;  %v1582_v38 = vmul.f32 %v1574_v35, %v1422_v37  ;;  %v3221_v32 = vld [vmem:[#allocation11 + $0x244] ss:$8 sps:$4 sm:$0xff]  }
 0x311   : > { %v1591_v1 = vadd.f32 1.0, %v1583_v62  ;;  %v1584_v42 = vmul.f32 %v1576_v0, %v1424_v41 }
 0x312   : > { %v1590_v39 = vadd.f32 1.0, %v1582_v38  ;;  %v1597_v43 = vmul.f32 %v1589_v33, %v1397_v40 }
 0x313   : > { %v1592_v29 = vadd.f32 1.0, %v1584_v42  ;;  %v1599_v47 = vmul.f32 %v1591_v1, %v1399_v44  ;;  %v3227_v1 = vld [vmem:[#allocation11 + $0x254] ss:$8 sps:$4 sm:$0xff]   ;;  %v3222_v42 = vld [vmem:[#allocation11 + $0x340] ss:$8 sps:$4 sm:$0xff]  }
 0x314   : > { %v1598_v46 = vmul.f32 %v1590_v39, %v1398_v63  ;;  %v1605_v51 = vpack.c.bf16 %v1597_v43, %v1597_v43  ;;  %v3230_v44 = vld [vmem:[#allocation11 + $0x354] ss:$8 sps:$4 sm:$0xff]  }
 0x315   : > { %v1600_v49 = vmul.f32 %v1592_v29, %v1400_v5  ;;  %v1607_v55 = vpack.c.bf16 %v1599_v47, %v1599_v47  ;;  %v3233_v47 = vld [vmem:[#allocation11 + $0x264] ss:$8 sps:$4 sm:$0xff]  }
 0x316   : > { %v1606_v48 = vpack.c.bf16 %v1598_v46, %v1598_v46  ;;  %v3225_v46 = vld [vmem:[#allocation11 + $0x250] ss:$8 sps:$4 sm:$0xff]  }
 0x317   : > { %v1608_v52 = vpack.c.bf16 %v1600_v49, %v1600_v49  ;;  %v3228_v49 = vld [vmem:[#allocation11 + $0x350] ss:$8 sps:$4 sm:$0xff]  }
 0x318   : > { %2425 = vmatprep.mubr.bf16.mxu0 %v1606_v48 }
 0x319   : > { %2426 = vmatmul.mubr.bf16.vlgmr.msra.gmra.mrb[8].mxu0 %v1605_v51  ;;  %2466 = vmatprep.mubr.bf16.mxu1 %v1608_v52  ;;  %v3239_v52 = vld [vmem:[#allocation11 + $0x274] ss:$8 sps:$4 sm:$0xff]  }
 0x31a   : > { %2476 = vmatpush1.bf16.msra.mxu0 %v3195_v50  ;;  %2467 = vmatmul.mubr.bf16.vlgmr.msra.gmra.mrb[8].mxu1 %v1607_v55  ;;  %v3236_v50 = vld [vmem:[#allocation11 + $0x364] ss:$8 sps:$4 sm:$0xff]  }
 0x31b   : > { %2477 = vmatprep.subr.bf16.mxu0 %v3203_v54  ;;  %2517 = vmatpush1.bf16.msra.mxu1 %v3198_v53  ;;  %v3231_v54 = vld [vmem:[#allocation11 + $0x260] ss:$8 sps:$4 sm:$0xff]  }
 0x31c   : > { %2518 = vmatprep.subr.bf16.mxu1 %v3206_v57  ;;  %v3234_v53 = vld [vmem:[#allocation11 + $0x360] ss:$8 sps:$4 sm:$0xff]   ;;  %v3242_v57 = vld [vmem:[#allocation11 + $0x374] ss:$8 sps:$4 sm:$0xff]  }
 0x31e   : > { %2478 = vmatpush1.bf16.msra.mxu0 %v3201_v58  ;;  %v3245_v58 = vld [vmem:[#allocation11 + $0x284] ss:$8 sps:$4 sm:$0xff]  }
 0x31f   : > { %2479 = vmatprep.subr.bf16.mxu0 %v3209_v2  ;;  %2519 = vmatpush1.bf16.msra.mxu1 %v3204_v3 }
 0x320   : > { %2520 = vmatprep.subr.bf16.mxu1 %v3212_v4  ;;  %v3248_v4 = vld [vmem:[#allocation11 + $0x384] ss:$8 sps:$4 sm:$0xff]  }
 0x322   : > { %v1349_v12 = vpop.f32.mrb[4].mxu0  ;;  %v1390_v13 = vpop.f32.mrb[4].mxu1  ;;  %2480 = vmatpush1.bf16.msra.mxu0 %v3207_v8 }
 0x323   : > { %v4019_v14 = vadd.f32 %v1349_v12, %v572_v6  ;;  %v4021_v15 = vadd.f32 %v1390_v13, %v580_v7  ;;  %v1351_v16 = vpop.f32.mrb[5].mxu0  ;;  %v1392_v17 = vpop.f32.mrb[5].mxu1  ;;  %2481 = vmatprep.subr.bf16.mxu0 %v3215_v11  ;;  %2521 = vmatpush1.bf16.msra.mxu1 %v3210_v24  ;;  %v3251_v24 = vld [vmem:[#allocation11 + $0x294] ss:$8 sps:$4 sm:$0xff]   ;;  %v3246_v13 = vld [vmem:[#allocation11 + $0x380] ss:$8 sps:$4 sm:$0xff]  }
 0x324   : > { %v4023_v20 = vadd.f32 %v1351_v16, %v576_v9  ;;  %v4025_v21 = vadd.f32 %v1392_v17, %v584_v10  ;;  %v1353_v30 = vpop.f32.mrb[6].mxu0  ;;  %v1394_v23 = vpop.f32.mrb[6].mxu1  ;;  %2522 = vmatprep.subr.bf16.mxu1 %v3218_v18  ;;  %v3243_v9 = vld [vmem:[#allocation11 + $0x280] ss:$8 sps:$4 sm:$0xff]  }
 0x325   : > { %v4028_v28 = vmul.f32 0.70710677, %v4019_v14  ;;  %v4031_v31 = vmul.f32 0.70710677, %v4021_v15  ;;  %v1354_v38 = vpop.f32.mrb[7].mxu0  ;;  %v1395_v63 = vpop.f32.mrb[7].mxu1 }
 0x326   : > { %v4034_v61 = vmul.f32 0.70710677, %v4023_v20  ;;  %v4042_v37 = vmul.f32 0.70710677, %v4025_v21  ;;  %2482 = vmatpush1.bf16.msra.mxu0 %v3213_v19  ;;  %v3254_v23 = vld [vmem:[#allocation11 + $0x394] ss:$8 sps:$4 sm:$0xff]  }
 0x327   : > { %v1433_v62 = vand.u32 2147483647, %v4028_v28  ;;  %v1435_v35 = vand.u32 2147483647, %v4031_v31  ;;  %2483 = vmatprep.subr.bf16.mxu0 %v3221_v32  ;;  %2523 = vmatpush1.bf16.msra.mxu1 %v3216_v22  ;;  %v3252_v38 = vld [vmem:[#allocation11 + $0x390] ss:$8 sps:$4 sm:$0xff]  }
 0x328   : > { %v4039_v33 = vand.u32 2147483647, %v4034_v61  ;;  %2524 = vmatprep.subr.bf16.mxu1 %v3224_v34  ;;  %v1436_v5 = vand.u32 2147483647, %v4042_v37  ;;  %v3249_v34 = vld [vmem:[#allocation11 + $0x290] ss:$8 sps:$4 sm:$0xff]  }
 0x329   : > { %v1441_v0 = vmul.f32 0.3275911, %v1433_v62  ;;  %v1443_v40 = vmul.f32 0.3275911, %v1435_v35  ;;  %v1537_v55 = vsub.f32 0.0, %v1433_v62  ;;  %v1539_v56 = vsub.f32 0.0, %v1435_v35 }
 0x32a   : > { %v1442_v41 = vmul.f32 0.3275911, %v4039_v33  ;;  %2484 = vmatpush1.bf16.msra.mxu0 %v3219_v36  ;;  %v1444_v48 = vmul.f32 0.3275911, %v1436_v5  ;;  %v1538_v3 = vsub.f32 0.0, %v4039_v33  ;;  %v1540_v11 = vsub.f32 0.0, %v1436_v5 }
 0x32b   : > { %v1449_v39 = vadd.f32 1.0, %v1441_v0  ;;  %v1451_v43 = vadd.f32 1.0, %v1443_v40  ;;  %2485 = vmatprep.subr.bf16.mxu0 %v3227_v1  ;;  %2525 = vmatpush1.bf16.msra.mxu1 %v3222_v42  ;;  %v1545_v2 = vmul.f32 %v1537_v55, %v1433_v62  ;;  %v1547_v8 = vmul.f32 %v1539_v56, %v1435_v35  ;;  %v3257_v0 = vld [vmem:[#allocation11 + $0x2a4] ss:$8 sps:$4 sm:$0xff]   ;;  %v3261_v56 = vld [vmem:[#allocation11 + $0x2b0] ss:$8 sps:$4 sm:$0xff]  }
 0x32c   : > { %v1450_v29 = vadd.f32 1.0, %v1442_v41  ;;  %2526 = vmatprep.subr.bf16.mxu1 %v3230_v44  ;;  %v1452_v51 = vadd.f32 1.0, %v1444_v48  ;;  %v1546_v30 = vmul.f32 %v1538_v3, %v4039_v33  ;;  %v1548_v36 = vmul.f32 %v1540_v11, %v1436_v5  ;;  %v3260_v42 = vld [vmem:[#allocation11 + $0x3a4] ss:$8 sps:$4 sm:$0xff]   ;;  %v3255_v5 = vld [vmem:[#allocation11 + $0x2a0] ss:$8 sps:$4 sm:$0xff]  }
 0x32d   : > { %3309 = vrcp.f32 %v1449_v39  ;;  %v1557_v17 = vmul.f32 1.442695, %v1545_v2  ;;  %v1561_v32 = vmul.f32 1.442695, %v1547_v8  ;;  %v3272_v8 = vld [vmem:[#allocation11 + $0x3c4] ss:$8 sps:$4 sm:$0xff]  }
 0x32e   : > { %3311 = vrcp.f32 %v1451_v43  ;;  %2486 = vmatpush1.bf16.msra.mxu0 %v3225_v46  ;;  %v1559_v63 = vmul.f32 1.442695, %v1546_v30  ;;  %vm1417_vm4 = vcmp.ge.f32.partialorder %v4028_v28, 0.0  ;;  %vm1419_vm5 = vcmp.ge.f32.partialorder %v4031_v31, 0.0 }
 0x32f   : > { %3313 = vrcp.f32 %v1450_v29  ;;  %2487 = vmatprep.subr.bf16.mxu0 %v3233_v47  ;;  %2527 = vmatpush1.bf16.msra.mxu1 %v3228_v49  ;;  %v1563_v29 = vmul.f32 1.442695, %v1548_v36  ;;  %v3263_v47 = vld [vmem:[#allocation11 + $0x2b4] ss:$8 sps:$4 sm:$0xff]   ;;  %v1427_v31 = vsel %vm1419_vm5, 1.0, %v3616_v27  ;;  %vm1418_vm6 = vcmp.ge.f32.partialorder %v4034_v61, 0.0 }
 0x330   : > { %3315 = vrcp.f32 %v1452_v51  ;;  %2528 = vmatprep.subr.bf16.mxu1 %v3236_v50  ;;  %v3258_v51 = vld [vmem:[#allocation11 + $0x3a0] ss:$8 sps:$4 sm:$0xff]   ;;  %vm1420_vm7 = vcmp.ge.f32.partialorder %v4042_v37, 0.0  ;;  %v3287_v61 = vld [vmem:[#allocation11 + $0x2f4] ss:$8 sps:$4 sm:$0xff]   ;;  %v1402_v37 = vmul.f32 0.5, %v4023_v20 }
 0x331   : > { %3317 = vpow2.f32 %v1557_v17  ;;  %v3275_v17 = vld [vmem:[#allocation11 + $0x2d4] ss:$8 sps:$4 sm:$0xff]  }
 0x332   : > { %2488 = vmatpush1.bf16.msra.mxu0 %v3231_v54  ;;  %3319 = vpow2.f32 %v1561_v32 }
 0x333   : > { %2489 = vmatprep.subr.bf16.mxu0 %v3239_v52  ;;  %2529 = vmatpush1.bf16.msra.mxu1 %v3234_v53  ;;  %3321 = vpow2.f32 %v1559_v63  ;;  %v3266_v52 = vld [vmem:[#allocation11 + $0x3b4] ss:$8 sps:$4 sm:$0xff]  }
 0x334   : > { %2530 = vmatprep.subr.bf16.mxu1 %v3242_v57  ;;  %3323 = vpow2.f32 %v1563_v29  ;;  %v1426_v29 = vsel %vm1418_vm6, 1.0, %v3616_v27 }
 0x336   : > { %2490 = vmatpush1.bf16.msra.mxu0 %v3237_v45 }
 0x337   : > { %v4046_v60 = vpop.eup %3309  ;;  %2491 = vmatprep.subr.bf16.mxu0 %v3245_v58  ;;  %2531 = vmatpush1.bf16.msra.mxu1 %v3240_v59  ;;  %v3269_v58 = vld [vmem:[#allocation11 + $0x2c4] ss:$8 sps:$4 sm:$0xff]  }
 0x338   : > { %v4049_v6 = vpop.eup %3311  ;;  %v1465_v7 = vmul.f32 1.0614054, %v4046_v60  ;;  %2532 = vmatprep.subr.bf16.mxu1 %v3248_v4  ;;  %v3264_v4 = vld [vmem:[#allocation11 + $0x3b0] ss:$8 sps:$4 sm:$0xff]  }
 0x339   : > { %v1467_v10 = vmul.f32 1.0614054, %v4049_v6  ;;  %v4053_v16 = vpop.eup %3313 }
 0x33a   : > { %v1473_v12 = vadd.f32 -1.4531521, %v1465_v7  ;;  %v1466_v22 = vmul.f32 1.0614054, %v4053_v16  ;;  %2492 = vmatpush1.bf16.msra.mxu0 %v3243_v9  ;;  %v4058_v62 = vpop.eup %3315 }
 0x33b   : > { %v1475_v18 = vadd.f32 -1.4531521, %v1467_v10  ;;  %2493 = vmatprep.subr.bf16.mxu0 %v3251_v24  ;;  %v1468_v33 = vmul.f32 1.0614054, %v4058_v62  ;;  %2533 = vmatpush1.bf16.msra.mxu1 %v3246_v13  ;;  %v3267_v24 = vld [vmem:[#allocation11 + $0x2c0] ss:$8 sps:$4 sm:$0xff]  }
 0x33c   : > { %v1481_v19 = vmul.f32 %v4046_v60, %v1473_v12  ;;  %v1474_v1 = vadd.f32 -1.4531521, %v1466_v22  ;;  %2534 = vmatprep.subr.bf16.mxu1 %v3254_v23  ;;  %v3318_v12 = vpop.eup %3317  ;;  %v3278_v22 = vld [vmem:[#allocation11 + $0x3d4] ss:$8 sps:$4 sm:$0xff]  }
 0x33d   : > { %v1483_v35 = vmul.f32 %v4049_v6, %v1475_v18  ;;  %v1476_v44 = vadd.f32 -1.4531521, %v1468_v33  ;;  %v3320_v18 = vpop.eup %3319 }
 0x33e   : > { %v1489_v40 = vadd.f32 1.4214138, %v1481_v19  ;;  %v1482_v43 = vmul.f32 %v4053_v16, %v1474_v1  ;;  %2494 = vmatpush1.bf16.msra.mxu0 %v3249_v34  ;;  %v3281_v1 = vld [vmem:[#allocation11 + $0x2e4] ss:$8 sps:$4 sm:$0xff]  }
 0x33f   : > { %v1491_v41 = vadd.f32 1.4214138, %v1483_v35  ;;  %2495 = vmatprep.subr.bf16.mxu0 %v3257_v0  ;;  %v1484_v50 = vmul.f32 %v4058_v62, %v1476_v44  ;;  %2535 = vmatpush1.bf16.msra.mxu1 %v3252_v38  ;;  %v3322_v38 = vpop.eup %3321  ;;  %v1425_v0 = vsel %vm1417_vm4, 1.0, %v3616_v27 }
 0x340   : > { %v1497_v39 = vmul.f32 %v4046_v60, %v1489_v40  ;;  %v1490_v49 = vadd.f32 1.4214138, %v1482_v43  ;;  %2536 = vmatprep.subr.bf16.mxu1 %v3260_v42  ;;  %v3324_v42 = vpop.eup %3323  ;;  %v3284_v43 = vld [vmem:[#allocation11 + $0x3e4] ss:$8 sps:$4 sm:$0xff]  }
 0x341   : > { %v1499_v46 = vmul.f32 %v4049_v6, %v1491_v41  ;;  %v1492_v57 = vadd.f32 1.4214138, %v1484_v50 }
 0x342   : > { %v1505_v48 = vadd.f32 -0.28449672, %v1497_v39  ;;  %v1498_v55 = vmul.f32 %v4053_v16, %v1490_v49  ;;  %2496 = vmatpush1.bf16.msra.mxu0 %v3255_v5  ;;  %v3279_v5 = vld [vmem:[#allocation11 + $0x2e0] ss:$8 sps:$4 sm:$0xff]   ;;  %v1401_v49 = vmul.f32 0.5, %v4019_v14 }
 0x343   : > { %v1507_v54 = vadd.f32 -0.28449672, %v1499_v46  ;;  %2497 = vmatprep.subr.bf16.mxu0 %v3263_v47  ;;  %v1500_v3 = vmul.f32 %v4058_v62, %v1492_v57  ;;  %2537 = vmatpush1.bf16.msra.mxu1 %v3258_v51  ;;  %v1428_v51 = vsel %vm1420_vm7, 1.0, %v3616_v27 }
 0x344   : > { %v1513_v53 = vmul.f32 %v4046_v60, %v1505_v48  ;;  %v1506_v2 = vadd.f32 -0.28449672, %v1498_v55  ;;  %2538 = vmatprep.subr.bf16.mxu1 %v3266_v52 }
 0x345   : > { %v1515_v45 = vmul.f32 %v4049_v6, %v1507_v54  ;;  %v1508_v11 = vadd.f32 -0.28449672, %v1500_v3  ;;  %v3290_v54 = vld [vmem:[#allocation11 + $0x3f4] ss:$8 sps:$4 sm:$0xff]  }
 0x346   : > { %v1521_v59 = vadd.f32 0.2548296, %v1513_v53  ;;  %v1514_v10 = vmul.f32 %v4053_v16, %v1506_v2  ;;  %2498 = vmatpush1.bf16.msra.mxu0 %v3261_v56  ;;  %v3285_v53 = vld [vmem:[#allocation11 + $0x2f0] ss:$8 sps:$4 sm:$0xff]   ;;  %v1403_v56 = vmul.f32 0.5, %v4021_v15 }
 0x347   : > { %v1523_v7 = vadd.f32 0.2548296, %v1515_v45  ;;  %2499 = vmatprep.subr.bf16.mxu0 %v3269_v58  ;;  %v1516_v19 = vmul.f32 %v4058_v62, %v1508_v11  ;;  %2539 = vmatpush1.bf16.msra.mxu1 %v3264_v4  ;;  %v1404_v45 = vmul.f32 0.5, %v4025_v21  ;;  %v3288_v58 = vld [vmem:[#allocation11 + $0x3f0] ss:$8 sps:$4 sm:$0xff]  }
 0x348   : > { %v1529_v9 = vmul.f32 %v4046_v60, %v1521_v59  ;;  %v1522_v23 = vadd.f32 0.2548296, %v1514_v10  ;;  %v3270_v60 = vld [vmem:[#allocation11 + $0x3c0] ss:$8 sps:$4 sm:$0xff]   ;;  %2540 = vmatprep.subr.bf16.mxu1 %v3272_v8 }
 0x349   : > { %v1531_v13 = vmul.f32 %v4049_v6, %v1523_v7  ;;  %v1524_v36 = vadd.f32 0.2548296, %v1516_v19  ;;  %v3273_v6 = vld [vmem:[#allocation11 + $0x2d0] ss:$8 sps:$4 sm:$0xff]   ;;  %v1741_v15 = vld [vmem:[#allocation13] sm:$0x3] }
 0x34a   : > { %v1569_v30 = vmul.f32 %v3318_v12, %v1529_v9  ;;  %v1530_v35 = vmul.f32 %v4053_v16, %v1522_v23  ;;  %2500 = vmatpush1.bf16.msra.mxu0 %v3267_v24  ;;  %v3276_v16 = vld [vmem:[#allocation11 + $0x3d0] ss:$8 sps:$4 sm:$0xff]   ;;  %v1746_v21 = vrot.slane %v1741_v15, %v3951_v26  ;;  %v1750_v8 = vrot.slane %v1741_v15, %v3948_v25 }
 0x34b   : > { %v1571_v32 = vmul.f32 %v3320_v18, %v1531_v13  ;;  %2501 = vmatprep.subr.bf16.mxu0 %v3275_v17  ;;  %v1532_v63 = vmul.f32 %v4058_v62, %v1524_v36  ;;  %2541 = vmatpush1.bf16.msra.mxu1 %v3270_v60  ;;  %v3282_v62 = vld [vmem:[#allocation11 + $0x3e0] ss:$8 sps:$4 sm:$0xff]  }
 0x34c   : > { %v1577_v34 = vsub.f32 1.0, %v1569_v30  ;;  %v1570_v41 = vmul.f32 %v3322_v38, %v1530_v35  ;;  %2542 = vmatprep.subr.bf16.mxu1 %v3278_v22 }
 0x34d   : > { %v1579_v40 = vsub.f32 1.0, %v1571_v32  ;;  %v1572_v28 = vmul.f32 %v3324_v42, %v1532_v63 }
 0x34e   : > { %v1585_v33 = vmul.f32 %v1577_v34, %v1425_v0  ;;  %v1578_v44 = vsub.f32 1.0, %v1570_v41  ;;  %2502 = vmatpush1.bf16.msra.mxu0 %v3273_v6  ;;  %v3326_v41 = vld [vmem:[%s3909_s16 + $0x8] sm:$0xff] }
 0x34f   : > { %v1587_v39 = vmul.f32 %v1579_v40, %v1427_v31  ;;  %2503 = vmatprep.subr.bf16.mxu0 %v3281_v1  ;;  %v1580_v48 = vsub.f32 1.0, %v1572_v28  ;;  %2543 = vmatpush1.bf16.msra.mxu1 %v3276_v16  ;;  %v3325_v40 = vld [vmem:[%s3909_s16] sm:$0xff] }
 0x350   : > { %v1593_v46 = vadd.f32 1.0, %v1585_v33  ;;  %v1586_v47 = vmul.f32 %v1578_v44, %v1426_v29  ;;  %2544 = vmatprep.subr.bf16.mxu1 %v3284_v43 }
 0x351   : > { %v1595_v50 = vadd.f32 1.0, %v1587_v39  ;;  %v1588_v52 = vmul.f32 %v1580_v48, %v1428_v51 }
 0x352   : > { %2504 = vmatpush1.bf16.msra.mxu0 %v3279_v5  ;;  %v1594_v55 = vadd.f32 1.0, %v1586_v47  ;;  %v1601_v57 = vmul.f32 %v1593_v46, %v1401_v49 }
 0x353   : > { %2505 = vmatprep.subr.bf16.mxu0 %v3287_v61  ;;  %2545 = vmatpush1.bf16.msra.mxu1 %v3282_v62  ;;  %v1596_v59 = vadd.f32 1.0, %v1588_v52  ;;  %v1603_v2 = vmul.f32 %v1595_v50, %v1403_v56 }
 0x354   : > { %v1602_v14 = vmul.f32 %v1594_v55, %v1402_v37  ;;  %2546 = vmatprep.subr.bf16.mxu1 %v3290_v54  ;;  %v1609_v20 = vpack.c.bf16 %v1601_v57, %v1601_v57 }
 0x355   : > { %v1604_v3 = vmul.f32 %v1596_v59, %v1404_v45  ;;  %v1611_v7 = vpack.c.bf16 %v1603_v2, %v1603_v2 }
 0x356   : > { %2506 = vmatpush1.bf16.msra.mxu0 %v3285_v53  ;;  %v1610_v27 = vpack.c.bf16 %v1602_v14, %v1602_v14 }
 0x357   : > { %2547 = vmatpush1.bf16.msra.mxu1 %v3288_v58  ;;  %v1612_v4 = vpack.c.bf16 %v1604_v3, %v1604_v3 }
 0x358   : > { %2507 = vmatprep.mubr.bf16.mxu0 %v1610_v27 }
 0x359   : > { %2508 = vmatmul.mubr.bf16.vlgmr.msra.gmra.mrb[12].mxu0 %v1609_v20  ;;  %2548 = vmatprep.mubr.bf16.mxu1 %v1612_v4 }
 0x35a   : > { %2549 = vmatmul.mubr.bf16.vlgmr.msra.gmra.mrb[12].mxu1 %v1611_v7 }
 0x3ec   : > { %v2427_v9 = vpop.f32.mrb[8].mxu0 }
 0x3ed   : > { %v2428_v10 = vadd.f32 %v2427_v9, %v1746_v21  ;;  %v2429_v11 = vpop.f32.mrb[9].mxu0  ;;  %v2468_v24 = vpop.f32.mrb[8].mxu1 }
 0x3ee   : > { %v2430_v12 = vadd.f32 %v2429_v11, %v1750_v8  ;;  %v2431_v13 = vpop.f32.mrb[10].mxu0  ;;  %v2470_v18 = vpop.f32.mrb[9].mxu1 }
 0x3ef   : > { %v2469_v17 = vadd.f32 %v2468_v24, %v2428_v10  ;;  %v2432_v30 = vpop.f32.mrb[11].mxu0  ;;  %v2472_v19 = vpop.f32.mrb[10].mxu1 }
 0x3f0   : > { %v2471_v23 = vadd.f32 %v2470_v18, %v2430_v12  ;;  %v2473_v60 = vpop.f32.mrb[11].mxu1 }
 0x42c   : > { %v2509_v32 = vpop.f32.mrb[12].mxu0 }
 0x42d   : > { %v2510_v22 = vadd.f32 %v2509_v32, %v2469_v17  ;;  %v2511_v26 = vpop.f32.mrb[13].mxu0  ;;  %v2550_v25 = vpop.f32.mrb[12].mxu1 }
 0x42e   : > { %v2512_v34 = vadd.f32 %v2511_v26, %v2471_v23  ;;  %v2513_v35 = vpop.f32.mrb[14].mxu0  ;;  %v2552_v6 = vpop.f32.mrb[13].mxu1 }
 0x42f   : > { %v2551_v36 = vadd.f32 %v2550_v25, %v2510_v22  ;;  %v2514_v38 = vpop.f32.mrb[15].mxu0  ;;  %v2554_v31 = vpop.f32.mrb[14].mxu1 }
 0x430   : > { %v2553_v0 = vadd.f32 %v2552_v6, %v2512_v34  ;;  %v2555_v33 = vpop.f32.mrb[15].mxu1 }
 0x431   : > { %v2557_v1 = vadd.f32 %v3325_v40, %v2551_v36 }
 0x432   : > { %v2558_v63 = vadd.f32 %v3326_v41, %v2553_v0 }
 0x433   : > { %2559 = vst [vmem:[%s373_s17] sm:$0xff] %v2557_v1 }
 0x434   : > { %2560 = vst [vmem:[%s373_s17 + $0x8] sm:$0xff] %v2558_v63 }
 0x435   : > { %3538 = shalt.err (!%p3535_p9)
}
 0x436   : > { %s3539_s15 = scalar_lea.hbm %s4100_s19, 256  ;;  %s3543_s1 = scalar_lea.hbm %s4151_s7, 512 }
 0x437   : > { %p3540_p13 = scmp.ne.s32.totalorder %s4100_s19, %s3539_s15  ;;  %p3544_p8 = scmp.lt.u32.totalorder %s4100_s19, %s4151_s7 }
 0x438   : > { %p3545_p10 = scmp.lt.u32.totalorder %s3543_s1, %s3539_s15  ;;  %p3547_p6 = scmp.lt.u32.totalorder %s3539_s15, %s4100_s19 }
 0x439   : > { %p3541_p0 = pnand %p3540_p13, %p4173_p12 }
 0x43a   : > { %p3546_p11 = por %p3545_p10, %p3544_p8 }
 0x43b   : > { %p3542_p2 = pneg %p3541_p0 }
 0x43c   : > { %p3548_p5 = por %p3547_p6, %p3546_p11 }
 0x43e   : > { %p3549_p7 = pnand %p3548_p5, %p3542_p2 }
 0x440   : > { %3552 = shalt.err (!%p3549_p7)
}
 0x441   : > { %3013 = dma.vmem_to_hbm [thread:$0]  (%p4173_p12), %s4102_s22, 256, %s4100_s19, %s2562_s30  }
 0x442 PF: > { %s2588_s17 = sand.u32 1, %s3591_s24   ;;  %p4174_p4 = scmp.ne.s32.totalorder %s4164_s18, 0 }
 0x443   : > { %p4175_p1 = scmp.ge.s32.totalorder %s3603_s27, 2  ;;  %s2589_s28 = scalar_lea.sflag [#allocation4], %s2588_s17 }
 0x445   : > { %p3039_p3 = pnand %p4175_p1, %p4174_p4 }
 0x447   : > { %3586 = dma.done.wait (!%p3039_p3), %s2589_s28, 256  }
 0x448   : > { %3588 = vsyncadd (!%p3039_p3), %s2589_s28, 4294967040  ;;  %p23_p9 = scmp.ge.s32.totalorder %s3827_s11, 4   ;;  %s4176_s24 = smov %s3595_s25 }
 0x449   : > { %s4177_s25 = smov %s3599_s26  ;;  %s4178_s26 = smov %s3838_s23 }
 0x44a   : > { %s4179_s27 = smov %s3827_s11  ;;  %25 = sbr.rel (!%p23_p9) target bundleno = 10 (0xa), region = 117 }
 0x451   :  { %2594 = vsyncpa [#allocation3], 1 }
 0x452   :  { %2596 = vsyncpa [#allocation3 + $0x1], 1 }
 0x453   :  { %2597 = vsyncpa [#allocation6], 1 }
 0x454   :  { %2598 = vsyncpa [#allocation9], 1 }
 0x455   :  { %2599 = vsyncpa [#allocation12], 1 }
 0x456   :  { %2600 = vsyncpa [#allocation4], 1 }
 0x457   :  { %2602 = vsyncpa [#allocation4 + $0x1], 1 }

</bundles_post_ra>
